<compile_context>
chip_gen: v7x
topology: tpu7x:2x2x1
jax: 0.10.0
libtpu: 0.0.40
codegen_flags: <defaults>
</compile_context>

<pallas_src>
import jax
import jax.numpy as jnp
from jax.experimental import pallas as pl
from jax.experimental.pallas import tpu as pltpu

GROWTH_RATE = 32
NUM_LAYERS = 4
BN_EPS = 1e-5


# ----------------------------- Fused Pallas kernel -----------------------------

def _down_fused_kernel(x_ref, w_ref, b_ref, o_ref, feat_ref, tap_ref):
    # x_ref:    (N, Hp, Wp, 4*Cin)  f32   2x2 pool window pre-arranged on lanes
    # w_ref:    (L, K, 9*G)         bf16  BN-folded, tap-folded conv weights
    #                                     (rows follow the scratch channel layout)
    # b_ref:    (L, 1, G)           f32   folded BN bias
    # o_ref:    (N, Hp, Wp, Cout)   f32   concat(pooled, layer1..layer4)
    # feat_ref: (N, Hp+2, Wpad, K)  bf16  zero-padded matmul-input scratch
    # tap_ref:  (N, Hp+2, Wpad, 9G) f32   per-layer tap-matmul output scratch
    N, Hp, Wp, C4 = x_ref.shape
    Cin = C4 // 4
    L, K, NG = w_ref.shape
    G = NG // 9
    Cpad = K - (L - 1) * G                      # pooled slot size in the scratch (32)
    Hpad, Wpad = feat_ref.shape[1], feat_ref.shape[2]

    # Largest h-chunk dividing Hpad with <= 128 matmul rows, so each f32
    # (h_chunk*Wpad, 288) result is <= ~48 vregs and streams to VMEM (no spills).
    h_chunk = 1
    for cand in range(Hpad, 0, -1):
        if Hpad % cand == 0 and cand * Wpad <= 128:
            h_chunk = cand
            break

    # Zero the bf16 scratch once (~80 KB): the 1-px border is the conv SAME
    # padding; pad channels and not-yet-produced layer channels must be zero so
    # every layer can run a single full-K matmul exactly.
    feat_ref[...] = jnp.zeros_like(feat_ref)

    # ---- MaxPool2d(2): batched 4-way lane-slice max (f32, VPU) ----
    xw = x_ref[...]
    pooled = jnp.maximum(
        jnp.maximum(xw[..., 0 * Cin:1 * Cin], xw[..., 1 * Cin:2 * Cin]),
        jnp.maximum(xw[..., 2 * Cin:3 * Cin], xw[..., 3 * Cin:4 * Cin]))
    o_ref[:, :, :, 0:Cin] = pooled                                 # exact f32 output
    feat_ref[:, 1:Hp + 1, 1:Wp + 1, 0:Cin] = pooled.astype(feat_ref.dtype)

    # ---- DenseBlock: 4 x (3x3 conv -> folded-BN bias -> ReLU), all in VMEM ----
    for l in range(L):
        # Tap-folded conv: (rows, K=128) x (K, 9*G=288) MXU matmuls over the whole
        # zero-padded extent, chunked over rows, streamed into the f32 tap scratch.
        for n in range(N):
            for hb in range(0, Hpad, h_chunk):
                blk = feat_ref[n, hb:hb + h_chunk].reshape(h_chunk * Wpad, K)
                tap_ref[n, hb:hb + h_chunk] = jnp.dot(
                    blk, w_ref[l], preferred_element_type=jnp.float32,
                ).reshape(h_chunk, Wpad, NG)

        # Fold the 9 taps back with shifted slice-adds (VPU; no per-tap repacks).
        acc = jnp.zeros((N, Hp, Wp, G), jnp.float32)
        for ky in range(3):
            for kx in range(3):
                t = ky * 3 + kx
                acc = acc + tap_ref[:, ky:ky + Hp, kx:kx + Wp, t * G:(t + 1) * G]
        y = jnp.maximum(acc + b_ref[l].reshape(1, 1, 1, G), 0.0)   # BN bias + ReLU (f32)

        # Direct f32 store of this layer's 32 channels into the concat output.
        # TODO(synk): on v5e, if these masked stores show up, pad the kernel-facing
        # output channel dim to 160 (aligned) and slice channels in the wrapper.
        o_ref[:, :, :, Cin + l * G:Cin + (l + 1) * G] = y

        # Incremental bf16 update of the matmul-input scratch (layer 4's output
        # is never re-consumed, so it only goes to o_ref).
        if l + 1 < L:
            c0 = Cpad + l * G
            feat_ref[:, 1:Hp + 1, 1:Wp + 1, c0:c0 + G] = y.astype(feat_ref.dtype)


# --------------------------------- Wrappers ---------------------------------

def down_forward_pooled_window(x_pre, w_packed, b_packed, in_channels):
    # x_pre: (N, Hp, Wp, 4*Cin) with the 2x2 pool window folded onto channels.
    N, Hp, Wp, C4 = x_pre.shape
    L, K, NG = w_packed.shape
    G = NG // 9
    c_out = in_channels + L * G
    wpad = ((Wp + 2 + 7) // 8) * 8      # sublane-multiple scratch width -> free reshapes
    # TODO(synk): for realistic image sizes, tile over output rows with a 2-row
    # halo, add a "parallel" grid axis (v7x second TensorCore) and budget the
    # bf16+f32 scratches against v7x's 64 MiB VMEM; at this toy size one step fits.
    return pl.pallas_call(
        _down_fused_kernel,
        out_shape=jax.ShapeDtypeStruct((N, Hp, Wp, c_out), jnp.float32),
        grid=(1,),
        in_specs=[
            pl.BlockSpec((N, Hp, Wp, C4), lambda i: (0, 0, 0, 0)),
            pl.BlockSpec((L, K, NG), lambda i: (0, 0, 0)),
            pl.BlockSpec((L, 1, G), lambda i: (0, 0, 0)),
        ],
        out_specs=pl.BlockSpec((N, Hp, Wp, c_out), lambda i: (0, 0, 0, 0)),
        scratch_shapes=[
            pltpu.VMEM((N, Hp + 2, wpad, K), jnp.bfloat16),
            pltpu.VMEM((N, Hp + 2, wpad, NG), jnp.float32),
        ],
        compiler_params=pltpu.CompilerParams(
            dimension_semantics=("arbitrary",)),
    )(x_pre, w_packed, b_packed)


@jax.jit
def down_forward_nchw(x_nchw, w_packed, b_packed):
    # PyTorch-facing interface: NCHW in, NCHW out.
    N, C, H, W = x_nchw.shape
    Hp, Wp = H // 2, W // 2
    # Fold the 2x2 pool window onto the channel axis while doing the NCHW->NHWC
    # layout change the kernel needed anyway (one fused XLA transpose):
    #   x_pre[n, i, j, (dy*2+dx)*C + c] = x[n, c, 2i+dy, 2j+dx]
    x_pre = jnp.transpose(
        x_nchw.reshape(N, C, Hp, 2, Wp, 2), (0, 2, 4, 3, 5, 1)
    ).reshape(N, Hp, Wp, 4 * C)
    y_nhwc = down_forward_pooled_window(x_pre, w_packed, b_packed, C)
    # TODO(synk): if adjacent ops consume NHWC, return y_nhwc and drop this transpose.
    return jnp.transpose(y_nhwc, (0, 3, 1, 2))


# ------------------------------ Parameter setup ------------------------------

def init_down_params(in_channels, key):
    """Deterministic params: list of (conv_w (3,3,Cin_l,32), bn_scale, bn_bias)
    with BatchNorm already in inference (scale/bias) form."""
    params = []
    channels = in_channels
    for _ in range(NUM_LAYERS):
        key, kw, kg, kb, km, kv = jax.random.split(key, 6)
        w = 0.1 * jax.random.normal(kw, (3, 3, channels, GROWTH_RATE), jnp.float32)
        gamma = 1.0 + 0.05 * jax.random.normal(kg, (GROWTH_RATE,), jnp.float32)
        beta = 0.05 * jax.random.normal(kb, (GROWTH_RATE,), jnp.float32)
        running_mean = 0.05 * jax.random.normal(km, (GROWTH_RATE,), jnp.float32)
        running_var = 1.0 + 0.05 * jnp.abs(
            jax.random.normal(kv, (GROWTH_RATE,), jnp.float32))
        scale = gamma / jnp.sqrt(running_var + BN_EPS)
        bias = beta - running_mean * scale
        params.append((w, scale, bias))
        channels += GROWTH_RATE
    return params


def pack_down_params(params, in_channels):
    """Fold BN scale into the conv weights, remap input channels onto the
    32-aligned scratch layout [pooled|l1|l2|l3] (K=128), tap-fold the 3x3 taps
    into the matmul output dim (K, 9*G), and cast matmul weights to bf16."""
    G = GROWTH_RATE
    L = NUM_LAYERS
    cpad = ((in_channels + 31) // 32) * 32        # pooled slot, padded to 32
    K = cpad + (L - 1) * G                        # = 128 for in_channels <= 32
    w_list, b_list = [], []
    for l, (w, scale, bias) in enumerate(params):
        wf = w * scale[None, None, None, :]       # (3, 3, cin_l, G), BN scale folded
        wk = jnp.zeros((3, 3, K, G), jnp.float32)
        wk = wk.at[:, :, 0:in_channels, :].set(wf[:, :, 0:in_channels, :])
        for i in range(l):                        # previous layer outputs
            src = in_channels + i * G
            dst = cpad + i * G
            wk = wk.at[:, :, dst:dst + G, :].set(wf[:, :, src:src + G, :])
        # tap-fold: (3,3,K,G) -> (K, 9*G), column block t = ky*3+kx
        wt = jnp.transpose(wk, (2, 0, 1, 3)).reshape(K, 9 * G)
        w_list.append(wt)
        b_list.append(bias.reshape(1, G))
    w_packed = jnp.stack(w_list).astype(jnp.bfloat16)   # (L, K, 9*G)
    b_packed = jnp.stack(b_list).astype(jnp.float32)    # (L, 1, G)
    return w_packed, b_packed


# ------------------------------ Pure-JAX reference ----------------------------

def down_reference_nhwc(x_nhwc, params):
    N, H, W, C = x_nhwc.shape
    xp = jnp.max(x_nhwc.reshape(N, H // 2, 2, W // 2, 2, C), axis=(2, 4))
    feats = [xp]
    for (w, scale, bias) in params:
        inp = jnp.concatenate(feats, axis=-1)
        y = jax.lax.conv_general_dilated(
            inp, w, window_strides=(1, 1), padding="SAME",
            dimension_numbers=("NHWC", "HWIO", "NHWC"))
        feats.append(jnp.maximum(y * scale + bias, 0.0))
    return jnp.concatenate(feats, axis=-1)


# ------------------------------------ Main ------------------------------------

if __name__ == "__main__":
    N, C, H, W = 2, 4, 16, 16            # out_channels = 4 + 4*32 = 132
    x = jax.random.normal(jax.random.PRNGKey(0), (N, C, H, W), jnp.float32)

    params = init_down_params(C, jax.random.PRNGKey(42))
    w_packed, b_packed = pack_down_params(params, C)

    y = down_forward_nchw(x, w_packed, b_packed)
    y = jax.block_until_ready(y)

    expected_shape = (N, C + NUM_LAYERS * GROWTH_RATE, H // 2, W // 2)
    assert y.shape == expected_shape, (y.shape, expected_shape)
    assert bool(jnp.all(jnp.isfinite(y)))

    # Pure-JAX f32 reference; tolerance sized for bf16 MXU operands (K <= 100).
    y_ref = jnp.transpose(
        down_reference_nhwc(jnp.transpose(x, (0, 2, 3, 1)), params),
        (0, 3, 1, 2))
    max_err = float(jnp.max(jnp.abs(y - y_ref)))
    assert bool(jnp.allclose(y, y_ref, atol=1e-1, rtol=1e-1)), max_err

    print("KERNEL_OK")
</pallas_src>

<mosaic_0001>
module attributes {stable_mosaic.version = 11 : i64} {
  func.func @_down_fused_kernel(%arg0: i32, %arg1: memref<2x8x8x16xf32, #tpu.memory_space<vmem>>, %arg2: memref<4x128x288xbf16, #tpu.memory_space<vmem>>, %arg3: memref<4x1x32xf32, #tpu.memory_space<vmem>>, %arg4: memref<2x8x8x132xf32, #tpu.memory_space<vmem>>, %arg5: memref<2x10x16x128xbf16, #tpu.memory_space<vmem>>, %arg6: memref<2x10x16x288xf32, #tpu.memory_space<vmem>>) attributes {dimension_semantics = [#tpu.dimension_semantics<arbitrary>], iteration_bounds = array<i64: 1>, scalar_prefetch = 0 : i64, scratch_operands = 2 : i64, tpu.core_type = #tpu.core_type<tc>, window_params = [{pipeline_mode = #tpu.pipeline_mode<synchronous>, transform_indices = @transform_0, window_bounds = array<i64: 2, 8, 8, 16>}, {pipeline_mode = #tpu.pipeline_mode<synchronous>, transform_indices = @transform_1, window_bounds = array<i64: 4, 128, 288>}, {pipeline_mode = #tpu.pipeline_mode<synchronous>, transform_indices = @transform_2, window_bounds = array<i64: 4, 1, 32>}, {pipeline_mode = #tpu.pipeline_mode<synchronous>, transform_indices = @transform_3, window_bounds = array<i64: 2, 8, 8, 132>}]} {
    %cst = arith.constant 0.000000e+00 : bf16
    %0 = vector.broadcast %cst : bf16 to vector<2x10x16x128xbf16>
    %c0 = arith.constant 0 : index
    %c0_0 = arith.constant 0 : index
    %c0_1 = arith.constant 0 : index
    %c0_2 = arith.constant 0 : index
    %1 = vector.load %arg5[%c0, %c0_0, %c0_1, %c0_2] : memref<2x10x16x128xbf16, #tpu.memory_space<vmem>>, vector<2x10x16x128xbf16>
    tpu.vector_store %arg5[%c0, %c0_0, %c0_1, %c0_2], %0 {strides = array<i32>} : memref<2x10x16x128xbf16, #tpu.memory_space<vmem>>, vector<2x10x16x128xbf16>,
    %c0_3 = arith.constant 0 : index
    %c0_4 = arith.constant 0 : index
    %c0_5 = arith.constant 0 : index
    %c0_6 = arith.constant 0 : index
    %2 = vector.load %arg1[%c0_3, %c0_4, %c0_5, %c0_6] : memref<2x8x8x16xf32, #tpu.memory_space<vmem>>, vector<2x8x8x16xf32>
    %3 = vector.extract_strided_slice %2 {offsets = [0, 0, 0, 0], sizes = [2, 8, 8, 4], strides = [1, 1, 1, 1]} : vector<2x8x8x16xf32> to vector<2x8x8x4xf32>
    %4 = vector.extract_strided_slice %2 {offsets = [0, 0, 0, 4], sizes = [2, 8, 8, 4], strides = [1, 1, 1, 1]} : vector<2x8x8x16xf32> to vector<2x8x8x4xf32>
    %5 = arith.maximumf %3, %4 : vector<2x8x8x4xf32>
    %6 = vector.extract_strided_slice %2 {offsets = [0, 0, 0, 8], sizes = [2, 8, 8, 4], strides = [1, 1, 1, 1]} : vector<2x8x8x16xf32> to vector<2x8x8x4xf32>
    %7 = vector.extract_strided_slice %2 {offsets = [0, 0, 0, 12], sizes = [2, 8, 8, 4], strides = [1, 1, 1, 1]} : vector<2x8x8x16xf32> to vector<2x8x8x4xf32>
    %8 = arith.maximumf %6, %7 : vector<2x8x8x4xf32>
    %9 = arith.maximumf %5, %8 : vector<2x8x8x4xf32>
    %c0_7 = arith.constant 0 : index
    %c0_8 = arith.constant 0 : index
    %c0_9 = arith.constant 0 : index
    %c0_10 = arith.constant 0 : index
    %10 = vector.load %arg4[%c0_7, %c0_8, %c0_9, %c0_10] : memref<2x8x8x132xf32, #tpu.memory_space<vmem>>, vector<2x8x8x4xf32>
    tpu.vector_store %arg4[%c0_7, %c0_8, %c0_9, %c0_10], %9 {strides = array<i32>} : memref<2x8x8x132xf32, #tpu.memory_space<vmem>>, vector<2x8x8x4xf32>,
    %11 = arith.truncf %9 : vector<2x8x8x4xf32> to vector<2x8x8x4xbf16>
    %c0_11 = arith.constant 0 : index
    %c1 = arith.constant 1 : index
    %c1_12 = arith.constant 1 : index
    %c0_13 = arith.constant 0 : index
    %12 = vector.load %arg5[%c0_11, %c1, %c1_12, %c0_13] : memref<2x10x16x128xbf16, #tpu.memory_space<vmem>>, vector<2x8x8x4xbf16>
    tpu.vector_store %arg5[%c0_11, %c1, %c1_12, %c0_13], %11 {strides = array<i32>} : memref<2x10x16x128xbf16, #tpu.memory_space<vmem>>, vector<2x8x8x4xbf16>,
    %c0_14 = arith.constant 0 : index
    %c0_15 = arith.constant 0 : index
    %c0_16 = arith.constant 0 : index
    %c0_17 = arith.constant 0 : index
    %13 = vector.load %arg5[%c0_14, %c0_15, %c0_16, %c0_17] : memref<2x10x16x128xbf16, #tpu.memory_space<vmem>>, vector<1x5x16x128xbf16>
    %14 = vector.shape_cast %13 : vector<1x5x16x128xbf16> to vector<5x16x128xbf16>
    %15 = vector.shape_cast %14 : vector<5x16x128xbf16> to vector<80x128xbf16>
    %c0_18 = arith.constant 0 : index
    %c0_19 = arith.constant 0 : index
    %c0_20 = arith.constant 0 : index
    %16 = vector.load %arg2[%c0_18, %c0_19, %c0_20] : memref<4x128x288xbf16, #tpu.memory_space<vmem>>, vector<1x128x288xbf16>
    %17 = vector.shape_cast %16 : vector<1x128x288xbf16> to vector<128x288xbf16>
    %cst_21 = arith.constant dense<0.000000e+00> : vector<80x288xf32>
    %18 = tpu.matmul %15, %17, %cst_21 {dimension_numbers = #tpu.dot_dimension_numbers<[1], [0], [0], [1], [0, 0, 1, 1], [], []>} : vector<80x128xbf16>, vector<128x288xbf16>, vector<80x288xf32> -> vector<80x288xf32>
    %19 = vector.shape_cast %18 : vector<80x288xf32> to vector<5x16x288xf32>
    %c0_22 = arith.constant 0 : index
    %c0_23 = arith.constant 0 : index
    %c0_24 = arith.constant 0 : index
    %c0_25 = arith.constant 0 : index
    %20 = vector.load %arg6[%c0_22, %c0_23, %c0_24, %c0_25] : memref<2x10x16x288xf32, #tpu.memory_space<vmem>>, vector<1x5x16x288xf32>
    %21 = vector.shape_cast %20 : vector<1x5x16x288xf32> to vector<5x16x288xf32>
    %22 = vector.shape_cast %19 : vector<5x16x288xf32> to vector<1x5x16x288xf32>
    tpu.vector_store %arg6[%c0_22, %c0_23, %c0_24, %c0_25], %22 {strides = array<i32>} : memref<2x10x16x288xf32, #tpu.memory_space<vmem>>, vector<1x5x16x288xf32>,
    %c0_26 = arith.constant 0 : index
    %c5 = arith.constant 5 : index
    %c0_27 = arith.constant 0 : index
    %c0_28 = arith.constant 0 : index
    %23 = vector.load %arg5[%c0_26, %c5, %c0_27, %c0_28] : memref<2x10x16x128xbf16, #tpu.memory_space<vmem>>, vector<1x5x16x128xbf16>
    %24 = vector.shape_cast %23 : vector<1x5x16x128xbf16> to vector<5x16x128xbf16>
    %25 = vector.shape_cast %24 : vector<5x16x128xbf16> to vector<80x128xbf16>
    %c0_29 = arith.constant 0 : index
    %c0_30 = arith.constant 0 : index
    %c0_31 = arith.constant 0 : index
    %26 = vector.load %arg2[%c0_29, %c0_30, %c0_31] : memref<4x128x288xbf16, #tpu.memory_space<vmem>>, vector<1x128x288xbf16>
    %27 = vector.shape_cast %26 : vector<1x128x288xbf16> to vector<128x288xbf16>
    %cst_32 = arith.constant dense<0.000000e+00> : vector<80x288xf32>
    %28 = tpu.matmul %25, %27, %cst_32 {dimension_numbers = #tpu.dot_dimension_numbers<[1], [0], [0], [1], [0, 0, 1, 1], [], []>} : vector<80x128xbf16>, vector<128x288xbf16>, vector<80x288xf32> -> vector<80x288xf32>
    %29 = vector.shape_cast %28 : vector<80x288xf32> to vector<5x16x288xf32>
    %c0_33 = arith.constant 0 : index
    %c5_34 = arith.constant 5 : index
    %c0_35 = arith.constant 0 : index
    %c0_36 = arith.constant 0 : index
    %30 = vector.load %arg6[%c0_33, %c5_34, %c0_35, %c0_36] : memref<2x10x16x288xf32, #tpu.memory_space<vmem>>, vector<1x5x16x288xf32>
    %31 = vector.shape_cast %30 : vector<1x5x16x288xf32> to vector<5x16x288xf32>
    %32 = vector.shape_cast %29 : vector<5x16x288xf32> to vector<1x5x16x288xf32>
    tpu.vector_store %arg6[%c0_33, %c5_34, %c0_35, %c0_36], %32 {strides = array<i32>} : memref<2x10x16x288xf32, #tpu.memory_space<vmem>>, vector<1x5x16x288xf32>,
    %c1_37 = arith.constant 1 : index
    %c0_38 = arith.constant 0 : index
    %c0_39 = arith.constant 0 : index
    %c0_40 = arith.constant 0 : index
    %33 = vector.load %arg5[%c1_37, %c0_38, %c0_39, %c0_40] : memref<2x10x16x128xbf16, #tpu.memory_space<vmem>>, vector<1x5x16x128xbf16>
    %34 = vector.shape_cast %33 : vector<1x5x16x128xbf16> to vector<5x16x128xbf16>
    %35 = vector.shape_cast %34 : vector<5x16x128xbf16> to vector<80x128xbf16>
    %c0_41 = arith.constant 0 : index
    %c0_42 = arith.constant 0 : index
    %c0_43 = arith.constant 0 : index
    %36 = vector.load %arg2[%c0_41, %c0_42, %c0_43] : memref<4x128x288xbf16, #tpu.memory_space<vmem>>, vector<1x128x288xbf16>
    %37 = vector.shape_cast %36 : vector<1x128x288xbf16> to vector<128x288xbf16>
    %cst_44 = arith.constant dense<0.000000e+00> : vector<80x288xf32>
    %38 = tpu.matmul %35, %37, %cst_44 {dimension_numbers = #tpu.dot_dimension_numbers<[1], [0], [0], [1], [0, 0, 1, 1], [], []>} : vector<80x128xbf16>, vector<128x288xbf16>, vector<80x288xf32> -> vector<80x288xf32>
    %39 = vector.shape_cast %38 : vector<80x288xf32> to vector<5x16x288xf32>
    %c1_45 = arith.constant 1 : index
    %c0_46 = arith.constant 0 : index
    %c0_47 = arith.constant 0 : index
    %c0_48 = arith.constant 0 : index
    %40 = vector.load %arg6[%c1_45, %c0_46, %c0_47, %c0_48] : memref<2x10x16x288xf32, #tpu.memory_space<vmem>>, vector<1x5x16x288xf32>
    %41 = vector.shape_cast %40 : vector<1x5x16x288xf32> to vector<5x16x288xf32>
    %42 = vector.shape_cast %39 : vector<5x16x288xf32> to vector<1x5x16x288xf32>
    tpu.vector_store %arg6[%c1_45, %c0_46, %c0_47, %c0_48], %42 {strides = array<i32>} : memref<2x10x16x288xf32, #tpu.memory_space<vmem>>, vector<1x5x16x288xf32>,
    %c1_49 = arith.constant 1 : index
    %c5_50 = arith.constant 5 : index
    %c0_51 = arith.constant 0 : index
    %c0_52 = arith.constant 0 : index
    %43 = vector.load %arg5[%c1_49, %c5_50, %c0_51, %c0_52] : memref<2x10x16x128xbf16, #tpu.memory_space<vmem>>, vector<1x5x16x128xbf16>
    %44 = vector.shape_cast %43 : vector<1x5x16x128xbf16> to vector<5x16x128xbf16>
    %45 = vector.shape_cast %44 : vector<5x16x128xbf16> to vector<80x128xbf16>
    %c0_53 = arith.constant 0 : index
    %c0_54 = arith.constant 0 : index
    %c0_55 = arith.constant 0 : index
    %46 = vector.load %arg2[%c0_53, %c0_54, %c0_55] : memref<4x128x288xbf16, #tpu.memory_space<vmem>>, vector<1x128x288xbf16>
    %47 = vector.shape_cast %46 : vector<1x128x288xbf16> to vector<128x288xbf16>
    %cst_56 = arith.constant dense<0.000000e+00> : vector<80x288xf32>
    %48 = tpu.matmul %45, %47, %cst_56 {dimension_numbers = #tpu.dot_dimension_numbers<[1], [0], [0], [1], [0, 0, 1, 1], [], []>} : vector<80x128xbf16>, vector<128x288xbf16>, vector<80x288xf32> -> vector<80x288xf32>
    %49 = vector.shape_cast %48 : vector<80x288xf32> to vector<5x16x288xf32>
    %c1_57 = arith.constant 1 : index
    %c5_58 = arith.constant 5 : index
    %c0_59 = arith.constant 0 : index
    %c0_60 = arith.constant 0 : index
    %50 = vector.load %arg6[%c1_57, %c5_58, %c0_59, %c0_60] : memref<2x10x16x288xf32, #tpu.memory_space<vmem>>, vector<1x5x16x288xf32>
    %51 = vector.shape_cast %50 : vector<1x5x16x288xf32> to vector<5x16x288xf32>
    %52 = vector.shape_cast %49 : vector<5x16x288xf32> to vector<1x5x16x288xf32>
    tpu.vector_store %arg6[%c1_57, %c5_58, %c0_59, %c0_60], %52 {strides = array<i32>} : memref<2x10x16x288xf32, #tpu.memory_space<vmem>>, vector<1x5x16x288xf32>,
    %cst_61 = arith.constant 0.000000e+00 : f32
    %53 = vector.broadcast %cst_61 : f32 to vector<2x8x8x32xf32>
    %c0_62 = arith.constant 0 : index
    %c0_63 = arith.constant 0 : index
    %c0_64 = arith.constant 0 : index
    %c0_65 = arith.constant 0 : index
    %54 = vector.load %arg6[%c0_62, %c0_63, %c0_64, %c0_65] : memref<2x10x16x288xf32, #tpu.memory_space<vmem>>, vector<2x8x8x32xf32>
    %55 = arith.addf %53, %54 : vector<2x8x8x32xf32>
    %c0_66 = arith.constant 0 : index
    %c0_67 = arith.constant 0 : index
    %c1_68 = arith.constant 1 : index
    %c32 = arith.constant 32 : index
    %56 = vector.load %arg6[%c0_66, %c0_67, %c1_68, %c32] : memref<2x10x16x288xf32, #tpu.memory_space<vmem>>, vector<2x8x8x32xf32>
    %57 = arith.addf %55, %56 : vector<2x8x8x32xf32>
    %c0_69 = arith.constant 0 : index
    %c0_70 = arith.constant 0 : index
    %c2 = arith.constant 2 : index
    %c64 = arith.constant 64 : index
    %58 = vector.load %arg6[%c0_69, %c0_70, %c2, %c64] : memref<2x10x16x288xf32, #tpu.memory_space<vmem>>, vector<2x8x8x32xf32>
    %59 = arith.addf %57, %58 : vector<2x8x8x32xf32>
    %c0_71 = arith.constant 0 : index
    %c1_72 = arith.constant 1 : index
    %c0_73 = arith.constant 0 : index
    %c96 = arith.constant 96 : index
    %60 = vector.load %arg6[%c0_71, %c1_72, %c0_73, %c96] : memref<2x10x16x288xf32, #tpu.memory_space<vmem>>, vector<2x8x8x32xf32>
    %61 = arith.addf %59, %60 : vector<2x8x8x32xf32>
    %c0_74 = arith.constant 0 : index
    %c1_75 = arith.constant 1 : index
    %c1_76 = arith.constant 1 : index
    %c128 = arith.constant 128 : index
    %62 = vector.load %arg6[%c0_74, %c1_75, %c1_76, %c128] : memref<2x10x16x288xf32, #tpu.memory_space<vmem>>, vector<2x8x8x32xf32>
    %63 = arith.addf %61, %62 : vector<2x8x8x32xf32>
    %c0_77 = arith.constant 0 : index
    %c1_78 = arith.constant 1 : index
    %c2_79 = arith.constant 2 : index
    %c160 = arith.constant 160 : index
    %64 = vector.load %arg6[%c0_77, %c1_78, %c2_79, %c160] : memref<2x10x16x288xf32, #tpu.memory_space<vmem>>, vector<2x8x8x32xf32>
    %65 = arith.addf %63, %64 : vector<2x8x8x32xf32>
    %c0_80 = arith.constant 0 : index
    %c2_81 = arith.constant 2 : index
    %c0_82 = arith.constant 0 : index
    %c192 = arith.constant 192 : index
    %66 = vector.load %arg6[%c0_80, %c2_81, %c0_82, %c192] : memref<2x10x16x288xf32, #tpu.memory_space<vmem>>, vector<2x8x8x32xf32>
    %67 = arith.addf %65, %66 : vector<2x8x8x32xf32>
    %c0_83 = arith.constant 0 : index
    %c2_84 = arith.constant 2 : index
    %c1_85 = arith.constant 1 : index
    %c224 = arith.constant 224 : index
    %68 = vector.load %arg6[%c0_83, %c2_84, %c1_85, %c224] : memref<2x10x16x288xf32, #tpu.memory_space<vmem>>, vector<2x8x8x32xf32>
    %69 = arith.addf %67, %68 : vector<2x8x8x32xf32>
    %c0_86 = arith.constant 0 : index
    %c2_87 = arith.constant 2 : index
    %c2_88 = arith.constant 2 : index
    %c256 = arith.constant 256 : index
    %70 = vector.load %arg6[%c0_86, %c2_87, %c2_88, %c256] : memref<2x10x16x288xf32, #tpu.memory_space<vmem>>, vector<2x8x8x32xf32>
    %71 = arith.addf %69, %70 : vector<2x8x8x32xf32>
    %c0_89 = arith.constant 0 : index
    %c0_90 = arith.constant 0 : index
    %c0_91 = arith.constant 0 : index
    %72 = vector.load %arg3[%c0_89, %c0_90, %c0_91] : memref<4x1x32xf32, #tpu.memory_space<vmem>>, vector<1x1x32xf32>
    %73 = vector.shape_cast %72 : vector<1x1x32xf32> to vector<1x32xf32>
    %74 = vector.shape_cast %73 : vector<1x32xf32> to vector<1x1x1x32xf32>
    %75 = vector.broadcast %74 : vector<1x1x1x32xf32> to vector<2x8x8x32xf32>
    %76 = arith.addf %71, %75 : vector<2x8x8x32xf32>
    %cst_92 = arith.constant 0.000000e+00 : f32
    %77 = vector.broadcast %cst_92 : f32 to vector<2x8x8x32xf32>
    %78 = arith.maximumf %76, %77 : vector<2x8x8x32xf32>
    %c0_93 = arith.constant 0 : index
    %c0_94 = arith.constant 0 : index
    %c0_95 = arith.constant 0 : index
    %c4 = arith.constant 4 : index
    %79 = vector.load %arg4[%c0_93, %c0_94, %c0_95, %c4] : memref<2x8x8x132xf32, #tpu.memory_space<vmem>>, vector<2x8x8x32xf32>
    tpu.vector_store %arg4[%c0_93, %c0_94, %c0_95, %c4], %78 {strides = array<i32>} : memref<2x8x8x132xf32, #tpu.memory_space<vmem>>, vector<2x8x8x32xf32>,
    %80 = arith.truncf %78 : vector<2x8x8x32xf32> to vector<2x8x8x32xbf16>
    %c0_96 = arith.constant 0 : index
    %c1_97 = arith.constant 1 : index
    %c1_98 = arith.constant 1 : index
    %c32_99 = arith.constant 32 : index
    %81 = vector.load %arg5[%c0_96, %c1_97, %c1_98, %c32_99] : memref<2x10x16x128xbf16, #tpu.memory_space<vmem>>, vector<2x8x8x32xbf16>
    tpu.vector_store %arg5[%c0_96, %c1_97, %c1_98, %c32_99], %80 {strides = array<i32>} : memref<2x10x16x128xbf16, #tpu.memory_space<vmem>>, vector<2x8x8x32xbf16>,
    %c0_100 = arith.constant 0 : index
    %c0_101 = arith.constant 0 : index
    %c0_102 = arith.constant 0 : index
    %c0_103 = arith.constant 0 : index
    %82 = vector.load %arg5[%c0_100, %c0_101, %c0_102, %c0_103] : memref<2x10x16x128xbf16, #tpu.memory_space<vmem>>, vector<1x5x16x128xbf16>
    %83 = vector.shape_cast %82 : vector<1x5x16x128xbf16> to vector<5x16x128xbf16>
    %84 = vector.shape_cast %83 : vector<5x16x128xbf16> to vector<80x128xbf16>
    %c1_104 = arith.constant 1 : index
    %c0_105 = arith.constant 0 : index
    %c0_106 = arith.constant 0 : index
    %85 = vector.load %arg2[%c1_104, %c0_105, %c0_106] : memref<4x128x288xbf16, #tpu.memory_space<vmem>>, vector<1x128x288xbf16>
    %86 = vector.shape_cast %85 : vector<1x128x288xbf16> to vector<128x288xbf16>
    %cst_107 = arith.constant dense<0.000000e+00> : vector<80x288xf32>
    %87 = tpu.matmul %84, %86, %cst_107 {dimension_numbers = #tpu.dot_dimension_numbers<[1], [0], [0], [1], [0, 0, 1, 1], [], []>} : vector<80x128xbf16>, vector<128x288xbf16>, vector<80x288xf32> -> vector<80x288xf32>
    %88 = vector.shape_cast %87 : vector<80x288xf32> to vector<5x16x288xf32>
    %c0_108 = arith.constant 0 : index
    %c0_109 = arith.constant 0 : index
    %c0_110 = arith.constant 0 : index
    %c0_111 = arith.constant 0 : index
    %89 = vector.load %arg6[%c0_108, %c0_109, %c0_110, %c0_111] : memref<2x10x16x288xf32, #tpu.memory_space<vmem>>, vector<1x5x16x288xf32>
    %90 = vector.shape_cast %89 : vector<1x5x16x288xf32> to vector<5x16x288xf32>
    %91 = vector.shape_cast %88 : vector<5x16x288xf32> to vector<1x5x16x288xf32>
    tpu.vector_store %arg6[%c0_108, %c0_109, %c0_110, %c0_111], %91 {strides = array<i32>} : memref<2x10x16x288xf32, #tpu.memory_space<vmem>>, vector<1x5x16x288xf32>,
    %c0_112 = arith.constant 0 : index
    %c5_113 = arith.constant 5 : index
    %c0_114 = arith.constant 0 : index
    %c0_115 = arith.constant 0 : index
    %92 = vector.load %arg5[%c0_112, %c5_113, %c0_114, %c0_115] : memref<2x10x16x128xbf16, #tpu.memory_space<vmem>>, vector<1x5x16x128xbf16>
    %93 = vector.shape_cast %92 : vector<1x5x16x128xbf16> to vector<5x16x128xbf16>
    %94 = vector.shape_cast %93 : vector<5x16x128xbf16> to vector<80x128xbf16>
    %c1_116 = arith.constant 1 : index
    %c0_117 = arith.constant 0 : index
    %c0_118 = arith.constant 0 : index
    %95 = vector.load %arg2[%c1_116, %c0_117, %c0_118] : memref<4x128x288xbf16, #tpu.memory_space<vmem>>, vector<1x128x288xbf16>
    %96 = vector.shape_cast %95 : vector<1x128x288xbf16> to vector<128x288xbf16>
    %cst_119 = arith.constant dense<0.000000e+00> : vector<80x288xf32>
    %97 = tpu.matmul %94, %96, %cst_119 {dimension_numbers = #tpu.dot_dimension_numbers<[1], [0], [0], [1], [0, 0, 1, 1], [], []>} : vector<80x128xbf16>, vector<128x288xbf16>, vector<80x288xf32> -> vector<80x288xf32>
    %98 = vector.shape_cast %97 : vector<80x288xf32> to vector<5x16x288xf32>
    %c0_120 = arith.constant 0 : index
    %c5_121 = arith.constant 5 : index
    %c0_122 = arith.constant 0 : index
    %c0_123 = arith.constant 0 : index
    %99 = vector.load %arg6[%c0_120, %c5_121, %c0_122, %c0_123] : memref<2x10x16x288xf32, #tpu.memory_space<vmem>>, vector<1x5x16x288xf32>
    %100 = vector.shape_cast %99 : vector<1x5x16x288xf32> to vector<5x16x288xf32>
    %101 = vector.shape_cast %98 : vector<5x16x288xf32> to vector<1x5x16x288xf32>
    tpu.vector_store %arg6[%c0_120, %c5_121, %c0_122, %c0_123], %101 {strides = array<i32>} : memref<2x10x16x288xf32, #tpu.memory_space<vmem>>, vector<1x5x16x288xf32>,
    %c1_124 = arith.constant 1 : index
    %c0_125 = arith.constant 0 : index
    %c0_126 = arith.constant 0 : index
    %c0_127 = arith.constant 0 : index
    %102 = vector.load %arg5[%c1_124, %c0_125, %c0_126, %c0_127] : memref<2x10x16x128xbf16, #tpu.memory_space<vmem>>, vector<1x5x16x128xbf16>
    %103 = vector.shape_cast %102 : vector<1x5x16x128xbf16> to vector<5x16x128xbf16>
    %104 = vector.shape_cast %103 : vector<5x16x128xbf16> to vector<80x128xbf16>
    %c1_128 = arith.constant 1 : index
    %c0_129 = arith.constant 0 : index
    %c0_130 = arith.constant 0 : index
    %105 = vector.load %arg2[%c1_128, %c0_129, %c0_130] : memref<4x128x288xbf16, #tpu.memory_space<vmem>>, vector<1x128x288xbf16>
    %106 = vector.shape_cast %105 : vector<1x128x288xbf16> to vector<128x288xbf16>
    %cst_131 = arith.constant dense<0.000000e+00> : vector<80x288xf32>
    %107 = tpu.matmul %104, %106, %cst_131 {dimension_numbers = #tpu.dot_dimension_numbers<[1], [0], [0], [1], [0, 0, 1, 1], [], []>} : vector<80x128xbf16>, vector<128x288xbf16>, vector<80x288xf32> -> vector<80x288xf32>
    %108 = vector.shape_cast %107 : vector<80x288xf32> to vector<5x16x288xf32>
    %c1_132 = arith.constant 1 : index
    %c0_133 = arith.constant 0 : index
    %c0_134 = arith.constant 0 : index
    %c0_135 = arith.constant 0 : index
    %109 = vector.load %arg6[%c1_132, %c0_133, %c0_134, %c0_135] : memref<2x10x16x288xf32, #tpu.memory_space<vmem>>, vector<1x5x16x288xf32>
    %110 = vector.shape_cast %109 : vector<1x5x16x288xf32> to vector<5x16x288xf32>
    %111 = vector.shape_cast %108 : vector<5x16x288xf32> to vector<1x5x16x288xf32>
    tpu.vector_store %arg6[%c1_132, %c0_133, %c0_134, %c0_135], %111 {strides = array<i32>} : memref<2x10x16x288xf32, #tpu.memory_space<vmem>>, vector<1x5x16x288xf32>,
    %c1_136 = arith.constant 1 : index
    %c5_137 = arith.constant 5 : index
    %c0_138 = arith.constant 0 : index
    %c0_139 = arith.constant 0 : index
    %112 = vector.load %arg5[%c1_136, %c5_137, %c0_138, %c0_139] : memref<2x10x16x128xbf16, #tpu.memory_space<vmem>>, vector<1x5x16x128xbf16>
    %113 = vector.shape_cast %112 : vector<1x5x16x128xbf16> to vector<5x16x128xbf16>
    %114 = vector.shape_cast %113 : vector<5x16x128xbf16> to vector<80x128xbf16>
    %c1_140 = arith.constant 1 : index
    %c0_141 = arith.constant 0 : index
    %c0_142 = arith.constant 0 : index
    %115 = vector.load %arg2[%c1_140, %c0_141, %c0_142] : memref<4x128x288xbf16, #tpu.memory_space<vmem>>, vector<1x128x288xbf16>
    %116 = vector.shape_cast %115 : vector<1x128x288xbf16> to vector<128x288xbf16>
    %cst_143 = arith.constant dense<0.000000e+00> : vector<80x288xf32>
    %117 = tpu.matmul %114, %116, %cst_143 {dimension_numbers = #tpu.dot_dimension_numbers<[1], [0], [0], [1], [0, 0, 1, 1], [], []>} : vector<80x128xbf16>, vector<128x288xbf16>, vector<80x288xf32> -> vector<80x288xf32>
    %118 = vector.shape_cast %117 : vector<80x288xf32> to vector<5x16x288xf32>
    %c1_144 = arith.constant 1 : index
    %c5_145 = arith.constant 5 : index
    %c0_146 = arith.constant 0 : index
    %c0_147 = arith.constant 0 : index
    %119 = vector.load %arg6[%c1_144, %c5_145, %c0_146, %c0_147] : memref<2x10x16x288xf32, #tpu.memory_space<vmem>>, vector<1x5x16x288xf32>
    %120 = vector.shape_cast %119 : vector<1x5x16x288xf32> to vector<5x16x288xf32>
    %121 = vector.shape_cast %118 : vector<5x16x288xf32> to vector<1x5x16x288xf32>
    tpu.vector_store %arg6[%c1_144, %c5_145, %c0_146, %c0_147], %121 {strides = array<i32>} : memref<2x10x16x288xf32, #tpu.memory_space<vmem>>, vector<1x5x16x288xf32>,
    %cst_148 = arith.constant 0.000000e+00 : f32
    %122 = vector.broadcast %cst_148 : f32 to vector<2x8x8x32xf32>
    %c0_149 = arith.constant 0 : index
    %c0_150 = arith.constant 0 : index
    %c0_151 = arith.constant 0 : index
    %c0_152 = arith.constant 0 : index
    %123 = vector.load %arg6[%c0_149, %c0_150, %c0_151, %c0_152] : memref<2x10x16x288xf32, #tpu.memory_space<vmem>>, vector<2x8x8x32xf32>
    %124 = arith.addf %122, %123 : vector<2x8x8x32xf32>
    %c0_153 = arith.constant 0 : index
    %c0_154 = arith.constant 0 : index
    %c1_155 = arith.constant 1 : index
    %c32_156 = arith.constant 32 : index
    %125 = vector.load %arg6[%c0_153, %c0_154, %c1_155, %c32_156] : memref<2x10x16x288xf32, #tpu.memory_space<vmem>>, vector<2x8x8x32xf32>
    %126 = arith.addf %124, %125 : vector<2x8x8x32xf32>
    %c0_157 = arith.constant 0 : index
    %c0_158 = arith.constant 0 : index
    %c2_159 = arith.constant 2 : index
    %c64_160 = arith.constant 64 : index
    %127 = vector.load %arg6[%c0_157, %c0_158, %c2_159, %c64_160] : memref<2x10x16x288xf32, #tpu.memory_space<vmem>>, vector<2x8x8x32xf32>
    %128 = arith.addf %126, %127 : vector<2x8x8x32xf32>
    %c0_161 = arith.constant 0 : index
    %c1_162 = arith.constant 1 : index
    %c0_163 = arith.constant 0 : index
    %c96_164 = arith.constant 96 : index
    %129 = vector.load %arg6[%c0_161, %c1_162, %c0_163, %c96_164] : memref<2x10x16x288xf32, #tpu.memory_space<vmem>>, vector<2x8x8x32xf32>
    %130 = arith.addf %128, %129 : vector<2x8x8x32xf32>
    %c0_165 = arith.constant 0 : index
    %c1_166 = arith.constant 1 : index
    %c1_167 = arith.constant 1 : index
    %c128_168 = arith.constant 128 : index
    %131 = vector.load %arg6[%c0_165, %c1_166, %c1_167, %c128_168] : memref<2x10x16x288xf32, #tpu.memory_space<vmem>>, vector<2x8x8x32xf32>
    %132 = arith.addf %130, %131 : vector<2x8x8x32xf32>
    %c0_169 = arith.constant 0 : index
    %c1_170 = arith.constant 1 : index
    %c2_171 = arith.constant 2 : index
    %c160_172 = arith.constant 160 : index
    %133 = vector.load %arg6[%c0_169, %c1_170, %c2_171, %c160_172] : memref<2x10x16x288xf32, #tpu.memory_space<vmem>>, vector<2x8x8x32xf32>
    %134 = arith.addf %132, %133 : vector<2x8x8x32xf32>
    %c0_173 = arith.constant 0 : index
    %c2_174 = arith.constant 2 : index
    %c0_175 = arith.constant 0 : index
    %c192_176 = arith.constant 192 : index
    %135 = vector.load %arg6[%c0_173, %c2_174, %c0_175, %c192_176] : memref<2x10x16x288xf32, #tpu.memory_space<vmem>>, vector<2x8x8x32xf32>
    %136 = arith.addf %134, %135 : vector<2x8x8x32xf32>
    %c0_177 = arith.constant 0 : index
    %c2_178 = arith.constant 2 : index
    %c1_179 = arith.constant 1 : index
    %c224_180 = arith.constant 224 : index
    %137 = vector.load %arg6[%c0_177, %c2_178, %c1_179, %c224_180] : memref<2x10x16x288xf32, #tpu.memory_space<vmem>>, vector<2x8x8x32xf32>
    %138 = arith.addf %136, %137 : vector<2x8x8x32xf32>
    %c0_181 = arith.constant 0 : index
    %c2_182 = arith.constant 2 : index
    %c2_183 = arith.constant 2 : index
    %c256_184 = arith.constant 256 : index
    %139 = vector.load %arg6[%c0_181, %c2_182, %c2_183, %c256_184] : memref<2x10x16x288xf32, #tpu.memory_space<vmem>>, vector<2x8x8x32xf32>
    %140 = arith.addf %138, %139 : vector<2x8x8x32xf32>
    %c1_185 = arith.constant 1 : index
    %c0_186 = arith.constant 0 : index
    %c0_187 = arith.constant 0 : index
    %141 = vector.load %arg3[%c1_185, %c0_186, %c0_187] : memref<4x1x32xf32, #tpu.memory_space<vmem>>, vector<1x1x32xf32>
    %142 = vector.shape_cast %141 : vector<1x1x32xf32> to vector<1x32xf32>
    %143 = vector.shape_cast %142 : vector<1x32xf32> to vector<1x1x1x32xf32>
    %144 = vector.broadcast %143 : vector<1x1x1x32xf32> to vector<2x8x8x32xf32>
    %145 = arith.addf %140, %144 : vector<2x8x8x32xf32>
    %cst_188 = arith.constant 0.000000e+00 : f32
    %146 = vector.broadcast %cst_188 : f32 to vector<2x8x8x32xf32>
    %147 = arith.maximumf %145, %146 : vector<2x8x8x32xf32>
    %c0_189 = arith.constant 0 : index
    %c0_190 = arith.constant 0 : index
    %c0_191 = arith.constant 0 : index
    %c36 = arith.constant 36 : index
    %148 = vector.load %arg4[%c0_189, %c0_190, %c0_191, %c36] : memref<2x8x8x132xf32, #tpu.memory_space<vmem>>, vector<2x8x8x32xf32>
    tpu.vector_store %arg4[%c0_189, %c0_190, %c0_191, %c36], %147 {strides = array<i32>} : memref<2x8x8x132xf32, #tpu.memory_space<vmem>>, vector<2x8x8x32xf32>,
    %149 = arith.truncf %147 : vector<2x8x8x32xf32> to vector<2x8x8x32xbf16>
    %c0_192 = arith.constant 0 : index
    %c1_193 = arith.constant 1 : index
    %c1_194 = arith.constant 1 : index
    %c64_195 = arith.constant 64 : index
    %150 = vector.load %arg5[%c0_192, %c1_193, %c1_194, %c64_195] : memref<2x10x16x128xbf16, #tpu.memory_space<vmem>>, vector<2x8x8x32xbf16>
    tpu.vector_store %arg5[%c0_192, %c1_193, %c1_194, %c64_195], %149 {strides = array<i32>} : memref<2x10x16x128xbf16, #tpu.memory_space<vmem>>, vector<2x8x8x32xbf16>,
    %c0_196 = arith.constant 0 : index
    %c0_197 = arith.constant 0 : index
    %c0_198 = arith.constant 0 : index
    %c0_199 = arith.constant 0 : index
    %151 = vector.load %arg5[%c0_196, %c0_197, %c0_198, %c0_199] : memref<2x10x16x128xbf16, #tpu.memory_space<vmem>>, vector<1x5x16x128xbf16>
    %152 = vector.shape_cast %151 : vector<1x5x16x128xbf16> to vector<5x16x128xbf16>
    %153 = vector.shape_cast %152 : vector<5x16x128xbf16> to vector<80x128xbf16>
    %c2_200 = arith.constant 2 : index
    %c0_201 = arith.constant 0 : index
    %c0_202 = arith.constant 0 : index
    %154 = vector.load %arg2[%c2_200, %c0_201, %c0_202] : memref<4x128x288xbf16, #tpu.memory_space<vmem>>, vector<1x128x288xbf16>
    %155 = vector.shape_cast %154 : vector<1x128x288xbf16> to vector<128x288xbf16>
    %cst_203 = arith.constant dense<0.000000e+00> : vector<80x288xf32>
    %156 = tpu.matmul %153, %155, %cst_203 {dimension_numbers = #tpu.dot_dimension_numbers<[1], [0], [0], [1], [0, 0, 1, 1], [], []>} : vector<80x128xbf16>, vector<128x288xbf16>, vector<80x288xf32> -> vector<80x288xf32>
    %157 = vector.shape_cast %156 : vector<80x288xf32> to vector<5x16x288xf32>
    %c0_204 = arith.constant 0 : index
    %c0_205 = arith.constant 0 : index
    %c0_206 = arith.constant 0 : index
    %c0_207 = arith.constant 0 : index
    %158 = vector.load %arg6[%c0_204, %c0_205, %c0_206, %c0_207] : memref<2x10x16x288xf32, #tpu.memory_space<vmem>>, vector<1x5x16x288xf32>
    %159 = vector.shape_cast %158 : vector<1x5x16x288xf32> to vector<5x16x288xf32>
    %160 = vector.shape_cast %157 : vector<5x16x288xf32> to vector<1x5x16x288xf32>
    tpu.vector_store %arg6[%c0_204, %c0_205, %c0_206, %c0_207], %160 {strides = array<i32>} : memref<2x10x16x288xf32, #tpu.memory_space<vmem>>, vector<1x5x16x288xf32>,
    %c0_208 = arith.constant 0 : index
    %c5_209 = arith.constant 5 : index
    %c0_210 = arith.constant 0 : index
    %c0_211 = arith.constant 0 : index
    %161 = vector.load %arg5[%c0_208, %c5_209, %c0_210, %c0_211] : memref<2x10x16x128xbf16, #tpu.memory_space<vmem>>, vector<1x5x16x128xbf16>
    %162 = vector.shape_cast %161 : vector<1x5x16x128xbf16> to vector<5x16x128xbf16>
    %163 = vector.shape_cast %162 : vector<5x16x128xbf16> to vector<80x128xbf16>
    %c2_212 = arith.constant 2 : index
    %c0_213 = arith.constant 0 : index
    %c0_214 = arith.constant 0 : index
    %164 = vector.load %arg2[%c2_212, %c0_213, %c0_214] : memref<4x128x288xbf16, #tpu.memory_space<vmem>>, vector<1x128x288xbf16>
    %165 = vector.shape_cast %164 : vector<1x128x288xbf16> to vector<128x288xbf16>
    %cst_215 = arith.constant dense<0.000000e+00> : vector<80x288xf32>
    %166 = tpu.matmul %163, %165, %cst_215 {dimension_numbers = #tpu.dot_dimension_numbers<[1], [0], [0], [1], [0, 0, 1, 1], [], []>} : vector<80x128xbf16>, vector<128x288xbf16>, vector<80x288xf32> -> vector<80x288xf32>
    %167 = vector.shape_cast %166 : vector<80x288xf32> to vector<5x16x288xf32>
    %c0_216 = arith.constant 0 : index
    %c5_217 = arith.constant 5 : index
    %c0_218 = arith.constant 0 : index
    %c0_219 = arith.constant 0 : index
    %168 = vector.load %arg6[%c0_216, %c5_217, %c0_218, %c0_219] : memref<2x10x16x288xf32, #tpu.memory_space<vmem>>, vector<1x5x16x288xf32>
    %169 = vector.shape_cast %168 : vector<1x5x16x288xf32> to vector<5x16x288xf32>
    %170 = vector.shape_cast %167 : vector<5x16x288xf32> to vector<1x5x16x288xf32>
    tpu.vector_store %arg6[%c0_216, %c5_217, %c0_218, %c0_219], %170 {strides = array<i32>} : memref<2x10x16x288xf32, #tpu.memory_space<vmem>>, vector<1x5x16x288xf32>,
    %c1_220 = arith.constant 1 : index
    %c0_221 = arith.constant 0 : index
    %c0_222 = arith.constant 0 : index
    %c0_223 = arith.constant 0 : index
    %171 = vector.load %arg5[%c1_220, %c0_221, %c0_222, %c0_223] : memref<2x10x16x128xbf16, #tpu.memory_space<vmem>>, vector<1x5x16x128xbf16>
    %172 = vector.shape_cast %171 : vector<1x5x16x128xbf16> to vector<5x16x128xbf16>
    %173 = vector.shape_cast %172 : vector<5x16x128xbf16> to vector<80x128xbf16>
    %c2_224 = arith.constant 2 : index
    %c0_225 = arith.constant 0 : index
    %c0_226 = arith.constant 0 : index
    %174 = vector.load %arg2[%c2_224, %c0_225, %c0_226] : memref<4x128x288xbf16, #tpu.memory_space<vmem>>, vector<1x128x288xbf16>
    %175 = vector.shape_cast %174 : vector<1x128x288xbf16> to vector<128x288xbf16>
    %cst_227 = arith.constant dense<0.000000e+00> : vector<80x288xf32>
    %176 = tpu.matmul %173, %175, %cst_227 {dimension_numbers = #tpu.dot_dimension_numbers<[1], [0], [0], [1], [0, 0, 1, 1], [], []>} : vector<80x128xbf16>, vector<128x288xbf16>, vector<80x288xf32> -> vector<80x288xf32>
    %177 = vector.shape_cast %176 : vector<80x288xf32> to vector<5x16x288xf32>
    %c1_228 = arith.constant 1 : index
    %c0_229 = arith.constant 0 : index
    %c0_230 = arith.constant 0 : index
    %c0_231 = arith.constant 0 : index
    %178 = vector.load %arg6[%c1_228, %c0_229, %c0_230, %c0_231] : memref<2x10x16x288xf32, #tpu.memory_space<vmem>>, vector<1x5x16x288xf32>
    %179 = vector.shape_cast %178 : vector<1x5x16x288xf32> to vector<5x16x288xf32>
    %180 = vector.shape_cast %177 : vector<5x16x288xf32> to vector<1x5x16x288xf32>
    tpu.vector_store %arg6[%c1_228, %c0_229, %c0_230, %c0_231], %180 {strides = array<i32>} : memref<2x10x16x288xf32, #tpu.memory_space<vmem>>, vector<1x5x16x288xf32>,
    %c1_232 = arith.constant 1 : index
    %c5_233 = arith.constant 5 : index
    %c0_234 = arith.constant 0 : index
    %c0_235 = arith.constant 0 : index
    %181 = vector.load %arg5[%c1_232, %c5_233, %c0_234, %c0_235] : memref<2x10x16x128xbf16, #tpu.memory_space<vmem>>, vector<1x5x16x128xbf16>
    %182 = vector.shape_cast %181 : vector<1x5x16x128xbf16> to vector<5x16x128xbf16>
    %183 = vector.shape_cast %182 : vector<5x16x128xbf16> to vector<80x128xbf16>
    %c2_236 = arith.constant 2 : index
    %c0_237 = arith.constant 0 : index
    %c0_238 = arith.constant 0 : index
    %184 = vector.load %arg2[%c2_236, %c0_237, %c0_238] : memref<4x128x288xbf16, #tpu.memory_space<vmem>>, vector<1x128x288xbf16>
    %185 = vector.shape_cast %184 : vector<1x128x288xbf16> to vector<128x288xbf16>
    %cst_239 = arith.constant dense<0.000000e+00> : vector<80x288xf32>
    %186 = tpu.matmul %183, %185, %cst_239 {dimension_numbers = #tpu.dot_dimension_numbers<[1], [0], [0], [1], [0, 0, 1, 1], [], []>} : vector<80x128xbf16>, vector<128x288xbf16>, vector<80x288xf32> -> vector<80x288xf32>
    %187 = vector.shape_cast %186 : vector<80x288xf32> to vector<5x16x288xf32>
    %c1_240 = arith.constant 1 : index
    %c5_241 = arith.constant 5 : index
    %c0_242 = arith.constant 0 : index
    %c0_243 = arith.constant 0 : index
    %188 = vector.load %arg6[%c1_240, %c5_241, %c0_242, %c0_243] : memref<2x10x16x288xf32, #tpu.memory_space<vmem>>, vector<1x5x16x288xf32>
    %189 = vector.shape_cast %188 : vector<1x5x16x288xf32> to vector<5x16x288xf32>
    %190 = vector.shape_cast %187 : vector<5x16x288xf32> to vector<1x5x16x288xf32>
    tpu.vector_store %arg6[%c1_240, %c5_241, %c0_242, %c0_243], %190 {strides = array<i32>} : memref<2x10x16x288xf32, #tpu.memory_space<vmem>>, vector<1x5x16x288xf32>,
    %cst_244 = arith.constant 0.000000e+00 : f32
    %191 = vector.broadcast %cst_244 : f32 to vector<2x8x8x32xf32>
    %c0_245 = arith.constant 0 : index
    %c0_246 = arith.constant 0 : index
    %c0_247 = arith.constant 0 : index
    %c0_248 = arith.constant 0 : index
    %192 = vector.load %arg6[%c0_245, %c0_246, %c0_247, %c0_248] : memref<2x10x16x288xf32, #tpu.memory_space<vmem>>, vector<2x8x8x32xf32>
    %193 = arith.addf %191, %192 : vector<2x8x8x32xf32>
    %c0_249 = arith.constant 0 : index
    %c0_250 = arith.constant 0 : index
    %c1_251 = arith.constant 1 : index
    %c32_252 = arith.constant 32 : index
    %194 = vector.load %arg6[%c0_249, %c0_250, %c1_251, %c32_252] : memref<2x10x16x288xf32, #tpu.memory_space<vmem>>, vector<2x8x8x32xf32>
    %195 = arith.addf %193, %194 : vector<2x8x8x32xf32>
    %c0_253 = arith.constant 0 : index
    %c0_254 = arith.constant 0 : index
    %c2_255 = arith.constant 2 : index
    %c64_256 = arith.constant 64 : index
    %196 = vector.load %arg6[%c0_253, %c0_254, %c2_255, %c64_256] : memref<2x10x16x288xf32, #tpu.memory_space<vmem>>, vector<2x8x8x32xf32>
    %197 = arith.addf %195, %196 : vector<2x8x8x32xf32>
    %c0_257 = arith.constant 0 : index
    %c1_258 = arith.constant 1 : index
    %c0_259 = arith.constant 0 : index
    %c96_260 = arith.constant 96 : index
    %198 = vector.load %arg6[%c0_257, %c1_258, %c0_259, %c96_260] : memref<2x10x16x288xf32, #tpu.memory_space<vmem>>, vector<2x8x8x32xf32>
    %199 = arith.addf %197, %198 : vector<2x8x8x32xf32>
    %c0_261 = arith.constant 0 : index
    %c1_262 = arith.constant 1 : index
    %c1_263 = arith.constant 1 : index
    %c128_264 = arith.constant 128 : index
    %200 = vector.load %arg6[%c0_261, %c1_262, %c1_263, %c128_264] : memref<2x10x16x288xf32, #tpu.memory_space<vmem>>, vector<2x8x8x32xf32>
    %201 = arith.addf %199, %200 : vector<2x8x8x32xf32>
    %c0_265 = arith.constant 0 : index
    %c1_266 = arith.constant 1 : index
    %c2_267 = arith.constant 2 : index
    %c160_268 = arith.constant 160 : index
    %202 = vector.load %arg6[%c0_265, %c1_266, %c2_267, %c160_268] : memref<2x10x16x288xf32, #tpu.memory_space<vmem>>, vector<2x8x8x32xf32>
    %203 = arith.addf %201, %202 : vector<2x8x8x32xf32>
    %c0_269 = arith.constant 0 : index
    %c2_270 = arith.constant 2 : index
    %c0_271 = arith.constant 0 : index
    %c192_272 = arith.constant 192 : index
    %204 = vector.load %arg6[%c0_269, %c2_270, %c0_271, %c192_272] : memref<2x10x16x288xf32, #tpu.memory_space<vmem>>, vector<2x8x8x32xf32>
    %205 = arith.addf %203, %204 : vector<2x8x8x32xf32>
    %c0_273 = arith.constant 0 : index
    %c2_274 = arith.constant 2 : index
    %c1_275 = arith.constant 1 : index
    %c224_276 = arith.constant 224 : index
    %206 = vector.load %arg6[%c0_273, %c2_274, %c1_275, %c224_276] : memref<2x10x16x288xf32, #tpu.memory_space<vmem>>, vector<2x8x8x32xf32>
    %207 = arith.addf %205, %206 : vector<2x8x8x32xf32>
    %c0_277 = arith.constant 0 : index
    %c2_278 = arith.constant 2 : index
    %c2_279 = arith.constant 2 : index
    %c256_280 = arith.constant 256 : index
    %208 = vector.load %arg6[%c0_277, %c2_278, %c2_279, %c256_280] : memref<2x10x16x288xf32, #tpu.memory_space<vmem>>, vector<2x8x8x32xf32>
    %209 = arith.addf %207, %208 : vector<2x8x8x32xf32>
    %c2_281 = arith.constant 2 : index
    %c0_282 = arith.constant 0 : index
    %c0_283 = arith.constant 0 : index
    %210 = vector.load %arg3[%c2_281, %c0_282, %c0_283] : memref<4x1x32xf32, #tpu.memory_space<vmem>>, vector<1x1x32xf32>
    %211 = vector.shape_cast %210 : vector<1x1x32xf32> to vector<1x32xf32>
    %212 = vector.shape_cast %211 : vector<1x32xf32> to vector<1x1x1x32xf32>
    %213 = vector.broadcast %212 : vector<1x1x1x32xf32> to vector<2x8x8x32xf32>
    %214 = arith.addf %209, %213 : vector<2x8x8x32xf32>
    %cst_284 = arith.constant 0.000000e+00 : f32
    %215 = vector.broadcast %cst_284 : f32 to vector<2x8x8x32xf32>
    %216 = arith.maximumf %214, %215 : vector<2x8x8x32xf32>
    %c0_285 = arith.constant 0 : index
    %c0_286 = arith.constant 0 : index
    %c0_287 = arith.constant 0 : index
    %c68 = arith.constant 68 : index
    %217 = vector.load %arg4[%c0_285, %c0_286, %c0_287, %c68] : memref<2x8x8x132xf32, #tpu.memory_space<vmem>>, vector<2x8x8x32xf32>
    tpu.vector_store %arg4[%c0_285, %c0_286, %c0_287, %c68], %216 {strides = array<i32>} : memref<2x8x8x132xf32, #tpu.memory_space<vmem>>, vector<2x8x8x32xf32>,
    %218 = arith.truncf %216 : vector<2x8x8x32xf32> to vector<2x8x8x32xbf16>
    %c0_288 = arith.constant 0 : index
    %c1_289 = arith.constant 1 : index
    %c1_290 = arith.constant 1 : index
    %c96_291 = arith.constant 96 : index
    %219 = vector.load %arg5[%c0_288, %c1_289, %c1_290, %c96_291] : memref<2x10x16x128xbf16, #tpu.memory_space<vmem>>, vector<2x8x8x32xbf16>
    tpu.vector_store %arg5[%c0_288, %c1_289, %c1_290, %c96_291], %218 {strides = array<i32>} : memref<2x10x16x128xbf16, #tpu.memory_space<vmem>>, vector<2x8x8x32xbf16>,
    %c0_292 = arith.constant 0 : index
    %c0_293 = arith.constant 0 : index
    %c0_294 = arith.constant 0 : index
    %c0_295 = arith.constant 0 : index
    %220 = vector.load %arg5[%c0_292, %c0_293, %c0_294, %c0_295] : memref<2x10x16x128xbf16, #tpu.memory_space<vmem>>, vector<1x5x16x128xbf16>
    %221 = vector.shape_cast %220 : vector<1x5x16x128xbf16> to vector<5x16x128xbf16>
    %222 = vector.shape_cast %221 : vector<5x16x128xbf16> to vector<80x128xbf16>
    %c3 = arith.constant 3 : index
    %c0_296 = arith.constant 0 : index
    %c0_297 = arith.constant 0 : index
    %223 = vector.load %arg2[%c3, %c0_296, %c0_297] : memref<4x128x288xbf16, #tpu.memory_space<vmem>>, vector<1x128x288xbf16>
    %224 = vector.shape_cast %223 : vector<1x128x288xbf16> to vector<128x288xbf16>
    %cst_298 = arith.constant dense<0.000000e+00> : vector<80x288xf32>
    %225 = tpu.matmul %222, %224, %cst_298 {dimension_numbers = #tpu.dot_dimension_numbers<[1], [0], [0], [1], [0, 0, 1, 1], [], []>} : vector<80x128xbf16>, vector<128x288xbf16>, vector<80x288xf32> -> vector<80x288xf32>
    %226 = vector.shape_cast %225 : vector<80x288xf32> to vector<5x16x288xf32>
    %c0_299 = arith.constant 0 : index
    %c0_300 = arith.constant 0 : index
    %c0_301 = arith.constant 0 : index
    %c0_302 = arith.constant 0 : index
    %227 = vector.load %arg6[%c0_299, %c0_300, %c0_301, %c0_302] : memref<2x10x16x288xf32, #tpu.memory_space<vmem>>, vector<1x5x16x288xf32>
    %228 = vector.shape_cast %227 : vector<1x5x16x288xf32> to vector<5x16x288xf32>
    %229 = vector.shape_cast %226 : vector<5x16x288xf32> to vector<1x5x16x288xf32>
    tpu.vector_store %arg6[%c0_299, %c0_300, %c0_301, %c0_302], %229 {strides = array<i32>} : memref<2x10x16x288xf32, #tpu.memory_space<vmem>>, vector<1x5x16x288xf32>,
    %c0_303 = arith.constant 0 : index
    %c5_304 = arith.constant 5 : index
    %c0_305 = arith.constant 0 : index
    %c0_306 = arith.constant 0 : index
    %230 = vector.load %arg5[%c0_303, %c5_304, %c0_305, %c0_306] : memref<2x10x16x128xbf16, #tpu.memory_space<vmem>>, vector<1x5x16x128xbf16>
    %231 = vector.shape_cast %230 : vector<1x5x16x128xbf16> to vector<5x16x128xbf16>
    %232 = vector.shape_cast %231 : vector<5x16x128xbf16> to vector<80x128xbf16>
    %c3_307 = arith.constant 3 : index
    %c0_308 = arith.constant 0 : index
    %c0_309 = arith.constant 0 : index
    %233 = vector.load %arg2[%c3_307, %c0_308, %c0_309] : memref<4x128x288xbf16, #tpu.memory_space<vmem>>, vector<1x128x288xbf16>
    %234 = vector.shape_cast %233 : vector<1x128x288xbf16> to vector<128x288xbf16>
    %cst_310 = arith.constant dense<0.000000e+00> : vector<80x288xf32>
    %235 = tpu.matmul %232, %234, %cst_310 {dimension_numbers = #tpu.dot_dimension_numbers<[1], [0], [0], [1], [0, 0, 1, 1], [], []>} : vector<80x128xbf16>, vector<128x288xbf16>, vector<80x288xf32> -> vector<80x288xf32>
    %236 = vector.shape_cast %235 : vector<80x288xf32> to vector<5x16x288xf32>
    %c0_311 = arith.constant 0 : index
    %c5_312 = arith.constant 5 : index
    %c0_313 = arith.constant 0 : index
    %c0_314 = arith.constant 0 : index
    %237 = vector.load %arg6[%c0_311, %c5_312, %c0_313, %c0_314] : memref<2x10x16x288xf32, #tpu.memory_space<vmem>>, vector<1x5x16x288xf32>
    %238 = vector.shape_cast %237 : vector<1x5x16x288xf32> to vector<5x16x288xf32>
    %239 = vector.shape_cast %236 : vector<5x16x288xf32> to vector<1x5x16x288xf32>
    tpu.vector_store %arg6[%c0_311, %c5_312, %c0_313, %c0_314], %239 {strides = array<i32>} : memref<2x10x16x288xf32, #tpu.memory_space<vmem>>, vector<1x5x16x288xf32>,
    %c1_315 = arith.constant 1 : index
    %c0_316 = arith.constant 0 : index
    %c0_317 = arith.constant 0 : index
    %c0_318 = arith.constant 0 : index
    %240 = vector.load %arg5[%c1_315, %c0_316, %c0_317, %c0_318] : memref<2x10x16x128xbf16, #tpu.memory_space<vmem>>, vector<1x5x16x128xbf16>
    %241 = vector.shape_cast %240 : vector<1x5x16x128xbf16> to vector<5x16x128xbf16>
    %242 = vector.shape_cast %241 : vector<5x16x128xbf16> to vector<80x128xbf16>
    %c3_319 = arith.constant 3 : index
    %c0_320 = arith.constant 0 : index
    %c0_321 = arith.constant 0 : index
    %243 = vector.load %arg2[%c3_319, %c0_320, %c0_321] : memref<4x128x288xbf16, #tpu.memory_space<vmem>>, vector<1x128x288xbf16>
    %244 = vector.shape_cast %243 : vector<1x128x288xbf16> to vector<128x288xbf16>
    %cst_322 = arith.constant dense<0.000000e+00> : vector<80x288xf32>
    %245 = tpu.matmul %242, %244, %cst_322 {dimension_numbers = #tpu.dot_dimension_numbers<[1], [0], [0], [1], [0, 0, 1, 1], [], []>} : vector<80x128xbf16>, vector<128x288xbf16>, vector<80x288xf32> -> vector<80x288xf32>
    %246 = vector.shape_cast %245 : vector<80x288xf32> to vector<5x16x288xf32>
    %c1_323 = arith.constant 1 : index
    %c0_324 = arith.constant 0 : index
    %c0_325 = arith.constant 0 : index
    %c0_326 = arith.constant 0 : index
    %247 = vector.load %arg6[%c1_323, %c0_324, %c0_325, %c0_326] : memref<2x10x16x288xf32, #tpu.memory_space<vmem>>, vector<1x5x16x288xf32>
    %248 = vector.shape_cast %247 : vector<1x5x16x288xf32> to vector<5x16x288xf32>
    %249 = vector.shape_cast %246 : vector<5x16x288xf32> to vector<1x5x16x288xf32>
    tpu.vector_store %arg6[%c1_323, %c0_324, %c0_325, %c0_326], %249 {strides = array<i32>} : memref<2x10x16x288xf32, #tpu.memory_space<vmem>>, vector<1x5x16x288xf32>,
    %c1_327 = arith.constant 1 : index
    %c5_328 = arith.constant 5 : index
    %c0_329 = arith.constant 0 : index
    %c0_330 = arith.constant 0 : index
    %250 = vector.load %arg5[%c1_327, %c5_328, %c0_329, %c0_330] : memref<2x10x16x128xbf16, #tpu.memory_space<vmem>>, vector<1x5x16x128xbf16>
    %251 = vector.shape_cast %250 : vector<1x5x16x128xbf16> to vector<5x16x128xbf16>
    %252 = vector.shape_cast %251 : vector<5x16x128xbf16> to vector<80x128xbf16>
    %c3_331 = arith.constant 3 : index
    %c0_332 = arith.constant 0 : index
    %c0_333 = arith.constant 0 : index
    %253 = vector.load %arg2[%c3_331, %c0_332, %c0_333] : memref<4x128x288xbf16, #tpu.memory_space<vmem>>, vector<1x128x288xbf16>
    %254 = vector.shape_cast %253 : vector<1x128x288xbf16> to vector<128x288xbf16>
    %cst_334 = arith.constant dense<0.000000e+00> : vector<80x288xf32>
    %255 = tpu.matmul %252, %254, %cst_334 {dimension_numbers = #tpu.dot_dimension_numbers<[1], [0], [0], [1], [0, 0, 1, 1], [], []>} : vector<80x128xbf16>, vector<128x288xbf16>, vector<80x288xf32> -> vector<80x288xf32>
    %256 = vector.shape_cast %255 : vector<80x288xf32> to vector<5x16x288xf32>
    %c1_335 = arith.constant 1 : index
    %c5_336 = arith.constant 5 : index
    %c0_337 = arith.constant 0 : index
    %c0_338 = arith.constant 0 : index
    %257 = vector.load %arg6[%c1_335, %c5_336, %c0_337, %c0_338] : memref<2x10x16x288xf32, #tpu.memory_space<vmem>>, vector<1x5x16x288xf32>
    %258 = vector.shape_cast %257 : vector<1x5x16x288xf32> to vector<5x16x288xf32>
    %259 = vector.shape_cast %256 : vector<5x16x288xf32> to vector<1x5x16x288xf32>
    tpu.vector_store %arg6[%c1_335, %c5_336, %c0_337, %c0_338], %259 {strides = array<i32>} : memref<2x10x16x288xf32, #tpu.memory_space<vmem>>, vector<1x5x16x288xf32>,
    %cst_339 = arith.constant 0.000000e+00 : f32
    %260 = vector.broadcast %cst_339 : f32 to vector<2x8x8x32xf32>
    %c0_340 = arith.constant 0 : index
    %c0_341 = arith.constant 0 : index
    %c0_342 = arith.constant 0 : index
    %c0_343 = arith.constant 0 : index
    %261 = vector.load %arg6[%c0_340, %c0_341, %c0_342, %c0_343] : memref<2x10x16x288xf32, #tpu.memory_space<vmem>>, vector<2x8x8x32xf32>
    %262 = arith.addf %260, %261 : vector<2x8x8x32xf32>
    %c0_344 = arith.constant 0 : index
    %c0_345 = arith.constant 0 : index
    %c1_346 = arith.constant 1 : index
    %c32_347 = arith.constant 32 : index
    %263 = vector.load %arg6[%c0_344, %c0_345, %c1_346, %c32_347] : memref<2x10x16x288xf32, #tpu.memory_space<vmem>>, vector<2x8x8x32xf32>
    %264 = arith.addf %262, %263 : vector<2x8x8x32xf32>
    %c0_348 = arith.constant 0 : index
    %c0_349 = arith.constant 0 : index
    %c2_350 = arith.constant 2 : index
    %c64_351 = arith.constant 64 : index
    %265 = vector.load %arg6[%c0_348, %c0_349, %c2_350, %c64_351] : memref<2x10x16x288xf32, #tpu.memory_space<vmem>>, vector<2x8x8x32xf32>
    %266 = arith.addf %264, %265 : vector<2x8x8x32xf32>
    %c0_352 = arith.constant 0 : index
    %c1_353 = arith.constant 1 : index
    %c0_354 = arith.constant 0 : index
    %c96_355 = arith.constant 96 : index
    %267 = vector.load %arg6[%c0_352, %c1_353, %c0_354, %c96_355] : memref<2x10x16x288xf32, #tpu.memory_space<vmem>>, vector<2x8x8x32xf32>
    %268 = arith.addf %266, %267 : vector<2x8x8x32xf32>
    %c0_356 = arith.constant 0 : index
    %c1_357 = arith.constant 1 : index
    %c1_358 = arith.constant 1 : index
    %c128_359 = arith.constant 128 : index
    %269 = vector.load %arg6[%c0_356, %c1_357, %c1_358, %c128_359] : memref<2x10x16x288xf32, #tpu.memory_space<vmem>>, vector<2x8x8x32xf32>
    %270 = arith.addf %268, %269 : vector<2x8x8x32xf32>
    %c0_360 = arith.constant 0 : index
    %c1_361 = arith.constant 1 : index
    %c2_362 = arith.constant 2 : index
    %c160_363 = arith.constant 160 : index
    %271 = vector.load %arg6[%c0_360, %c1_361, %c2_362, %c160_363] : memref<2x10x16x288xf32, #tpu.memory_space<vmem>>, vector<2x8x8x32xf32>
    %272 = arith.addf %270, %271 : vector<2x8x8x32xf32>
    %c0_364 = arith.constant 0 : index
    %c2_365 = arith.constant 2 : index
    %c0_366 = arith.constant 0 : index
    %c192_367 = arith.constant 192 : index
    %273 = vector.load %arg6[%c0_364, %c2_365, %c0_366, %c192_367] : memref<2x10x16x288xf32, #tpu.memory_space<vmem>>, vector<2x8x8x32xf32>
    %274 = arith.addf %272, %273 : vector<2x8x8x32xf32>
    %c0_368 = arith.constant 0 : index
    %c2_369 = arith.constant 2 : index
    %c1_370 = arith.constant 1 : index
    %c224_371 = arith.constant 224 : index
    %275 = vector.load %arg6[%c0_368, %c2_369, %c1_370, %c224_371] : memref<2x10x16x288xf32, #tpu.memory_space<vmem>>, vector<2x8x8x32xf32>
    %276 = arith.addf %274, %275 : vector<2x8x8x32xf32>
    %c0_372 = arith.constant 0 : index
    %c2_373 = arith.constant 2 : index
    %c2_374 = arith.constant 2 : index
    %c256_375 = arith.constant 256 : index
    %277 = vector.load %arg6[%c0_372, %c2_373, %c2_374, %c256_375] : memref<2x10x16x288xf32, #tpu.memory_space<vmem>>, vector<2x8x8x32xf32>
    %278 = arith.addf %276, %277 : vector<2x8x8x32xf32>
    %c3_376 = arith.constant 3 : index
    %c0_377 = arith.constant 0 : index
    %c0_378 = arith.constant 0 : index
    %279 = vector.load %arg3[%c3_376, %c0_377, %c0_378] : memref<4x1x32xf32, #tpu.memory_space<vmem>>, vector<1x1x32xf32>
    %280 = vector.shape_cast %279 : vector<1x1x32xf32> to vector<1x32xf32>
    %281 = vector.shape_cast %280 : vector<1x32xf32> to vector<1x1x1x32xf32>
    %282 = vector.broadcast %281 : vector<1x1x1x32xf32> to vector<2x8x8x32xf32>
    %283 = arith.addf %278, %282 : vector<2x8x8x32xf32>
    %cst_379 = arith.constant 0.000000e+00 : f32
    %284 = vector.broadcast %cst_379 : f32 to vector<2x8x8x32xf32>
    %285 = arith.maximumf %283, %284 : vector<2x8x8x32xf32>
    %c0_380 = arith.constant 0 : index
    %c0_381 = arith.constant 0 : index
    %c0_382 = arith.constant 0 : index
    %c100 = arith.constant 100 : index
    %286 = vector.load %arg4[%c0_380, %c0_381, %c0_382, %c100] : memref<2x8x8x132xf32, #tpu.memory_space<vmem>>, vector<2x8x8x32xf32>
    tpu.vector_store %arg4[%c0_380, %c0_381, %c0_382, %c100], %285 {strides = array<i32>} : memref<2x8x8x132xf32, #tpu.memory_space<vmem>>, vector<2x8x8x32xf32>,
    return
  }
  func.func @transform_0(%arg0: i32) -> (i32, i32, i32, i32) {
    %c0_i32 = arith.constant 0 : i32
    %c0_i32_0 = arith.constant 0 : i32
    %c0_i32_1 = arith.constant 0 : i32
    %c0_i32_2 = arith.constant 0 : i32
    %c0_i32_3 = arith.constant 0 : i32
    return %c0_i32, %c0_i32_0, %c0_i32_1, %c0_i32_2 : i32, i32, i32, i32
  }
  func.func @transform_1(%arg0: i32) -> (i32, i32, i32) {
    %c0_i32 = arith.constant 0 : i32
    %c0_i32_0 = arith.constant 0 : i32
    %c0_i32_1 = arith.constant 0 : i32
    %c0_i32_2 = arith.constant 0 : i32
    return %c0_i32, %c0_i32_0, %c0_i32_1 : i32, i32, i32
  }
  func.func @transform_2(%arg0: i32) -> (i32, i32, i32) {
    %c0_i32 = arith.constant 0 : i32
    %c0_i32_0 = arith.constant 0 : i32
    %c0_i32_1 = arith.constant 0 : i32
    %c0_i32_2 = arith.constant 0 : i32
    return %c0_i32, %c0_i32_0, %c0_i32_1 : i32, i32, i32
  }
  func.func @transform_3(%arg0: i32) -> (i32, i32, i32, i32) {
    %c0_i32 = arith.constant 0 : i32
    %c0_i32_0 = arith.constant 0 : i32
    %c0_i32_1 = arith.constant 0 : i32
    %c0_i32_2 = arith.constant 0 : i32
    %c0_i32_3 = arith.constant 0 : i32
    return %c0_i32, %c0_i32_0, %c0_i32_1, %c0_i32_2 : i32, i32, i32, i32
  }
}

</mosaic_0001>

<bundles_post_ra>
// kernel: down_forward_nchw.1
= control target key start
LH: loop header
LB: loop body
LE: loop exit
PB: predicated region body
PF: predicated region fallthrough
CT: control target
= control target key end

     0   :  { %s14095_s16 = smov 124   ;;  %v14096_v8 = vmov 0   ;;  %v18158_v23 = vmov 0.0   ;;  %vm14098_vm0 = vmmov 0   ;;  %s14099_s25 = smov 120   ;;  %s18148_s0 = inlined_call_operand.vmem [shape: f32[2,8,8,16], index: 0, kind: input, shape index: {}]   ;;  %s18149_s1 = inlined_call_operand.vmem [shape: bf16[4,128,288], index: 1, kind: input, shape index: {}]   ;;  %s18150_s2 = inlined_call_operand.vmem [shape: f32[4,1,32], index: 2, kind: input, shape index: {}]   ;;  %s18151_s3 = inlined_call_operand.hbm [shape: f32[2,8,8,132], index: 3, kind: output, shape index: {}]  }
   0x1   :  { %v14133_v0 = vld [vmem:[%s18148_s0] sm:$0xff]  ;;  %v14138_v1 = vld [vmem:[%s18148_s0 + $0x10] sm:$0xff]  ;;  %v14147_v2 = vld [vmem:[%s18148_s0 + $0x8] sm:$0xff]  ;;  %16 = vst [vmem:[#allocation2] sm:$0xff] %v14096_v8  ;;  %622 = vmatprep.mubr.bf16.mxu0 %v14096_v8  ;;  %13095 = vmatprep.subr.bf16.mxu1 %v18158_v23 }
   0x2   :  { %68 = vrot.lane.b32.xlu0 %v14133_v0, %s14095_s16  ;;  %72 = vrot.lane.b32.xlu1 %v14138_v1, %s14095_s16  ;;  %v14152_v3 = vld [vmem:[%s18148_s0 + $0x18] sm:$0xff]  ;;  %v14157_v4 = vld [vmem:[%s18149_s1 + $0x4] ss:$12 sps:$4 sm:$0xff]   ;;  %17 = vst [vmem:[#allocation2 + $0x8] sm:$0xff] %v14096_v8  ;;  %18 = vst [vmem:[#allocation2 + $0x10] sm:$0xff] %v14096_v8 }
   0x3   :  { %v14162_v5 = vld [vmem:[%s18149_s1] ss:$12 sps:$4 sm:$0xff]   ;;  %v14176_v7 = vld [vmem:[%s18149_s1 + $0x1c] ss:$12 sps:$4 sm:$0xff]   ;;  %19 = vst [vmem:[#allocation2 + $0x18] sm:$0xff] %v14096_v8  ;;  %20 = vst [vmem:[#allocation2 + $0x20] sm:$0xff] %v14096_v8  ;;  %590 = vmatprep.subr.bf16.mxu0 %v14157_v4  ;;  %13111 = vmatprep.mubr.msk.bf16.mxu1 %vm14098_vm0, %v18158_v23 }
   0x4   :  { %v14171_v6 = vld [vmem:[%s18148_s0 + $0x20] sm:$0xff]  ;;  %21 = vst [vmem:[#allocation2 + $0x28] sm:$0xff] %v14096_v8  ;;  %22 = vst [vmem:[#allocation2 + $0x30] sm:$0xff] %v14096_v8  ;;  %v14198_v9 = vld [vmem:[%s18148_s0 + $0x28] sm:$0xff]  ;;  %591 = vmatpush1.bf16.msra.mxu0 %v14162_v5 }
   0x5   :  { %23 = vst [vmem:[#allocation2 + $0x38] sm:$0xff] %v14096_v8  ;;  %24 = vst [vmem:[#allocation2 + $0x40] sm:$0xff] %v14096_v8  ;;  %v13691_v10 = vld [vmem:[%s18149_s1 + $0x18] ss:$12 sps:$4 sm:$0xff]   ;;  %592 = vmatprep.subr.bf16.mxu0 %v14176_v7  ;;  %v13692_v11 = vld [vmem:[%s18149_s1 + $0x34] ss:$12 sps:$4 sm:$0xff]  }
   0x6   :  { %70 = vrot.lane.b32.xlu0 %v14147_v2, %s14095_s16  ;;  %74 = vrot.lane.b32.xlu1 %v14152_v3, %s14095_s16  ;;  %27 = vst [vmem:[#allocation2 + $0x58] sm:$0xff] %v14096_v8  ;;  %28 = vst [vmem:[#allocation2 + $0x60] sm:$0xff] %v14096_v8  ;;  %v14217_v12 = vld [vmem:[%s18148_s0 + $0x30] sm:$0xff]  ;;  %v14222_v13 = vld [vmem:[%s18148_s0 + $0x38] sm:$0xff] }
   0x7   :  { %29 = vst [vmem:[#allocation2 + $0x68] sm:$0xff] %v14096_v8  ;;  %30 = vst [vmem:[#allocation2 + $0x70] sm:$0xff] %v14096_v8  ;;  %v13694_v14 = vld [vmem:[%s18149_s1 + $0x30] ss:$12 sps:$4 sm:$0xff]   ;;  %v13695_v15 = vld [vmem:[%s18149_s1 + $0x4c] ss:$12 sps:$4 sm:$0xff]  }
   0x8   :  { %31 = vst [vmem:[#allocation2 + $0x78] sm:$0xff] %v14096_v8  ;;  %32 = vst [vmem:[#allocation2 + $0x80] sm:$0xff] %v14096_v8  ;;  %593 = vmatpush1.bf16.msra.mxu0 %v13691_v10  ;;  %v13697_v16 = vld [vmem:[%s18149_s1 + $0x48] ss:$12 sps:$4 sm:$0xff]   ;;  %v13698_v17 = vld [vmem:[%s18149_s1 + $0x64] ss:$12 sps:$4 sm:$0xff]  }
   0x9   :  { %33 = vst [vmem:[#allocation2 + $0x88] sm:$0xff] %v14096_v8  ;;  %34 = vst [vmem:[#allocation2 + $0x90] sm:$0xff] %v14096_v8  ;;  %594 = vmatprep.subr.bf16.mxu0 %v13692_v11  ;;  %v13700_v18 = vld [vmem:[%s18149_s1 + $0x60] ss:$12 sps:$4 sm:$0xff]   ;;  %v13701_v19 = vld [vmem:[%s18149_s1 + $0x7c] ss:$12 sps:$4 sm:$0xff]  }
   0xa   :  { %76 = vrot.lane.b32.xlu0 %v14171_v6, %s14095_s16  ;;  %78 = vrot.lane.b32.xlu1 %v14198_v9, %s14095_s16  ;;  %v13710_v20 = vld [vmem:[%s18149_s1 + $0x8] ss:$12 sps:$4 sm:$0xff]   ;;  %v13703_v21 = vld [vmem:[%s18149_s1 + $0x78] ss:$12 sps:$4 sm:$0xff]  }
   0xb   :  { %v13704_v22 = vld [vmem:[%s18149_s1 + $0x94] ss:$12 sps:$4 sm:$0xff]   ;;  %13096 = vmatpush3.bf16.msra.mxu1 %v13710_v20  ;;  %v13706_v25 = vld [vmem:[%s18149_s1 + $0x90] ss:$12 sps:$4 sm:$0xff]   ;;  %v13707_v26 = vld [vmem:[%s18149_s1 + $0xac] ss:$12 sps:$4 sm:$0xff]  }
   0xc   :  { %595 = vmatpush1.bf16.msra.mxu0 %v13694_v14  ;;  %v13711_v24 = vld [vmem:[%s18149_s1 + $0x20] ss:$12 sps:$4 sm:$0xff]   ;;  %13097 = vmatprep.subr.bf16.mxu1 %v18158_v23  ;;  %v13712_v27 = vld [vmem:[%s18149_s1 + $0x38] ss:$12 sps:$4 sm:$0xff]   ;;  %v13709_v28 = vld [vmem:[%s18149_s1 + $0xa8] ss:$12 sps:$4 sm:$0xff]  }
   0xd   :  { %596 = vmatprep.subr.bf16.mxu0 %v13695_v15  ;;  %v13713_v29 = vld [vmem:[%s18149_s1 + $0x50] ss:$12 sps:$4 sm:$0xff]   ;;  %v13714_v30 = vld [vmem:[%s18149_s1 + $0x68] ss:$12 sps:$4 sm:$0xff]   ;;  %v13715_v31 = vld [vmem:[%s18149_s1 + $0x80] ss:$12 sps:$4 sm:$0xff]  }
   0xe   :  { %80 = vrot.lane.b32.xlu0 %v14217_v12, %s14095_s16  ;;  %82 = vrot.lane.b32.xlu1 %v14222_v13, %s14095_s16  ;;  %v13716_v32 = vld [vmem:[%s18149_s1 + $0x98] ss:$12 sps:$4 sm:$0xff]   ;;  %v13717_v33 = vld [vmem:[%s18149_s1 + $0xb0] ss:$12 sps:$4 sm:$0xff]  }
   0xf   :  { %13098 = vmatpush3.bf16.msra.mxu1 %v13711_v24  ;;  %v14319_v41 = vld [vmem:[%s18148_s0 + $0x40] sm:$0xff]  ;;  %v13718_v44 = vld [vmem:[%s18149_s1 + $0x8] ss:$12 sps:$4 sm:$0xff]   ;;  %v14366_v53 = vld [vmem:[%s18148_s0 + $0x58] sm:$0xff] }
  0x10   :  { %597 = vmatpush1.bf16.msra.mxu0 %v13697_v16  ;;  %13099 = vmatprep.subr.bf16.mxu1 %v18158_v23  ;;  %v14334_v45 = vld [vmem:[%s18148_s0 + $0x48] sm:$0xff]  ;;  %v14350_v49 = vld [vmem:[%s18148_s0 + $0x50] sm:$0xff]  ;;  %v13720_v52 = vld [vmem:[%s18149_s1 + $0x38] ss:$12 sps:$4 sm:$0xff]  }
  0x11   :  { %598 = vmatprep.subr.bf16.mxu0 %v13698_v17  ;;  %v13719_v48 = vld [vmem:[%s18149_s1 + $0x20] ss:$12 sps:$4 sm:$0xff]   ;;  %v13721_v56 = vld [vmem:[%s18149_s1 + $0x50] ss:$12 sps:$4 sm:$0xff]   ;;  %v13722_v59 = vld [vmem:[%s18149_s1 + $0x68] ss:$12 sps:$4 sm:$0xff]  }
  0x12   :  { %v14382_v57 = vld [vmem:[%s18148_s0 + $0x60] sm:$0xff]  ;;  %v14398_v60 = vld [vmem:[%s18148_s0 + $0x68] sm:$0xff]  ;;  %v14403_v61 = vld [vmem:[%s18148_s0 + $0x70] sm:$0xff] }
  0x13   :  { %13100 = vmatpush3.bf16.msra.mxu1 %v13712_v27  ;;  %v13723_v62 = vld [vmem:[%s18149_s1 + $0x80] ss:$12 sps:$4 sm:$0xff]   ;;  %v14416_v63 = vld [vmem:[%s18148_s0 + $0x78] sm:$0xff] }
  0x14   :  { %599 = vmatpush1.bf16.msra.mxu0 %v13700_v18  ;;  %13101 = vmatprep.subr.bf16.mxu1 %v18158_v23 }
  0x15   :  { %600 = vmatprep.subr.bf16.mxu0 %v13701_v19 }
  0x17   :  { %13102 = vmatpush3.bf16.msra.mxu1 %v13713_v29 }
  0x18   :  { %601 = vmatpush1.bf16.msra.mxu0 %v13703_v21  ;;  %13103 = vmatprep.subr.bf16.mxu1 %v18158_v23 }
  0x19   :  { %602 = vmatprep.subr.bf16.mxu0 %v13704_v22 }
  0x1b   :  { %13104 = vmatpush3.bf16.msra.mxu1 %v13714_v30 }
  0x1c   :  { %603 = vmatpush1.bf16.msra.mxu0 %v13706_v25  ;;  %13105 = vmatprep.subr.bf16.mxu1 %v18158_v23 }
  0x1d   :  { %604 = vmatprep.subr.bf16.mxu0 %v13707_v26 }
  0x1f   :  { %13106 = vmatpush3.bf16.msra.mxu1 %v13715_v31 }
  0x20   :  { %605 = vmatpush1.bf16.msra.mxu0 %v13709_v28  ;;  %13107 = vmatprep.subr.bf16.mxu1 %v18158_v23 }
  0x21   :  { %943 = vmatprep.subr.bf16.mxu0 %v14157_v4 }
  0x23   :  { %623 = vmatmul.mubr.bf16.vlgmr.msra.gmra.mrb[0].mxu0 %v14096_v8  ;;  %13108 = vmatpush3.bf16.msra.mxu1 %v13716_v32 }
  0x24   :  { %632 = vmatprep.mubr.bf16.mxu0 %v14096_v8  ;;  %944 = vmatpush1.bf16.msra.mxu0 %v14162_v5 }
  0x25   :  { %945 = vmatprep.subr.bf16.mxu0 %v14176_v7  ;;  %13109 = vmatprep.subr.bf16.mxu1 %v18158_v23 }
  0x27   :  { %13110 = vmatpush3.bf16.msra.mxu1 %v13717_v33 }
  0x28   :  { %946 = vmatpush1.bf16.msra.mxu0 %v13691_v10  ;;  %13131 = vmatprep.subr.bf16.mxu1 %v18158_v23 }
  0x29   :  { %947 = vmatprep.subr.bf16.mxu0 %v13692_v11 }
  0x2a   :  { %13112 = vmatmul.mubr.bf16.vlgmr.msra.gmra.mrb[0].mxu1 %v14096_v8 }
  0x2b   :  { %13115 = vmatprep.mubr.msk.bf16.mxu1 %vm14098_vm0, %v18158_v23  ;;  %13132 = vmatpush3.bf16.msra.mxu1 %v13718_v44 }
  0x2c   :  { %948 = vmatpush1.bf16.msra.mxu0 %v13694_v14  ;;  %13133 = vmatprep.subr.bf16.mxu1 %v18158_v23 }
  0x2d   :  { %949 = vmatprep.subr.bf16.mxu0 %v13695_v15 }
  0x2f   :  { %13134 = vmatpush3.bf16.msra.mxu1 %v13719_v48 }
  0x30   :  { %950 = vmatpush1.bf16.msra.mxu0 %v13697_v16  ;;  %13135 = vmatprep.subr.bf16.mxu1 %v18158_v23 }
  0x31   :  { %951 = vmatprep.subr.bf16.mxu0 %v13698_v17 }
  0x33   :  { %13136 = vmatpush3.bf16.msra.mxu1 %v13720_v52 }
  0x34   :  { %952 = vmatpush1.bf16.msra.mxu0 %v13700_v18  ;;  %13137 = vmatprep.subr.bf16.mxu1 %v18158_v23 }
  0x35   :  { %953 = vmatprep.subr.bf16.mxu0 %v13701_v19 }
  0x37   :  { %13138 = vmatpush3.bf16.msra.mxu1 %v13721_v56 }
  0x38   :  { %954 = vmatpush1.bf16.msra.mxu0 %v13703_v21  ;;  %13139 = vmatprep.subr.bf16.mxu1 %v18158_v23 }
  0x39   :  { %955 = vmatprep.subr.bf16.mxu0 %v13704_v22 }
  0x3b   :  { %13140 = vmatpush3.bf16.msra.mxu1 %v13722_v59 }
  0x3c   :  { %956 = vmatpush1.bf16.msra.mxu0 %v13706_v25  ;;  %13141 = vmatprep.subr.bf16.mxu1 %v18158_v23 }
  0x3d   :  { %957 = vmatprep.subr.bf16.mxu0 %v13707_v26 }
  0x3f   :  { %13142 = vmatpush3.bf16.msra.mxu1 %v13723_v62 }
  0x40   :  { %958 = vmatpush1.bf16.msra.mxu0 %v13709_v28  ;;  %13143 = vmatprep.subr.bf16.mxu1 %v18158_v23 }
  0x41   :  { %1296 = vmatprep.subr.bf16.mxu0 %v14157_v4 }
  0x74   :  { %v69_v34 = vpop.permute.xlu0 %68  ;;  %v73_v35 = vpop.permute.xlu1 %72 }
  0x75   :  { %v14301_v36 = vmax.f32 %v14133_v0, %v69_v34  ;;  %v14309_v37 = vmax.f32 %v14138_v1, %v73_v35  ;;  %v13724_v0 = vld [vmem:[%s18149_s1 + $0x98] ss:$12 sps:$4 sm:$0xff]  }
  0x77   :  { %148 = vrot.lane.b32.xlu0 %v14301_v36, %s14099_s25 }
  0x78   :  { %v71_v38 = vpop.permute.xlu0 %70  ;;  %v75_v39 = vpop.permute.xlu1 %74 }
  0x79   :  { %v14314_v40 = vmax.f32 %v14147_v2, %v71_v38  ;;  %v14326_v42 = vmax.f32 %v14152_v3, %v75_v39 }
  0x7b   :  { %152 = vrot.lane.b32.xlu0 %v14309_v37, %s14099_s25  ;;  %150 = vrot.lane.b32.xlu1 %v14314_v40, %s14099_s25 }
  0x7c   :  { %v77_v43 = vpop.permute.xlu0 %76  ;;  %v79_v47 = vpop.permute.xlu1 %78 }
  0x7d   :  { %v14341_v46 = vmax.f32 %v14171_v6, %v77_v43  ;;  %v14357_v50 = vmax.f32 %v14198_v9, %v79_v47 }
  0x7f   :  { %154 = vrot.lane.b32.xlu0 %v14326_v42, %s14099_s25  ;;  %84 = vrot.lane.b32.xlu1 %v14319_v41, %s14095_s16 }
  0x80   :  { %v81_v51 = vpop.permute.xlu0 %80  ;;  %v83_v55 = vpop.permute.xlu1 %82 }
  0x81   :  { %v14373_v54 = vmax.f32 %v14217_v12, %v81_v51  ;;  %v14389_v58 = vmax.f32 %v14222_v13, %v83_v55 }
  0x83   :  { %86 = vrot.lane.b32.xlu1 %v14334_v45, %s14095_s16  ;;  %156 = vrot.lane.b32.xlu0 %v14341_v46, %s14099_s25 }
  0x87   :  { %88 = vrot.lane.b32.xlu1 %v14350_v49, %s14095_s16  ;;  %158 = vrot.lane.b32.xlu0 %v14357_v50, %s14099_s25 }
  0x8b   :  { %90 = vrot.lane.b32.xlu1 %v14366_v53, %s14095_s16  ;;  %160 = vrot.lane.b32.xlu0 %v14373_v54, %s14099_s25 }
  0x8f   :  { %92 = vrot.lane.b32.xlu1 %v14382_v57, %s14095_s16  ;;  %162 = vrot.lane.b32.xlu0 %v14389_v58, %s14099_s25 }
  0x93   :  { %94 = vrot.lane.b32.xlu1 %v14398_v60, %s14095_s16  ;;  %96 = vrot.lane.b32.xlu0 %v14403_v61, %s14095_s16 }
  0x97   :  { %98 = vrot.lane.b32.xlu1 %v14416_v63, %s14095_s16 }
  0x98   :  { %8 = vsyncpa [#allocation5], 0  ;;  %13144 = vmatpush3.bf16.msra.mxu1 %v13724_v0  ;;  %v13725_v1 = vld [vmem:[%s18149_s1 + $0xb0] ss:$12 sps:$4 sm:$0xff]   ;;  %vm212_vm1 = vcmask 31744   ;;  %vm374_vm2 = vcmask 28672  }
  0x99   :  { %13145 = vmatprep.subr.bf16.mxu1 %v18158_v23  ;;  %vm375_vm3 = vsmask.f32 4354  ;;  %v377_v15 = vld [vmem:[#allocation2 + $0x8] sm:$0x1f]  ;;  %v380_v29 = vld [vmem:[#allocation2 + $0x10] sm:$0x1f] }
  0x9a   :  { %vm14440_vm4 = vmand %vm374_vm2, %vm375_vm3  ;;  %v383_v30 = vld [vmem:[#allocation2 + $0x18] sm:$0x1f]  ;;  %vm1932_vm5 = vcmask 1046528   ;;  %vm2109_vm6 = vcmask 1045504   ;;  %s14100_s16 = smov 96   ;;  %s14101_s5 = smov 64  }
  0x9b   :  { %vm748_vm7 = vcmask 261120   ;;  %s14102_s22 = smov 32   ;;  %vm3352_vm8 = vcmask 520448   ;;  %vm6320_vm10 = vcmask 782848   ;;  %vm9288_vm12 = vcmask 1045248   ;;  %s14103_s15 = smov 4  }
  0x9c   :  { %13146 = vmatpush3.bf16.msra.mxu1 %v13725_v1  ;;  %vm15423_vm9 = vmand %vm3352_vm8, %vm375_vm3  ;;  %vm3159_vm14 = vcmask 293920   ;;  %vm6127_vm15 = vcmask 556320   ;;  %vm12063_vm2 = vcmask 1048352  }
  0x9d   :  { %13167 = vmatprep.subr.bf16.mxu1 %v18158_v23  ;;  %vm16282_vm11 = vmand %vm6320_vm10, %vm375_vm3 }
  0x9e   :  { %vm17158_vm13 = vmand %vm9288_vm12, %vm375_vm3 }
  0xe9   :  { %v149_v2 = vpop.permute.xlu0 %148 }
  0xea   :  { %v196_v3 = vmax.f32 %v14301_v36, %v149_v2 }
  0xec   :  { %213 = vst.msk [vmem:[#allocation4] sm:$0xff] %vm212_vm1, %v196_v3  ;;  %v229_v4 = vpack.c.bf16 %v196_v3, %v196_v3  ;;  %v389_v3 = vld [vmem:[#allocation2 + $0x28] sm:$0x1f] }
  0xed   :  { %v151_v5 = vpop.permute.xlu1 %150  ;;  %v153_v6 = vpop.permute.xlu0 %152 }
  0xee   :  { %v246_v7 = vshrl.u32 %v229_v4, 16  ;;  %v197_v8 = vmax.f32 %v14314_v40, %v151_v5  ;;  %v198_v9 = vmax.f32 %v14309_v37, %v153_v6  ;;  %v249_v11 = vshll.u32 %v229_v4, 16 }
  0xf0   :  { %v248_v10 = vrot.slane %v246_v7, 7  ;;  %214 = vst.msk [vmem:[#allocation4 + $0x10] sm:$0xff] %vm212_vm1, %v197_v8  ;;  %v230_v12 = vpack.c.bf16 %v197_v8, %v197_v8  ;;  %215 = vst.msk [vmem:[#allocation4 + $0x20] sm:$0xff] %vm212_vm1, %v198_v9  ;;  %v231_v13 = vpack.c.bf16 %v198_v9, %v198_v9  ;;  %v14476_v8 = vld [vmem:[#allocation2] sm:$0xff] }
  0xf1   :  { %v85_v16 = vpop.permute.xlu1 %84  ;;  %v155_v17 = vpop.permute.xlu0 %154 }
  0xf2   :  { %v251_v18 = vor.u32 %v249_v11, %v248_v10  ;;  %v253_v19 = vshrl.u32 %v230_v12, 16  ;;  %v260_v20 = vshrl.u32 %v231_v13, 16  ;;  %v256_v21 = vshll.u32 %v230_v12, 16 }
  0xf3   :  { %v14445_v22 = vmax.f32 %v14319_v41, %v85_v16  ;;  %v199_v24 = vmax.f32 %v14326_v42, %v155_v17  ;;  %v263_v28 = vshll.u32 %v231_v13, 16 }
  0xf4   :  { %v378_v25 = vsel %vm14440_vm4, %v251_v18, %v377_v15  ;;  %v255_v26 = vrot.slane %v253_v19, 7  ;;  %v262_v27 = vrot.slane %v260_v20, 7 }
  0xf5   :  { %379 = vst [vmem:[#allocation2 + $0x8] sm:$0x1f] %v378_v25  ;;  %216 = vst.msk [vmem:[#allocation4 + $0x30] sm:$0xff] %vm212_vm1, %v199_v24  ;;  %v232_v31 = vpack.c.bf16 %v199_v24, %v199_v24  ;;  %164 = vrot.lane.b32.xlu0 %v14445_v22, %s14099_s25  ;;  %v87_v32 = vpop.permute.xlu1 %86  ;;  %v157_v33 = vpop.permute.xlu0 %156 }
  0xf6   :  { %v258_v34 = vor.u32 %v256_v21, %v255_v26  ;;  %v265_v35 = vor.u32 %v263_v28, %v262_v27  ;;  %v14454_v36 = vmax.f32 %v14334_v45, %v87_v32  ;;  %v200_v37 = vmax.f32 %v14341_v46, %v157_v33  ;;  %v386_v46 = vld [vmem:[#allocation2 + $0x20] sm:$0x1f]  ;;  %v624_v52 = vpop.f32.mrb[0].mxu0 }
  0xf7   :  { %v267_v38 = vshrl.u32 %v232_v31, 16  ;;  %v270_v43 = vshll.u32 %v232_v31, 16  ;;  %746 = vst [vmem:[#allocation3] sm:$0xff] %v624_v52  ;;  %v626_v56 = vpop.f32.mrb[1].mxu0 }
  0xf8   :  { %v381_v39 = vsel %vm14440_vm4, %v258_v34, %v380_v29  ;;  %v384_v40 = vsel %vm14440_vm4, %v265_v35, %v383_v30  ;;  %217 = vst.msk [vmem:[#allocation4 + $0x40] sm:$0xff] %vm212_vm1, %v200_v37  ;;  %v233_v41 = vpack.c.bf16 %v200_v37, %v200_v37  ;;  %166 = vrot.lane.b32.xlu1 %v14454_v36, %s14099_s25  ;;  %v628_v2 = vpop.f32.mrb[2].mxu0  ;;  %v13726_v56 = vld [vmem:[%s18149_s1 + $0x8] ss:$12 sps:$4 sm:$0xff]  }
  0xf9   :  { %382 = vst [vmem:[#allocation2 + $0x10] sm:$0x1f] %v381_v39  ;;  %385 = vst [vmem:[#allocation2 + $0x18] sm:$0x1f] %v384_v40  ;;  %v269_v42 = vrot.slane %v267_v38, 7  ;;  %v89_v44 = vpop.permute.xlu1 %88  ;;  %v159_v45 = vpop.permute.xlu0 %158 }
  0xfa   :  { %v274_v47 = vshrl.u32 %v233_v41, 16  ;;  %v14465_v48 = vmax.f32 %v14350_v49, %v89_v44  ;;  %v201_v51 = vmax.f32 %v14357_v50, %v159_v45  ;;  %v277_v62 = vshll.u32 %v233_v41, 16  ;;  %750 = vst [vmem:[#allocation3 + $0x18] sm:$0xff] %v628_v2  ;;  %v630_v10 = vpop.f32.mrb[3].mxu0  ;;  %v14009_v2 = vld [vmem:[%s18149_s1 + $0x18] ss:$12 sps:$4 sm:$0xff]  }
  0xfb   :  { %v272_v55 = vor.u32 %v270_v43, %v269_v42  ;;  %v13730_v10 = vld [vmem:[%s18149_s1 + $0x68] ss:$12 sps:$4 sm:$0xff]  }
  0xfc   :  { %v276_v59 = vrot.slane %v274_v47, 7  ;;  %218 = vst.msk [vmem:[#allocation4 + $0x50] sm:$0xff] %vm212_vm1, %v201_v51  ;;  %v234_v0 = vpack.c.bf16 %v201_v51, %v201_v51  ;;  %168 = vrot.lane.b32.xlu0 %v14465_v48, %s14099_s25  ;;  %v426_v1 = vld [vmem:[#allocation2 + $0x8] sm:$0xff] }
  0xfd   :  { %v387_v49 = vsel %vm14440_vm4, %v272_v55, %v386_v46  ;;  %v91_v4 = vpop.permute.xlu1 %90  ;;  %v161_v50 = vpop.permute.xlu0 %160  ;;  %633 = vmatmul.mubr.bf16.gmra.mrb[4].mxu0 %v426_v1  ;;  %13116 = vmatmul.mubr.bf16.gmra.mrb[4].mxu1 %v426_v1  ;;  %v14008_v1 = vld [vmem:[%s18149_s1 + $0x1c] ss:$12 sps:$4 sm:$0xff]  }
  0xfe   :  { %388 = vst [vmem:[#allocation2 + $0x20] sm:$0x1f] %v387_v49  ;;  %v279_v5 = vor.u32 %v277_v62, %v276_v59  ;;  %v281_v6 = vshrl.u32 %v234_v0, 16  ;;  %v14474_v7 = vmax.f32 %v14366_v53, %v91_v4  ;;  %642 = vmatprep.mubr.bf16.mxu0 %v14476_v8  ;;  %13119 = vmatprep.mubr.msk.bf16.mxu1 %vm14098_vm0, %v18158_v23  ;;  %v284_v13 = vshll.u32 %v234_v0, 16  ;;  %v392_v53 = vld [vmem:[#allocation2 + $0x30] sm:$0x1f] }
  0xff   :  { %v202_v9 = vmax.f32 %v14373_v54, %v161_v50  ;;  %v1868_v20 = vld [vmem:[#allocation3] sm:$0xfe]  ;;  %v14011_v50 = vld [vmem:[%s18149_s1 + $0x30] ss:$12 sps:$4 sm:$0xff]  }
 0x100   :  { %v390_v11 = vsel %vm14440_vm4, %v279_v5, %v389_v3  ;;  %v283_v12 = vrot.slane %v281_v6, 7  ;;  %170 = vrot.lane.b32.xlu1 %v14474_v7, %s14099_s25  ;;  %v427_v26 = vld [vmem:[#allocation2 + $0x10] sm:$0xff]  ;;  %v2045_v37 = vld [vmem:[#allocation3] sm:$0xfc]  ;;  %v428_v52 = vld [vmem:[#allocation2 + $0x18] sm:$0xff] }
 0x101   :  { %391 = vst [vmem:[#allocation2 + $0x28] sm:$0x1f] %v390_v11  ;;  %219 = vst.msk [vmem:[#allocation4 + $0x60] sm:$0xff] %vm212_vm1, %v202_v9  ;;  %v235_v15 = vpack.c.bf16 %v202_v9, %v202_v9  ;;  %v93_v16 = vpop.permute.xlu1 %92  ;;  %v163_v17 = vpop.permute.xlu0 %162  ;;  %v1869_v27 = vld [vmem:[#allocation3 + $0x18] sm:$0x1]  ;;  %v2110_v44 = vrot.slane %v2045_v37, 2 }
 0x102   :  { %v286_v18 = vor.u32 %v284_v13, %v283_v12  ;;  %v14488_v19 = vmax.f32 %v14382_v57, %v93_v16  ;;  %v203_v54 = vmax.f32 %v14389_v58, %v163_v17  ;;  %v395_v57 = vld [vmem:[#allocation2 + $0x38] sm:$0x1f]  ;;  %v1933_v58 = vrot.slane %v1868_v20, 1  ;;  %v14007_v62 = vld [vmem:[%s18149_s1] ss:$12 sps:$4 sm:$0xff]  }
 0x103   :  { %v288_v21 = vshrl.u32 %v235_v15, 16  ;;  %v291_v29 = vshll.u32 %v235_v15, 16  ;;  %v1934_v32 = vrot.slane %v1869_v27, 1  ;;  %v2046_v38 = vld [vmem:[#allocation3 + $0x18] sm:$0x3] }
 0x104   :  { %v393_v24 = vsel %vm14440_vm4, %v286_v18, %v392_v53  ;;  %220 = vst.msk [vmem:[#allocation4 + $0x70] sm:$0xff] %vm212_vm1, %v203_v54  ;;  %v236_v25 = vpack.c.bf16 %v203_v54, %v203_v54  ;;  %172 = vrot.lane.b32.xlu0 %v14488_v19, %s14099_s25  ;;  %v2111_v45 = vrot.slane %v2046_v38, 2  ;;  %v13727_v0 = vld [vmem:[%s18149_s1 + $0x20] ss:$12 sps:$4 sm:$0xff]   ;;  %v13728_v49 = vld [vmem:[%s18149_s1 + $0x38] ss:$12 sps:$4 sm:$0xff]  }
 0x105   :  { %394 = vst [vmem:[#allocation2 + $0x30] sm:$0x1f] %v393_v24  ;;  %v290_v28 = vrot.slane %v288_v21, 7  ;;  %v95_v30 = vpop.permute.xlu1 %94  ;;  %v97_v31 = vpop.permute.xlu0 %96  ;;  %643 = vmatmul.mubr.bf16.gmra.mrb[8].mxu0 %v427_v26  ;;  %13120 = vmatmul.mubr.bf16.gmra.mrb[8].mxu1 %v427_v26  ;;  %v1935_v43 = vsel %vm1932_vm5, %v1933_v58, %v1934_v32  ;;  %v14010_v4 = vld [vmem:[%s18149_s1 + $0x34] ss:$12 sps:$4 sm:$0xff]  }
 0x106   :  { %v295_v33 = vshrl.u32 %v236_v25, 16  ;;  %v14497_v34 = vmax.f32 %v14398_v60, %v95_v30  ;;  %v14500_v35 = vmax.f32 %v14403_v61, %v97_v31  ;;  %652 = vmatprep.mubr.bf16.mxu0 %v14476_v8  ;;  %13123 = vmatprep.mubr.msk.bf16.mxu1 %vm14098_vm0, %v18158_v23  ;;  %v298_v41 = vshll.u32 %v236_v25, 16  ;;  %v398_v61 = vld [vmem:[#allocation2 + $0x40] sm:$0x1f]  ;;  %v13729_v5 = vld [vmem:[%s18149_s1 + $0x50] ss:$12 sps:$4 sm:$0xff]  }
 0x107   :  { %v293_v39 = vor.u32 %v291_v29, %v290_v28  ;;  %v2112_v55 = vsel %vm2109_vm6, %v2110_v44, %v2111_v45  ;;  %v14012_v6 = vld [vmem:[%s18149_s1 + $0x4c] ss:$12 sps:$4 sm:$0xff]   ;;  %v14013_v9 = vld [vmem:[%s18149_s1 + $0x48] ss:$12 sps:$4 sm:$0xff]   ;;  %v14014_v12 = vld [vmem:[%s18149_s1 + $0x64] ss:$12 sps:$4 sm:$0xff]  }
 0x108   :  { %v297_v40 = vrot.slane %v295_v33, 7  ;;  %174 = vrot.lane.b32.xlu1 %v14497_v34, %s14099_s25  ;;  %176 = vrot.lane.b32.xlu0 %v14500_v35, %s14099_s25  ;;  %v778_v59 = vld [vmem:[#allocation2 + $0x28] sm:$0xff]  ;;  %v14017_v16 = vld [vmem:[%s18149_s1 + $0x78] ss:$12 sps:$4 sm:$0xff]   ;;  %v14018_v54 = vld [vmem:[%s18149_s1 + $0x94] ss:$12 sps:$4 sm:$0xff]  }
 0x109   :  { %v396_v60 = vsel %vm14440_vm4, %v293_v39, %v395_v57  ;;  %v99_v42 = vpop.permute.xlu1 %98  ;;  %v14015_v13 = vld [vmem:[%s18149_s1 + $0x60] ss:$12 sps:$4 sm:$0xff]   ;;  %v14016_v15 = vld [vmem:[%s18149_s1 + $0x7c] ss:$12 sps:$4 sm:$0xff]   ;;  %v13732_v17 = vld [vmem:[%s18149_s1 + $0x98] ss:$12 sps:$4 sm:$0xff]  }
 0x10a   :  { %397 = vst [vmem:[#allocation2 + $0x38] sm:$0x1f] %v396_v60  ;;  %v300_v46 = vor.u32 %v298_v41, %v297_v40  ;;  %v14513_v47 = vmax.f32 %v14416_v63, %v99_v42  ;;  %v429_v63 = vld [vmem:[#allocation2 + $0x20] sm:$0xff]  ;;  %v14019_v20 = vld [vmem:[%s18149_s1 + $0x90] ss:$12 sps:$4 sm:$0xff]   ;;  %v707_v58 = vpop.f32.mrb[0].mxu1 }
 0x10b   :  { %v13731_v53 = vld [vmem:[%s18149_s1 + $0x80] ss:$12 sps:$4 sm:$0xff]   ;;  %v13733_v21 = vld [vmem:[%s18149_s1 + $0xb0] ss:$12 sps:$4 sm:$0xff]   ;;  %v14021_v26 = vld [vmem:[%s18149_s1 + $0xa8] ss:$12 sps:$4 sm:$0xff]  }
 0x10c   :  { %v399_v51 = vsel %vm14440_vm4, %v300_v46, %v398_v61  ;;  %178 = vrot.lane.b32.xlu1 %v14513_v47, %s14099_s25  ;;  %1981 = vrot.lane.b32.xlu0 %v1935_v43, %s14100_s16  ;;  %v779_v3 = vld [vmem:[#allocation2 + $0x30] sm:$0xff]  ;;  %v14020_v24 = vld [vmem:[%s18149_s1 + $0xac] ss:$12 sps:$4 sm:$0xff]   ;;  %v13740_v29 = vld [vmem:[%s18149_s1 + $0x1c] ss:$12 sps:$4 sm:$0xff]   ;;  %v13113_v32 = vpop.f32.mrb[1].mxu1 }
 0x10d   :  { %400 = vst [vmem:[#allocation2 + $0x40] sm:$0x1f] %v399_v51  ;;  %653 = vmatmul.mubr.bf16.gmra.mrb[12].mxu0 %v428_v52  ;;  %13124 = vmatmul.mubr.bf16.gmra.mrb[12].mxu1 %v428_v52  ;;  %v13736_v25 = vld [vmem:[%s18149_s1 + $0x4] ss:$12 sps:$4 sm:$0xff]   ;;  %v13734_v27 = vld [vmem:[%s18149_s1] ss:$12 sps:$4 sm:$0xff]  }
 0x10e   :  { %662 = vmatprep.mubr.bf16.mxu0 %v14476_v8  ;;  %13127 = vmatprep.mubr.msk.bf16.mxu1 %vm14098_vm0, %v18158_v23  ;;  %v13737_v28 = vld [vmem:[%s18149_s1 + $0x8] ss:$12 sps:$4 sm:$0xff]   ;;  %v13738_v57 = vld [vmem:[%s18149_s1 + $0x18] ss:$12 sps:$4 sm:$0xff]   ;;  %v13741_v30 = vld [vmem:[%s18149_s1 + $0x20] ss:$12 sps:$4 sm:$0xff]  }
 0x10f   :  { %v13744_v31 = vld [vmem:[%s18149_s1 + $0x34] ss:$12 sps:$4 sm:$0xff]   ;;  %v13742_v33 = vld [vmem:[%s18149_s1 + $0x30] ss:$12 sps:$4 sm:$0xff]   ;;  %v13745_v37 = vld [vmem:[%s18149_s1 + $0x38] ss:$12 sps:$4 sm:$0xff]  }
 0x110   :  { %2158 = vrot.lane.b32.xlu1 %v2112_v55, %s14101_s5  ;;  %v710_v38 = vpop.f32.mrb[2].mxu1  ;;  %v13748_v39 = vld [vmem:[%s18149_s1 + $0x4c] ss:$12 sps:$4 sm:$0xff]   ;;  %v13746_v41 = vld [vmem:[%s18149_s1 + $0x48] ss:$12 sps:$4 sm:$0xff]   ;;  %s14104_s25 = smov 36  }
 0x111   :  { %v780_v11 = vld [vmem:[#allocation2 + $0x38] sm:$0xff]  ;;  %v13114_v40 = vpop.f32.mrb[3].mxu1  ;;  %v13752_v61 = vld [vmem:[%s18149_s1 + $0x64] ss:$12 sps:$4 sm:$0xff]   ;;  %v13750_v42 = vld [vmem:[%s18149_s1 + $0x60] ss:$12 sps:$4 sm:$0xff]  }
 0x112   :  { %v13749_v60 = vld [vmem:[%s18149_s1 + $0x50] ss:$12 sps:$4 sm:$0xff]   ;;  %v13753_v43 = vld [vmem:[%s18149_s1 + $0x68] ss:$12 sps:$4 sm:$0xff]   ;;  %v13754_v45 = vld [vmem:[%s18149_s1 + $0x78] ss:$12 sps:$4 sm:$0xff]  }
 0x113   :  { %v13756_v44 = vld [vmem:[%s18149_s1 + $0x7c] ss:$12 sps:$4 sm:$0xff]   ;;  %v13757_v46 = vld [vmem:[%s18149_s1 + $0x80] ss:$12 sps:$4 sm:$0xff]   ;;  %v13761_v55 = vld [vmem:[%s18149_s1 + $0x98] ss:$12 sps:$4 sm:$0xff]  }
 0x114   :  { %v781_v18 = vld [vmem:[#allocation2 + $0x40] sm:$0xff]  ;;  %v13758_v52 = vld [vmem:[%s18149_s1 + $0x90] ss:$12 sps:$4 sm:$0xff]  }
 0x115   :  { %663 = vmatmul.mubr.bf16.gmra.mrb[16].mxu0 %v429_v63  ;;  %13128 = vmatmul.mubr.bf16.gmra.mrb[16].mxu1 %v429_v63  ;;  %v13760_v51 = vld [vmem:[%s18149_s1 + $0x94] ss:$12 sps:$4 sm:$0xff]   ;;  %v13764_v63 = vld [vmem:[%s18149_s1 + $0xac] ss:$12 sps:$4 sm:$0xff]  }
 0x116   :  { %975 = vmatprep.mubr.bf16.mxu0 %v14476_v8  ;;  %13147 = vmatprep.mubr.msk.bf16.mxu1 %vm14098_vm0, %v18158_v23  ;;  %v410_v58 = vld [vmem:[#allocation2 + $0x70] sm:$0x1f] }
 0x11d   :  { %976 = vmatmul.mubr.bf16.vlgmr.msra.gmra.mrb[20].mxu0 %v778_v59  ;;  %13148 = vmatmul.mubr.bf16.vlgmr.msra.gmra.mrb[20].mxu1 %v778_v59  ;;  %v13765_v59 = vld [vmem:[%s18149_s1 + $0xb0] ss:$12 sps:$4 sm:$0xff]  }
 0x11e   :  { %985 = vmatprep.mubr.bf16.mxu0 %v14476_v8  ;;  %13151 = vmatprep.mubr.msk.bf16.mxu1 %vm14098_vm0, %v18158_v23 }
 0x11f   :  { %1297 = vmatpush1.bf16.msra.mxu0 %v14007_v62  ;;  %13168 = vmatpush3.bf16.msra.mxu1 %v13726_v56  ;;  %v13762_v56 = vld [vmem:[%s18149_s1 + $0xa8] ss:$12 sps:$4 sm:$0xff]  }
 0x120   :  { %1298 = vmatprep.subr.bf16.mxu0 %v14008_v1  ;;  %13169 = vmatprep.subr.bf16.mxu1 %v18158_v23 }
 0x123   :  { %1299 = vmatpush1.bf16.msra.mxu0 %v14009_v2  ;;  %13170 = vmatpush3.bf16.msra.mxu1 %v13727_v0 }
 0x124   :  { %1300 = vmatprep.subr.bf16.mxu0 %v14010_v4  ;;  %13171 = vmatprep.subr.bf16.mxu1 %v18158_v23 }
 0x125   :  { %986 = vmatmul.mubr.bf16.gmra.mrb[24].mxu0 %v779_v3  ;;  %13152 = vmatmul.mubr.bf16.gmra.mrb[24].mxu1 %v779_v3 }
 0x126   :  { %995 = vmatprep.mubr.bf16.mxu0 %v14476_v8  ;;  %13155 = vmatprep.mubr.msk.bf16.mxu1 %vm14098_vm0, %v18158_v23 }
 0x127   :  { %1301 = vmatpush1.bf16.msra.mxu0 %v14011_v50  ;;  %13172 = vmatpush3.bf16.msra.mxu1 %v13728_v49 }
 0x128   :  { %1302 = vmatprep.subr.bf16.mxu0 %v14012_v6  ;;  %13173 = vmatprep.subr.bf16.mxu1 %v18158_v23 }
 0x12b   :  { %1303 = vmatpush1.bf16.msra.mxu0 %v14013_v9  ;;  %13174 = vmatpush3.bf16.msra.mxu1 %v13729_v5  ;;  %v401_v9 = vld [vmem:[#allocation2 + $0x58] sm:$0x1f] }
 0x12c   :  { %1304 = vmatprep.subr.bf16.mxu0 %v14014_v12  ;;  %13175 = vmatprep.subr.bf16.mxu1 %v18158_v23 }
 0x12d   :  { %996 = vmatmul.mubr.bf16.gmra.mrb[28].mxu0 %v780_v11  ;;  %13156 = vmatmul.mubr.bf16.gmra.mrb[28].mxu1 %v780_v11 }
 0x12e   :  { %1005 = vmatprep.mubr.bf16.mxu0 %v14476_v8  ;;  %13159 = vmatprep.mubr.msk.bf16.mxu1 %vm14098_vm0, %v18158_v23 }
 0x12f   :  { %1305 = vmatpush1.bf16.msra.mxu0 %v14015_v13  ;;  %13176 = vmatpush3.bf16.msra.mxu1 %v13730_v10 }
 0x130   :  { %1306 = vmatprep.subr.bf16.mxu0 %v14016_v15  ;;  %13177 = vmatprep.subr.bf16.mxu1 %v18158_v23  ;;  %v404_v15 = vld [vmem:[#allocation2 + $0x60] sm:$0x1f] }
 0x133   :  { %1307 = vmatpush1.bf16.msra.mxu0 %v14017_v16  ;;  %13178 = vmatpush3.bf16.msra.mxu1 %v13731_v53 }
 0x134   :  { %1308 = vmatprep.subr.bf16.mxu0 %v14018_v54  ;;  %13179 = vmatprep.subr.bf16.mxu1 %v18158_v23 }
 0x135   :  { %1006 = vmatmul.mubr.bf16.gmra.mrb[32].mxu0 %v781_v18  ;;  %13160 = vmatmul.mubr.bf16.gmra.mrb[32].mxu1 %v781_v18 }
 0x136   :  { %1015 = vmatprep.mubr.bf16.mxu0 %v14476_v8  ;;  %13163 = vmatprep.mubr.msk.bf16.mxu1 %vm14098_vm0, %v18158_v23 }
 0x137   :  { %1309 = vmatpush1.bf16.msra.mxu0 %v14019_v20  ;;  %13180 = vmatpush3.bf16.msra.mxu1 %v13732_v17 }
 0x138   :  { %1310 = vmatprep.subr.bf16.mxu0 %v14020_v24  ;;  %13181 = vmatprep.subr.bf16.mxu1 %v18158_v23 }
 0x13b   :  { %1311 = vmatpush1.bf16.msra.mxu0 %v14021_v26  ;;  %13182 = vmatpush3.bf16.msra.mxu1 %v13733_v21 }
 0x13c   :  { %1649 = vmatprep.subr.bf16.mxu0 %v13736_v25  ;;  %13203 = vmatprep.subr.bf16.mxu1 %v18158_v23  ;;  %v407_v25 = vld [vmem:[#allocation2 + $0x68] sm:$0x1f] }
 0x13d   :  { %1016 = vmatmul.mubr.bf16.gmra.mrb[36].mxu0 %v14476_v8  ;;  %13164 = vmatmul.mubr.bf16.gmra.mrb[36].mxu1 %v14476_v8 }
 0x13e   :  { %1328 = vmatprep.mubr.bf16.mxu0 %v14476_v8  ;;  %13183 = vmatprep.mubr.msk.bf16.mxu1 %vm14098_vm0, %v18158_v23 }
 0x145   :  { %1329 = vmatmul.mubr.bf16.vlgmr.msra.gmra.mrb[40].mxu0 %v14476_v8  ;;  %13184 = vmatmul.mubr.bf16.vlgmr.msra.gmra.mrb[40].mxu1 %v14476_v8 }
 0x146   :  { %1338 = vmatprep.mubr.bf16.mxu0 %v14476_v8  ;;  %13187 = vmatprep.mubr.msk.bf16.mxu1 %vm14098_vm0, %v18158_v23 }
 0x147   :  { %1650 = vmatpush1.bf16.msra.mxu0 %v13734_v27  ;;  %13204 = vmatpush3.bf16.msra.mxu1 %v13737_v28 }
 0x148   :  { %1651 = vmatprep.subr.bf16.mxu0 %v13740_v29  ;;  %13205 = vmatprep.subr.bf16.mxu1 %v18158_v23 }
 0x14b   :  { %1652 = vmatpush1.bf16.msra.mxu0 %v13738_v57  ;;  %13206 = vmatpush3.bf16.msra.mxu1 %v13741_v30 }
 0x14c   :  { %1653 = vmatprep.subr.bf16.mxu0 %v13744_v31  ;;  %13207 = vmatprep.subr.bf16.mxu1 %v18158_v23 }
 0x14f   :  { %1654 = vmatpush1.bf16.msra.mxu0 %v13742_v33  ;;  %13208 = vmatpush3.bf16.msra.mxu1 %v13745_v37 }
 0x150   :  { %1655 = vmatprep.subr.bf16.mxu0 %v13748_v39  ;;  %13209 = vmatprep.subr.bf16.mxu1 %v18158_v23 }
 0x153   :  { %1656 = vmatpush1.bf16.msra.mxu0 %v13746_v41  ;;  %13210 = vmatpush3.bf16.msra.mxu1 %v13749_v60 }
 0x154   :  { %1657 = vmatprep.subr.bf16.mxu0 %v13752_v61  ;;  %13211 = vmatprep.subr.bf16.mxu1 %v18158_v23 }
 0x157   :  { %1658 = vmatpush1.bf16.msra.mxu0 %v13750_v42  ;;  %13212 = vmatpush3.bf16.msra.mxu1 %v13753_v43  ;;  %v413_v43 = vld [vmem:[#allocation2 + $0x78] sm:$0x1f] }
 0x158   :  { %1659 = vmatprep.subr.bf16.mxu0 %v13756_v44  ;;  %13213 = vmatprep.subr.bf16.mxu1 %v18158_v23 }
 0x15b   :  { %1660 = vmatpush1.bf16.msra.mxu0 %v13754_v45  ;;  %13214 = vmatpush3.bf16.msra.mxu1 %v13757_v46 }
 0x15c   :  { %1661 = vmatprep.subr.bf16.mxu0 %v13760_v51  ;;  %13215 = vmatprep.subr.bf16.mxu1 %v18158_v23 }
 0x15f   :  { %1662 = vmatpush1.bf16.msra.mxu0 %v13758_v52  ;;  %13216 = vmatpush3.bf16.msra.mxu1 %v13761_v55 }
 0x160   :  { %1663 = vmatprep.subr.bf16.mxu0 %v13764_v63  ;;  %13217 = vmatprep.subr.bf16.mxu1 %v18158_v23 }
 0x163   :  { %1664 = vmatpush1.bf16.msra.mxu0 %v13762_v56  ;;  %13218 = vmatpush3.bf16.msra.mxu1 %v13765_v59  ;;  %v416_v59 = vld [vmem:[#allocation2 + $0x80] sm:$0x1f] }
 0x164   :  { %13239 = vmatprep.subr.bf16.mxu1 %v18158_v23 }
 0x167   :  { %v165_v62 = vpop.permute.xlu0 %164 }
 0x168   :  { %v204_v0 = vmax.f32 %v14445_v22, %v165_v62 }
 0x16a   :  { %221 = vst.msk [vmem:[#allocation4 + $0x80] sm:$0xff] %vm212_vm1, %v204_v0  ;;  %v237_v1 = vpack.c.bf16 %v204_v0, %v204_v0  ;;  %v167_v2 = vpop.permute.xlu1 %166 }
 0x16b   :  { %v205_v49 = vmax.f32 %v14454_v36, %v167_v2 }
 0x16c   :  { %v302_v3 = vshrl.u32 %v237_v1, 16  ;;  %v305_v5 = vshll.u32 %v237_v1, 16 }
 0x16d   :  { %222 = vst.msk [vmem:[#allocation4 + $0x90] sm:$0xff] %vm212_vm1, %v205_v49  ;;  %v238_v4 = vpack.c.bf16 %v205_v49, %v205_v49  ;;  %v419_v49 = vld [vmem:[#allocation2 + $0x88] sm:$0x1f] }
 0x16e   :  { %v304_v50 = vrot.slane %v302_v3, 7  ;;  %v169_v6 = vpop.permute.xlu0 %168 }
 0x16f   :  { %v309_v10 = vshrl.u32 %v238_v4, 16  ;;  %v206_v11 = vmax.f32 %v14465_v48, %v169_v6  ;;  %v312_v22 = vshll.u32 %v238_v4, 16 }
 0x170   :  { %v307_v12 = vor.u32 %v305_v5, %v304_v50 }
 0x171   :  { %v311_v13 = vrot.slane %v309_v10, 7  ;;  %223 = vst.msk [vmem:[#allocation4 + $0xa0] sm:$0xff] %vm212_vm1, %v206_v11  ;;  %v239_v53 = vpack.c.bf16 %v206_v11, %v206_v11 }
 0x172   :  { %v402_v36 = vsel %vm14440_vm4, %v307_v12, %v401_v9  ;;  %v171_v16 = vpop.permute.xlu1 %170  ;;  %v422_v9 = vld [vmem:[#allocation2 + $0x90] sm:$0x1f] }
 0x173   :  { %403 = vst [vmem:[#allocation2 + $0x58] sm:$0x1f] %v402_v36  ;;  %v314_v17 = vor.u32 %v312_v22, %v311_v13  ;;  %v316_v18 = vshrl.u32 %v239_v53, 16  ;;  %v207_v54 = vmax.f32 %v14474_v7, %v171_v16  ;;  %v319_v21 = vshll.u32 %v239_v53, 16 }
 0x175   :  { %v405_v20 = vsel %vm14440_vm4, %v314_v17, %v404_v15  ;;  %v318_v48 = vrot.slane %v316_v18, 7  ;;  %224 = vst.msk [vmem:[#allocation4 + $0xb0] sm:$0xff] %vm212_vm1, %v207_v54  ;;  %v240_v24 = vpack.c.bf16 %v207_v54, %v207_v54 }
 0x176   :  { %406 = vst [vmem:[#allocation2 + $0x60] sm:$0x1f] %v405_v20  ;;  %v173_v26 = vpop.permute.xlu0 %172 }
 0x177   :  { %v321_v27 = vor.u32 %v319_v21, %v318_v48  ;;  %v323_v28 = vshrl.u32 %v240_v24, 16  ;;  %v208_v29 = vmax.f32 %v14488_v19, %v173_v26  ;;  %v326_v7 = vshll.u32 %v240_v24, 16 }
 0x179   :  { %v408_v57 = vsel %vm14440_vm4, %v321_v27, %v407_v25  ;;  %v325_v30 = vrot.slane %v323_v28, 7  ;;  %225 = vst.msk [vmem:[#allocation4 + $0xc0] sm:$0xff] %vm212_vm1, %v208_v29  ;;  %v241_v31 = vpack.c.bf16 %v208_v29, %v208_v29 }
 0x17a   :  { %409 = vst [vmem:[#allocation2 + $0x68] sm:$0x1f] %v408_v57  ;;  %v175_v32 = vpop.permute.xlu1 %174  ;;  %v177_v33 = vpop.permute.xlu0 %176  ;;  %v1132_v37 = vld [vmem:[#allocation2 + $0x58] sm:$0xff] }
 0x17b   :  { %v328_v38 = vor.u32 %v326_v7, %v325_v30  ;;  %v330_v39 = vshrl.u32 %v241_v31, 16  ;;  %v209_v40 = vmax.f32 %v14497_v34, %v175_v32  ;;  %1339 = vmatmul.mubr.bf16.gmra.mrb[44].mxu0 %v1132_v37  ;;  %13188 = vmatmul.mubr.bf16.gmra.mrb[44].mxu1 %v1132_v37  ;;  %v210_v19 = vmax.f32 %v14500_v35, %v177_v33 }
 0x17c   :  { %1348 = vmatprep.mubr.bf16.mxu0 %v14476_v8  ;;  %13191 = vmatprep.mubr.msk.bf16.mxu1 %vm14098_vm0, %v18158_v23  ;;  %v333_v61 = vshll.u32 %v241_v31, 16 }
 0x17d   :  { %v411_v41 = vsel %vm14440_vm4, %v328_v38, %v410_v58  ;;  %v332_v60 = vrot.slane %v330_v39, 7  ;;  %226 = vst.msk [vmem:[#allocation4 + $0xd0] sm:$0xff] %vm212_vm1, %v209_v40  ;;  %v242_v42 = vpack.c.bf16 %v209_v40, %v209_v40  ;;  %227 = vst.msk [vmem:[#allocation4 + $0xe0] sm:$0xff] %vm212_vm1, %v210_v19  ;;  %v243_v34 = vpack.c.bf16 %v210_v19, %v210_v19  ;;  %v1133_v1 = vld [vmem:[#allocation2 + $0x60] sm:$0xff] }
 0x17e   :  { %412 = vst [vmem:[#allocation2 + $0x70] sm:$0x1f] %v411_v41  ;;  %v179_v44 = vpop.permute.xlu1 %178 }
 0x17f   :  { %v335_v35 = vor.u32 %v333_v61, %v332_v60  ;;  %v337_v45 = vshrl.u32 %v242_v42, 16  ;;  %v211_v46 = vmax.f32 %v14513_v47, %v179_v44  ;;  %v344_v51 = vshrl.u32 %v243_v34, 16 }
 0x180   :  { %v340_v63 = vshll.u32 %v242_v42, 16  ;;  %v347_v0 = vshll.u32 %v243_v34, 16 }
 0x181   :  { %v414_v52 = vsel %vm14440_vm4, %v335_v35, %v413_v43  ;;  %v339_v55 = vrot.slane %v337_v45, 7  ;;  %228 = vst.msk [vmem:[#allocation4 + $0xf0] sm:$0xff] %vm212_vm1, %v211_v46  ;;  %v244_v56 = vpack.c.bf16 %v211_v46, %v211_v46  ;;  %v346_v62 = vrot.slane %v344_v51, 7  ;;  %v1134_v12 = vld [vmem:[#allocation2 + $0x68] sm:$0xff] }
 0x182   :  { %415 = vst [vmem:[#allocation2 + $0x78] sm:$0x1f] %v414_v52 }
 0x183   :  { %v342_v2 = vor.u32 %v340_v63, %v339_v55  ;;  %v351_v3 = vshrl.u32 %v244_v56, 16  ;;  %1349 = vmatmul.mubr.bf16.gmra.mrb[48].mxu0 %v1133_v1  ;;  %13192 = vmatmul.mubr.bf16.gmra.mrb[48].mxu1 %v1133_v1  ;;  %v349_v47 = vor.u32 %v347_v0, %v346_v62  ;;  %v354_v5 = vshll.u32 %v244_v56, 16 }
 0x184   :  { %1358 = vmatprep.mubr.bf16.mxu0 %v14476_v8  ;;  %13195 = vmatprep.mubr.msk.bf16.mxu1 %vm14098_vm0, %v18158_v23 }
 0x185   :  { %v417_v4 = vsel %vm14440_vm4, %v342_v2, %v416_v59  ;;  %v353_v50 = vrot.slane %v351_v3, 7  ;;  %v420_v6 = vsel %vm14440_vm4, %v349_v47, %v419_v49  ;;  %v1135_v13 = vld [vmem:[#allocation2 + $0x70] sm:$0xff] }
 0x186   :  { %418 = vst [vmem:[#allocation2 + $0x80] sm:$0x1f] %v417_v4  ;;  %421 = vst [vmem:[#allocation2 + $0x88] sm:$0x1f] %v420_v6 }
 0x187   :  { %v356_v10 = vor.u32 %v354_v5, %v353_v50 }
 0x189   :  { %v423_v11 = vsel %vm14440_vm4, %v356_v10, %v422_v9  ;;  %v1484_v22 = vld [vmem:[#allocation2 + $0x78] sm:$0xff] }
 0x18a   :  { %424 = vst [vmem:[#allocation2 + $0x90] sm:$0x1f] %v423_v11 }
 0x18b   :  { %1359 = vmatmul.mubr.bf16.gmra.mrb[52].mxu0 %v1134_v12  ;;  %13196 = vmatmul.mubr.bf16.gmra.mrb[52].mxu1 %v1134_v12 }
 0x18c   :  { %1368 = vmatprep.mubr.bf16.mxu0 %v14476_v8  ;;  %13199 = vmatprep.mubr.msk.bf16.mxu1 %vm14098_vm0, %v18158_v23 }
 0x18d   :  { %v1485_v14 = vld [vmem:[#allocation2 + $0x80] sm:$0xff]  ;;  %v1486_v53 = vld [vmem:[#allocation2 + $0x88] sm:$0xff] }
 0x191   :  { %v1487_v36 = vld [vmem:[#allocation2 + $0x90] sm:$0xff] }
 0x193   :  { %1369 = vmatmul.mubr.bf16.gmra.mrb[56].mxu0 %v1135_v13  ;;  %13200 = vmatmul.mubr.bf16.gmra.mrb[56].mxu1 %v1135_v13 }
 0x194   :  { %1681 = vmatprep.mubr.bf16.mxu0 %v14476_v8  ;;  %13219 = vmatprep.mubr.msk.bf16.mxu1 %vm14098_vm0, %v18158_v23 }
 0x19b   :  { %1682 = vmatmul.mubr.bf16.vlgmr.msra.gmra.mrb[60].mxu0 %v1484_v22  ;;  %13220 = vmatmul.mubr.bf16.vlgmr.msra.gmra.mrb[60].mxu1 %v1484_v22 }
 0x19c   :  { %1691 = vmatprep.mubr.bf16.mxu0 %v14476_v8  ;;  %13223 = vmatprep.mubr.msk.bf16.mxu1 %vm14098_vm0, %v18158_v23 }
 0x1a3   :  { %1692 = vmatmul.mubr.bf16.gmra.mrb[64].mxu0 %v1485_v14  ;;  %13224 = vmatmul.mubr.bf16.gmra.mrb[64].mxu1 %v1485_v14 }
 0x1a4   :  { %1701 = vmatprep.mubr.bf16.mxu0 %v14476_v8  ;;  %13227 = vmatprep.mubr.msk.bf16.mxu1 %vm14098_vm0, %v18158_v23 }
 0x1ab   :  { %1702 = vmatmul.mubr.bf16.gmra.mrb[68].mxu0 %v1486_v53  ;;  %13228 = vmatmul.mubr.bf16.gmra.mrb[68].mxu1 %v1486_v53 }
 0x1ac   :  { %1711 = vmatprep.mubr.bf16.mxu0 %v14476_v8  ;;  %13231 = vmatprep.mubr.msk.bf16.mxu1 %vm14098_vm0, %v18158_v23 }
 0x1b3   :  { %1712 = vmatmul.mubr.bf16.gmra.mrb[72].mxu0 %v1487_v36  ;;  %13232 = vmatmul.mubr.bf16.gmra.mrb[72].mxu1 %v1487_v36 }
 0x1b4   :  { %1721 = vmatprep.mubr.bf16.mxu0 %v14476_v8  ;;  %13235 = vmatprep.mubr.msk.bf16.mxu1 %vm14098_vm0, %v18158_v23 }
 0x1bb   :  { %1722 = vmatmul.mubr.bf16.gmra.mrb[76].mxu0 %v14476_v8  ;;  %13236 = vmatmul.mubr.bf16.gmra.mrb[76].mxu1 %v14476_v8 }
 0x1bc   :  { %3600 = vmatprep.mubr.bf16.mxu0 %v14476_v8  ;;  %13255 = vmatprep.mubr.msk.bf16.mxu1 %vm14098_vm0, %v18158_v23 }
 0x1d0   :  { %v14768_v15 = vpop.f32.mrb[4].mxu0  ;;  %v715_v16 = vpop.f32.mrb[4].mxu1 }
 0x1d1   :  { %753 = vst [vmem:[#allocation3 + $0x30] sm:$0xff] %v14768_v15  ;;  %v636_v17 = vpop.f32.mrb[5].mxu0  ;;  %v13117_v18 = vpop.f32.mrb[5].mxu1  ;;  %2255 = vrot.lane.b32.xlu0 %v14768_v15, %s14102_s22 }
 0x1d2   :  { %754 = vst [vmem:[#allocation3 + $0x38] sm:$0xff] %v636_v17  ;;  %v638_v54 = vpop.f32.mrb[6].mxu0  ;;  %v718_v20 = vpop.f32.mrb[6].mxu1 }
 0x1d3   :  { %756 = vst [vmem:[#allocation3 + $0x48] sm:$0xff] %v638_v54  ;;  %v640_v48 = vpop.f32.mrb[7].mxu0  ;;  %v13118_v8 = vpop.f32.mrb[7].mxu1 }
 0x1d4   :  { %757 = vst [vmem:[#allocation3 + $0x50] sm:$0xff] %v640_v48  ;;  %v13766_v8 = vld [vmem:[%s18149_s1 + $0xc0] ss:$12 sps:$4 sm:$0xff]  }
 0x1d8   :  { %v14773_v21 = vpop.f32.mrb[8].mxu0  ;;  %v723_v24 = vpop.f32.mrb[8].mxu1  ;;  %v1870_v25 = vld [vmem:[#allocation3 + $0x30] sm:$0xfe] }
 0x1d9   :  { %759 = vst [vmem:[#allocation3 + $0x60] sm:$0xff] %v14773_v21  ;;  %761 = vst.msk [vmem:[#allocation3 + $0x70] sm:$0xff] %vm748_vm7, %v723_v24  ;;  %v13121_v26 = vpop.f32.mrb[9].mxu1  ;;  %v646_v27 = vpop.f32.mrb[9].mxu0  ;;  %v2463_v28 = vld [vmem:[#allocation3 + $0x38] sm:$0xfc] }
 0x1da   :  { %760 = vst [vmem:[#allocation3 + $0x68] sm:$0xff] %v646_v27  ;;  %v648_v29 = vpop.f32.mrb[10].mxu0  ;;  %v726_v57 = vpop.f32.mrb[10].mxu1  ;;  %v1871_v30 = vld [vmem:[#allocation3 + $0x48] sm:$0x1]  ;;  %v1936_v58 = vrot.slane %v1870_v25, 1 }
 0x1db   :  { %762 = vst [vmem:[#allocation3 + $0x78] sm:$0xff] %v648_v29  ;;  %764 = vst.msk [vmem:[#allocation3 + $0x88] sm:$0xff] %vm748_vm7, %v726_v57  ;;  %v650_v7 = vpop.f32.mrb[11].mxu0  ;;  %v13122_v31 = vpop.f32.mrb[11].mxu1  ;;  %v1937_v32 = vrot.slane %v1871_v30, 1  ;;  %v2527_v37 = vrot.slane %v2463_v28, 2 }
 0x1dc   :  { %v2464_v33 = vld [vmem:[#allocation3 + $0x50] sm:$0x3]  ;;  %763 = vst [vmem:[#allocation3 + $0x80] sm:$0xff] %v650_v7  ;;  %v2047_v39 = vld [vmem:[#allocation3 + $0x30] sm:$0xfc] }
 0x1dd   :  { %v2528_v38 = vrot.slane %v2464_v33, 2  ;;  %v2048_v40 = vld [vmem:[#allocation3 + $0x48] sm:$0x3]  ;;  %v1938_v19 = vsel %vm1932_vm5, %v1936_v58, %v1937_v32  ;;  %v2113_v61 = vrot.slane %v2047_v39, 2  ;;  %v13768_v26 = vld [vmem:[%s18149_s1 + $0xc4] ss:$12 sps:$4 sm:$0xff]  }
 0x1de   :  { %v2114_v41 = vrot.slane %v2048_v40, 2  ;;  %1983 = vrot.lane.b32.xlu1 %v1938_v19, %s14100_s16  ;;  %3568 = vmatprep.subr.bf16.mxu0 %v13768_v26 }
 0x1df   :  { %v2529_v60 = vsel %vm2109_vm6, %v2527_v37, %v2528_v38  ;;  %3569 = vmatpush1.bf16.msra.mxu0 %v13766_v8 }
 0x1e0   :  { %2575 = vrot.lane.b32.xlu0 %v2529_v60, %s14100_s16  ;;  %v14782_v42 = vpop.f32.mrb[12].mxu0  ;;  %v731_v43 = vpop.f32.mrb[12].mxu1  ;;  %v2115_v35 = vsel %vm2109_vm6, %v2113_v61, %v2114_v41  ;;  %v1872_v0 = vld [vmem:[#allocation3 + $0x60] sm:$0xfe] }
 0x1e1   :  { %765 = vst [vmem:[#allocation3 + $0x90] sm:$0xff] %v14782_v42  ;;  %767 = vst.msk [vmem:[#allocation3 + $0xa0] sm:$0xff] %vm748_vm7, %v731_v43  ;;  %v656_v34 = vpop.f32.mrb[13].mxu0  ;;  %v13125_v44 = vpop.f32.mrb[13].mxu1  ;;  %v2736_v45 = vld [vmem:[#allocation3 + $0x68] sm:$0xfe] }
 0x1e2   :  { %766 = vst [vmem:[#allocation3 + $0x98] sm:$0xff] %v656_v34  ;;  %v734_v46 = vpop.f32.mrb[14].mxu1  ;;  %2160 = vrot.lane.b32.xlu1 %v2115_v35, %s14101_s5  ;;  %v658_v51 = vpop.f32.mrb[14].mxu0  ;;  %v1873_v52 = vld [vmem:[#allocation3 + $0x78] sm:$0x1]  ;;  %v2800_v59 = vrot.slane %v2736_v45, 1 }
 0x1e3   :  { %770 = vst.msk [vmem:[#allocation3 + $0xb8] sm:$0xff] %vm748_vm7, %v734_v46  ;;  %768 = vst [vmem:[#allocation3 + $0xa8] sm:$0xff] %v658_v51  ;;  %v13126_v55 = vpop.f32.mrb[15].mxu1  ;;  %v660_v63 = vpop.f32.mrb[15].mxu0  ;;  %v2737_v56 = vld [vmem:[#allocation3 + $0x80] sm:$0x1] }
 0x1e4   :  { %2672 = vrot.lane.b32.xlu0 %v646_v27, %s14101_s5  ;;  %769 = vst [vmem:[#allocation3 + $0xb0] sm:$0xff] %v660_v63  ;;  %v2801_v62 = vrot.slane %v2737_v56, 1  ;;  %v2466_v1 = vld [vmem:[#allocation3 + $0x80] sm:$0x3]  ;;  %v1940_v2 = vrot.slane %v1873_v52, 1  ;;  %v1939_v50 = vrot.slane %v1872_v0, 1 }
 0x1e5   :  { %v2465_v49 = vld [vmem:[#allocation3 + $0x68] sm:$0xfc]  ;;  %v2531_v47 = vrot.slane %v2466_v1, 2  ;;  %v2050_v4 = vld [vmem:[#allocation3 + $0x78] sm:$0x3] }
 0x1e6   :  { %2257 = vrot.lane.b32.xlu1 %v14773_v21, %s14102_s22  ;;  %v2802_v3 = vsel %vm1932_vm5, %v2800_v59, %v2801_v62  ;;  %v2530_v9 = vrot.slane %v2465_v49, 2  ;;  %v2049_v10 = vld [vmem:[#allocation3 + $0x60] sm:$0xfc]  ;;  %v1941_v13 = vsel %vm1932_vm5, %v1939_v50, %v1940_v2  ;;  %v2117_v22 = vrot.slane %v2050_v4, 2  ;;  %v13771_v45 = vld [vmem:[%s18149_s1 + $0xdc] ss:$12 sps:$4 sm:$0xff]  }
 0x1e7   :  { %v2116_v18 = vrot.slane %v2049_v10, 2  ;;  %v13774_v52 = vld [vmem:[%s18149_s1 + $0xf4] ss:$12 sps:$4 sm:$0xff]   ;;  %3570 = vmatprep.subr.bf16.mxu0 %v13771_v45  ;;  %v13772_v1 = vld [vmem:[%s18149_s1 + $0xf0] ss:$12 sps:$4 sm:$0xff]  }
 0x1e8   :  { %2848 = vrot.lane.b32.xlu0 %v2802_v3, %s14102_s22  ;;  %v14794_v5 = vpop.f32.mrb[16].mxu0  ;;  %v739_v6 = vpop.f32.mrb[16].mxu1  ;;  %v2532_v36 = vsel %vm2109_vm6, %v2530_v9, %v2531_v47  ;;  %v1874_v30 = vld [vmem:[#allocation3 + $0x90] sm:$0xfe] }
 0x1e9   :  { %771 = vst [vmem:[#allocation3 + $0xc0] sm:$0xff] %v14794_v5  ;;  %773 = vst.msk [vmem:[#allocation3 + $0xd0] sm:$0xff] %vm748_vm7, %v739_v6  ;;  %v14798_v11 = vpop.f32.mrb[17].mxu0  ;;  %v13129_v12 = vpop.f32.mrb[17].mxu1  ;;  %v2118_v20 = vsel %vm2109_vm6, %v2116_v18, %v2117_v22  ;;  %v2738_v48 = vld [vmem:[#allocation3 + $0x98] sm:$0xfe] }
 0x1ea   :  { %772 = vst [vmem:[#allocation3 + $0xc8] sm:$0xff] %v14798_v11  ;;  %v742_v14 = vpop.f32.mrb[18].mxu1  ;;  %1985 = vrot.lane.b32.xlu1 %v1941_v13, %s14100_s16  ;;  %v668_v53 = vpop.f32.mrb[18].mxu0  ;;  %v1875_v25 = vld [vmem:[#allocation3 + $0xa8] sm:$0x1]  ;;  %v2803_v57 = vrot.slane %v2738_v48, 1 }
 0x1eb   :  { %776 = vst.msk [vmem:[#allocation3 + $0xe8] sm:$0xff] %vm748_vm7, %v742_v14  ;;  %774 = vst [vmem:[#allocation3 + $0xd8] sm:$0xff] %v668_v53  ;;  %v13130_v16 = vpop.f32.mrb[19].mxu1  ;;  %v670_v17 = vpop.f32.mrb[19].mxu0  ;;  %v2739_v54 = vld [vmem:[#allocation3 + $0xb0] sm:$0x1] }
 0x1ec   :  { %2577 = vrot.lane.b32.xlu0 %v2532_v36, %s14100_s16  ;;  %775 = vst [vmem:[#allocation3 + $0xe0] sm:$0xff] %v670_v17  ;;  %v2804_v24 = vrot.slane %v2739_v54, 1  ;;  %v2468_v27 = vld [vmem:[#allocation3 + $0xb0] sm:$0x3]  ;;  %v1943_v58 = vrot.slane %v1875_v25, 1  ;;  %v1942_v60 = vrot.slane %v1874_v30, 1 }
 0x1ed   :  { %v2467_v32 = vld [vmem:[#allocation3 + $0x98] sm:$0xfc]  ;;  %v2534_v39 = vrot.slane %v2468_v27, 2  ;;  %v2052_v40 = vld [vmem:[#allocation3 + $0xa8] sm:$0x3] }
 0x1ee   :  { %2162 = vrot.lane.b32.xlu1 %v2118_v20, %s14101_s5  ;;  %v2805_v38 = vsel %vm1932_vm5, %v2803_v57, %v2804_v24  ;;  %v2533_v61 = vrot.slane %v2467_v32, 2  ;;  %v2051_v43 = vld [vmem:[#allocation3 + $0x90] sm:$0xfc]  ;;  %v2120_v44 = vrot.slane %v2052_v40, 2  ;;  %v13783_v40 = vld [vmem:[%s18149_s1 + $0x13c] ss:$12 sps:$4 sm:$0xff]  }
 0x1ef   :  { %v2119_v46 = vrot.slane %v2051_v43, 2  ;;  %v13775_v22 = vld [vmem:[%s18149_s1 + $0x108] ss:$12 sps:$4 sm:$0xff]  }
 0x1f0   :  { %2674 = vrot.lane.b32.xlu0 %v656_v34, %s14101_s5  ;;  %v14815_v28 = vpop.f32.mrb[20].mxu0  ;;  %v1060_v29 = vpop.f32.mrb[20].mxu1  ;;  %v1944_v34 = vsel %vm1932_vm5, %v1942_v60, %v1943_v58  ;;  %v2535_v35 = vsel %vm2109_vm6, %v2533_v61, %v2534_v39  ;;  %v1876_v10 = vld [vmem:[#allocation3 + $0xc0] sm:$0xfe] }
 0x1f1   :  { %1100 = vst [vmem:[#allocation3 + $0xf0] sm:$0xff] %v14815_v28  ;;  %1102 = vst.msk [vmem:[#allocation3 + $0x100] sm:$0xff] %vm748_vm7, %v1060_v29  ;;  %v14819_v7 = vpop.f32.mrb[21].mxu0  ;;  %v13149_v31 = vpop.f32.mrb[21].mxu1  ;;  %v2121_v62 = vsel %vm2109_vm6, %v2119_v46, %v2120_v44  ;;  %v2740_v0 = vld [vmem:[#allocation3 + $0xc8] sm:$0xfe] }
 0x1f2   :  { %1101 = vst [vmem:[#allocation3 + $0xf8] sm:$0xff] %v14819_v7  ;;  %v1063_v33 = vpop.f32.mrb[22].mxu1  ;;  %2259 = vrot.lane.b32.xlu1 %v14782_v42, %s14102_s22  ;;  %v981_v37 = vpop.f32.mrb[22].mxu0  ;;  %v13769_v42 = vld [vmem:[%s18149_s1 + $0xd8] ss:$12 sps:$4 sm:$0xff]   ;;  %v2806_v9 = vrot.slane %v2740_v0, 1 }
 0x1f3   :  { %1105 = vst.msk [vmem:[#allocation3 + $0x118] sm:$0xff] %vm748_vm7, %v1063_v33  ;;  %1103 = vst [vmem:[#allocation3 + $0x108] sm:$0xff] %v981_v37  ;;  %v13150_v19 = vpop.f32.mrb[23].mxu1  ;;  %v983_v41 = vpop.f32.mrb[23].mxu0  ;;  %v2741_v51 = vld [vmem:[#allocation3 + $0xe0] sm:$0x1]  ;;  %3571 = vmatpush1.bf16.msra.mxu0 %v13769_v42 }
 0x1f4   :  { %2850 = vrot.lane.b32.xlu0 %v2805_v38, %s14102_s22  ;;  %1104 = vst [vmem:[#allocation3 + $0x110] sm:$0xff] %v983_v41  ;;  %v2807_v3 = vrot.slane %v2741_v51, 1  ;;  %v1877_v47 = vld [vmem:[#allocation3 + $0xd8] sm:$0x1]  ;;  %3572 = vmatprep.subr.bf16.mxu0 %v13774_v52  ;;  %v2470_v6 = vld [vmem:[#allocation3 + $0xe0] sm:$0x3] }
 0x1f5   :  { %v1946_v12 = vrot.slane %v1877_v47, 1  ;;  %v2469_v13 = vld [vmem:[#allocation3 + $0xc8] sm:$0xfc]  ;;  %v2537_v53 = vrot.slane %v2470_v6, 2  ;;  %v2054_v36 = vld [vmem:[#allocation3 + $0xd8] sm:$0x3] }
 0x1f6   :  { %1987 = vrot.lane.b32.xlu1 %v1944_v34, %s14100_s16  ;;  %v2808_v14 = vsel %vm1932_vm5, %v2806_v9, %v2807_v3  ;;  %v1945_v16 = vrot.slane %v1876_v10, 1  ;;  %v2536_v54 = vrot.slane %v2469_v13, 2  ;;  %v2053_v20 = vld [vmem:[#allocation3 + $0xc0] sm:$0xfc]  ;;  %v2123_v24 = vrot.slane %v2054_v36, 2 }
 0x1f7   :  { %3573 = vmatpush1.bf16.msra.mxu0 %v13772_v1  ;;  %v2122_v30 = vrot.slane %v2053_v20, 2  ;;  %v13778_v58 = vld [vmem:[%s18149_s1 + $0x120] ss:$12 sps:$4 sm:$0xff]   ;;  %v13780_v38 = vld [vmem:[%s18149_s1 + $0x124] ss:$12 sps:$4 sm:$0xff]  }
 0x1f8   :  { %2579 = vrot.lane.b32.xlu0 %v2535_v35, %s14100_s16  ;;  %v14840_v55 = vpop.f32.mrb[24].mxu0  ;;  %v1068_v63 = vpop.f32.mrb[24].mxu1  ;;  %v1947_v8 = vsel %vm1932_vm5, %v1945_v16, %v1946_v12  ;;  %v2538_v27 = vsel %vm2109_vm6, %v2536_v54, %v2537_v53  ;;  %v1878_v19 = vld [vmem:[#allocation3 + $0xf0] sm:$0xfe]  ;;  %v13781_v44 = vld [vmem:[%s18149_s1 + $0x138] ss:$12 sps:$4 sm:$0xff]  }
 0x1f9   :  { %1106 = vst [vmem:[#allocation3 + $0x120] sm:$0xff] %v14840_v55  ;;  %1108 = vst.msk [vmem:[#allocation3 + $0x130] sm:$0xff] %vm748_vm7, %v1068_v63  ;;  %v14844_v56 = vpop.f32.mrb[25].mxu0  ;;  %v13153_v59 = vpop.f32.mrb[25].mxu1  ;;  %v2124_v32 = vsel %vm2109_vm6, %v2122_v30, %v2123_v24  ;;  %v2742_v33 = vld [vmem:[#allocation3 + $0xf8] sm:$0xfe] }
 0x1fa   :  { %1107 = vst [vmem:[#allocation3 + $0x128] sm:$0xff] %v14844_v56  ;;  %v1071_v2 = vpop.f32.mrb[26].mxu1  ;;  %2164 = vrot.lane.b32.xlu1 %v2121_v62, %s14101_s5  ;;  %v991_v49 = vpop.f32.mrb[26].mxu0  ;;  %v1879_v37 = vld [vmem:[#allocation3 + $0x108] sm:$0x1]  ;;  %v2809_v43 = vrot.slane %v2742_v33, 1 }
 0x1fb   :  { %1111 = vst.msk [vmem:[#allocation3 + $0x148] sm:$0xff] %vm748_vm7, %v1071_v2  ;;  %1109 = vst [vmem:[#allocation3 + $0x138] sm:$0xff] %v991_v49  ;;  %v13154_v4 = vpop.f32.mrb[27].mxu1  ;;  %v993_v50 = vpop.f32.mrb[27].mxu0  ;;  %v2743_v31 = vld [vmem:[#allocation3 + $0x110] sm:$0x1] }
 0x1fc   :  { %2676 = vrot.lane.b32.xlu0 %v14798_v11, %s14101_s5  ;;  %1110 = vst [vmem:[#allocation3 + $0x140] sm:$0xff] %v993_v50  ;;  %v13777_v11 = vld [vmem:[%s18149_s1 + $0x10c] ss:$12 sps:$4 sm:$0xff]   ;;  %v2810_v39 = vrot.slane %v2743_v31, 1  ;;  %v2472_v41 = vld [vmem:[#allocation3 + $0x110] sm:$0x3] }
 0x1fd   :  { %3574 = vmatprep.subr.bf16.mxu0 %v13777_v11  ;;  %v1949_v34 = vrot.slane %v1879_v37, 1  ;;  %v2471_v45 = vld [vmem:[#allocation3 + $0xf8] sm:$0xfc]  ;;  %v2540_v63 = vrot.slane %v2472_v41, 2  ;;  %v2056_v59 = vld [vmem:[#allocation3 + $0x108] sm:$0x3] }
 0x1fe   :  { %2261 = vrot.lane.b32.xlu1 %v14794_v5, %s14102_s22  ;;  %3575 = vmatpush1.bf16.msra.mxu0 %v13775_v22  ;;  %v2811_v52 = vsel %vm1932_vm5, %v2809_v43, %v2810_v39  ;;  %v1948_v1 = vrot.slane %v1878_v19, 1  ;;  %v2539_v2 = vrot.slane %v2471_v45, 2  ;;  %v2055_v49 = vld [vmem:[#allocation3 + $0xf0] sm:$0xfc]  ;;  %v2126_v47 = vrot.slane %v2056_v59, 2  ;;  %v14933_v31 = vld [vmem:[#allocation2] sm:$0xff] }
 0x1ff   :  { %3576 = vmatprep.subr.bf16.mxu0 %v13780_v38  ;;  %v2125_v50 = vrot.slane %v2055_v49, 2  ;;  %v13789_v9 = vld [vmem:[%s18149_s1 + $0x16c] ss:$12 sps:$4 sm:$0xff]   ;;  %v13787_v13 = vld [vmem:[%s18149_s1 + $0x168] ss:$12 sps:$4 sm:$0xff]  }
 0x200   :  { %2852 = vrot.lane.b32.xlu0 %v2808_v14, %s14102_s22  ;;  %v14865_v17 = vpop.f32.mrb[28].mxu0  ;;  %v1076_v18 = vpop.f32.mrb[28].mxu1  ;;  %v1950_v3 = vsel %vm1932_vm5, %v1948_v1, %v1949_v34  ;;  %v2541_v4 = vsel %vm2109_vm6, %v2539_v2, %v2540_v63 }
 0x201   :  { %1112 = vst [vmem:[#allocation3 + $0x150] sm:$0xff] %v14865_v17  ;;  %1114 = vst.msk [vmem:[#allocation3 + $0x160] sm:$0xff] %vm748_vm7, %v1076_v18  ;;  %v14869_v5 = vpop.f32.mrb[29].mxu0  ;;  %v13157_v48 = vpop.f32.mrb[29].mxu1  ;;  %v2127_v22 = vsel %vm2109_vm6, %v2125_v50, %v2126_v47  ;;  %v2744_v14 = vld [vmem:[#allocation3 + $0x128] sm:$0xfe] }
 0x202   :  { %1113 = vst [vmem:[#allocation3 + $0x158] sm:$0xff] %v14869_v5  ;;  %v1079_v25 = vpop.f32.mrb[30].mxu1  ;;  %1989 = vrot.lane.b32.xlu1 %v1947_v8, %s14100_s16  ;;  %v1001_v26 = vpop.f32.mrb[30].mxu0  ;;  %3577 = vmatpush1.bf16.msra.mxu0 %v13778_v58  ;;  %v1881_v16 = vld [vmem:[#allocation3 + $0x138] sm:$0x1]  ;;  %v2812_v24 = vrot.slane %v2744_v14, 1 }
 0x203   :  { %1117 = vst.msk [vmem:[#allocation3 + $0x178] sm:$0xff] %vm748_vm7, %v1079_v25  ;;  %1115 = vst [vmem:[#allocation3 + $0x168] sm:$0xff] %v1001_v26  ;;  %v1003_v29 = vpop.f32.mrb[31].mxu0  ;;  %v13158_v57 = vpop.f32.mrb[31].mxu1  ;;  %3578 = vmatprep.subr.bf16.mxu0 %v13783_v40  ;;  %v2745_v6 = vld [vmem:[#allocation3 + $0x140] sm:$0x1] }
 0x204   :  { %2581 = vrot.lane.b32.xlu0 %v2538_v27, %s14100_s16  ;;  %1116 = vst [vmem:[#allocation3 + $0x170] sm:$0xff] %v1003_v29  ;;  %v2813_v11 = vrot.slane %v2745_v6, 1  ;;  %v2474_v20 = vld [vmem:[#allocation3 + $0x140] sm:$0x3]  ;;  %v1952_v26 = vrot.slane %v1881_v16, 1 }
 0x205   :  { %v1880_v25 = vld [vmem:[#allocation3 + $0x120] sm:$0xfe]  ;;  %v2473_v27 = vld [vmem:[#allocation3 + $0x128] sm:$0xfc]  ;;  %v2543_v57 = vrot.slane %v2474_v20, 2 }
 0x206   :  { %2166 = vrot.lane.b32.xlu1 %v2124_v32, %s14101_s5  ;;  %3579 = vmatpush1.bf16.msra.mxu0 %v13781_v44  ;;  %v2814_v29 = vsel %vm1932_vm5, %v2812_v24, %v2813_v11  ;;  %v2058_v30 = vld [vmem:[#allocation3 + $0x138] sm:$0x3]  ;;  %v2542_v58 = vrot.slane %v2473_v27, 2  ;;  %v2057_v32 = vld [vmem:[#allocation3 + $0x120] sm:$0xfc] }
 0x207   :  { %v2128_v43 = vrot.slane %v2057_v32, 2  ;;  %v1982_v32 = vpop.permute.xlu0 %1981 }
 0x208   :  { %2678 = vrot.lane.b32.xlu0 %v14819_v7, %s14101_s5  ;;  %v14890_v60 = vpop.f32.mrb[32].mxu0  ;;  %v1084_v61 = vpop.f32.mrb[32].mxu1  ;;  %v13786_v7 = vld [vmem:[%s18149_s1 + $0x154] ss:$12 sps:$4 sm:$0xff]   ;;  %v2544_v19 = vsel %vm2109_vm6, %v2542_v58, %v2543_v57 }
 0x209   :  { %1120 = vst.msk [vmem:[#allocation3 + $0x190] sm:$0xff] %vm748_vm7, %v1084_v61  ;;  %v14896_v42 = vpop.f32.mrb[33].mxu0  ;;  %v13161_v35 = vpop.f32.mrb[33].mxu1  ;;  %3580 = vmatprep.subr.bf16.mxu0 %v13786_v7  ;;  %v2746_v7 = vld [vmem:[#allocation3 + $0x158] sm:$0xfe] }
 0x20a   :  { %1119 = vst [vmem:[#allocation3 + $0x188] sm:$0xff] %v14896_v42  ;;  %v1087_v46 = vpop.f32.mrb[34].mxu1  ;;  %2263 = vrot.lane.b32.xlu1 %v14815_v28, %s14102_s22  ;;  %v1011_v51 = vpop.f32.mrb[34].mxu0  ;;  %v13784_v28 = vld [vmem:[%s18149_s1 + $0x150] ss:$12 sps:$4 sm:$0xff]   ;;  %v2815_v63 = vrot.slane %v2746_v7, 1 }
 0x20b   :  { %1123 = vst.msk [vmem:[#allocation3 + $0x1a8] sm:$0xff] %vm748_vm7, %v1087_v46  ;;  %v1013_v62 = vpop.f32.mrb[35].mxu0  ;;  %v13162_v0 = vpop.f32.mrb[35].mxu1  ;;  %3581 = vmatpush1.bf16.msra.mxu0 %v13784_v28  ;;  %v2747_v34 = vld [vmem:[#allocation3 + $0x170] sm:$0x1] }
 0x20c   :  { %2854 = vrot.lane.b32.xlu0 %v2811_v52, %s14102_s22  ;;  %1122 = vst [vmem:[#allocation3 + $0x1a0] sm:$0xff] %v1013_v62  ;;  %3582 = vmatprep.subr.bf16.mxu0 %v13789_v9  ;;  %v2816_v46 = vrot.slane %v2747_v34, 1  ;;  %v1883_v51 = vld [vmem:[#allocation3 + $0x168] sm:$0x1]  ;;  %v2476_v52 = vld [vmem:[#allocation3 + $0x170] sm:$0x3] }
 0x20d   :  { %v1882_v59 = vld [vmem:[#allocation3 + $0x150] sm:$0xfe]  ;;  %v1955_v62 = vrot.slane %v1883_v51, 1  ;;  %v2475_v0 = vld [vmem:[#allocation3 + $0x158] sm:$0xfc]  ;;  %v2546_v2 = vrot.slane %v2476_v52, 2 }
 0x20e   :  { %1991 = vrot.lane.b32.xlu1 %v1950_v3, %s14100_s16  ;;  %v2817_v1 = vsel %vm1932_vm5, %v2815_v63, %v2816_v46  ;;  %v2060_v49 = vld [vmem:[#allocation3 + $0x168] sm:$0x3]  ;;  %v1954_v3 = vrot.slane %v1882_v59, 1  ;;  %v2545_v47 = vrot.slane %v2475_v0, 2  ;;  %v2059_v28 = vld [vmem:[#allocation3 + $0x150] sm:$0xfc] }
 0x20f   :  { %3583 = vmatpush1.bf16.msra.mxu0 %v13787_v13  ;;  %v2131_v6 = vrot.slane %v2059_v28, 2  ;;  %v14023_v52 = vld [vmem:[#allocation3] sm:$0xff]  ;;  %v2320_v59 = vld [vmem:[#allocation3 + $0x50] sm:$0x1] }
 0x210   :  { %2583 = vrot.lane.b32.xlu0 %v2541_v4, %s14100_s16  ;;  %v1017_v10 = vpop.f32.mrb[36].mxu0  ;;  %v1092_v12 = vpop.f32.mrb[36].mxu1  ;;  %v1956_v4 = vsel %vm1932_vm5, %v1954_v3, %v1955_v62  ;;  %v2547_v50 = vsel %vm2109_vm6, %v2545_v47, %v2546_v2  ;;  %v2029_v63 = vadd.f32 %v14023_v52, %v1982_v32 }
 0x211   :  { %v14921_v53 = vpop.f32.mrb[37].mxu0  ;;  %1126 = vst.msk [vmem:[#allocation3 + $0x1c0] sm:$0xff] %vm748_vm7, %v1092_v12  ;;  %v13165_v36 = vpop.f32.mrb[37].mxu1  ;;  %v2748_v10 = vld [vmem:[#allocation3 + $0x188] sm:$0xfe] }
 0x212   :  { %2168 = vrot.lane.b32.xlu1 %v2127_v22, %s14101_s5  ;;  %1125 = vst [vmem:[#allocation3 + $0x1b8] sm:$0xff] %v14921_v53  ;;  %v1021_v18 = vpop.f32.mrb[38].mxu0  ;;  %v1095_v54 = vpop.f32.mrb[38].mxu1  ;;  %3601 = vmatmul.mubr.bf16.vlgmr.msra.gmra.mrb[80].mxu0 %v14933_v31  ;;  %v2477_v22 = vld [vmem:[#allocation3 + $0x188] sm:$0xfc]  ;;  %v2818_v14 = vrot.slane %v2748_v10, 1 }
 0x213   :  { %v1023_v48 = vpop.f32.mrb[39].mxu0  ;;  %1129 = vst.msk [vmem:[#allocation3 + $0x1d8] sm:$0xff] %vm748_vm7, %v1095_v54  ;;  %v13166_v8 = vpop.f32.mrb[39].mxu1  ;;  %3610 = vmatprep.mubr.bf16.mxu0 %v14933_v31  ;;  %v2478_v13 = vld [vmem:[#allocation3 + $0x1a0] sm:$0x3] }
 0x214   :  { %2680 = vrot.lane.b32.xlu0 %v14844_v56, %s14101_s5  ;;  %1128 = vst [vmem:[#allocation3 + $0x1d0] sm:$0xff] %v1023_v48  ;;  %v1951_v56 = vrot.slane %v1880_v25, 1  ;;  %v2549_v16 = vrot.slane %v2478_v13, 2  ;;  %v2548_v48 = vrot.slane %v2477_v22, 2 }
 0x216   :  { %2265 = vrot.lane.b32.xlu1 %v14840_v55, %s14102_s22  ;;  %v1953_v38 = vsel %vm1932_vm5, %v1951_v56, %v1952_v26  ;;  %v2129_v55 = vrot.slane %v2058_v30, 2 }
 0x218   :  { %2856 = vrot.lane.b32.xlu0 %v2814_v29, %s14102_s22  ;;  %v1330_v33 = vpop.f32.mrb[40].mxu0  ;;  %v1413_v37 = vpop.f32.mrb[40].mxu1  ;;  %v2130_v45 = vsel %vm2109_vm6, %v2128_v43, %v2129_v55  ;;  %v2550_v29 = vsel %vm2109_vm6, %v2548_v48, %v2549_v16  ;;  %v2384_v16 = vrot.slane %v2320_v59, 1 }
 0x219   :  { %1453 = vst [vmem:[#allocation3 + $0x1e0] sm:$0xff] %v1330_v33  ;;  %v1332_v39 = vpop.f32.mrb[41].mxu0  ;;  %v13185_v40 = vpop.f32.mrb[41].mxu1  ;;  %v2750_v36 = vld [vmem:[#allocation3 + $0x1b8] sm:$0xfe] }
 0x21a   :  { %1993 = vrot.lane.b32.xlu1 %v1953_v38, %s14100_s16  ;;  %v1334_v41 = vpop.f32.mrb[42].mxu0  ;;  %v1416_v61 = vpop.f32.mrb[42].mxu1  ;;  %v2821_v8 = vrot.slane %v2750_v36, 1 }
 0x21b   :  { %1456 = vst [vmem:[#allocation3 + $0x1f8] sm:$0xff] %v1334_v41  ;;  %v1336_v44 = vpop.f32.mrb[43].mxu0  ;;  %v13186_v35 = vpop.f32.mrb[43].mxu1  ;;  %v2751_v11 = vld [vmem:[#allocation3 + $0x1d0] sm:$0x1] }
 0x21c   :  { %2585 = vrot.lane.b32.xlu0 %v2544_v19, %s14100_s16  ;;  %v2822_v24 = vrot.slane %v2751_v11, 1  ;;  %v2159_v33 = vpop.permute.xlu1 %2158  ;;  %v2319_v11 = vld [vmem:[#allocation3 + $0x38] sm:$0xfe] }
 0x21d   :  { %v2206_v36 = vadd.f32 %v2159_v33, %v2029_v63 }
 0x21e   :  { %2170 = vrot.lane.b32.xlu1 %v2130_v45, %s14101_s5 }
 0x220   :  { %2682 = vrot.lane.b32.xlu0 %v14869_v5, %s14101_s5  ;;  %v2132_v5 = vrot.slane %v2060_v49, 2  ;;  %v1884_v18 = vld [vmem:[#allocation3 + $0x1e0] sm:$0xfe] }
 0x221   :  { %v1957_v25 = vrot.slane %v1884_v18, 1 }
 0x222   :  { %2267 = vrot.lane.b32.xlu1 %v14865_v17, %s14102_s22  ;;  %v2749_v17 = vld [vmem:[#allocation3 + $0x1a0] sm:$0x1]  ;;  %v2133_v9 = vsel %vm2109_vm6, %v2131_v6, %v2132_v5  ;;  %v1885_v54 = vld [vmem:[#allocation3 + $0x1f8] sm:$0x1] }
 0x223   :  { %v2819_v12 = vrot.slane %v2749_v17, 1  ;;  %v1958_v26 = vrot.slane %v1885_v54, 1  ;;  %v2062_v27 = vld [vmem:[#allocation3 + $0x1f8] sm:$0x3] }
 0x224   :  { %2858 = vrot.lane.b32.xlu0 %v2817_v1, %s14102_s22  ;;  %v2135_v30 = vrot.slane %v2062_v27, 2 }
 0x225   :  { %v2820_v20 = vsel %vm1932_vm5, %v2818_v14, %v2819_v12  ;;  %v1959_v56 = vsel %vm1932_vm5, %v1957_v25, %v1958_v26  ;;  %v13790_v14 = vld [vmem:[%s18149_s1 + $0xc8] ss:$12 sps:$4 sm:$0xff]   ;;  %v2322_v26 = vld [vmem:[#allocation3 + $0x80] sm:$0x1] }
 0x226   :  { %1995 = vrot.lane.b32.xlu1 %v1956_v4, %s14100_s16  ;;  %13240 = vmatpush3.bf16.msra.mxu1 %v13790_v14  ;;  %v2387_v33 = vrot.slane %v2322_v26, 1 }
 0x227   :  { %13241 = vmatprep.subr.bf16.mxu1 %v18158_v23 }
 0x228   :  { %2587 = vrot.lane.b32.xlu0 %v2547_v50, %s14100_s16 }
 0x22a   :  { %2172 = vrot.lane.b32.xlu1 %v2133_v9, %s14101_s5 }
 0x22c   :  { %2684 = vrot.lane.b32.xlu0 %v14896_v42, %s14101_s5  ;;  %v2061_v42 = vld [vmem:[#allocation3 + $0x1e0] sm:$0xfc] }
 0x22d   :  { %v2134_v57 = vrot.slane %v2061_v42, 2  ;;  %v2383_v42 = vrot.slane %v2319_v11, 1  ;;  %v2324_v11 = vld [vmem:[#allocation3 + $0xb0] sm:$0x1] }
 0x22e   :  { %2269 = vrot.lane.b32.xlu1 %v14890_v60, %s14102_s22  ;;  %v2823_v60 = vsel %vm1932_vm5, %v2821_v8, %v2822_v24 }
 0x22f   :  { %v2136_v58 = vsel %vm2109_vm6, %v2134_v57, %v2135_v30  ;;  %v2385_v32 = vsel %vm1932_vm5, %v2383_v42, %v2384_v16  ;;  %v2323_v42 = vld [vmem:[#allocation3 + $0x98] sm:$0xfe] }
 0x230   :  { %2860 = vrot.lane.b32.xlu0 %v2820_v20, %s14102_s22  ;;  %v13791_v20 = vld [vmem:[%s18149_s1 + $0xe0] ss:$12 sps:$4 sm:$0xff]  }
 0x231   :  { %13242 = vmatpush3.bf16.msra.mxu1 %v13791_v20 }
 0x232   :  { %2589 = vrot.lane.b32.xlu1 %v2550_v29, %s14100_s16  ;;  %13243 = vmatprep.subr.bf16.mxu1 %v18158_v23 }
 0x234   :  { %2686 = vrot.lane.b32.xlu0 %v14921_v53, %s14101_s5 }
 0x236   :  { %2862 = vrot.lane.b32.xlu1 %v2823_v60, %s14102_s22 }
 0x238   :  { %1997 = vrot.lane.b32.xlu0 %v1959_v56, %s14100_s16 }
 0x23a   :  { %2174 = vrot.lane.b32.xlu1 %v2136_v58, %s14101_s5 }
 0x243   :  { %v2256_v37 = vpop.permute.xlu0 %2255 }
 0x244   :  { %v2303_v48 = vadd.f32 %v2256_v37, %v2206_v36 }
 0x24e   :  { %v1340_v38 = vpop.f32.mrb[44].mxu0  ;;  %v1421_v55 = vpop.f32.mrb[44].mxu1 }
 0x24f   :  { %1459 = vst [vmem:[#allocation3 + $0x210] sm:$0xff] %v1340_v38  ;;  %v1342_v53 = vpop.f32.mrb[45].mxu0  ;;  %v13189_v39 = vpop.f32.mrb[45].mxu1  ;;  %2271 = vrot.lane.b32.xlu0 %v1340_v38, %s14102_s22 }
 0x250   :  { %1460 = vst [vmem:[#allocation3 + $0x218] sm:$0xff] %v1342_v53  ;;  %v1344_v40 = vpop.f32.mrb[46].mxu0  ;;  %v1424_v19 = vpop.f32.mrb[46].mxu1  ;;  %v2447_v39 = vadd.f32 %v2385_v32, %v2303_v48 }
 0x251   :  { %1462 = vst [vmem:[#allocation3 + $0x228] sm:$0xff] %v1344_v40  ;;  %v13190_v41 = vpop.f32.mrb[47].mxu1  ;;  %v1984_v61 = vpop.permute.xlu1 %1983 }
 0x252   :  { %v1346_v43 = vpop.f32.mrb[47].mxu0  ;;  %v14972_v34 = vpop.permute.xlu0 %2575  ;;  %v2030_v8 = vadd.f32 %v1984_v61, %v14768_v15  ;;  %v2321_v15 = vld [vmem:[#allocation3 + $0x68] sm:$0xfe] }
 0x253   :  { %1463 = vst [vmem:[#allocation3 + $0x230] sm:$0xff] %v1346_v43  ;;  %v2623_v59 = vadd.f32 %v14972_v34, %v2447_v39 }
 0x255   :  { %v2161_v44 = vpop.permute.xlu1 %2160 }
 0x256   :  { %v1429_v35 = vpop.f32.mrb[48].mxu1  ;;  %v14974_v45 = vpop.permute.xlu0 %2672  ;;  %v1886_v7 = vld [vmem:[#allocation3 + $0x210] sm:$0xfe]  ;;  %v2207_v30 = vadd.f32 %v2161_v44, %v2030_v8 }
 0x257   :  { %1467 = vst.msk [vmem:[#allocation3 + $0x250] sm:$0xff] %vm748_vm7, %v1429_v35  ;;  %v14977_v46 = vpop.f32.mrb[48].mxu0  ;;  %v13193_v51 = vpop.f32.mrb[49].mxu1  ;;  %v2479_v2 = vld [vmem:[#allocation3 + $0x218] sm:$0xfc]  ;;  %v1960_v47 = vrot.slane %v1886_v7, 1 }
 0x258   :  { %1465 = vst [vmem:[#allocation3 + $0x240] sm:$0xff] %v14977_v46  ;;  %v14980_v62 = vpop.f32.mrb[49].mxu0  ;;  %v1432_v0 = vpop.f32.mrb[50].mxu1  ;;  %v1887_v1 = vld [vmem:[#allocation3 + $0x228] sm:$0x1]  ;;  %v2551_v12 = vrot.slane %v2479_v2, 2 }
 0x259   :  { %1466 = vst [vmem:[#allocation3 + $0x248] sm:$0xff] %v14980_v62  ;;  %v1354_v49 = vpop.f32.mrb[50].mxu0  ;;  %1470 = vst.msk [vmem:[#allocation3 + $0x268] sm:$0xff] %vm748_vm7, %v1432_v0  ;;  %v13194_v3 = vpop.f32.mrb[51].mxu1  ;;  %v1961_v28 = vrot.slane %v1887_v1, 1  ;;  %v2386_v35 = vrot.slane %v2321_v15, 1 }
 0x25a   :  { %v2064_v4 = vld [vmem:[#allocation3 + $0x228] sm:$0x3]  ;;  %1468 = vst [vmem:[#allocation3 + $0x258] sm:$0xff] %v1354_v49  ;;  %v2258_v5 = vpop.permute.xlu1 %2257  ;;  %v1356_v50 = vpop.f32.mrb[51].mxu0  ;;  %v2480_v6 = vld [vmem:[#allocation3 + $0x230] sm:$0x3] }
 0x25b   :  { %v2063_v17 = vld [vmem:[#allocation3 + $0x210] sm:$0xfc]  ;;  %1469 = vst [vmem:[#allocation3 + $0x260] sm:$0xff] %v1356_v50  ;;  %v14984_v9 = vpop.permute.xlu0 %2848  ;;  %v1962_v10 = vsel %vm1932_vm5, %v1960_v47, %v1961_v28  ;;  %v2552_v13 = vrot.slane %v2480_v6, 2  ;;  %v2138_v22 = vrot.slane %v2064_v4, 2  ;;  %v2304_v40 = vadd.f32 %v2258_v5, %v2207_v30 }
 0x25c   :  { %1999 = vrot.lane.b32.xlu0 %v1962_v10, %s14100_s16  ;;  %v2137_v54 = vrot.slane %v2063_v17, 2  ;;  %v2913_v0 = vld [vmem:[#allocation3 + $0x88] sm:$0x3]  ;;  %v2388_v2 = vsel %vm1932_vm5, %v2386_v35, %v2387_v33  ;;  %v2720_v47 = vadd.f32 %v14974_v45, %v2623_v59  ;;  %v2912_v28 = vld [vmem:[#allocation3 + $0x70] sm:$0xfc] }
 0x25d   :  { %v2553_v18 = vsel %vm2109_vm6, %v2551_v12, %v2552_v13  ;;  %v2448_v4 = vadd.f32 %v2388_v2, %v2304_v40  ;;  %v2977_v6 = vrot.slane %v2913_v0, 2  ;;  %v15045_v30 = vld [vmem:[%s18150_s2] ss:$0 sm:$0xff]  ;;  %v13792_v40 = vld [vmem:[%s18149_s1 + $0xf8] ss:$12 sps:$4 sm:$0xff]  }
 0x25e   :  { %v14996_v24 = vpop.permute.xlu1 %1985  ;;  %2591 = vrot.lane.b32.xlu1 %v2553_v18, %s14100_s16  ;;  %v1437_v25 = vpop.f32.mrb[52].mxu1  ;;  %v2139_v60 = vsel %vm2109_vm6, %v2137_v54, %v2138_v22  ;;  %v2896_v13 = vadd.f32 %v14984_v9, %v2720_v47  ;;  %v15030_v22 = vld [vmem:[#allocation3 + $0xb8] sm:$0x3]  ;;  %v2976_v18 = vrot.slane %v2912_v28, 2  ;;  %13244 = vmatpush3.bf16.msra.mxu1 %v13792_v40  ;;  %v14024_v47 = vld [vmem:[#allocation3 + $0x90] sm:$0xff] }
 0x25f   :  { %1473 = vst.msk [vmem:[#allocation3 + $0x280] sm:$0xff] %vm748_vm7, %v1437_v25  ;;  %v15001_v27 = vpop.permute.xlu0 %2577  ;;  %v15003_v29 = vpop.f32.mrb[52].mxu0  ;;  %v1888_v57 = vld [vmem:[#allocation3 + $0x240] sm:$0xfe]  ;;  %v2031_v45 = vadd.f32 %v14996_v24, %v14773_v21  ;;  %13245 = vmatprep.subr.bf16.mxu1 %v18158_v23 }
 0x260   :  { %1471 = vst [vmem:[#allocation3 + $0x270] sm:$0xff] %v15003_v29  ;;  %v15007_v56 = vpop.f32.mrb[53].mxu0  ;;  %v13197_v58 = vpop.f32.mrb[53].mxu1  ;;  %2176 = vrot.lane.b32.xlu0 %v2139_v60, %s14101_s5  ;;  %v1963_v53 = vrot.slane %v1888_v57, 1  ;;  %v2481_v43 = vld [vmem:[#allocation3 + $0x248] sm:$0xfc]  ;;  %v2624_v8 = vadd.f32 %v15001_v27, %v2448_v4  ;;  %v2978_v57 = vsel %vm2109_vm6, %v2976_v18, %v2977_v6 }
 0x261   :  { %1472 = vst [vmem:[#allocation3 + $0x278] sm:$0xff] %v15007_v56  ;;  %v1364_v37 = vpop.f32.mrb[54].mxu0  ;;  %v1440_v38 = vpop.f32.mrb[54].mxu1  ;;  %v1889_v55 = vld [vmem:[#allocation3 + $0x258] sm:$0x1]  ;;  %v2554_v49 = vrot.slane %v2481_v43, 2 }
 0x262   :  { %1474 = vst [vmem:[#allocation3 + $0x288] sm:$0xff] %v1364_v37  ;;  %1476 = vst.msk [vmem:[#allocation3 + $0x298] sm:$0xff] %vm748_vm7, %v1440_v38  ;;  %v13198_v19 = vpop.f32.mrb[55].mxu1  ;;  %v2163_v41 = vpop.permute.xlu1 %2162  ;;  %2688 = vrot.lane.b32.xlu1 %v14980_v62, %s14101_s5  ;;  %v1964_v61 = vrot.slane %v1889_v55, 1  ;;  %v2482_v44 = vld [vmem:[#allocation3 + $0x260] sm:$0x3]  ;;  %v3040_v37 = vadd.f32 %v2978_v57, %v2896_v13 }
 0x263   :  { %v1366_v7 = vpop.f32.mrb[55].mxu0  ;;  %v2675_v51 = vpop.permute.xlu0 %2674  ;;  %v2555_v52 = vrot.slane %v2482_v44, 2  ;;  %v2066_v63 = vld [vmem:[#allocation3 + $0x258] sm:$0x3]  ;;  %v2065_v62 = vld [vmem:[#allocation3 + $0x240] sm:$0xfc]  ;;  %v2208_v24 = vadd.f32 %v2163_v41, %v2031_v45 }
 0x264   :  { %1475 = vst [vmem:[#allocation3 + $0x290] sm:$0xff] %v1366_v7  ;;  %2273 = vrot.lane.b32.xlu0 %v14977_v46, %s14102_s22  ;;  %v1965_v1 = vsel %vm1932_vm5, %v1963_v53, %v1964_v61  ;;  %v2141_v3 = vrot.slane %v2066_v63, 2  ;;  %v2753_v50 = vld [vmem:[#allocation3 + $0x260] sm:$0x1]  ;;  %v2140_v12 = vrot.slane %v2065_v62, 2  ;;  %v2390_v27 = vrot.slane %v2324_v11, 1 }
 0x265   :  { %v2556_v10 = vsel %vm2109_vm6, %v2554_v49, %v2555_v52  ;;  %v2752_v16 = vld [vmem:[#allocation3 + $0x248] sm:$0xfe]  ;;  %v2825_v48 = vrot.slane %v2753_v50, 1  ;;  %v2721_v38 = vadd.f32 %v2675_v51, %v2624_v8  ;;  %v2914_v53 = vld [vmem:[#allocation3 + $0xa0] sm:$0xfc]  ;;  %v2980_v19 = vrot.slane %v15030_v22, 2 }
 0x266   :  { %v2260_v5 = vpop.permute.xlu1 %2259  ;;  %2001 = vrot.lane.b32.xlu1 %v1965_v1, %s14100_s16  ;;  %v1445_v34 = vpop.f32.mrb[56].mxu1  ;;  %v2142_v9 = vsel %vm2109_vm6, %v2140_v12, %v2141_v3  ;;  %v2824_v32 = vrot.slane %v2752_v16, 1  ;;  %v2389_v41 = vrot.slane %v2323_v42, 1  ;;  %v2979_v63 = vrot.slane %v2914_v53, 2  ;;  %v2326_v49 = vld [vmem:[#allocation3 + $0xe0] sm:$0x1] }
 0x267   :  { %1479 = vst.msk [vmem:[#allocation3 + $0x2b0] sm:$0xff] %vm748_vm7, %v1445_v34  ;;  %v2851_v46 = vpop.permute.xlu0 %2850  ;;  %v15024_v17 = vpop.f32.mrb[56].mxu0  ;;  %v1890_v60 = vld [vmem:[#allocation3 + $0x270] sm:$0xfe]  ;;  %v2305_v55 = vadd.f32 %v2260_v5, %v2208_v24  ;;  %v3063_v3 = vadd.f32 %v15045_v30, %v3040_v37  ;;  %v2325_v18 = vld [vmem:[#allocation3 + $0xc8] sm:$0xfe] }
 0x268   :  { %1477 = vst [vmem:[#allocation3 + $0x2a0] sm:$0xff] %v15024_v17  ;;  %v15033_v14 = vpop.f32.mrb[57].mxu0  ;;  %v13201_v36 = vpop.f32.mrb[57].mxu1  ;;  %2593 = vrot.lane.b32.xlu0 %v2556_v10, %s14100_s16  ;;  %v2826_v61 = vsel %vm1932_vm5, %v2824_v32, %v2825_v48  ;;  %v1966_v43 = vrot.slane %v1890_v60, 1  ;;  %v2067_v44 = vld [vmem:[#allocation3 + $0x270] sm:$0xfc]  ;;  %v2897_v35 = vadd.f32 %v2851_v46, %v2721_v38  ;;  %v2391_v59 = vsel %vm1932_vm5, %v2389_v41, %v2390_v27 }
 0x269   :  { %1478 = vst [vmem:[#allocation3 + $0x2a8] sm:$0xff] %v15033_v14  ;;  %v1374_v54 = vpop.f32.mrb[58].mxu0  ;;  %v1448_v20 = vpop.f32.mrb[58].mxu1  ;;  %v1891_v21 = vld [vmem:[#allocation3 + $0x288] sm:$0x1]  ;;  %v2449_v4 = vadd.f32 %v2391_v59, %v2305_v55  ;;  %v2981_v46 = vsel %vm2109_vm6, %v2979_v63, %v2980_v19  ;;  %v2143_v13 = vrot.slane %v2067_v44, 2 }
 0x26a   :  { %1480 = vst [vmem:[#allocation3 + $0x2b8] sm:$0xff] %v1374_v54  ;;  %1482 = vst.msk [vmem:[#allocation3 + $0x2c8] sm:$0xff] %vm748_vm7, %v1448_v20  ;;  %v13202_v25 = vpop.f32.mrb[59].mxu1  ;;  %v1988_v26 = vpop.permute.xlu1 %1987  ;;  %2178 = vrot.lane.b32.xlu1 %v2142_v9, %s14101_s5  ;;  %v1967_v33 = vrot.slane %v1891_v21, 1  ;;  %v2068_v39 = vld [vmem:[#allocation3 + $0x288] sm:$0x3]  ;;  %v3041_v22 = vadd.f32 %v2981_v46, %v2897_v35 }
 0x26b   :  { %v1376_v15 = vpop.f32.mrb[59].mxu0  ;;  %v15047_v58 = vpop.permute.xlu0 %2579  ;;  %v2484_v52 = vld [vmem:[#allocation3 + $0x290] sm:$0x3]  ;;  %v2144_v2 = vrot.slane %v2068_v39, 2  ;;  %v2032_v28 = vadd.f32 %v14024_v47, %v1988_v26  ;;  %v2483_v50 = vld [vmem:[#allocation3 + $0x278] sm:$0xfc] }
 0x26c   :  { %1481 = vst [vmem:[#allocation3 + $0x2c0] sm:$0xff] %v1376_v15  ;;  %2690 = vrot.lane.b32.xlu0 %v15007_v56, %s14101_s5  ;;  %v13793_v56 = vld [vmem:[%s18149_s1 + $0x110] ss:$12 sps:$4 sm:$0xff]   ;;  %v1968_v62 = vsel %vm1932_vm5, %v1966_v43, %v1967_v33  ;;  %v2558_v45 = vrot.slane %v2484_v52, 2  ;;  %v2557_v21 = vrot.slane %v2483_v50, 2  ;;  %v2393_v8 = vrot.slane %v2326_v49, 1 }
 0x26d   :  { %v2755_v6 = vld [vmem:[#allocation3 + $0x290] sm:$0x1]  ;;  %v2754_v54 = vld [vmem:[#allocation3 + $0x278] sm:$0xfe]  ;;  %13246 = vmatpush3.bf16.msra.mxu1 %v13793_v56  ;;  %v2145_v48 = vsel %vm2109_vm6, %v2143_v13, %v2144_v2  ;;  %v15078_v25 = vmax.f32 %v3063_v3, 0.0  ;;  %v2625_v26 = vadd.f32 %v15047_v58, %v2449_v4  ;;  %v2392_v27 = vrot.slane %v2325_v18, 1 }
 0x26e   :  { %v2165_v7 = vpop.permute.xlu1 %2164  ;;  %2864 = vrot.lane.b32.xlu1 %v2826_v61, %s14102_s22  ;;  %v1766_v51 = vpop.f32.mrb[60].mxu1  ;;  %v2828_v24 = vrot.slane %v2755_v6, 1  ;;  %13247 = vmatprep.subr.bf16.mxu1 %v18158_v23  ;;  %v2917_v60 = vld [vmem:[#allocation3 + $0xe8] sm:$0x3]  ;;  %v2916_v57 = vld [vmem:[#allocation3 + $0xd0] sm:$0xfc]  ;;  %v2559_v15 = vsel %vm2109_vm6, %v2557_v21, %v2558_v45  ;;  %v3064_v33 = vadd.f32 %v15045_v30, %v3041_v22 }
 0x26f   :  { %1808 = vst.msk [vmem:[#allocation3 + $0x2e0] sm:$0xff] %vm748_vm7, %v1766_v51  ;;  %v2677_v0 = vpop.permute.xlu0 %2676  ;;  %v15062_v1 = vpop.f32.mrb[60].mxu0  ;;  %v2209_v36 = vadd.f32 %v2165_v7, %v2032_v28  ;;  %v2827_v32 = vrot.slane %v2754_v54, 1  ;;  %v13795_v53 = vld [vmem:[%s18149_s1 + $0x140] ss:$12 sps:$4 sm:$0xff]   ;;  %v2983_v39 = vrot.slane %v2917_v60, 2  ;;  %v2394_v41 = vsel %vm1932_vm5, %v2392_v27, %v2393_v8 }
 0x270   :  { %1806 = vst [vmem:[#allocation3 + $0x2d0] sm:$0xff] %v15062_v1  ;;  %v15068_v5 = vpop.f32.mrb[61].mxu0  ;;  %v13221_v34 = vpop.f32.mrb[61].mxu1  ;;  %2003 = vrot.lane.b32.xlu0 %v1968_v62, %s14100_s16  ;;  %v2722_v37 = vadd.f32 %v2677_v0, %v2625_v26  ;;  %v15099_v43 = vpack.c.bf16 %v15078_v25, %v15078_v25  ;;  %v1892_v52 = vld [vmem:[#allocation3 + $0x2a0] sm:$0xfe]  ;;  %v2982_v59 = vrot.slane %v2916_v57, 2 }
 0x271   :  { %1807 = vst [vmem:[#allocation3 + $0x2d8] sm:$0xff] %v15068_v5  ;;  %v1687_v10 = vpop.f32.mrb[62].mxu0  ;;  %v1769_v12 = vpop.f32.mrb[62].mxu1  ;;  %v1893_v55 = vld [vmem:[#allocation3 + $0x2b8] sm:$0x1]  ;;  %v2829_v61 = vsel %vm1932_vm5, %v2827_v32, %v2828_v24  ;;  %v15108_v3 = vmax.f32 %v3064_v33, 0.0 }
 0x272   :  { %1809 = vst [vmem:[#allocation3 + $0x2e8] sm:$0xff] %v1687_v10  ;;  %1811 = vst.msk [vmem:[#allocation3 + $0x2f8] sm:$0xff] %vm748_vm7, %v1769_v12  ;;  %v13222_v11 = vpop.f32.mrb[63].mxu1  ;;  %v2262_v16 = vpop.permute.xlu1 %2261  ;;  %2275 = vrot.lane.b32.xlu1 %v15003_v29, %s14102_s22  ;;  %v13794_v29 = vld [vmem:[%s18149_s1 + $0x128] ss:$12 sps:$4 sm:$0xff]   ;;  %v1970_v2 = vrot.slane %v1893_v55, 1  ;;  %v2984_v50 = vsel %vm2109_vm6, %v2982_v59, %v2983_v39 }
 0x273   :  { %v1689_v20 = vpop.f32.mrb[63].mxu0  ;;  %v2853_v9 = vpop.permute.xlu0 %2852  ;;  %v2306_v42 = vadd.f32 %v2262_v16, %v2209_v36  ;;  %13248 = vmatpush3.bf16.msra.mxu1 %v13794_v29  ;;  %v15105_v56 = vld [vmem:[#allocation3 + $0x118] sm:$0x3]  ;;  %v2486_v63 = vld [vmem:[#allocation3 + $0x2c0] sm:$0x3]  ;;  %v1969_v12 = vrot.slane %v1892_v52, 1  ;;  %v15125_v21 = vpack.c.bf16 %v15108_v3, %v15108_v3 }
 0x274   :  { %1810 = vst [vmem:[#allocation3 + $0x2f0] sm:$0xff] %v1689_v20  ;;  %2180 = vrot.lane.b32.xlu0 %v2145_v48, %s14101_s5  ;;  %13249 = vmatprep.subr.bf16.mxu1 %v18158_v23  ;;  %v2898_v44 = vadd.f32 %v2853_v9, %v2722_v37  ;;  %v2485_v49 = vld [vmem:[#allocation3 + $0x2a8] sm:$0xfc]  ;;  %v2757_v4 = vld [vmem:[#allocation3 + $0x2c0] sm:$0x1]  ;;  %v2561_v45 = vrot.slane %v2486_v63, 2 }
 0x275   :  { %v2450_v35 = vadd.f32 %v2394_v41, %v2306_v42  ;;  %v13796_v34 = vld [vmem:[%s18149_s1 + $0x158] ss:$12 sps:$4 sm:$0xff]   ;;  %v2328_v16 = vld [vmem:[#allocation3 + $0x110] sm:$0x1]  ;;  %v3193_v18 = vshrl.u32 %v15099_v43, 16  ;;  %v1971_v54 = vsel %vm1932_vm5, %v1969_v12, %v1970_v2  ;;  %v2986_v20 = vrot.slane %v15105_v56, 2 }
 0x276   :  { %v1990_v38 = vpop.permute.xlu1 %1989  ;;  %2595 = vrot.lane.b32.xlu1 %v2559_v15, %s14100_s16  ;;  %v15088_v58 = vpop.f32.mrb[64].mxu0  ;;  %v1840_v6 = vld [vmem:[#allocation3 + $0xc0] sm:$0xff]  ;;  %v3042_v22 = vadd.f32 %v2984_v50, %v2898_v44  ;;  %v2560_v9 = vrot.slane %v2485_v49, 2  ;;  %v2831_v48 = vrot.slane %v2757_v4, 1  ;;  %v2327_v42 = vld [vmem:[#allocation3 + $0xf8] sm:$0xfe] }
 0x277   :  { %1812 = vst [vmem:[#allocation3 + $0x300] sm:$0xff] %v15088_v58  ;;  %v1774_v40 = vpop.f32.mrb[64].mxu1  ;;  %v2582_v19 = vpop.permute.xlu0 %2581  ;;  %13250 = vmatpush3.bf16.msra.mxu1 %v13795_v53  ;;  %v2918_v13 = vld [vmem:[#allocation3 + $0x100] sm:$0xfc]  ;;  %v2033_v36 = vadd.f32 %v1990_v38, %v1840_v6  ;;  %v2396_v32 = vrot.slane %v2328_v16, 1  ;;  %v3195_v39 = vrot.slane %v3193_v18, 7 }
 0x278   :  { %1814 = vst.msk [vmem:[#allocation3 + $0x310] sm:$0xff] %vm748_vm7, %v1774_v40  ;;  %v15102_v7 = vpop.f32.mrb[65].mxu0  ;;  %v13225_v51 = vpop.f32.mrb[65].mxu1  ;;  %2866 = vrot.lane.b32.xlu0 %v2829_v61, %s14102_s22  ;;  %13251 = vmatprep.subr.bf16.mxu1 %v18158_v23  ;;  %v2626_v11 = vadd.f32 %v2582_v19, %v2450_v35  ;;  %v2985_v29 = vrot.slane %v2918_v13, 2  ;;  %v2562_v15 = vsel %vm2109_vm6, %v2560_v9, %v2561_v45  ;;  %v2395_v35 = vrot.slane %v2327_v42, 1 }
 0x279   :  { %1813 = vst [vmem:[#allocation3 + $0x308] sm:$0xff] %v15102_v7  ;;  %v1697_v0 = vpop.f32.mrb[66].mxu0  ;;  %v1777_v62 = vpop.f32.mrb[66].mxu1  ;;  %v3065_v33 = vadd.f32 %v15045_v30, %v3042_v22  ;;  %v3196_v51 = vshll.u32 %v15099_v43, 16  ;;  %v2758_v59 = vld [vmem:[#allocation3 + $0x2d8] sm:$0xfe] }
 0x27a   :  { %1815 = vst [vmem:[#allocation3 + $0x318] sm:$0xff] %v1697_v0  ;;  %1817 = vst.msk [vmem:[#allocation3 + $0x328] sm:$0xff] %vm748_vm7, %v1777_v62  ;;  %v13226_v47 = vpop.f32.mrb[67].mxu1  ;;  %v2167_v28 = vpop.permute.xlu1 %2166  ;;  %2692 = vrot.lane.b32.xlu1 %v15033_v14, %s14101_s5  ;;  %v2756_v14 = vld [vmem:[#allocation3 + $0x2a8] sm:$0xfe]  ;;  %v2987_v19 = vsel %vm2109_vm6, %v2985_v29, %v2986_v20  ;;  %v3200_v62 = vshrl.u32 %v15125_v21, 16  ;;  %v2397_v49 = vsel %vm1932_vm5, %v2395_v35, %v2396_v32 }
 0x27b   :  { %v1699_v46 = vpop.f32.mrb[67].mxu0  ;;  %v2679_v10 = vpop.permute.xlu0 %2678  ;;  %v2210_v8 = vadd.f32 %v2167_v28, %v2033_v36  ;;  %13252 = vmatpush3.bf16.msra.mxu1 %v13796_v34  ;;  %v2830_v27 = vrot.slane %v2756_v14, 1  ;;  %v2759_v40 = vld [vmem:[#allocation3 + $0x2f0] sm:$0x1]  ;;  %v2070_v0 = vld [vmem:[#allocation3 + $0x2b8] sm:$0x3]  ;;  %v3198_v50 = vor.u32 %v3196_v51, %v3195_v39 }
 0x27c   :  { %1816 = vst [vmem:[#allocation3 + $0x320] sm:$0xff] %v1699_v46  ;;  %2277 = vrot.lane.b32.xlu0 %v15024_v17, %s14102_s22  ;;  %v2723_v24 = vadd.f32 %v2679_v10, %v2626_v11  ;;  %13253 = vmatprep.subr.bf16.mxu1 %v18158_v23  ;;  %v2834_v28 = vrot.slane %v2759_v40, 1  ;;  %v15146_v4 = vld [vmem:[#allocation3 + $0x130] sm:$0xfc]  ;;  %v15148_v43 = vmax.f32 %v3065_v33, 0.0  ;;  %v2833_v10 = vrot.slane %v2758_v59, 1 }
 0x27d   :  { %v2832_v44 = vsel %vm1932_vm5, %v2830_v27, %v2831_v48  ;;  %v2069_v6 = vld [vmem:[#allocation3 + $0x2a0] sm:$0xfc]  ;;  %v13797_v46 = vld [vmem:[%s18149_s1 + $0x170] ss:$12 sps:$4 sm:$0xff]   ;;  %v2147_v12 = vrot.slane %v2070_v0, 2  ;;  %v3202_v11 = vrot.slane %v3200_v62, 7 }
 0x27e   :  { %v2264_v26 = vpop.permute.xlu1 %2263  ;;  %2005 = vrot.lane.b32.xlu1 %v1971_v54, %s14100_s16  ;;  %v15128_v17 = vpop.f32.mrb[68].mxu0  ;;  %v2921_v36 = vld [vmem:[#allocation3 + $0x148] sm:$0x3]  ;;  %v15159_v14 = vld [vmem:[#allocation3 + $0x140] sm:$0x1]  ;;  %v2835_v54 = vsel %vm1932_vm5, %v2833_v10, %v2834_v28  ;;  %v2146_v20 = vrot.slane %v2069_v6, 2  ;;  %v15166_v48 = vpack.c.bf16 %v15148_v43, %v15148_v43 }
 0x27f   :  { %1818 = vst [vmem:[#allocation3 + $0x330] sm:$0xff] %v15128_v17  ;;  %v1782_v60 = vpop.f32.mrb[68].mxu1  ;;  %v2855_v57 = vpop.permute.xlu0 %2854  ;;  %v2307_v37 = vadd.f32 %v2264_v26, %v2210_v8  ;;  %13254 = vmatpush3.bf16.msra.mxu1 %v13797_v46  ;;  %v2988_v9 = vrot.slane %v15146_v4, 2  ;;  %v2329_v29 = vld [vmem:[#allocation3 + $0x128] sm:$0xfe]  ;;  %v2989_v33 = vrot.slane %v2921_v36, 2 }
 0x280   :  { %1820 = vst.msk [vmem:[#allocation3 + $0x340] sm:$0xff] %vm748_vm7, %v1782_v60  ;;  %v2899_v38 = vadd.f32 %v2855_v57, %v2723_v24  ;;  %v15135_v55 = vpop.f32.mrb[69].mxu0  ;;  %v13229_v53 = vpop.f32.mrb[69].mxu1  ;;  %2597 = vrot.lane.b32.xlu0 %v2562_v15, %s14100_s16  ;;  %13275 = vmatprep.subr.bf16.mxu1 %v18158_v23  ;;  %v3203_v60 = vshll.u32 %v15125_v21, 16  ;;  %v1895_v57 = vld [vmem:[#allocation3 + $0x2e8] sm:$0x1]  ;;  %v2148_v32 = vsel %vm2109_vm6, %v2146_v20, %v2147_v12 }
 0x281   :  { %1819 = vst [vmem:[#allocation3 + $0x338] sm:$0xff] %v15135_v55  ;;  %v1707_v41 = vpop.f32.mrb[70].mxu0  ;;  %v1785_v61 = vpop.f32.mrb[70].mxu1  ;;  %v2451_v34 = vadd.f32 %v2397_v49, %v2307_v37  ;;  %v2399_v37 = vrot.slane %v15159_v14, 1  ;;  %v3207_v0 = vshrl.u32 %v15166_v48, 16  ;;  %v2990_v49 = vsel %vm2109_vm6, %v2988_v9, %v2989_v33 }
 0x282   :  { %v3043_v52 = vadd.f32 %v2987_v19, %v2899_v38  ;;  %1821 = vst [vmem:[#allocation3 + $0x348] sm:$0xff] %v1707_v41  ;;  %1823 = vst.msk [vmem:[#allocation3 + $0x358] sm:$0xff] %vm748_vm7, %v1785_v61  ;;  %v13230_v56 = vpop.f32.mrb[71].mxu1  ;;  %v1992_v63 = vpop.permute.xlu1 %1991  ;;  %2868 = vrot.lane.b32.xlu1 %v2832_v44, %s14102_s22  ;;  %v1894_v38 = vld [vmem:[#allocation3 + $0x2d0] sm:$0xfe]  ;;  %13256 = vmatmul.mubr.bf16.vlgmr.msra.gmra.mrb[80].mxu1 %v14933_v31  ;;  %v3205_v41 = vor.u32 %v3203_v60, %v3202_v11 }
 0x283   :  { %v1709_v2 = vpop.f32.mrb[71].mxu0  ;;  %v2584_v47 = vpop.permute.xlu0 %2583  ;;  %v2487_v61 = vld [vmem:[#allocation3 + $0x2d8] sm:$0xfc]  ;;  %v2488_v44 = vld [vmem:[#allocation3 + $0x2f0] sm:$0x3]  ;;  %13259 = vmatprep.mubr.msk.bf16.mxu1 %vm14098_vm0, %v18158_v23  ;;  %v1972_v28 = vrot.slane %v1894_v38, 1 }
 0x284   :  { %1822 = vst [vmem:[#allocation3 + $0x350] sm:$0xff] %v1709_v2  ;;  %2694 = vrot.lane.b32.xlu0 %v15068_v5, %s14101_s5  ;;  %v3066_v13 = vadd.f32 %v15045_v30, %v3043_v52  ;;  %v1841_v5 = vld [vmem:[#allocation3 + $0xf0] sm:$0xff]  ;;  %v2627_v24 = vadd.f32 %v2584_v47, %v2451_v34  ;;  %v1973_v52 = vrot.slane %v1895_v57, 1  ;;  %v2072_v31 = vld [vmem:[#allocation3 + $0x2e8] sm:$0x3]  ;;  %v2398_v47 = vrot.slane %v2329_v29, 1 }
 0x285   :  { %v2034_v8 = vadd.f32 %v1992_v63, %v1841_v5  ;;  %v13798_v56 = vld [vmem:[%s18149_s1 + $0xc0] ss:$12 sps:$4 sm:$0xff]   ;;  %v15191_v62 = vld [vmem:[%s18149_s1 + $0xc4] ss:$12 sps:$4 sm:$0xff]   ;;  %v13801_v2 = vld [vmem:[%s18149_s1 + $0xc8] ss:$12 sps:$4 sm:$0xff]  }
 0x286   :  { %v2169_v45 = vpop.permute.xlu1 %2168  ;;  %3304 = vrot.lane.b32.xlu1 %v3198_v50, %s14102_s22  ;;  %v15157_v22 = vpop.f32.mrb[72].mxu0  ;;  %v15177_v53 = vmax.f32 %v3066_v13, 0.0  ;;  %v2564_v4 = vrot.slane %v2488_v44, 2  ;;  %v2563_v46 = vrot.slane %v2487_v61, 2  ;;  %v2071_v10 = vld [vmem:[#allocation3 + $0x2d0] sm:$0xfc]  ;;  %3919 = vmatprep.subr.bf16.mxu0 %v15191_v62  ;;  %v1974_v11 = vsel %vm1932_vm5, %v1972_v28, %v1973_v52 }
 0x287   :  { %v1790_v16 = vpop.f32.mrb[72].mxu1  ;;  %v2681_v18 = vpop.permute.xlu0 %2680  ;;  %v2211_v39 = vadd.f32 %v2169_v45, %v2034_v8  ;;  %v13804_v13 = vld [vmem:[%s18149_s1 + $0xdc] ss:$12 sps:$4 sm:$0xff]   ;;  %v2400_v45 = vsel %vm1932_vm5, %v2398_v47, %v2399_v37  ;;  %v2150_v14 = vrot.slane %v2072_v31, 2  ;;  %3920 = vmatpush1.bf16.msra.mxu0 %v13798_v56  ;;  %13276 = vmatpush3.bf16.msra.mxu1 %v13801_v2  ;;  %v3209_v20 = vrot.slane %v3207_v0, 7  ;;  %v1842_v8 = vld [vmem:[#allocation3 + $0x120] sm:$0xff] }
 0x288   :  { %1826 = vst.msk [vmem:[#allocation3 + $0x370] sm:$0xff] %vm748_vm7, %v1790_v16  ;;  %v15169_v26 = vpop.f32.mrb[73].mxu0  ;;  %v13233_v42 = vpop.f32.mrb[73].mxu1  ;;  %2870 = vrot.lane.b32.xlu0 %v2835_v54, %s14102_s22  ;;  %v2724_v40 = vadd.f32 %v2681_v18, %v2627_v24  ;;  %v15199_v34 = vpack.c.bf16 %v15177_v53, %v15177_v53  ;;  %v13805_v16 = vld [vmem:[%s18149_s1 + $0xe0] ss:$12 sps:$4 sm:$0xff]   ;;  %3921 = vmatprep.subr.bf16.mxu0 %v13804_v13  ;;  %v3210_v57 = vshll.u32 %v15166_v48, 16 }
 0x289   :  { %1825 = vst [vmem:[#allocation3 + $0x368] sm:$0xff] %v15169_v26  ;;  %v1717_v15 = vpop.f32.mrb[74].mxu0  ;;  %v1793_v27 = vpop.f32.mrb[74].mxu1  ;;  %v2565_v24 = vsel %vm2109_vm6, %v2563_v46, %v2564_v4  ;;  %v2149_v42 = vrot.slane %v2071_v10, 2  ;;  %13277 = vmatprep.subr.bf16.mxu1 %v18158_v23  ;;  %v2922_v38 = vld [vmem:[#allocation3 + $0x160] sm:$0xfc] }
 0x28a   :  { %1829 = vst.msk [vmem:[#allocation3 + $0x388] sm:$0xff] %vm748_vm7, %v1793_v27  ;;  %v13234_v21 = vpop.f32.mrb[75].mxu1  ;;  %v2266_v19 = vpop.permute.xlu1 %2265  ;;  %2182 = vrot.lane.b32.xlu1 %v2148_v32, %s14101_s5  ;;  %v2923_v15 = vld [vmem:[#allocation3 + $0x178] sm:$0x3]  ;;  %v3214_v27 = vshrl.u32 %v15199_v34, 16  ;;  %v2991_v0 = vrot.slane %v2922_v38, 2 }
 0x28b   :  { %v1719_v35 = vpop.f32.mrb[75].mxu0  ;;  %v2857_v51 = vpop.permute.xlu0 %2856  ;;  %v2308_v63 = vadd.f32 %v2266_v19, %v2211_v39  ;;  %v15228_v32 = vld [vmem:[%s18149_s1 + $0xf4] ss:$12 sps:$4 sm:$0xff]   ;;  %v2151_v37 = vsel %vm2109_vm6, %v2149_v42, %v2150_v14  ;;  %13278 = vmatpush3.bf16.msra.mxu1 %v13805_v16  ;;  %v13806_v39 = vld [vmem:[%s18149_s1 + $0xf0] ss:$12 sps:$4 sm:$0xff]   ;;  %v3217_v46 = vshll.u32 %v15199_v34, 16 }
 0x28c   :  { %1828 = vst [vmem:[#allocation3 + $0x380] sm:$0xff] %v1719_v35  ;;  %v2900_v59 = vadd.f32 %v2857_v51, %v2724_v40  ;;  %3306 = vrot.lane.b32.xlu0 %v3205_v41, %s14102_s22  ;;  %v13809_v48 = vld [vmem:[%s18149_s1 + $0xf8] ss:$12 sps:$4 sm:$0xff]   ;;  %v3212_v41 = vor.u32 %v3210_v57, %v3209_v20  ;;  %v2332_v61 = vld [vmem:[#allocation3 + $0x170] sm:$0x1]  ;;  %v2992_v35 = vrot.slane %v2923_v15, 2  ;;  %13279 = vmatprep.subr.bf16.mxu1 %v18158_v23 }
 0x28d   :  { %v2452_v54 = vadd.f32 %v2400_v45, %v2308_v63  ;;  %v15244_v44 = vld [vmem:[%s18149_s1 + $0x10c] ss:$12 sps:$4 sm:$0xff]   ;;  %v3216_v63 = vrot.slane %v3214_v27, 7  ;;  %v15251_v47 = vld [vmem:[%s18149_s1 + $0x108] ss:$12 sps:$4 sm:$0xff]  }
 0x28e   :  { %v3044_v50 = vadd.f32 %v2990_v49, %v2900_v59  ;;  %v1994_v6 = vpop.permute.xlu1 %1993  ;;  %2279 = vrot.lane.b32.xlu1 %v15062_v1, %s14102_s22  ;;  %v1723_v12 = vpop.f32.mrb[76].mxu0  ;;  %v13802_v1 = vld [vmem:[%s18149_s1 + $0xd8] ss:$12 sps:$4 sm:$0xff]   ;;  %v2761_v59 = vld [vmem:[#allocation3 + $0x320] sm:$0x1]  ;;  %v2402_v49 = vrot.slane %v2332_v61, 1  ;;  %v2993_v13 = vsel %vm2109_vm6, %v2991_v0, %v2992_v35 }
 0x28f   :  { %v2586_v36 = vpop.permute.xlu0 %2585  ;;  %v15209_v5 = vpop.f32.mrb[77].mxu0  ;;  %3922 = vmatpush1.bf16.msra.mxu0 %v13802_v1  ;;  %v2035_v21 = vadd.f32 %v1994_v6, %v1842_v8  ;;  %v2331_v56 = vld [vmem:[#allocation3 + $0x158] sm:$0xfe]  ;;  %13280 = vmatpush3.bf16.msra.mxu1 %v13809_v48  ;;  %v2760_v10 = vld [vmem:[#allocation3 + $0x308] sm:$0xfe] }
 0x290   :  { %v3067_v18 = vadd.f32 %v15045_v30, %v3044_v50  ;;  %2007 = vrot.lane.b32.xlu0 %v1974_v11, %s14100_s16  ;;  %1831 = vst [vmem:[#allocation3 + $0x398] sm:$0xff] %v15209_v5  ;;  %v1727_v9 = vpop.f32.mrb[78].mxu0  ;;  %v2628_v19 = vadd.f32 %v2586_v36, %v2452_v54  ;;  %3923 = vmatprep.subr.bf16.mxu0 %v15228_v32  ;;  %v13813_v28 = vld [vmem:[%s18149_s1 + $0x110] ss:$12 sps:$4 sm:$0xff]   ;;  %v2490_v12 = vld [vmem:[#allocation3 + $0x320] sm:$0x3] }
 0x291   :  { %v1729_v60 = vpop.f32.mrb[79].mxu0  ;;  %v2401_v45 = vrot.slane %v2331_v56, 1  ;;  %v2837_v36 = vrot.slane %v2761_v59, 1  ;;  %13281 = vmatprep.subr.bf16.mxu1 %v18158_v23  ;;  %v15269_v11 = vld [vmem:[%s18149_s1 + $0x124] ss:$12 sps:$4 sm:$0xff]   ;;  %v2836_v20 = vrot.slane %v2760_v10, 1 }
 0x292   :  { %v2171_v29 = vpop.permute.xlu1 %2170  ;;  %2599 = vrot.lane.b32.xlu1 %v2565_v24, %s14100_s16  ;;  %1834 = vst [vmem:[#allocation3 + $0x3b0] sm:$0xff] %v1729_v60  ;;  %v15237_v40 = vmax.f32 %v3067_v18, 0.0  ;;  %v2489_v34 = vld [vmem:[#allocation3 + $0x308] sm:$0xfc]  ;;  %v1897_v16 = vld [vmem:[#allocation3 + $0x318] sm:$0x1] }
 0x293   :  { %v2683_v33 = vpop.permute.xlu0 %2682  ;;  %v2212_v51 = vadd.f32 %v2171_v29, %v2035_v21  ;;  %3924 = vmatpush1.bf16.msra.mxu0 %v13806_v39  ;;  %v2403_v18 = vsel %vm1932_vm5, %v2401_v45, %v2402_v49  ;;  %v2567_v9 = vrot.slane %v2490_v12, 2  ;;  %13282 = vmatpush3.bf16.msra.mxu1 %v13813_v28  ;;  %v15278_v8 = vld [vmem:[%s18149_s1 + $0x120] ss:$12 sps:$4 sm:$0xff]   ;;  %v15290_v57 = vld [vmem:[%s18149_s1 + $0x13c] ss:$12 sps:$4 sm:$0xff]   ;;  %v2838_v15 = vsel %vm1932_vm5, %v2836_v20, %v2837_v36  ;;  %v1843_v39 = vld [vmem:[#allocation3 + $0x150] sm:$0xff] }
 0x294   :  { %2184 = vrot.lane.b32.xlu0 %v2151_v37, %s14101_s5  ;;  %v2725_v52 = vadd.f32 %v2683_v33, %v2628_v19  ;;  %v15258_v4 = vpack.c.bf16 %v15237_v40, %v15237_v40  ;;  %3925 = vmatprep.subr.bf16.mxu0 %v15244_v44  ;;  %v1896_v60 = vld [vmem:[#allocation3 + $0x300] sm:$0xfe]  ;;  %v2566_v27 = vrot.slane %v2489_v34, 2  ;;  %v1976_v33 = vrot.slane %v1897_v16, 1  ;;  %v2334_v37 = vld [vmem:[#allocation3 + $0x1a0] sm:$0x1] }
 0x295   :  { %13283 = vmatprep.subr.bf16.mxu1 %v18158_v23  ;;  %v2924_v21 = vld [vmem:[#allocation3 + $0x190] sm:$0xfc]  ;;  %v2925_v19 = vld [vmem:[#allocation3 + $0x1a8] sm:$0x3]  ;;  %v13821_v56 = vld [vmem:[%s18149_s1 + $0x140] ss:$12 sps:$4 sm:$0xff]  }
 0x296   :  { %v2268_v31 = vpop.permute.xlu1 %2267  ;;  %3308 = vrot.lane.b32.xlu1 %v3212_v41, %s14102_s22  ;;  %v3221_v29 = vshrl.u32 %v15258_v4, 16  ;;  %v2333_v41 = vld [vmem:[#allocation3 + $0x188] sm:$0xfe]  ;;  %v2405_v0 = vrot.slane %v2334_v37, 1  ;;  %v2763_v49 = vld [vmem:[#allocation3 + $0x350] sm:$0x1] }
 0x297   :  { %v2859_v2 = vpop.permute.xlu0 %2858  ;;  %v2309_v50 = vadd.f32 %v2268_v31, %v2212_v51  ;;  %3926 = vmatpush1.bf16.msra.mxu0 %v15251_v47  ;;  %v2568_v51 = vsel %vm2109_vm6, %v2566_v27, %v2567_v9  ;;  %v15302_v31 = vld [vmem:[%s18149_s1 + $0x138] ss:$12 sps:$4 sm:$0xff]   ;;  %v15316_v28 = vld [vmem:[%s18149_s1 + $0x154] ss:$12 sps:$4 sm:$0xff]   ;;  %v2404_v10 = vrot.slane %v2333_v41, 1  ;;  %v2840_v20 = vrot.slane %v2763_v49, 1 }
 0x298   :  { %v2901_v6 = vadd.f32 %v2859_v2, %v2725_v52  ;;  %2281 = vrot.lane.b32.xlu0 %v15088_v58, %s14102_s22  ;;  %v3219_v58 = vor.u32 %v3217_v46, %v3216_v63  ;;  %3927 = vmatprep.subr.bf16.mxu0 %v15269_v11  ;;  %v1975_v52 = vrot.slane %v1896_v60, 1  ;;  %v3223_v2 = vrot.slane %v3221_v29, 7  ;;  %v2926_v12 = vld [vmem:[#allocation3 + $0x1c0] sm:$0xfc]  ;;  %v15327_v9 = vld [vmem:[%s18149_s1 + $0x150] ss:$12 sps:$4 sm:$0xff]  }
 0x299   :  { %v2453_v42 = vadd.f32 %v2403_v18, %v2309_v50  ;;  %v2995_v46 = vrot.slane %v2925_v19, 2  ;;  %v2994_v18 = vrot.slane %v2924_v21, 2  ;;  %v2073_v60 = vld [vmem:[#allocation3 + $0x300] sm:$0xfc]  ;;  %v15339_v29 = vld [vmem:[%s18149_s1 + $0x16c] ss:$12 sps:$4 sm:$0xff]  }
 0x29a   :  { %v3045_v14 = vadd.f32 %v2993_v13, %v2901_v6  ;;  %v1996_v1 = vpop.permute.xlu1 %1995  ;;  %2696 = vrot.lane.b32.xlu1 %v15102_v7, %s14101_s5  ;;  %v13817_v7 = vld [vmem:[%s18149_s1 + $0x128] ss:$12 sps:$4 sm:$0xff]   ;;  %v1977_v6 = vsel %vm1932_vm5, %v1975_v52, %v1976_v33  ;;  %v2927_v13 = vld [vmem:[#allocation3 + $0x1d8] sm:$0x3] }
 0x29b   :  { %v2588_v54 = vpop.permute.xlu0 %2587  ;;  %v2036_v61 = vadd.f32 %v1996_v1, %v1843_v39  ;;  %3928 = vmatpush1.bf16.msra.mxu0 %v15278_v8  ;;  %13284 = vmatpush3.bf16.msra.mxu1 %v13817_v7  ;;  %v2762_v1 = vld [vmem:[#allocation3 + $0x338] sm:$0xfe]  ;;  %v2998_v21 = vrot.slane %v2927_v13, 2  ;;  %v15349_v52 = vld [vmem:[%s18149_s1 + $0x168] ss:$12 sps:$4 sm:$0xff]  }
 0x29c   :  { %v3068_v24 = vadd.f32 %v15045_v30, %v3045_v14  ;;  %3310 = vrot.lane.b32.xlu0 %v3219_v58, %s14102_s22  ;;  %v2629_v59 = vadd.f32 %v2588_v54, %v2453_v42  ;;  %3929 = vmatprep.subr.bf16.mxu0 %v15290_v57  ;;  %v3224_v14 = vshll.u32 %v15258_v4, 16  ;;  %v2074_v58 = vld [vmem:[#allocation3 + $0x318] sm:$0x3]  ;;  %v2839_v33 = vrot.slane %v2762_v1, 1  ;;  %v1898_v13 = vld [vmem:[#allocation3 + $0x330] sm:$0xfe] }
 0x29d   :  { %13285 = vmatprep.subr.bf16.mxu1 %v18158_v23  ;;  %v13825_v4 = vld [vmem:[%s18149_s1 + $0x158] ss:$12 sps:$4 sm:$0xff]   ;;  %v2153_v37 = vrot.slane %v2074_v58, 2  ;;  %v2076_v58 = vld [vmem:[#allocation3 + $0x348] sm:$0x3] }
 0x29e   :  { %v15294_v38 = vmax.f32 %v3068_v24, 0.0  ;;  %v2173_v48 = vpop.permute.xlu1 %2172  ;;  %2872 = vrot.lane.b32.xlu1 %v2838_v15, %s14102_s22  ;;  %v2406_v24 = vsel %vm1932_vm5, %v2404_v10, %v2405_v0  ;;  %v3226_v42 = vor.u32 %v3224_v14, %v3223_v2  ;;  %v2996_v15 = vsel %vm2109_vm6, %v2994_v18, %v2995_v46  ;;  %v1899_v2 = vld [vmem:[#allocation3 + $0x348] sm:$0x1]  ;;  %v2491_v1 = vld [vmem:[#allocation3 + $0x338] sm:$0xfc] }
 0x29f   :  { %v2685_v35 = vpop.permute.xlu0 %2684  ;;  %v2213_v50 = vadd.f32 %v2173_v48, %v2036_v61  ;;  %3930 = vmatpush1.bf16.msra.mxu0 %v15302_v31  ;;  %13286 = vmatpush3.bf16.msra.mxu1 %v13821_v56  ;;  %v2997_v48 = vrot.slane %v2926_v12, 2  ;;  %v13829_v56 = vld [vmem:[%s18149_s1 + $0x170] ss:$12 sps:$4 sm:$0xff]  }
 0x2a0   :  { %v15309_v63 = vpack.c.bf16 %v15294_v38, %v15294_v38  ;;  %2601 = vrot.lane.b32.xlu0 %v2568_v51, %s14100_s16  ;;  %v2726_v45 = vadd.f32 %v2685_v35, %v2629_v59  ;;  %3931 = vmatprep.subr.bf16.mxu0 %v15316_v28  ;;  %v2841_v35 = vsel %vm1932_vm5, %v2839_v33, %v2840_v20  ;;  %v2152_v51 = vrot.slane %v2073_v60, 2  ;;  %v2075_v20 = vld [vmem:[#allocation3 + $0x330] sm:$0xfc] }
 0x2a1   :  { %13287 = vmatprep.subr.bf16.mxu1 %v18158_v23  ;;  %v2999_v46 = vsel %vm2109_vm6, %v2997_v48, %v2998_v21  ;;  %v2569_v60 = vrot.slane %v2491_v1, 2 }
 0x2a2   :  { %v2270_v36 = vpop.permute.xlu1 %2269  ;;  %2009 = vrot.lane.b32.xlu1 %v1977_v6, %s14100_s16  ;;  %v3228_v34 = vshrl.u32 %v15309_v63, 16  ;;  %v3231_v0 = vshll.u32 %v15309_v63, 16  ;;  %v1979_v63 = vrot.slane %v1899_v2, 1 }
 0x2a3   :  { %v2310_v16 = vadd.f32 %v2270_v36, %v2213_v50  ;;  %v2861_v54 = vpop.permute.xlu0 %2860  ;;  %3932 = vmatpush1.bf16.msra.mxu0 %v15327_v9  ;;  %13288 = vmatpush3.bf16.msra.mxu1 %v13825_v4  ;;  %v2154_v50 = vsel %vm2109_vm6, %v2152_v51, %v2153_v37  ;;  %v2764_v51 = vld [vmem:[#allocation3 + $0x368] sm:$0xfe] }
 0x2a4   :  { %v2902_v7 = vadd.f32 %v2861_v54, %v2726_v45  ;;  %2698 = vrot.lane.b32.xlu0 %v15135_v55, %s14101_s5  ;;  %v3230_v19 = vrot.slane %v3228_v34, 7  ;;  %3933 = vmatprep.subr.bf16.mxu0 %v15339_v29  ;;  %v2492_v45 = vld [vmem:[#allocation3 + $0x350] sm:$0x3]  ;;  %v1798_v54 = vpop.f32.mrb[76].mxu1  ;;  %v2842_v2 = vrot.slane %v2764_v51, 1 }
 0x2a5   :  { %v2454_v27 = vadd.f32 %v2406_v24, %v2310_v16  ;;  %13289 = vmatprep.subr.bf16.mxu1 %v18158_v23  ;;  %v1978_v16 = vrot.slane %v1898_v13, 1  ;;  %v2570_v18 = vrot.slane %v2492_v45, 2  ;;  %1832 = vst.msk [vmem:[#allocation3 + $0x3a0] sm:$0xff] %vm748_vm7, %v1798_v54 }
 0x2a6   :  { %v3046_v39 = vadd.f32 %v2996_v15, %v2902_v7  ;;  %v2590_v55 = vpop.permute.xlu1 %2589  ;;  %3312 = vrot.lane.b32.xlu1 %v3226_v42, %s14102_s22  ;;  %v3233_v12 = vor.u32 %v3231_v0, %v3230_v19  ;;  %v13237_v7 = vpop.f32.mrb[77].mxu1  ;;  %v2494_v0 = vld [vmem:[#allocation3 + $0x380] sm:$0x3] }
 0x2a7   :  { %v2630_v41 = vadd.f32 %v2590_v55, %v2454_v27  ;;  %v2687_v61 = vpop.permute.xlu0 %2686  ;;  %3934 = vmatpush1.bf16.msra.mxu0 %v15349_v52  ;;  %13290 = vmatpush3.bf16.msra.mxu1 %v13829_v56  ;;  %v1980_v42 = vsel %vm1932_vm5, %v1978_v16, %v1979_v63  ;;  %v1801_v15 = vpop.f32.mrb[78].mxu1 }
 0x2a8   :  { %v3069_v59 = vadd.f32 %v15045_v30, %v3046_v39  ;;  %2874 = vrot.lane.b32.xlu0 %v2841_v35, %s14102_s22  ;;  %4270 = vmatprep.subr.bf16.mxu0 %v15191_v62  ;;  %v2156_v62 = vrot.slane %v2076_v58, 2  ;;  %1835 = vst.msk [vmem:[#allocation3 + $0x3b8] sm:$0xff] %vm748_vm7, %v1801_v15  ;;  %v13238_v33 = vpop.f32.mrb[79].mxu1  ;;  %v2155_v39 = vrot.slane %v2075_v20, 2  ;;  %v2336_v20 = vld [vmem:[#allocation3 + $0x230] sm:$0x1] }
 0x2a9   :  { %v2727_v49 = vadd.f32 %v2687_v61, %v2630_v41  ;;  %13311 = vmatprep.subr.bf16.mxu1 %v18158_v23  ;;  %v2765_v41 = vld [vmem:[#allocation3 + $0x380] sm:$0x1] }
 0x2aa   :  { %v15360_v6 = vmax.f32 %v3069_v59, 0.0  ;;  %v2863_v10 = vpop.permute.xlu1 %2862  ;;  %2186 = vrot.lane.b32.xlu1 %v2154_v50, %s14101_s5  ;;  %v2157_v48 = vsel %vm2109_vm6, %v2155_v39, %v2156_v62  ;;  %v2843_v56 = vrot.slane %v2765_v41, 1  ;;  %v2766_v50 = vld [vmem:[#allocation3 + $0x398] sm:$0xfe] }
 0x2ab   :  { %v2903_v36 = vadd.f32 %v2863_v10, %v2727_v49  ;;  %v2493_v49 = vld [vmem:[#allocation3 + $0x368] sm:$0xfc]  ;;  %v2845_v13 = vrot.slane %v2766_v50, 1  ;;  %v1998_v63 = vpop.permute.xlu0 %1997 }
 0x2ac   :  { %v3182_v14 = vpack.c.bf16 %v15360_v6, %v15360_v6  ;;  %3314 = vrot.lane.b32.xlu0 %v3233_v12, %s14102_s22  ;;  %v2844_v10 = vsel %vm1932_vm5, %v2842_v2, %v2843_v56  ;;  %v2573_v12 = vrot.slane %v2494_v0, 2 }
 0x2ad   :  { %v3047_v34 = vadd.f32 %v2999_v46, %v2903_v36  ;;  %v2767_v46 = vld [vmem:[#allocation3 + $0x3b0] sm:$0x1] }
 0x2ae   :  { %2283 = vrot.lane.b32.xlu1 %v15128_v17, %s14102_s22  ;;  %v3235_v4 = vshrl.u32 %v3182_v14, 16  ;;  %v2571_v17 = vsel %vm2109_vm6, %v2569_v60, %v2570_v18  ;;  %v3238_v55 = vshll.u32 %v3182_v14, 16  ;;  %v2846_v45 = vrot.slane %v2767_v46, 1  ;;  %v2175_v1 = vpop.permute.xlu1 %2174 }
 0x2af   :  { %v3070_v24 = vadd.f32 %v15045_v30, %v3047_v34  ;;  %v1844_v34 = vld [vmem:[#allocation3 + $0x1e0] sm:$0xff] }
 0x2b0   :  { %2011 = vrot.lane.b32.xlu0 %v1980_v42, %s14100_s16  ;;  %v3237_v27 = vrot.slane %v3235_v4, 7  ;;  %v2847_v36 = vsel %vm1932_vm5, %v2845_v13, %v2846_v45  ;;  %v2037_v18 = vadd.f32 %v1998_v63, %v1844_v34  ;;  %v2340_v34 = vld [vmem:[#allocation3 + $0x290] sm:$0x1] }
 0x2b1   :  { %v15377_v37 = vmax.f32 %v3070_v24, 0.0  ;;  %v2408_v24 = vrot.slane %v2336_v20, 1 }
 0x2b2   :  { %2603 = vrot.lane.b32.xlu1 %v2571_v17, %s14100_s16  ;;  %v3240_v21 = vor.u32 %v3238_v55, %v3237_v27  ;;  %v2214_v7 = vadd.f32 %v2175_v1, %v2037_v18  ;;  %v1845_v27 = vld [vmem:[#allocation3 + $0x210] sm:$0xff]  ;;  %v15405_v1 = vld [vmem:[%s18150_s2] ss:$0 sm:$0xff] }
 0x2b3   :  { %v3183_v30 = vpack.c.bf16 %v15377_v37, %v15377_v37 }
 0x2b4   :  { %2188 = vrot.lane.b32.xlu0 %v2157_v48, %s14101_s5  ;;  %v2929_v48 = vld [vmem:[#allocation3 + $0x268] sm:$0x3] }
 0x2b5   :  { %v3242_v19 = vshrl.u32 %v3183_v30, 16  ;;  %v3245_v35 = vshll.u32 %v3183_v30, 16  ;;  %v2338_v30 = vld [vmem:[#allocation3 + $0x260] sm:$0x1] }
 0x2b6   :  { %3316 = vrot.lane.b32.xlu1 %v3240_v21, %s14102_s22  ;;  %v2411_v51 = vrot.slane %v2338_v30, 1 }
 0x2b7   :  { %v3244_v61 = vrot.slane %v3242_v19, 7 }
 0x2b8   :  { %2285 = vrot.lane.b32.xlu0 %v15157_v22, %s14102_s22  ;;  %v2572_v22 = vrot.slane %v2493_v49, 2 }
 0x2b9   :  { %v3247_v59 = vor.u32 %v3245_v35, %v3244_v61  ;;  %v2337_v61 = vld [vmem:[#allocation3 + $0x248] sm:$0xfe]  ;;  %v2928_v35 = vld [vmem:[#allocation3 + $0x250] sm:$0xfc] }
 0x2ba   :  { %2700 = vrot.lane.b32.xlu1 %v15169_v26, %s14101_s5  ;;  %v2574_v26 = vsel %vm2109_vm6, %v2572_v22, %v2573_v12  ;;  %v2410_v49 = vrot.slane %v2337_v61, 1  ;;  %v3000_v50 = vrot.slane %v2928_v35, 2 }
 0x2bc   :  { %3318 = vrot.lane.b32.xlu0 %v3247_v59, %s14102_s22  ;;  %v3001_v59 = vrot.slane %v2929_v48, 2  ;;  %v2412_v12 = vsel %vm1932_vm5, %v2410_v49, %v2411_v51 }
 0x2be   :  { %2876 = vrot.lane.b32.xlu1 %v2844_v10, %s14102_s22  ;;  %v3002_v22 = vsel %vm2109_vm6, %v3000_v50, %v3001_v59 }
 0x2c0   :  { %2702 = vrot.lane.b32.xlu0 %v15209_v5, %s14101_s5  ;;  %v2335_v5 = vld [vmem:[#allocation3 + $0x218] sm:$0xfe] }
 0x2c1   :  { %v2272_v14 = vpop.permute.xlu0 %2271  ;;  %v2407_v62 = vrot.slane %v2335_v5, 1  ;;  %v2930_v5 = vld [vmem:[#allocation3 + $0x280] sm:$0xfc] }
 0x2c2   :  { %2605 = vrot.lane.b32.xlu1 %v2574_v26, %s14100_s16  ;;  %v2311_v60 = vadd.f32 %v2272_v14, %v2214_v7  ;;  %v2339_v7 = vld [vmem:[#allocation3 + $0x278] sm:$0xfe]  ;;  %v3003_v30 = vrot.slane %v2930_v5, 2 }
 0x2c3   :  { %v2409_v33 = vsel %vm1932_vm5, %v2407_v62, %v2408_v24  ;;  %v2414_v24 = vrot.slane %v2340_v34, 1 }
 0x2c4   :  { %v2455_v55 = vadd.f32 %v2409_v33, %v2311_v60 }
 0x2c6   :  { %2878 = vrot.lane.b32.xlu1 %v2847_v36, %s14102_s22  ;;  %v1846_v36 = vld [vmem:[#allocation3 + $0x240] sm:$0xff] }
 0x2ce   :  { %v2000_v58 = vpop.permute.xlu0 %1999 }
 0x2cf   :  { %v2038_v39 = vadd.f32 %v2000_v58, %v1845_v27  ;;  %v1847_v27 = vld [vmem:[#allocation3 + $0x270] sm:$0xff] }
 0x2d0   :  { %v2592_v16 = vpop.permute.xlu1 %2591 }
 0x2d1   :  { %v2631_v19 = vadd.f32 %v2592_v16, %v2455_v55  ;;  %v2931_v16 = vld [vmem:[#allocation3 + $0x298] sm:$0x3]  ;;  %v2413_v55 = vrot.slane %v2339_v7, 1 }
 0x2d2   :  { %v2177_v54 = vpop.permute.xlu0 %2176  ;;  %v3004_v60 = vrot.slane %v2931_v16, 2 }
 0x2d3   :  { %v2215_v41 = vadd.f32 %v2177_v54, %v2038_v39  ;;  %v2415_v51 = vsel %vm1932_vm5, %v2413_v55, %v2414_v24 }
 0x2d4   :  { %v2689_v4 = vpop.permute.xlu1 %2688 }
 0x2d5   :  { %v2728_v0 = vadd.f32 %v2689_v4, %v2631_v19 }
 0x2d6   :  { %v2274_v42 = vpop.permute.xlu0 %2273 }
 0x2d7   :  { %v2312_v2 = vadd.f32 %v2274_v42, %v2215_v41  ;;  %v2342_v41 = vld [vmem:[#allocation3 + $0x2c0] sm:$0x1] }
 0x2d8   :  { %v2002_v15 = vpop.permute.xlu1 %2001 }
 0x2d9   :  { %v2456_v45 = vadd.f32 %v2412_v12, %v2312_v2  ;;  %v2039_v14 = vadd.f32 %v2002_v15, %v1846_v36 }
 0x2da   :  { %v2594_v17 = vpop.permute.xlu0 %2593 }
 0x2db   :  { %v2632_v54 = vadd.f32 %v2594_v17, %v2456_v45 }
 0x2dc   :  { %v2179_v21 = vpop.permute.xlu1 %2178 }
 0x2dd   :  { %v2216_v20 = vadd.f32 %v2179_v21, %v2039_v14 }
 0x2de   :  { %v2691_v56 = vpop.permute.xlu0 %2690 }
 0x2df   :  { %v2729_v62 = vadd.f32 %v2691_v56, %v2632_v54  ;;  %v3005_v56 = vsel %vm2109_vm6, %v3003_v30, %v3004_v60 }
 0x2e0   :  { %v2865_v46 = vpop.permute.xlu1 %2864 }
 0x2e1   :  { %v2904_v10 = vadd.f32 %v2865_v46, %v2728_v0 }
 0x2e2   :  { %v2004_v13 = vpop.permute.xlu0 %2003 }
 0x2e3   :  { %v3048_v26 = vadd.f32 %v3002_v22, %v2904_v10  ;;  %v2040_v39 = vadd.f32 %v2004_v13, %v1847_v27  ;;  %v2341_v10 = vld [vmem:[#allocation3 + $0x2a8] sm:$0xfe]  ;;  %v2417_v13 = vrot.slane %v2342_v41, 1 }
 0x2e4   :  { %v2276_v63 = vpop.permute.xlu1 %2275 }
 0x2e5   :  { %v3071_v58 = vadd.f32 %v15405_v1, %v3048_v26  ;;  %v2313_v33 = vadd.f32 %v2276_v63, %v2216_v20  ;;  %v3602_v19 = vpop.f32.mrb[80].mxu0  ;;  %v2933_v63 = vld [vmem:[#allocation3 + $0x2c8] sm:$0x3] }
 0x2e6   :  { %v2181_v18 = vpop.permute.xlu0 %2180  ;;  %3724 = vst [vmem:[#allocation3] sm:$0xff] %v3602_v19  ;;  %v3604_v61 = vpop.f32.mrb[81].mxu0  ;;  %v3007_v7 = vrot.slane %v2933_v63, 2 }
 0x2e7   :  { %v15408_v4 = vmax.f32 %v3071_v58, 0.0  ;;  %v2217_v35 = vadd.f32 %v2181_v18, %v2040_v39  ;;  %v3606_v0 = vpop.f32.mrb[82].mxu0  ;;  %v2457_v2 = vadd.f32 %v2415_v51, %v2313_v33  ;;  %v2416_v58 = vrot.slane %v2341_v10, 1  ;;  %v2932_v18 = vld [vmem:[#allocation3 + $0x2b0] sm:$0xfc] }
 0x2e8   :  { %v2596_v42 = vpop.permute.xlu1 %2595  ;;  %3727 = vst [vmem:[#allocation3 + $0x18] sm:$0xff] %v3606_v0  ;;  %v3608_v12 = vpop.f32.mrb[83].mxu0  ;;  %v2935_v33 = vld [vmem:[#allocation3 + $0x2f8] sm:$0x3]  ;;  %v3354_v61 = vld [vmem:[#allocation2 + $0x8] sm:$0x1f] }
 0x2e9   :  { %v3184_v15 = vpack.c.bf16 %v15408_v4, %v15408_v4  ;;  %v2633_v34 = vadd.f32 %v2596_v42, %v2457_v2  ;;  %v2418_v54 = vsel %vm1932_vm5, %v2416_v58, %v2417_v13  ;;  %v3010_v51 = vrot.slane %v2935_v33, 2 }
 0x2ea   :  { %v2867_v48 = vpop.permute.xlu0 %2866 }
 0x2eb   :  { %v2905_v17 = vadd.f32 %v2867_v48, %v2729_v62  ;;  %v3249_v21 = vshrl.u32 %v3184_v15, 16  ;;  %v3252_v46 = vshll.u32 %v3184_v15, 16  ;;  %v3006_v62 = vrot.slane %v2932_v18, 2  ;;  %v1848_v18 = vld [vmem:[#allocation3 + $0x2a0] sm:$0xff] }
 0x2ec   :  { %v2693_v59 = vpop.permute.xlu1 %2692 }
 0x2ed   :  { %v3049_v49 = vadd.f32 %v3005_v56, %v2905_v17  ;;  %v3251_v50 = vrot.slane %v3249_v21, 7  ;;  %v2730_v24 = vadd.f32 %v2693_v59, %v2633_v34  ;;  %v3008_v39 = vsel %vm2109_vm6, %v3006_v62, %v3007_v7  ;;  %v2934_v17 = vld [vmem:[#allocation3 + $0x2e0] sm:$0xfc] }
 0x2ee   :  { %v2278_v22 = vpop.permute.xlu0 %2277 }
 0x2ef   :  { %v3072_v45 = vadd.f32 %v15405_v1, %v3049_v49  ;;  %v2314_v26 = vadd.f32 %v2278_v22, %v2217_v35  ;;  %v3254_v36 = vor.u32 %v3252_v46, %v3251_v50  ;;  %v3009_v49 = vrot.slane %v2934_v17, 2 }
 0x2f0   :  { %v2006_v14 = vpop.permute.xlu1 %2005 }
 0x2f1   :  { %v15415_v16 = vmax.f32 %v3072_v45, 0.0  ;;  %3320 = vrot.lane.b32.xlu0 %v3254_v36, %s14102_s22  ;;  %v2458_v60 = vadd.f32 %v2418_v54, %v2314_v26  ;;  %v3011_v12 = vsel %vm2109_vm6, %v3009_v49, %v3010_v51  ;;  %v3357_v26 = vld [vmem:[#allocation2 + $0x10] sm:$0x1f] }
 0x2f2   :  { %v2598_v20 = vpop.permute.xlu0 %2597 }
 0x2f3   :  { %v3185_v5 = vpack.c.bf16 %v15415_v16, %v15415_v16  ;;  %v2634_v48 = vadd.f32 %v2598_v20, %v2458_v60  ;;  %v2041_v20 = vadd.f32 %v2006_v14, %v1848_v18 }
 0x2f4   :  { %v2869_v15 = vpop.permute.xlu1 %2868 }
 0x2f5   :  { %v2906_v27 = vadd.f32 %v2869_v15, %v2730_v24  ;;  %v3256_v42 = vshrl.u32 %v3185_v5, 16  ;;  %v3259_v41 = vshll.u32 %v3185_v5, 16  ;;  %v2344_v24 = vld [vmem:[#allocation3 + $0x2f0] sm:$0x1] }
 0x2f6   :  { %v2695_v55 = vpop.permute.xlu0 %2694  ;;  %v2420_v14 = vrot.slane %v2344_v24, 1  ;;  %v2345_v24 = vld [vmem:[#allocation3 + $0x308] sm:$0xfe] }
 0x2f7   :  { %v3050_v19 = vadd.f32 %v3008_v39, %v2906_v27  ;;  %v3258_v21 = vrot.slane %v3256_v42, 7  ;;  %v2731_v59 = vadd.f32 %v2695_v55, %v2634_v48  ;;  %v2343_v42 = vld [vmem:[#allocation3 + $0x2d8] sm:$0xfe]  ;;  %v15443_v55 = vld [vmem:[#allocation2] sm:$0xff] }
 0x2f8   :  { %v3305_v35 = vpop.permute.xlu1 %3304 }
 0x2f9   :  { %v3073_v56 = vadd.f32 %v15405_v1, %v3050_v19  ;;  %v3355_v0 = vsel %vm15423_vm9, %v3305_v35, %v3354_v61  ;;  %v3261_v2 = vor.u32 %v3259_v41, %v3258_v21  ;;  %v2419_v21 = vrot.slane %v2343_v42, 1 }
 0x2fa   :  { %3356 = vst [vmem:[#allocation2 + $0x8] sm:$0x1f] %v3355_v0  ;;  %v2871_v50 = vpop.permute.xlu0 %2870 }
 0x2fb   :  { %v15430_v46 = vmax.f32 %v3073_v56, 0.0  ;;  %v2907_v10 = vadd.f32 %v2871_v50, %v2731_v59  ;;  %3322 = vrot.lane.b32.xlu1 %v3261_v2, %s14102_s22  ;;  %v2421_v56 = vsel %vm1932_vm5, %v2419_v21, %v2420_v14  ;;  %v3360_v59 = vld [vmem:[#allocation2 + $0x18] sm:$0x1f]  ;;  %v2422_v14 = vrot.slane %v2345_v24, 1 }
 0x2fc   :  { %v2183_v22 = vpop.permute.xlu1 %2182 }
 0x2fd   :  { %v3186_v13 = vpack.c.bf16 %v15430_v46, %v15430_v46  ;;  %v3051_v45 = vadd.f32 %v3011_v12, %v2907_v10  ;;  %v2218_v33 = vadd.f32 %v2183_v22, %v2041_v20  ;;  %v2937_v12 = vld [vmem:[#allocation3 + $0x328] sm:$0x3]  ;;  %v1849_v22 = vld [vmem:[#allocation3 + $0x2d0] sm:$0xff] }
 0x2fe   :  { %v3307_v36 = vpop.permute.xlu0 %3306  ;;  %v3013_v18 = vrot.slane %v2937_v12, 2 }
 0x2ff   :  { %v3074_v63 = vadd.f32 %v15405_v1, %v3051_v45  ;;  %v3358_v58 = vsel %vm15423_vm9, %v3307_v36, %v3357_v26  ;;  %v3263_v34 = vshrl.u32 %v3186_v13, 16  ;;  %v3266_v62 = vshll.u32 %v3186_v13, 16  ;;  %v2936_v36 = vld [vmem:[#allocation3 + $0x310] sm:$0xfc] }
 0x300   :  { %3359 = vst [vmem:[#allocation2 + $0x10] sm:$0x1f] %v3358_v58  ;;  %v2280_v54 = vpop.permute.xlu1 %2279  ;;  %v3363_v58 = vld [vmem:[#allocation2 + $0x20] sm:$0x1f] }
 0x301   :  { %v15439_v7 = vmax.f32 %v3074_v63, 0.0  ;;  %v3403_v5 = vld [vmem:[#allocation2 + $0x8] sm:$0xff]  ;;  %v3265_v60 = vrot.slane %v3263_v34, 7  ;;  %v2315_v19 = vadd.f32 %v2280_v54, %v2218_v33  ;;  %v2346_v63 = vld [vmem:[#allocation3 + $0x320] sm:$0x1] }
 0x302   :  { %3611 = vmatmul.mubr.bf16.gmra.mrb[84].mxu0 %v3403_v5  ;;  %13260 = vmatmul.mubr.bf16.gmra.mrb[84].mxu1 %v3403_v5  ;;  %v2008_v15 = vpop.permute.xlu0 %2007 }
 0x303   :  { %v3187_v27 = vpack.c.bf16 %v15439_v7, %v15439_v7  ;;  %v3268_v39 = vor.u32 %v3266_v62, %v3265_v60  ;;  %3620 = vmatprep.mubr.bf16.mxu0 %v15443_v55  ;;  %13263 = vmatprep.mubr.msk.bf16.mxu1 %vm14098_vm0, %v18158_v23  ;;  %v2459_v2 = vadd.f32 %v2421_v56, %v2315_v19  ;;  %v3012_v60 = vrot.slane %v2936_v36, 2 }
 0x304   :  { %v2600_v48 = vpop.permute.xlu1 %2599  ;;  %v2042_v45 = vadd.f32 %v2008_v15, %v1849_v22 }
 0x305   :  { %3324 = vrot.lane.b32.xlu0 %v3268_v39, %s14102_s22  ;;  %v3270_v17 = vshrl.u32 %v3187_v27, 16  ;;  %v3273_v51 = vshll.u32 %v3187_v27, 16  ;;  %v2635_v26 = vadd.f32 %v2600_v48, %v2459_v2  ;;  %v2423_v27 = vrot.slane %v2346_v63, 1  ;;  %v2938_v2 = vld [vmem:[#allocation3 + $0x340] sm:$0xfc] }
 0x306   :  { %v2185_v41 = vpop.permute.xlu0 %2184  ;;  %v3014_v15 = vsel %vm2109_vm6, %v3012_v60, %v3013_v18 }
 0x307   :  { %v3404_v61 = vld [vmem:[#allocation2 + $0x10] sm:$0xff]  ;;  %v3272_v35 = vrot.slane %v3270_v17, 7  ;;  %v2219_v54 = vadd.f32 %v2185_v41, %v2042_v45  ;;  %v2424_v17 = vsel %vm1932_vm5, %v2422_v14, %v2423_v27  ;;  %v3015_v45 = vrot.slane %v2938_v2, 2 }
 0x308   :  { %v3309_v0 = vpop.permute.xlu1 %3308 }
 0x309   :  { %v3361_v49 = vsel %vm15423_vm9, %v3309_v0, %v3360_v59  ;;  %v3275_v50 = vor.u32 %v3273_v51, %v3272_v35  ;;  %v2939_v35 = vld [vmem:[#allocation3 + $0x358] sm:$0x3] }
 0x30a   :  { %3362 = vst [vmem:[#allocation2 + $0x18] sm:$0x1f] %v3361_v49  ;;  %3621 = vmatmul.mubr.bf16.gmra.mrb[88].mxu0 %v3404_v61  ;;  %13264 = vmatmul.mubr.bf16.gmra.mrb[88].mxu1 %v3404_v61  ;;  %v2282_v10 = vpop.permute.xlu0 %2281  ;;  %v3366_v49 = vld [vmem:[#allocation2 + $0x28] sm:$0x1f] }
 0x30b   :  { %3326 = vrot.lane.b32.xlu1 %v3275_v50, %s14102_s22  ;;  %3630 = vmatprep.mubr.bf16.mxu0 %v15443_v55  ;;  %v2316_v33 = vadd.f32 %v2282_v10, %v2219_v54  ;;  %v3016_v10 = vrot.slane %v2939_v35, 2  ;;  %v2347_v35 = vld [vmem:[#allocation3 + $0x338] sm:$0xfe] }
 0x30c   :  { %v2697_v13 = vpop.permute.xlu1 %2696  ;;  %13267 = vmatprep.mubr.msk.bf16.mxu1 %vm14098_vm0, %v18158_v23 }
 0x30d   :  { %v2732_v20 = vadd.f32 %v2697_v13, %v2635_v26  ;;  %v2460_v61 = vadd.f32 %v2424_v17, %v2316_v33  ;;  %v1850_v33 = vld [vmem:[#allocation3 + $0x300] sm:$0xff] }
 0x30e   :  { %v3311_v34 = vpop.permute.xlu0 %3310 }
 0x30f   :  { %v3364_v5 = vsel %vm15423_vm9, %v3311_v34, %v3363_v58  ;;  %v3017_v58 = vsel %vm2109_vm6, %v3015_v45, %v3016_v10  ;;  %v2425_v10 = vrot.slane %v2347_v35, 1 }
 0x310   :  { %3365 = vst [vmem:[#allocation2 + $0x20] sm:$0x1f] %v3364_v5  ;;  %v2873_v62 = vpop.permute.xlu1 %2872  ;;  %v3369_v5 = vld [vmem:[#allocation2 + $0x30] sm:$0x1f] }
 0x311   :  { %v2908_v42 = vadd.f32 %v2873_v62, %v2732_v20  ;;  %v3405_v39 = vld [vmem:[#allocation2 + $0x18] sm:$0xff] }
 0x312   :  { %3631 = vmatmul.mubr.bf16.gmra.mrb[92].mxu0 %v3405_v39  ;;  %13268 = vmatmul.mubr.bf16.gmra.mrb[92].mxu1 %v3405_v39  ;;  %v2602_v48 = vpop.permute.xlu0 %2601  ;;  %v13830_v39 = vld [vmem:[%s18149_s1 + $0xc8] ss:$12 sps:$4 sm:$0xff]  }
 0x313   :  { %v3052_v19 = vadd.f32 %v3014_v15, %v2908_v42  ;;  %3640 = vmatprep.mubr.bf16.mxu0 %v15443_v55  ;;  %13271 = vmatprep.mubr.msk.bf16.mxu1 %vm14098_vm0, %v18158_v23  ;;  %v2636_v59 = vadd.f32 %v2602_v48, %v2460_v61 }
 0x314   :  { %v2010_v21 = vpop.permute.xlu1 %2009 }
 0x315   :  { %v3075_v41 = vadd.f32 %v15405_v1, %v3052_v19  ;;  %v2043_v15 = vadd.f32 %v2010_v21, %v1850_v33  ;;  %v2348_v19 = vld [vmem:[#allocation3 + $0x350] sm:$0x1] }
 0x316   :  { %v2699_v51 = vpop.permute.xlu0 %2698  ;;  %v2426_v21 = vrot.slane %v2348_v19, 1  ;;  %v13833_v19 = vld [vmem:[%s18149_s1 + $0x110] ss:$12 sps:$4 sm:$0xff]  }
 0x317   :  { %v15464_v56 = vmax.f32 %v3075_v41, 0.0  ;;  %v3406_v0 = vld [vmem:[#allocation2 + $0x20] sm:$0xff]  ;;  %v2733_v22 = vadd.f32 %v2699_v51, %v2636_v59 }
 0x318   :  { %v3313_v50 = vpop.permute.xlu1 %3312  ;;  %v15491_v59 = vld [vmem:[%s18149_s1 + $0xc0] ss:$12 sps:$4 sm:$0xff]  }
 0x319   :  { %v3188_v12 = vpack.c.bf16 %v15464_v56, %v15464_v56  ;;  %v3367_v13 = vsel %vm15423_vm9, %v3313_v50, %v3366_v49  ;;  %v15500_v50 = vld [vmem:[%s18149_s1 + $0xdc] ss:$12 sps:$4 sm:$0xff]  }
 0x31a   :  { %3368 = vst [vmem:[#allocation2 + $0x28] sm:$0x1f] %v3367_v13  ;;  %3641 = vmatmul.mubr.bf16.gmra.mrb[96].mxu0 %v3406_v0  ;;  %13272 = vmatmul.mubr.bf16.gmra.mrb[96].mxu1 %v3406_v0  ;;  %v2875_v26 = vpop.permute.xlu0 %2874  ;;  %v13831_v0 = vld [vmem:[%s18149_s1 + $0xe0] ss:$12 sps:$4 sm:$0xff]  }
 0x31b   :  { %v2909_v36 = vadd.f32 %v2875_v26, %v2733_v22  ;;  %v3277_v63 = vshrl.u32 %v3188_v12, 16  ;;  %3951 = vmatprep.mubr.bf16.mxu0 %v15443_v55  ;;  %13291 = vmatprep.mubr.msk.bf16.mxu1 %vm14098_vm0, %v18158_v23  ;;  %v3280_v20 = vshll.u32 %v3188_v12, 16  ;;  %v2427_v26 = vsel %vm1932_vm5, %v2425_v10, %v2426_v21  ;;  %v2942_v10 = vld [vmem:[#allocation3 + $0x3a0] sm:$0xfc] }
 0x31c   :  { %v2187_v34 = vpop.permute.xlu1 %2186 }
 0x31d   :  { %v3053_v18 = vadd.f32 %v3017_v58, %v2909_v36  ;;  %v3279_v54 = vrot.slane %v3277_v63, 7  ;;  %v2220_v61 = vadd.f32 %v2187_v34, %v2043_v15  ;;  %v3372_v36 = vld [vmem:[#allocation2 + $0x38] sm:$0x1f]  ;;  %v2940_v15 = vld [vmem:[#allocation3 + $0x370] sm:$0xfc] }
 0x31e   :  { %v3315_v24 = vpop.permute.xlu0 %3314  ;;  %v15508_v58 = vld [vmem:[%s18149_s1 + $0xd8] ss:$12 sps:$4 sm:$0xff]  }
 0x31f   :  { %v3076_v60 = vadd.f32 %v15405_v1, %v3053_v18  ;;  %v3370_v62 = vsel %vm15423_vm9, %v3315_v24, %v3369_v5  ;;  %v3282_v27 = vor.u32 %v3280_v20, %v3279_v54  ;;  %v13832_v20 = vld [vmem:[%s18149_s1 + $0xf8] ss:$12 sps:$4 sm:$0xff]   ;;  %v1851_v5 = vld [vmem:[#allocation3 + $0x330] sm:$0xff] }
 0x320   :  { %3371 = vst [vmem:[#allocation2 + $0x30] sm:$0x1f] %v3370_v62  ;;  %v2284_v42 = vpop.permute.xlu1 %2283  ;;  %v2941_v62 = vld [vmem:[#allocation3 + $0x388] sm:$0x3] }
 0x321   :  { %v15480_v14 = vmax.f32 %v3076_v60, 0.0  ;;  %3328 = vrot.lane.b32.xlu0 %v3282_v27, %s14102_s22  ;;  %v3754_v48 = vld [vmem:[#allocation2 + $0x28] sm:$0xff]  ;;  %v2317_v2 = vadd.f32 %v2284_v42, %v2220_v61  ;;  %v2350_v27 = vld [vmem:[#allocation3 + $0x380] sm:$0x1]  ;;  %v3019_v61 = vrot.slane %v2941_v62, 2 }
 0x322   :  { %3952 = vmatmul.mubr.bf16.vlgmr.msra.gmra.mrb[100].mxu0 %v3754_v48  ;;  %13292 = vmatmul.mubr.bf16.vlgmr.msra.gmra.mrb[100].mxu1 %v3754_v48  ;;  %v2012_v17 = vpop.permute.xlu0 %2011  ;;  %v2349_v48 = vld [vmem:[#allocation3 + $0x368] sm:$0xfe]  ;;  %v2429_v35 = vrot.slane %v2350_v27, 1 }
 0x323   :  { %v3189_v41 = vpack.c.bf16 %v15480_v14, %v15480_v14  ;;  %3961 = vmatprep.mubr.bf16.mxu0 %v15443_v55  ;;  %13295 = vmatprep.mubr.msk.bf16.mxu1 %vm14098_vm0, %v18158_v23  ;;  %v2461_v34 = vadd.f32 %v2427_v26, %v2317_v2  ;;  %v2044_v60 = vadd.f32 %v2012_v17, %v1851_v5  ;;  %v3375_v17 = vld [vmem:[#allocation2 + $0x40] sm:$0x1f]  ;;  %v3018_v2 = vrot.slane %v2940_v15, 2 }
 0x324   :  { %v2604_v51 = vpop.permute.xlu1 %2603  ;;  %4271 = vmatpush1.bf16.msra.mxu0 %v15491_v59  ;;  %13312 = vmatpush3.bf16.msra.mxu1 %v13830_v39 }
 0x325   :  { %v3284_v49 = vshrl.u32 %v3189_v41, 16  ;;  %4272 = vmatprep.subr.bf16.mxu0 %v15500_v50  ;;  %13313 = vmatprep.subr.bf16.mxu1 %v18158_v23  ;;  %v3287_v45 = vshll.u32 %v3189_v41, 16  ;;  %v2637_v42 = vadd.f32 %v2604_v51, %v2461_v34  ;;  %v3020_v26 = vsel %vm2109_vm6, %v3018_v2, %v3019_v61  ;;  %v13837_v61 = vld [vmem:[%s18149_s1 + $0x170] ss:$12 sps:$4 sm:$0xff]   ;;  %v5015_v2 = vld [vmem:[#allocation3] sm:$0xfc] }
 0x326   :  { %v2189_v12 = vpop.permute.xlu0 %2188 }
 0x327   :  { %v3755_v22 = vld [vmem:[#allocation2 + $0x30] sm:$0xff]  ;;  %v3286_v13 = vrot.slane %v3284_v49, 7  ;;  %v2221_v39 = vadd.f32 %v2189_v12, %v2044_v60 }
 0x328   :  { %v3317_v63 = vpop.permute.xlu1 %3316  ;;  %4273 = vmatpush1.bf16.msra.mxu0 %v15508_v58  ;;  %13314 = vmatpush3.bf16.msra.mxu1 %v13831_v0 }
 0x329   :  { %v3373_v18 = vsel %vm15423_vm9, %v3317_v63, %v3372_v36  ;;  %v3289_v54 = vor.u32 %v3287_v45, %v3286_v13  ;;  %4274 = vmatprep.subr.bf16.mxu0 %v15228_v32  ;;  %13315 = vmatprep.subr.bf16.mxu1 %v18158_v23  ;;  %v15525_v32 = vld [vmem:[%s18149_s1 + $0xf0] ss:$12 sps:$4 sm:$0xff]   ;;  %v2943_v13 = vld [vmem:[#allocation3 + $0x3b8] sm:$0x3]  ;;  %v13834_v45 = vld [vmem:[%s18149_s1 + $0x128] ss:$12 sps:$4 sm:$0xff]  }
 0x32a   :  { %3374 = vst [vmem:[#allocation2 + $0x38] sm:$0x1f] %v3373_v18  ;;  %3962 = vmatmul.mubr.bf16.gmra.mrb[104].mxu0 %v3755_v22  ;;  %13296 = vmatmul.mubr.bf16.gmra.mrb[104].mxu1 %v3755_v22  ;;  %v2286_v24 = vpop.permute.xlu0 %2285  ;;  %v3021_v18 = vrot.slane %v2942_v10, 2 }
 0x32b   :  { %3330 = vrot.lane.b32.xlu1 %v3289_v54, %s14102_s22  ;;  %3971 = vmatprep.mubr.bf16.mxu0 %v15443_v55  ;;  %v2318_v21 = vadd.f32 %v2286_v24, %v2221_v39  ;;  %v3022_v54 = vrot.slane %v2943_v13, 2  ;;  %v13835_v24 = vld [vmem:[%s18149_s1 + $0x140] ss:$12 sps:$4 sm:$0xff]   ;;  %v13836_v39 = vld [vmem:[%s18149_s1 + $0x158] ss:$12 sps:$4 sm:$0xff]  }
 0x32c   :  { %v2701_v33 = vpop.permute.xlu1 %2700  ;;  %13299 = vmatprep.mubr.msk.bf16.mxu1 %vm14098_vm0, %v18158_v23  ;;  %4275 = vmatpush1.bf16.msra.mxu0 %v15525_v32 }
 0x32d   :  { %4276 = vmatprep.subr.bf16.mxu0 %v15244_v44  ;;  %13316 = vmatpush3.bf16.msra.mxu1 %v13832_v20  ;;  %v2734_v0 = vadd.f32 %v2701_v33, %v2637_v42  ;;  %v2428_v44 = vrot.slane %v2349_v48, 1 }
 0x32e   :  { %v3319_v41 = vpop.permute.xlu0 %3318  ;;  %13317 = vmatprep.subr.bf16.mxu1 %v18158_v23 }
 0x32f   :  { %v3376_v51 = vsel %vm15423_vm9, %v3319_v41, %v3375_v17  ;;  %v2430_v36 = vsel %vm1932_vm5, %v2428_v44, %v2429_v35 }
 0x330   :  { %3377 = vst [vmem:[#allocation2 + $0x40] sm:$0x1f] %v3376_v51  ;;  %v2877_v49 = vpop.permute.xlu1 %2876  ;;  %4277 = vmatpush1.bf16.msra.mxu0 %v15251_v47  ;;  %v2462_v34 = vadd.f32 %v2430_v36, %v2318_v21  ;;  %v13839_v36 = vld [vmem:[%s18149_s1 + $0xe0] ss:$12 sps:$4 sm:$0xff]  }
 0x331   :  { %v2910_v12 = vadd.f32 %v2877_v49, %v2734_v0  ;;  %v3756_v22 = vld [vmem:[#allocation2 + $0x38] sm:$0xff]  ;;  %4278 = vmatprep.subr.bf16.mxu0 %v15269_v11  ;;  %13318 = vmatpush3.bf16.msra.mxu1 %v13833_v19  ;;  %v14031_v49 = vld [vmem:[%s18149_s1 + $0xc4] ss:$12 sps:$4 sm:$0xff]  }
 0x332   :  { %3972 = vmatmul.mubr.bf16.gmra.mrb[108].mxu0 %v3756_v22  ;;  %13300 = vmatmul.mubr.bf16.gmra.mrb[108].mxu1 %v3756_v22  ;;  %v2703_v11 = vpop.permute.xlu0 %2702  ;;  %v4840_v19 = vld [vmem:[#allocation3 + $0x18] sm:$0x1] }
 0x333   :  { %v3054_v63 = vadd.f32 %v3020_v26, %v2910_v12  ;;  %3981 = vmatprep.mubr.bf16.mxu0 %v15443_v55  ;;  %13303 = vmatprep.mubr.msk.bf16.mxu1 %vm14098_vm0, %v18158_v23  ;;  %v4904_v21 = vrot.slane %v4840_v19, 1  ;;  %v5079_v12 = vrot.slane %v5015_v2, 2  ;;  %v14042_v19 = vld [vmem:[%s18149_s1 + $0x168] ss:$12 sps:$4 sm:$0xff]  }
 0x334   :  { %v2606_v47 = vpop.permute.xlu1 %2605  ;;  %4279 = vmatpush1.bf16.msra.mxu0 %v15278_v8  ;;  %13319 = vmatprep.subr.bf16.mxu1 %v18158_v23  ;;  %v3023_v8 = vsel %vm2109_vm6, %v3021_v18, %v3022_v54  ;;  %v13843_v18 = vld [vmem:[%s18149_s1 + $0x140] ss:$12 sps:$4 sm:$0xff]  }
 0x335   :  { %v3077_v20 = vadd.f32 %v15405_v1, %v3054_v63  ;;  %v2638_v5 = vadd.f32 %v2606_v47, %v2462_v34  ;;  %4280 = vmatprep.subr.bf16.mxu0 %v15290_v57  ;;  %13320 = vmatpush3.bf16.msra.mxu1 %v13834_v45  ;;  %v13838_v45 = vld [vmem:[%s18149_s1 + $0xc8] ss:$12 sps:$4 sm:$0xff]   ;;  %v13840_v63 = vld [vmem:[%s18149_s1 + $0xf8] ss:$12 sps:$4 sm:$0xff]  }
 0x336   :  { %13321 = vmatprep.subr.bf16.mxu1 %v18158_v23  ;;  %v14034_v34 = vld [vmem:[%s18149_s1 + $0x108] ss:$12 sps:$4 sm:$0xff]   ;;  %v14035_v47 = vld [vmem:[%s18149_s1 + $0x124] ss:$12 sps:$4 sm:$0xff]  }
 0x337   :  { %v15553_v60 = vmax.f32 %v3077_v20, 0.0  ;;  %v2735_v62 = vadd.f32 %v2703_v11, %v2638_v5  ;;  %v3757_v27 = vld [vmem:[#allocation2 + $0x40] sm:$0xff]  ;;  %v14037_v20 = vld [vmem:[%s18149_s1 + $0x13c] ss:$12 sps:$4 sm:$0xff]  }
 0x338   :  { %v2879_v33 = vpop.permute.xlu1 %2878  ;;  %4281 = vmatpush1.bf16.msra.mxu0 %v15302_v31  ;;  %v4839_v31 = vld [vmem:[#allocation3] sm:$0xfe] }
 0x339   :  { %v3190_v42 = vpack.c.bf16 %v15553_v60, %v15553_v60  ;;  %v2911_v57 = vadd.f32 %v2879_v33, %v2735_v62  ;;  %4282 = vmatprep.subr.bf16.mxu0 %v15316_v28  ;;  %13322 = vmatpush3.bf16.msra.mxu1 %v13835_v24  ;;  %v4903_v35 = vrot.slane %v4839_v31, 1  ;;  %v14036_v11 = vld [vmem:[%s18149_s1 + $0x120] ss:$12 sps:$4 sm:$0xff]  }
 0x33a   :  { %3982 = vmatmul.mubr.bf16.gmra.mrb[112].mxu0 %v3757_v27  ;;  %13304 = vmatmul.mubr.bf16.gmra.mrb[112].mxu1 %v3757_v27  ;;  %v14038_v27 = vld [vmem:[%s18149_s1 + $0x138] ss:$12 sps:$4 sm:$0xff]   ;;  %v14039_v33 = vld [vmem:[%s18149_s1 + $0x154] ss:$12 sps:$4 sm:$0xff]  }
 0x33b   :  { %v3055_v15 = vadd.f32 %v3023_v8, %v2911_v57  ;;  %v3291_v48 = vshrl.u32 %v3190_v42, 16  ;;  %3991 = vmatprep.mubr.bf16.mxu0 %v15443_v55  ;;  %13307 = vmatprep.mubr.msk.bf16.mxu1 %vm14098_vm0, %v18158_v23  ;;  %v3294_v41 = vshll.u32 %v3190_v42, 16  ;;  %v13844_v8 = vld [vmem:[%s18149_s1 + $0x158] ss:$12 sps:$4 sm:$0xff]  }
 0x33c   :  { %4283 = vmatpush1.bf16.msra.mxu0 %v15327_v9  ;;  %13323 = vmatprep.subr.bf16.mxu1 %v18158_v23  ;;  %v3378_v42 = vld [vmem:[#allocation2 + $0x58] sm:$0x1f] }
 0x33d   :  { %v3078_v28 = vadd.f32 %v15405_v1, %v3055_v15  ;;  %v3293_v17 = vrot.slane %v3291_v48, 7  ;;  %4284 = vmatprep.subr.bf16.mxu0 %v15339_v29  ;;  %13324 = vmatpush3.bf16.msra.mxu1 %v13836_v39  ;;  %v4905_v29 = vsel %vm1932_vm5, %v4903_v35, %v4904_v21  ;;  %v14040_v15 = vld [vmem:[%s18149_s1 + $0x150] ss:$12 sps:$4 sm:$0xff]   ;;  %v14041_v31 = vld [vmem:[%s18149_s1 + $0x16c] ss:$12 sps:$4 sm:$0xff]  }
 0x33e   :  { %13325 = vmatprep.subr.bf16.mxu1 %v18158_v23  ;;  %v13845_v48 = vld [vmem:[%s18149_s1 + $0x170] ss:$12 sps:$4 sm:$0xff]   ;;  %v3384_v21 = vld [vmem:[#allocation2 + $0x68] sm:$0x1f] }
 0x33f   :  { %v15574_v0 = vmax.f32 %v3078_v28, 0.0  ;;  %v3296_v9 = vor.u32 %v3294_v41, %v3293_v17  ;;  %v3381_v17 = vld [vmem:[#allocation2 + $0x60] sm:$0x1f] }
 0x340   :  { %4285 = vmatpush1.bf16.msra.mxu0 %v15349_v52  ;;  %v5016_v52 = vld [vmem:[#allocation3 + $0x18] sm:$0x3] }
 0x341   :  { %v3191_v1 = vpack.c.bf16 %v15574_v0, %v15574_v0  ;;  %3332 = vrot.lane.b32.xlu0 %v3296_v9, %s14102_s22  ;;  %13326 = vmatpush3.bf16.msra.mxu1 %v13837_v61  ;;  %v5080_v22 = vrot.slane %v5016_v52, 2 }
 0x342   :  { %3992 = vmatmul.mubr.bf16.gmra.mrb[116].mxu0 %v15443_v55  ;;  %13308 = vmatmul.mubr.bf16.gmra.mrb[116].mxu1 %v15443_v55 }
 0x343   :  { %v3298_v51 = vshrl.u32 %v3191_v1, 16  ;;  %4302 = vmatprep.mubr.bf16.mxu0 %v15443_v55  ;;  %13327 = vmatprep.mubr.msk.bf16.mxu1 %vm14098_vm0, %v18158_v23  ;;  %v3301_v10 = vshll.u32 %v3191_v1, 16  ;;  %v5081_v26 = vsel %vm2109_vm6, %v5079_v12, %v5080_v22 }
 0x344   :  { %4621 = vmatprep.subr.bf16.mxu0 %v14031_v49  ;;  %13347 = vmatprep.subr.bf16.mxu1 %v18158_v23 }
 0x345   :  { %v3300_v44 = vrot.slane %v3298_v51, 7  ;;  %4951 = vrot.lane.b32.xlu0 %v4905_v29, %s14100_s16  ;;  %v3387_v29 = vld [vmem:[#allocation2 + $0x70] sm:$0x1f] }
 0x347   :  { %v3303_v13 = vor.u32 %v3301_v10, %v3300_v44  ;;  %v3390_v44 = vld [vmem:[#allocation2 + $0x78] sm:$0x1f] }
 0x349   :  { %3334 = vrot.lane.b32.xlu1 %v3303_v13, %s14102_s22  ;;  %v3393_v13 = vld [vmem:[#allocation2 + $0x80] sm:$0x1f] }
 0x34a   :  { %4303 = vmatmul.mubr.bf16.vlgmr.msra.gmra.mrb[120].mxu0 %v15443_v55  ;;  %13328 = vmatmul.mubr.bf16.vlgmr.msra.gmra.mrb[120].mxu1 %v15443_v55 }
 0x34b   :  { %4312 = vmatprep.mubr.bf16.mxu0 %v15443_v55  ;;  %13331 = vmatprep.mubr.msk.bf16.mxu1 %vm14098_vm0, %v18158_v23 }
 0x34c   :  { %4622 = vmatpush1.bf16.msra.mxu0 %v15491_v59  ;;  %13348 = vmatpush3.bf16.msra.mxu1 %v13838_v45  ;;  %v14032_v59 = vld [vmem:[%s18149_s1 + $0xf4] ss:$12 sps:$4 sm:$0xff]  }
 0x34d   :  { %5127 = vrot.lane.b32.xlu1 %v5081_v26, %s14101_s5  ;;  %4623 = vmatprep.subr.bf16.mxu0 %v15500_v50  ;;  %v13841_v50 = vld [vmem:[%s18149_s1 + $0x110] ss:$12 sps:$4 sm:$0xff]  }
 0x34e   :  { %13349 = vmatprep.subr.bf16.mxu1 %v18158_v23 }
 0x350   :  { %4624 = vmatpush1.bf16.msra.mxu0 %v15508_v58  ;;  %13350 = vmatpush3.bf16.msra.mxu1 %v13839_v36  ;;  %v14033_v58 = vld [vmem:[%s18149_s1 + $0x10c] ss:$12 sps:$4 sm:$0xff]  }
 0x351   :  { %4625 = vmatprep.subr.bf16.mxu0 %v14032_v59  ;;  %13351 = vmatprep.subr.bf16.mxu1 %v18158_v23 }
 0x354   :  { %4626 = vmatpush1.bf16.msra.mxu0 %v15525_v32  ;;  %13352 = vmatpush3.bf16.msra.mxu1 %v13840_v63  ;;  %v13842_v32 = vld [vmem:[%s18149_s1 + $0x128] ss:$12 sps:$4 sm:$0xff]  }
 0x355   :  { %4627 = vmatprep.subr.bf16.mxu0 %v14033_v58  ;;  %13353 = vmatprep.subr.bf16.mxu1 %v18158_v23  ;;  %v3685_v54 = vpop.f32.mrb[80].mxu1  ;;  %v3396_v63 = vld [vmem:[#allocation2 + $0x88] sm:$0x1f]  ;;  %v3399_v58 = vld [vmem:[#allocation2 + $0x90] sm:$0x1f] }
 0x356   :  { %v13257_v5 = vpop.f32.mrb[81].mxu1 }
 0x357   :  { %v3688_v24 = vpop.f32.mrb[82].mxu1 }
 0x358   :  { %4628 = vmatpush1.bf16.msra.mxu0 %v14034_v34  ;;  %13354 = vmatpush3.bf16.msra.mxu1 %v13841_v50  ;;  %v13258_v62 = vpop.f32.mrb[83].mxu1 }
 0x359   :  { %4629 = vmatprep.subr.bf16.mxu0 %v14035_v47  ;;  %13355 = vmatprep.subr.bf16.mxu1 %v18158_v23 }
 0x35c   :  { %4630 = vmatpush1.bf16.msra.mxu0 %v14036_v11  ;;  %13356 = vmatpush3.bf16.msra.mxu1 %v13842_v32 }
 0x35d   :  { %4631 = vmatprep.subr.bf16.mxu0 %v14037_v20  ;;  %13357 = vmatprep.subr.bf16.mxu1 %v18158_v23 }
 0x360   :  { %4632 = vmatpush1.bf16.msra.mxu0 %v14038_v27  ;;  %13358 = vmatpush3.bf16.msra.mxu1 %v13843_v18 }
 0x361   :  { %4633 = vmatprep.subr.bf16.mxu0 %v14039_v33  ;;  %13359 = vmatprep.subr.bf16.mxu1 %v18158_v23  ;;  %v13849_v33 = vld [vmem:[%s18149_s1 + $0x198] ss:$12 sps:$4 sm:$0xff]  }
 0x363   :  { %v3321_v57 = vpop.permute.xlu0 %3320 }
 0x364   :  { %v3379_v39 = vsel %vm15423_vm9, %v3321_v57, %v3378_v42  ;;  %4634 = vmatpush1.bf16.msra.mxu0 %v14040_v15  ;;  %13360 = vmatpush3.bf16.msra.mxu1 %v13844_v8  ;;  %v13848_v8 = vld [vmem:[%s18149_s1 + $0x184] ss:$12 sps:$4 sm:$0xff]   ;;  %v13851_v42 = vld [vmem:[%s18149_s1 + $0x19c] ss:$12 sps:$4 sm:$0xff]  }
 0x365   :  { %3380 = vst [vmem:[#allocation2 + $0x58] sm:$0x1f] %v3379_v39  ;;  %4635 = vmatprep.subr.bf16.mxu0 %v14041_v31  ;;  %13361 = vmatprep.subr.bf16.mxu1 %v18158_v23 }
 0x368   :  { %4636 = vmatpush1.bf16.msra.mxu0 %v14042_v19  ;;  %13362 = vmatpush3.bf16.msra.mxu1 %v13845_v48 }
 0x369   :  { %13383 = vmatprep.subr.bf16.mxu1 %v18158_v23  ;;  %6536 = vmatprep.subr.bf16.mxu0 %v13848_v8  ;;  %v13852_v8 = vld [vmem:[%s18149_s1 + $0x1b0] ss:$12 sps:$4 sm:$0xff]  }
 0x36c   :  { %v4106_v28 = vld [vmem:[#allocation2 + $0x58] sm:$0xff] }
 0x36d   :  { %4313 = vmatmul.mubr.bf16.gmra.mrb[124].mxu0 %v4106_v28  ;;  %13332 = vmatmul.mubr.bf16.gmra.mrb[124].mxu1 %v4106_v28  ;;  %v3323_v41 = vpop.permute.xlu1 %3322 }
 0x36e   :  { %v3382_v61 = vsel %vm15423_vm9, %v3323_v41, %v3381_v17  ;;  %4322 = vmatprep.mubr.bf16.mxu0 %v15443_v55  ;;  %13335 = vmatprep.mubr.msk.bf16.mxu1 %vm14098_vm0, %v18158_v23 }
 0x36f   :  { %3383 = vst [vmem:[#allocation2 + $0x60] sm:$0x1f] %v3382_v61 }
 0x376   :  { %v4107_v35 = vld [vmem:[#allocation2 + $0x60] sm:$0xff] }
 0x377   :  { %v3325_v9 = vpop.permute.xlu0 %3324  ;;  %4323 = vmatmul.mubr.bf16.gmra.mrb[128].mxu0 %v4107_v35  ;;  %13336 = vmatmul.mubr.bf16.gmra.mrb[128].mxu1 %v4107_v35 }
 0x378   :  { %v3385_v1 = vsel %vm15423_vm9, %v3325_v9, %v3384_v21  ;;  %4332 = vmatprep.mubr.bf16.mxu0 %v15443_v55  ;;  %13339 = vmatprep.mubr.msk.bf16.mxu1 %vm14098_vm0, %v18158_v23 }
 0x379   :  { %3386 = vst [vmem:[#allocation2 + $0x68] sm:$0x1f] %v3385_v1 }
 0x37d   :  { %v3327_v51 = vpop.permute.xlu1 %3326 }
 0x37e   :  { %v3388_v2 = vsel %vm15423_vm9, %v3327_v51, %v3387_v29 }
 0x37f   :  { %3389 = vst [vmem:[#allocation2 + $0x70] sm:$0x1f] %v3388_v2 }
 0x380   :  { %v4108_v52 = vld [vmem:[#allocation2 + $0x68] sm:$0xff] }
 0x381   :  { %4333 = vmatmul.mubr.bf16.gmra.mrb[132].mxu0 %v4108_v52  ;;  %13340 = vmatmul.mubr.bf16.gmra.mrb[132].mxu1 %v4108_v52 }
 0x382   :  { %4342 = vmatprep.mubr.bf16.mxu0 %v15443_v55  ;;  %13343 = vmatprep.mubr.msk.bf16.mxu1 %vm14098_vm0, %v18158_v23 }
 0x386   :  { %v4109_v49 = vld [vmem:[#allocation2 + $0x70] sm:$0xff] }
 0x389   :  { %4343 = vmatmul.mubr.bf16.gmra.mrb[136].mxu0 %v4109_v49  ;;  %13344 = vmatmul.mubr.bf16.gmra.mrb[136].mxu1 %v4109_v49 }
 0x38a   :  { %4653 = vmatprep.mubr.bf16.mxu0 %v15443_v55  ;;  %13363 = vmatprep.mubr.msk.bf16.mxu1 %vm14098_vm0, %v18158_v23 }
 0x393   :  { %v3329_v10 = vpop.permute.xlu0 %3328 }
 0x394   :  { %v3391_v12 = vsel %vm15423_vm9, %v3329_v10, %v3390_v44 }
 0x395   :  { %3392 = vst [vmem:[#allocation2 + $0x78] sm:$0x1f] %v3391_v12 }
 0x39c   :  { %v4456_v22 = vld [vmem:[#allocation2 + $0x78] sm:$0xff] }
 0x39d   :  { %4654 = vmatmul.mubr.bf16.vlgmr.msra.gmra.mrb[140].mxu0 %v4456_v22  ;;  %13364 = vmatmul.mubr.bf16.vlgmr.msra.gmra.mrb[140].mxu1 %v4456_v22  ;;  %v3331_v45 = vpop.permute.xlu1 %3330 }
 0x39e   :  { %v3394_v26 = vsel %vm15423_vm9, %v3331_v45, %v3393_v13  ;;  %4663 = vmatprep.mubr.bf16.mxu0 %v15443_v55  ;;  %13367 = vmatprep.mubr.msk.bf16.mxu1 %vm14098_vm0, %v18158_v23 }
 0x39f   :  { %3395 = vst [vmem:[#allocation2 + $0x80] sm:$0x1f] %v3394_v26 }
 0x3a6   :  { %v4457_v36 = vld [vmem:[#allocation2 + $0x80] sm:$0xff] }
 0x3a7   :  { %4664 = vmatmul.mubr.bf16.gmra.mrb[144].mxu0 %v4457_v36  ;;  %13368 = vmatmul.mubr.bf16.gmra.mrb[144].mxu1 %v4457_v36 }
 0x3a8   :  { %4673 = vmatprep.mubr.bf16.mxu0 %v15443_v55  ;;  %13371 = vmatprep.mubr.msk.bf16.mxu1 %vm14098_vm0, %v18158_v23 }
 0x3b3   :  { %v3333_v59 = vpop.permute.xlu0 %3332 }
 0x3b4   :  { %v3397_v50 = vsel %vm15423_vm9, %v3333_v59, %v3396_v63 }
 0x3b5   :  { %3398 = vst [vmem:[#allocation2 + $0x88] sm:$0x1f] %v3397_v50 }
 0x3bb   :  { %v3335_v34 = vpop.permute.xlu1 %3334 }
 0x3bc   :  { %v3400_v32 = vsel %vm15423_vm9, %v3335_v34, %v3399_v58  ;;  %v4458_v47 = vld [vmem:[#allocation2 + $0x88] sm:$0xff] }
 0x3bd   :  { %3401 = vst [vmem:[#allocation2 + $0x90] sm:$0x1f] %v3400_v32  ;;  %4674 = vmatmul.mubr.bf16.gmra.mrb[148].mxu0 %v4458_v47  ;;  %13372 = vmatmul.mubr.bf16.gmra.mrb[148].mxu1 %v4458_v47 }
 0x3be   :  { %4683 = vmatprep.mubr.bf16.mxu0 %v15443_v55  ;;  %13375 = vmatprep.mubr.msk.bf16.mxu1 %vm14098_vm0, %v18158_v23 }
 0x3c4   :  { %v4459_v11 = vld [vmem:[#allocation2 + $0x90] sm:$0xff] }
 0x3c5   :  { %4684 = vmatmul.mubr.bf16.gmra.mrb[152].mxu0 %v4459_v11  ;;  %13376 = vmatmul.mubr.bf16.gmra.mrb[152].mxu1 %v4459_v11 }
 0x3c6   :  { %4693 = vmatprep.mubr.bf16.mxu0 %v15443_v55  ;;  %13379 = vmatprep.mubr.msk.bf16.mxu1 %vm14098_vm0, %v18158_v23 }
 0x3cd   :  { %4694 = vmatmul.mubr.bf16.gmra.mrb[156].mxu0 %v15443_v55  ;;  %13380 = vmatmul.mubr.bf16.gmra.mrb[156].mxu1 %v15443_v55 }
 0x3ce   :  { %6568 = vmatprep.mubr.bf16.mxu0 %v15443_v55  ;;  %13399 = vmatprep.mubr.msk.bf16.mxu1 %vm14098_vm0, %v18158_v23  ;;  %v13846_v55 = vld [vmem:[%s18149_s1 + $0x180] ss:$12 sps:$4 sm:$0xff]  }
 0x3cf   :  { %6537 = vmatpush1.bf16.msra.mxu0 %v13846_v55 }
 0x3d0   :  { %6538 = vmatprep.subr.bf16.mxu0 %v13851_v42  ;;  %v13854_v42 = vld [vmem:[%s18149_s1 + $0x1b4] ss:$12 sps:$4 sm:$0xff]  }
 0x3d3   :  { %6539 = vmatpush1.bf16.msra.mxu0 %v13849_v33 }
 0x3d4   :  { %6540 = vmatprep.subr.bf16.mxu0 %v13854_v42  ;;  %v13861_v42 = vld [vmem:[%s18149_s1 + $0x1f8] ss:$12 sps:$4 sm:$0xff]  }
 0x3d5   :  { %v15713_v30 = vpop.f32.mrb[84].mxu0  ;;  %v3693_v18 = vpop.f32.mrb[84].mxu1 }
 0x3d6   :  { %3730 = vst [vmem:[#allocation3 + $0x30] sm:$0xff] %v15713_v30  ;;  %v3614_v54 = vpop.f32.mrb[85].mxu0  ;;  %v13261_v20 = vpop.f32.mrb[85].mxu1  ;;  %5223 = vrot.lane.b32.xlu0 %v15713_v30, %s14102_s22 }
 0x3d7   :  { %3731 = vst [vmem:[#allocation3 + $0x38] sm:$0xff] %v3614_v54  ;;  %v3616_v5 = vpop.f32.mrb[86].mxu0  ;;  %v3696_v24 = vpop.f32.mrb[86].mxu1  ;;  %6541 = vmatpush1.bf16.msra.mxu0 %v13852_v8 }
 0x3d8   :  { %3733 = vst [vmem:[#allocation3 + $0x48] sm:$0xff] %v3616_v5  ;;  %v3618_v62 = vpop.f32.mrb[87].mxu0  ;;  %v13262_v27 = vpop.f32.mrb[87].mxu1 }
 0x3d9   :  { %3734 = vst [vmem:[#allocation3 + $0x50] sm:$0xff] %v3618_v62 }
 0x3dd   :  { %v3622_v57 = vpop.f32.mrb[88].mxu0  ;;  %v3701_v39 = vpop.f32.mrb[88].mxu1  ;;  %v4841_v15 = vld [vmem:[#allocation3 + $0x30] sm:$0xfe] }
 0x3de   :  { %3736 = vst [vmem:[#allocation3 + $0x60] sm:$0xff] %v3622_v57  ;;  %3738 = vst.msk [vmem:[#allocation3 + $0x70] sm:$0xff] %vm748_vm7, %v3701_v39  ;;  %v3624_v48 = vpop.f32.mrb[89].mxu0  ;;  %v13265_v31 = vpop.f32.mrb[89].mxu1  ;;  %v5431_v19 = vld [vmem:[#allocation3 + $0x38] sm:$0xfc] }
 0x3df   :  { %3737 = vst [vmem:[#allocation3 + $0x68] sm:$0xff] %v3624_v48  ;;  %v3626_v28 = vpop.f32.mrb[90].mxu0  ;;  %v3704_v17 = vpop.f32.mrb[90].mxu1  ;;  %v4842_v41 = vld [vmem:[#allocation3 + $0x48] sm:$0x1]  ;;  %v4906_v21 = vrot.slane %v4841_v15, 1 }
 0x3e0   :  { %3739 = vst [vmem:[#allocation3 + $0x78] sm:$0xff] %v3626_v28  ;;  %3741 = vst.msk [vmem:[#allocation3 + $0x88] sm:$0xff] %vm748_vm7, %v3704_v17  ;;  %v3628_v61 = vpop.f32.mrb[91].mxu0  ;;  %v13266_v35 = vpop.f32.mrb[91].mxu1  ;;  %v4907_v9 = vrot.slane %v4842_v41, 1  ;;  %v5495_v29 = vrot.slane %v5431_v19, 2 }
 0x3e1   :  { %v5432_v1 = vld [vmem:[#allocation3 + $0x50] sm:$0x3]  ;;  %3740 = vst [vmem:[#allocation3 + $0x80] sm:$0xff] %v3628_v61  ;;  %v5017_v2 = vld [vmem:[#allocation3 + $0x30] sm:$0xfc] }
 0x3e2   :  { %v5496_v51 = vrot.slane %v5432_v1, 2  ;;  %v5018_v52 = vld [vmem:[#allocation3 + $0x48] sm:$0x3]  ;;  %v4908_v49 = vsel %vm1932_vm5, %v4906_v21, %v4907_v9  ;;  %v5082_v12 = vrot.slane %v5017_v2, 2 }
 0x3e3   :  { %v5083_v44 = vrot.slane %v5018_v52, 2  ;;  %4953 = vrot.lane.b32.xlu1 %v4908_v49, %s14100_s16 }
 0x3e4   :  { %v5497_v10 = vsel %vm2109_vm6, %v5495_v29, %v5496_v51 }
 0x3e5   :  { %5543 = vrot.lane.b32.xlu0 %v5497_v10, %s14100_s16  ;;  %v15736_v22 = vpop.f32.mrb[92].mxu0  ;;  %v3709_v13 = vpop.f32.mrb[92].mxu1  ;;  %v5084_v36 = vsel %vm2109_vm6, %v5082_v12, %v5083_v44  ;;  %v4843_v54 = vld [vmem:[#allocation3 + $0x60] sm:$0xfe]  ;;  %v13855_v44 = vld [vmem:[%s18149_s1 + $0x1c8] ss:$12 sps:$4 sm:$0xff]  }
 0x3e6   :  { %3742 = vst [vmem:[#allocation3 + $0x90] sm:$0xff] %v15736_v22  ;;  %3744 = vst.msk [vmem:[#allocation3 + $0xa0] sm:$0xff] %vm748_vm7, %v3709_v13  ;;  %v3634_v45 = vpop.f32.mrb[93].mxu0  ;;  %v13269_v26 = vpop.f32.mrb[93].mxu1  ;;  %v5703_v63 = vld [vmem:[#allocation3 + $0x68] sm:$0xfe] }
 0x3e7   :  { %3743 = vst [vmem:[#allocation3 + $0x98] sm:$0xff] %v3634_v45  ;;  %v3636_v59 = vpop.f32.mrb[94].mxu0  ;;  %v3712_v50 = vpop.f32.mrb[94].mxu1  ;;  %5129 = vrot.lane.b32.xlu1 %v5084_v36, %s14101_s5  ;;  %v4844_v58 = vld [vmem:[#allocation3 + $0x78] sm:$0x1]  ;;  %v5767_v11 = vrot.slane %v5703_v63, 1 }
 0x3e8   :  { %3745 = vst [vmem:[#allocation3 + $0xa8] sm:$0xff] %v3636_v59  ;;  %3747 = vst.msk [vmem:[#allocation3 + $0xb8] sm:$0xff] %vm748_vm7, %v3712_v50  ;;  %v3638_v34 = vpop.f32.mrb[95].mxu0  ;;  %v13270_v32 = vpop.f32.mrb[95].mxu1  ;;  %v5704_v47 = vld [vmem:[#allocation3 + $0x80] sm:$0x1] }
 0x3e9   :  { %5639 = vrot.lane.b32.xlu0 %v3624_v48, %s14101_s5  ;;  %3746 = vst [vmem:[#allocation3 + $0xb0] sm:$0xff] %v3638_v34  ;;  %v5768_v18 = vrot.slane %v5704_v47, 1  ;;  %v5434_v20 = vld [vmem:[#allocation3 + $0x80] sm:$0x3]  ;;  %v4910_v5 = vrot.slane %v4844_v58, 1  ;;  %v4909_v33 = vrot.slane %v4843_v54, 1 }
 0x3ea   :  { %v5433_v24 = vld [vmem:[#allocation3 + $0x68] sm:$0xfc]  ;;  %v5499_v27 = vrot.slane %v5434_v20, 2  ;;  %v5020_v55 = vld [vmem:[#allocation3 + $0x78] sm:$0x3] }
 0x3eb   :  { %5225 = vrot.lane.b32.xlu1 %v3622_v57, %s14102_s22  ;;  %v5769_v62 = vsel %vm1932_vm5, %v5767_v11, %v5768_v18  ;;  %v5498_v48 = vrot.slane %v5433_v24, 2  ;;  %v5019_v57 = vld [vmem:[#allocation3 + $0x60] sm:$0xfc]  ;;  %v4911_v28 = vsel %vm1932_vm5, %v4909_v33, %v4910_v5  ;;  %v5086_v17 = vrot.slane %v5020_v55, 2  ;;  %v13857_v10 = vld [vmem:[%s18149_s1 + $0x1cc] ss:$12 sps:$4 sm:$0xff]  }
 0x3ec   :  { %v5085_v1 = vrot.slane %v5019_v57, 2  ;;  %v13860_v13 = vld [vmem:[%s18149_s1 + $0x1e4] ss:$12 sps:$4 sm:$0xff]   ;;  %6542 = vmatprep.subr.bf16.mxu0 %v13857_v10  ;;  %v13858_v32 = vld [vmem:[%s18149_s1 + $0x1e0] ss:$12 sps:$4 sm:$0xff]  }
 0x3ed   :  { %5815 = vrot.lane.b32.xlu0 %v5769_v62, %s14102_s22  ;;  %v15753_v39 = vpop.f32.mrb[96].mxu0  ;;  %v3717_v15 = vpop.f32.mrb[96].mxu1  ;;  %v5500_v35 = vsel %vm2109_vm6, %v5498_v48, %v5499_v27  ;;  %v4845_v59 = vld [vmem:[#allocation3 + $0x90] sm:$0xfe]  ;;  %6543 = vmatpush1.bf16.msra.mxu0 %v13855_v44 }
 0x3ee   :  { %3748 = vst [vmem:[#allocation3 + $0xc0] sm:$0xff] %v15753_v39  ;;  %3750 = vst.msk [vmem:[#allocation3 + $0xd0] sm:$0xff] %vm748_vm7, %v3717_v15  ;;  %v15757_v31 = vpop.f32.mrb[97].mxu0  ;;  %v13273_v19 = vpop.f32.mrb[97].mxu1  ;;  %v5087_v51 = vsel %vm2109_vm6, %v5085_v1, %v5086_v17  ;;  %v5705_v2 = vld [vmem:[#allocation3 + $0x98] sm:$0xfe]  ;;  %6544 = vmatprep.subr.bf16.mxu0 %v13860_v13 }
 0x3ef   :  { %3749 = vst [vmem:[#allocation3 + $0xc8] sm:$0xff] %v15757_v31  ;;  %v3646_v41 = vpop.f32.mrb[98].mxu0  ;;  %v3720_v61 = vpop.f32.mrb[98].mxu1  ;;  %4955 = vrot.lane.b32.xlu1 %v4911_v28, %s14100_s16  ;;  %v4846_v52 = vld [vmem:[#allocation3 + $0xa8] sm:$0x1]  ;;  %v5770_v63 = vrot.slane %v5705_v2, 1 }
 0x3f0   :  { %3751 = vst [vmem:[#allocation3 + $0xd8] sm:$0xff] %v3646_v41  ;;  %3753 = vst.msk [vmem:[#allocation3 + $0xe8] sm:$0xff] %vm748_vm7, %v3720_v61  ;;  %v3648_v21 = vpop.f32.mrb[99].mxu0  ;;  %v13274_v9 = vpop.f32.mrb[99].mxu1  ;;  %v5706_v29 = vld [vmem:[#allocation3 + $0xb0] sm:$0x1] }
 0x3f1   :  { %5545 = vrot.lane.b32.xlu0 %v5500_v35, %s14100_s16  ;;  %3752 = vst [vmem:[#allocation3 + $0xe0] sm:$0xff] %v3648_v21  ;;  %v5771_v49 = vrot.slane %v5706_v29, 1  ;;  %v5436_v12 = vld [vmem:[#allocation3 + $0xb0] sm:$0x3]  ;;  %v4913_v50 = vrot.slane %v4846_v52, 1  ;;  %v4912_v62 = vrot.slane %v4845_v59, 1  ;;  %6545 = vmatpush1.bf16.msra.mxu0 %v13858_v32 }
 0x3f2   :  { %v5502_v54 = vrot.slane %v5436_v12, 2  ;;  %v5022_v20 = vld [vmem:[#allocation3 + $0xa8] sm:$0x3]  ;;  %v5021_v55 = vld [vmem:[#allocation3 + $0x90] sm:$0xfc] }
 0x3f3   :  { %5131 = vrot.lane.b32.xlu1 %v5087_v51, %s14101_s5  ;;  %v5772_v18 = vsel %vm1932_vm5, %v5770_v63, %v5771_v49  ;;  %v4914_v8 = vsel %vm1932_vm5, %v4912_v62, %v4913_v50  ;;  %v5089_v33 = vrot.slane %v5022_v20, 2  ;;  %v13863_v15 = vld [vmem:[%s18149_s1 + $0x1fc] ss:$12 sps:$4 sm:$0xff]   ;;  %v5088_v48 = vrot.slane %v5021_v55, 2  ;;  %v13869_v50 = vld [vmem:[%s18149_s1 + $0x22c] ss:$12 sps:$4 sm:$0xff]  }
 0x3f4   :  { %6546 = vmatprep.subr.bf16.mxu0 %v13863_v15  ;;  %v13864_v10 = vld [vmem:[%s18149_s1 + $0x210] ss:$12 sps:$4 sm:$0xff]  }
 0x3f5   :  { %5641 = vrot.lane.b32.xlu0 %v3634_v45, %s14101_s5  ;;  %v15777_v26 = vpop.f32.mrb[100].mxu0  ;;  %v4036_v36 = vpop.f32.mrb[100].mxu1  ;;  %v5435_v45 = vld [vmem:[#allocation3 + $0x98] sm:$0xfc]  ;;  %v5090_v61 = vsel %vm2109_vm6, %v5088_v48, %v5089_v33  ;;  %6547 = vmatpush1.bf16.msra.mxu0 %v13861_v42  ;;  %v4847_v44 = vld [vmem:[#allocation3 + $0xc0] sm:$0xfe] }
 0x3f6   :  { %4075 = vst [vmem:[#allocation3 + $0xf0] sm:$0xff] %v15777_v26  ;;  %4077 = vst.msk [vmem:[#allocation3 + $0x100] sm:$0xff] %vm748_vm7, %v4036_v36  ;;  %v15781_v58 = vpop.f32.mrb[101].mxu0  ;;  %v13293_v34 = vpop.f32.mrb[101].mxu1  ;;  %v5501_v27 = vrot.slane %v5435_v45, 2 }
 0x3f7   :  { %4076 = vst [vmem:[#allocation3 + $0xf8] sm:$0xff] %v15781_v58  ;;  %v3957_v47 = vpop.f32.mrb[102].mxu0  ;;  %v4039_v11 = vpop.f32.mrb[102].mxu1  ;;  %5227 = vrot.lane.b32.xlu1 %v15736_v22, %s14102_s22  ;;  %v5707_v35 = vld [vmem:[#allocation3 + $0xc8] sm:$0xfe]  ;;  %v4915_v34 = vrot.slane %v4847_v44, 1 }
 0x3f8   :  { %4078 = vst [vmem:[#allocation3 + $0x108] sm:$0xff] %v3957_v47  ;;  %4080 = vst.msk [vmem:[#allocation3 + $0x118] sm:$0xff] %vm748_vm7, %v4039_v11  ;;  %v3959_v5 = vpop.f32.mrb[103].mxu0  ;;  %v13294_v24 = vpop.f32.mrb[103].mxu1  ;;  %v5503_v22 = vsel %vm2109_vm6, %v5501_v27, %v5502_v54  ;;  %v5708_v57 = vld [vmem:[#allocation3 + $0xe0] sm:$0x1] }
 0x3f9   :  { %5817 = vrot.lane.b32.xlu0 %v5772_v18, %s14102_s22  ;;  %4079 = vst [vmem:[#allocation3 + $0x110] sm:$0xff] %v3959_v5  ;;  %v5774_v1 = vrot.slane %v5708_v57, 1  ;;  %v4848_v29 = vld [vmem:[#allocation3 + $0xd8] sm:$0x1]  ;;  %v5438_v52 = vld [vmem:[#allocation3 + $0xe0] sm:$0x3] }
 0x3fa   :  { %v5773_v49 = vrot.slane %v5707_v35, 1  ;;  %v4916_v12 = vrot.slane %v4848_v29, 1  ;;  %v5437_v13 = vld [vmem:[#allocation3 + $0xc8] sm:$0xfc]  ;;  %v13866_v36 = vld [vmem:[%s18149_s1 + $0x214] ss:$12 sps:$4 sm:$0xff]  }
 0x3fb   :  { %4957 = vrot.lane.b32.xlu1 %v4914_v8, %s14100_s16  ;;  %v5505_v63 = vrot.slane %v5438_v52, 2  ;;  %v5024_v59 = vld [vmem:[#allocation3 + $0xd8] sm:$0x3]  ;;  %v5023_v45 = vld [vmem:[#allocation3 + $0xc0] sm:$0xfc]  ;;  %6548 = vmatprep.subr.bf16.mxu0 %v13866_v36  ;;  %v5504_v11 = vrot.slane %v5437_v13, 2 }
 0x3fc   :  { %6549 = vmatpush1.bf16.msra.mxu0 %v13864_v10  ;;  %v4917_v20 = vsel %vm1932_vm5, %v4915_v34, %v4916_v12  ;;  %v5092_v5 = vrot.slane %v5024_v59, 2  ;;  %v5091_v33 = vrot.slane %v5023_v45, 2 }
 0x3fd   :  { %5547 = vrot.lane.b32.xlu0 %v5503_v22, %s14100_s16  ;;  %v15802_v19 = vpop.f32.mrb[104].mxu0  ;;  %v4044_v28 = vpop.f32.mrb[104].mxu1  ;;  %6550 = vmatprep.subr.bf16.mxu0 %v13869_v50  ;;  %v5506_v27 = vsel %vm2109_vm6, %v5504_v11, %v5505_v63  ;;  %v5025_v63 = vld [vmem:[#allocation3 + $0xf0] sm:$0xfc] }
 0x3fe   :  { %4081 = vst [vmem:[#allocation3 + $0x120] sm:$0xff] %v15802_v19  ;;  %4083 = vst.msk [vmem:[#allocation3 + $0x130] sm:$0xff] %vm748_vm7, %v4044_v28  ;;  %v15806_v17 = vpop.f32.mrb[105].mxu0  ;;  %v13297_v41 = vpop.f32.mrb[105].mxu1  ;;  %v5093_v42 = vsel %vm2109_vm6, %v5091_v33, %v5092_v5  ;;  %v5709_v15 = vld [vmem:[#allocation3 + $0xf8] sm:$0xfe] }
 0x3ff   :  { %4082 = vst [vmem:[#allocation3 + $0x128] sm:$0xff] %v15806_v17  ;;  %v3967_v21 = vpop.f32.mrb[106].mxu0  ;;  %v4047_v9 = vpop.f32.mrb[106].mxu1  ;;  %5133 = vrot.lane.b32.xlu1 %v5090_v61, %s14101_s5  ;;  %v4850_v57 = vld [vmem:[#allocation3 + $0x108] sm:$0x1]  ;;  %v15846_v41 = vld [vmem:[#allocation2] sm:$0xff] }
 0x400   :  { %4084 = vst [vmem:[#allocation3 + $0x138] sm:$0xff] %v3967_v21  ;;  %4086 = vst.msk [vmem:[#allocation3 + $0x148] sm:$0xff] %vm748_vm7, %v4047_v9  ;;  %v3969_v51 = vpop.f32.mrb[107].mxu0  ;;  %v13298_v2 = vpop.f32.mrb[107].mxu1  ;;  %v5710_v22 = vld [vmem:[#allocation3 + $0x110] sm:$0x1] }
 0x401   :  { %5643 = vrot.lane.b32.xlu0 %v15757_v31, %s14101_s5  ;;  %4085 = vst [vmem:[#allocation3 + $0x140] sm:$0xff] %v3969_v51  ;;  %v5775_v31 = vsel %vm1932_vm5, %v5773_v49, %v5774_v1  ;;  %v5777_v48 = vrot.slane %v5710_v22, 1  ;;  %v5440_v28 = vld [vmem:[#allocation3 + $0x110] sm:$0x3]  ;;  %v5776_v21 = vrot.slane %v5709_v15, 1  ;;  %v4919_v51 = vrot.slane %v4850_v57, 1 }
 0x402   :  { %v4849_v9 = vld [vmem:[#allocation3 + $0xf0] sm:$0xfe]  ;;  %v5439_v2 = vld [vmem:[#allocation3 + $0xf8] sm:$0xfc]  ;;  %v5508_v44 = vrot.slane %v5440_v28, 2  ;;  %v5094_v34 = vrot.slane %v5025_v63, 2 }
 0x403   :  { %5229 = vrot.lane.b32.xlu1 %v15753_v39, %s14102_s22  ;;  %v13867_v39 = vld [vmem:[%s18149_s1 + $0x228] ss:$12 sps:$4 sm:$0xff]   ;;  %v5778_v49 = vsel %vm1932_vm5, %v5776_v21, %v5777_v48  ;;  %v4918_v36 = vrot.slane %v4849_v9, 1 }
 0x404   :  { %6551 = vmatpush1.bf16.msra.mxu0 %v13867_v39  ;;  %v5026_v10 = vld [vmem:[#allocation3 + $0x108] sm:$0x3] }
 0x405   :  { %5819 = vrot.lane.b32.xlu0 %v5775_v31, %s14102_s22  ;;  %v15827_v32 = vpop.f32.mrb[108].mxu0  ;;  %v4052_v47 = vpop.f32.mrb[108].mxu1  ;;  %v5507_v31 = vrot.slane %v5439_v2, 2  ;;  %v4920_v59 = vsel %vm1932_vm5, %v4918_v36, %v4919_v51  ;;  %v5095_v50 = vrot.slane %v5026_v10, 2  ;;  %v4851_v15 = vld [vmem:[#allocation3 + $0x120] sm:$0xfe] }
 0x406   :  { %4087 = vst [vmem:[#allocation3 + $0x150] sm:$0xff] %v15827_v32  ;;  %4089 = vst.msk [vmem:[#allocation3 + $0x160] sm:$0xff] %vm748_vm7, %v4052_v47  ;;  %v15834_v18 = vpop.f32.mrb[109].mxu0  ;;  %v13301_v54 = vpop.f32.mrb[109].mxu1  ;;  %v5441_v57 = vld [vmem:[#allocation3 + $0x128] sm:$0xfc] }
 0x407   :  { %4088 = vst [vmem:[#allocation3 + $0x158] sm:$0xff] %v15834_v18  ;;  %v3977_v24 = vpop.f32.mrb[110].mxu0  ;;  %v4055_v62 = vpop.f32.mrb[110].mxu1  ;;  %4959 = vrot.lane.b32.xlu1 %v4917_v20, %s14100_s16  ;;  %6569 = vmatmul.mubr.bf16.vlgmr.msra.gmra.mrb[160].mxu0 %v15846_v41  ;;  %v5096_v39 = vsel %vm2109_vm6, %v5094_v34, %v5095_v50  ;;  %v5711_v54 = vld [vmem:[#allocation3 + $0x128] sm:$0xfe]  ;;  %v5510_v9 = vrot.slane %v5441_v57, 2 }
 0x408   :  { %4090 = vst [vmem:[#allocation3 + $0x168] sm:$0xff] %v3977_v24  ;;  %4092 = vst.msk [vmem:[#allocation3 + $0x178] sm:$0xff] %vm748_vm7, %v4055_v62  ;;  %v3979_v55 = vpop.f32.mrb[111].mxu0  ;;  %v13302_v8 = vpop.f32.mrb[111].mxu1  ;;  %6578 = vmatprep.mubr.bf16.mxu0 %v15846_v41  ;;  %v5712_v45 = vld [vmem:[#allocation3 + $0x140] sm:$0x1] }
 0x409   :  { %5549 = vrot.lane.b32.xlu0 %v5506_v27, %s14100_s16  ;;  %4091 = vst [vmem:[#allocation3 + $0x170] sm:$0xff] %v3979_v55  ;;  %v5780_v24 = vrot.slane %v5712_v45, 1  ;;  %v4852_v62 = vld [vmem:[#allocation3 + $0x138] sm:$0x1]  ;;  %v5442_v8 = vld [vmem:[#allocation3 + $0x140] sm:$0x3] }
 0x40a   :  { %v4922_v48 = vrot.slane %v4852_v62, 1  ;;  %v5028_v21 = vld [vmem:[#allocation3 + $0x138] sm:$0x3] }
 0x40b   :  { %5135 = vrot.lane.b32.xlu1 %v5093_v42, %s14101_s5  ;;  %v5779_v42 = vrot.slane %v5711_v54, 1 }
 0x40d   :  { %5645 = vrot.lane.b32.xlu0 %v15781_v58, %s14101_s5  ;;  %v15849_v61 = vpop.f32.mrb[112].mxu0  ;;  %v4060_v35 = vpop.f32.mrb[112].mxu1  ;;  %v5781_v28 = vsel %vm1932_vm5, %v5779_v42, %v5780_v24 }
 0x40e   :  { %4095 = vst.msk [vmem:[#allocation3 + $0x190] sm:$0xff] %vm748_vm7, %v4060_v35  ;;  %v15853_v1 = vpop.f32.mrb[113].mxu0  ;;  %v13305_v29 = vpop.f32.mrb[113].mxu1  ;;  %v5511_v35 = vrot.slane %v5442_v8, 2  ;;  %v5713_v50 = vld [vmem:[#allocation3 + $0x158] sm:$0xfe] }
 0x40f   :  { %4094 = vst [vmem:[#allocation3 + $0x188] sm:$0xff] %v15853_v1  ;;  %v3987_v58 = vpop.f32.mrb[114].mxu0  ;;  %v4063_v52 = vpop.f32.mrb[114].mxu1  ;;  %5231 = vrot.lane.b32.xlu1 %v15777_v26, %s14102_s22  ;;  %v5509_v26 = vsel %vm2109_vm6, %v5507_v31, %v5508_v44  ;;  %v5027_v29 = vld [vmem:[#allocation3 + $0x120] sm:$0xfc] }
 0x410   :  { %4098 = vst.msk [vmem:[#allocation3 + $0x1a8] sm:$0xff] %vm748_vm7, %v4063_v52  ;;  %v3989_v12 = vpop.f32.mrb[115].mxu0  ;;  %v13306_v13 = vpop.f32.mrb[115].mxu1  ;;  %v5098_v52 = vrot.slane %v5028_v21, 2  ;;  %v5714_v36 = vld [vmem:[#allocation3 + $0x170] sm:$0x1] }
 0x411   :  { %5821 = vrot.lane.b32.xlu0 %v5778_v49, %s14102_s22  ;;  %4097 = vst [vmem:[#allocation3 + $0x1a0] sm:$0xff] %v3989_v12  ;;  %v5097_v13 = vrot.slane %v5027_v29, 2  ;;  %v4854_v34 = vld [vmem:[#allocation3 + $0x168] sm:$0x1]  ;;  %v5444_v45 = vld [vmem:[#allocation3 + $0x170] sm:$0x3] }
 0x412   :  { %v5443_v54 = vld [vmem:[#allocation3 + $0x158] sm:$0xfc]  ;;  %v5514_v24 = vrot.slane %v5444_v45, 2  ;;  %v5030_v62 = vld [vmem:[#allocation3 + $0x168] sm:$0x3] }
 0x413   :  { %4961 = vrot.lane.b32.xlu1 %v4920_v59, %s14100_s16  ;;  %v5099_v59 = vsel %vm2109_vm6, %v5097_v13, %v5098_v52  ;;  %v5029_v8 = vld [vmem:[#allocation3 + $0x150] sm:$0xfc] }
 0x414   :  { %v5100_v42 = vrot.slane %v5029_v8, 2 }
 0x415   :  { %5551 = vrot.lane.b32.xlu0 %v5509_v26, %s14100_s16  ;;  %v3993_v47 = vpop.f32.mrb[116].mxu0  ;;  %v4068_v11 = vpop.f32.mrb[116].mxu1  ;;  %v5783_v26 = vrot.slane %v5714_v36, 1 }
 0x416   :  { %v15866_v20 = vpop.f32.mrb[117].mxu0  ;;  %4101 = vst.msk [vmem:[#allocation3 + $0x1c0] sm:$0xff] %vm748_vm7, %v4068_v11  ;;  %v13309_v5 = vpop.f32.mrb[117].mxu1  ;;  %v5782_v47 = vrot.slane %v5713_v50, 1  ;;  %v4853_v11 = vld [vmem:[#allocation3 + $0x150] sm:$0xfe] }
 0x417   :  { %5137 = vrot.lane.b32.xlu1 %v5096_v39, %s14101_s5  ;;  %4100 = vst [vmem:[#allocation3 + $0x1b8] sm:$0xff] %v15866_v20  ;;  %v3997_v27 = vpop.f32.mrb[118].mxu0  ;;  %v4071_v55 = vpop.f32.mrb[118].mxu1  ;;  %v4925_v39 = vrot.slane %v4854_v34, 1 }
 0x418   :  { %v3999_v33 = vpop.f32.mrb[119].mxu0  ;;  %4104 = vst.msk [vmem:[#allocation3 + $0x1d8] sm:$0xff] %vm748_vm7, %v4071_v55  ;;  %v13310_v22 = vpop.f32.mrb[119].mxu1  ;;  %v5784_v5 = vsel %vm1932_vm5, %v5782_v47, %v5783_v26  ;;  %v4924_v27 = vrot.slane %v4853_v11, 1  ;;  %v5513_v55 = vrot.slane %v5443_v54, 2 }
 0x419   :  { %5647 = vrot.lane.b32.xlu0 %v15806_v17, %s14101_s5  ;;  %4103 = vst [vmem:[#allocation3 + $0x1d0] sm:$0xff] %v3999_v33  ;;  %v4921_v17 = vrot.slane %v4851_v15, 1 }
 0x41a   :  { %v4926_v33 = vsel %vm1932_vm5, %v4924_v27, %v4925_v39  ;;  %v5515_v22 = vsel %vm2109_vm6, %v5513_v55, %v5514_v24 }
 0x41b   :  { %5233 = vrot.lane.b32.xlu1 %v15802_v19, %s14102_s22  ;;  %v4923_v58 = vsel %vm1932_vm5, %v4921_v17, %v4922_v48  ;;  %v5512_v19 = vsel %vm2109_vm6, %v5510_v9, %v5511_v35  ;;  %v5715_v48 = vld [vmem:[#allocation3 + $0x188] sm:$0xfe] }
 0x41c   :  { %v5445_v35 = vld [vmem:[#allocation3 + $0x188] sm:$0xfc]  ;;  %v5785_v21 = vrot.slane %v5715_v48, 1 }
 0x41d   :  { %5823 = vrot.lane.b32.xlu0 %v5781_v28, %s14102_s22  ;;  %v4304_v51 = vpop.f32.mrb[120].mxu0  ;;  %v4387_v2 = vpop.f32.mrb[120].mxu1  ;;  %v5446_v28 = vld [vmem:[#allocation3 + $0x1a0] sm:$0x3]  ;;  %v5516_v52 = vrot.slane %v5445_v35, 2 }
 0x41e   :  { %4426 = vst [vmem:[#allocation3 + $0x1e0] sm:$0xff] %v4304_v51  ;;  %v4306_v49 = vpop.f32.mrb[121].mxu0  ;;  %v13329_v44 = vpop.f32.mrb[121].mxu1  ;;  %v5717_v17 = vld [vmem:[#allocation3 + $0x1b8] sm:$0xfe]  ;;  %v5517_v29 = vrot.slane %v5446_v28, 2 }
 0x41f   :  { %4963 = vrot.lane.b32.xlu1 %v4923_v58, %s14100_s16  ;;  %v4308_v10 = vpop.f32.mrb[122].mxu0  ;;  %v4390_v12 = vpop.f32.mrb[122].mxu1  ;;  %v5788_v49 = vrot.slane %v5717_v17, 1 }
 0x420   :  { %4429 = vst [vmem:[#allocation3 + $0x1f8] sm:$0xff] %v4308_v10  ;;  %v4310_v31 = vpop.f32.mrb[123].mxu0  ;;  %v13330_v63 = vpop.f32.mrb[123].mxu1  ;;  %v5718_v9 = vld [vmem:[#allocation3 + $0x1d0] sm:$0x1]  ;;  %v5518_v13 = vsel %vm2109_vm6, %v5516_v52, %v5517_v29  ;;  %v14044_v52 = vld [vmem:[#allocation3] sm:$0xff] }
 0x421   :  { %5553 = vrot.lane.b32.xlu0 %v5512_v19, %s14100_s16  ;;  %v5789_v44 = vrot.slane %v5718_v9, 1 }
 0x423   :  { %5139 = vrot.lane.b32.xlu1 %v5099_v59, %s14101_s5 }
 0x425   :  { %5649 = vrot.lane.b32.xlu0 %v15834_v18, %s14101_s5  ;;  %v5101_v18 = vrot.slane %v5030_v62, 2  ;;  %v4855_v51 = vld [vmem:[#allocation3 + $0x1e0] sm:$0xfe] }
 0x426   :  { %v4927_v19 = vrot.slane %v4855_v51, 1 }
 0x427   :  { %5235 = vrot.lane.b32.xlu1 %v15827_v32, %s14102_s22  ;;  %v5716_v32 = vld [vmem:[#allocation3 + $0x1a0] sm:$0x1]  ;;  %v5102_v15 = vsel %vm2109_vm6, %v5100_v42, %v5101_v18  ;;  %v4856_v2 = vld [vmem:[#allocation3 + $0x1f8] sm:$0x1] }
 0x428   :  { %v5786_v57 = vrot.slane %v5716_v32, 1  ;;  %v4928_v10 = vrot.slane %v4856_v2, 1  ;;  %v5032_v12 = vld [vmem:[#allocation3 + $0x1f8] sm:$0x3]  ;;  %v13870_v2 = vld [vmem:[%s18149_s1 + $0x188] ss:$12 sps:$4 sm:$0xff]  }
 0x429   :  { %5825 = vrot.lane.b32.xlu0 %v5784_v5, %s14102_s22  ;;  %v5104_v31 = vrot.slane %v5032_v12, 2  ;;  %v4952_v5 = vpop.permute.xlu0 %4951  ;;  %13384 = vmatpush3.bf16.msra.mxu1 %v13870_v2 }
 0x42a   :  { %v5787_v58 = vsel %vm1932_vm5, %v5785_v21, %v5786_v57  ;;  %v4929_v63 = vsel %vm1932_vm5, %v4927_v19, %v4928_v10  ;;  %v5288_v10 = vld [vmem:[#allocation3 + $0x50] sm:$0x1]  ;;  %13385 = vmatprep.subr.bf16.mxu1 %v18158_v23 }
 0x42b   :  { %4965 = vrot.lane.b32.xlu1 %v4926_v33, %s14100_s16 }
 0x42d   :  { %5555 = vrot.lane.b32.xlu0 %v5515_v22, %s14100_s16 }
 0x42f   :  { %5141 = vrot.lane.b32.xlu1 %v5102_v15, %s14101_s5 }
 0x431   :  { %5651 = vrot.lane.b32.xlu0 %v15853_v1, %s14101_s5  ;;  %v5031_v1 = vld [vmem:[#allocation3 + $0x1e0] sm:$0xfc] }
 0x432   :  { %v5103_v36 = vrot.slane %v5031_v1, 2  ;;  %v13871_v1 = vld [vmem:[%s18149_s1 + $0x1a0] ss:$12 sps:$4 sm:$0xff]  }
 0x433   :  { %5237 = vrot.lane.b32.xlu1 %v15849_v61, %s14102_s22  ;;  %v5790_v61 = vsel %vm1932_vm5, %v5788_v49, %v5789_v44  ;;  %v4999_v49 = vadd.f32 %v14044_v52, %v4952_v5  ;;  %v5128_v44 = vpop.permute.xlu1 %5127  ;;  %13386 = vmatpush3.bf16.msra.mxu1 %v13871_v1 }
 0x434   :  { %v5105_v59 = vsel %vm2109_vm6, %v5103_v36, %v5104_v31  ;;  %13387 = vmatprep.subr.bf16.mxu1 %v18158_v23 }
 0x435   :  { %5827 = vrot.lane.b32.xlu0 %v5787_v58, %s14102_s22  ;;  %v5175_v31 = vadd.f32 %v5128_v44, %v4999_v49 }
 0x437   :  { %5557 = vrot.lane.b32.xlu1 %v5518_v13, %s14100_s16 }
 0x439   :  { %5653 = vrot.lane.b32.xlu0 %v15866_v20, %s14101_s5 }
 0x43b   :  { %5829 = vrot.lane.b32.xlu1 %v5790_v61, %s14102_s22  ;;  %v5287_v61 = vld [vmem:[#allocation3 + $0x38] sm:$0xfe] }
 0x43d   :  { %4967 = vrot.lane.b32.xlu0 %v4929_v63, %s14100_s16 }
 0x43f   :  { %5143 = vrot.lane.b32.xlu1 %v5105_v59, %s14101_s5 }
 0x440   :  { %v4314_v50 = vpop.f32.mrb[124].mxu0  ;;  %v4395_v26 = vpop.f32.mrb[124].mxu1 }
 0x441   :  { %4432 = vst [vmem:[#allocation3 + $0x210] sm:$0xff] %v4314_v50  ;;  %v4316_v34 = vpop.f32.mrb[125].mxu0  ;;  %v13333_v45 = vpop.f32.mrb[125].mxu1  ;;  %5239 = vrot.lane.b32.xlu0 %v4314_v50, %s14102_s22  ;;  %v5352_v50 = vrot.slane %v5288_v10, 1 }
 0x442   :  { %4433 = vst [vmem:[#allocation3 + $0x218] sm:$0xff] %v4316_v34  ;;  %v4318_v20 = vpop.f32.mrb[126].mxu0  ;;  %v4398_v47 = vpop.f32.mrb[126].mxu1 }
 0x443   :  { %4435 = vst [vmem:[#allocation3 + $0x228] sm:$0xff] %v4318_v20  ;;  %v4320_v11 = vpop.f32.mrb[127].mxu0  ;;  %v13334_v39 = vpop.f32.mrb[127].mxu1 }
 0x444   :  { %4436 = vst [vmem:[#allocation3 + $0x230] sm:$0xff] %v4320_v11 }
 0x448   :  { %v4857_v54 = vld [vmem:[#allocation3 + $0x210] sm:$0xfe]  ;;  %v5224_v13 = vpop.permute.xlu0 %5223 }
 0x449   :  { %v5447_v24 = vld [vmem:[#allocation3 + $0x218] sm:$0xfc]  ;;  %v5033_v8 = vld [vmem:[#allocation3 + $0x210] sm:$0xfc]  ;;  %v4930_v22 = vrot.slane %v4857_v54, 1  ;;  %v5271_v54 = vadd.f32 %v5224_v13, %v5175_v31 }
 0x44a   :  { %v4324_v62 = vpop.f32.mrb[128].mxu0  ;;  %v4403_v27 = vpop.f32.mrb[128].mxu1  ;;  %v4858_v55 = vld [vmem:[#allocation3 + $0x228] sm:$0x1]  ;;  %v5519_v57 = vrot.slane %v5447_v24, 2  ;;  %v5106_v58 = vrot.slane %v5033_v8, 2 }
 0x44b   :  { %4438 = vst [vmem:[#allocation3 + $0x240] sm:$0xff] %v4324_v62  ;;  %4440 = vst.msk [vmem:[#allocation3 + $0x250] sm:$0xff] %vm748_vm7, %v4403_v27  ;;  %v4326_v33 = vpop.f32.mrb[129].mxu0  ;;  %v13337_v18 = vpop.f32.mrb[129].mxu1  ;;  %v4931_v42 = vrot.slane %v4858_v55, 1 }
 0x44c   :  { %v5448_v32 = vld [vmem:[#allocation3 + $0x230] sm:$0x3]  ;;  %4439 = vst [vmem:[#allocation3 + $0x248] sm:$0xff] %v4326_v33  ;;  %v4328_v15 = vpop.f32.mrb[130].mxu0  ;;  %v4406_v48 = vpop.f32.mrb[130].mxu1  ;;  %v5351_v18 = vrot.slane %v5287_v61, 1 }
 0x44d   :  { %v5520_v28 = vrot.slane %v5448_v32, 2  ;;  %v5034_v35 = vld [vmem:[#allocation3 + $0x228] sm:$0x3]  ;;  %4441 = vst [vmem:[#allocation3 + $0x258] sm:$0xff] %v4328_v15  ;;  %4443 = vst.msk [vmem:[#allocation3 + $0x268] sm:$0xff] %vm748_vm7, %v4406_v48  ;;  %v13338_v21 = vpop.f32.mrb[131].mxu1  ;;  %v4932_v17 = vsel %vm1932_vm5, %v4930_v22, %v4931_v42 }
 0x44e   :  { %v4330_v9 = vpop.f32.mrb[131].mxu0  ;;  %v5107_v29 = vrot.slane %v5034_v35, 2  ;;  %4969 = vrot.lane.b32.xlu0 %v4932_v17, %s14100_s16  ;;  %v5879_v15 = vld [vmem:[#allocation3 + $0x70] sm:$0xfc]  ;;  %v5353_v21 = vsel %vm1932_vm5, %v5351_v18, %v5352_v50 }
 0x44f   :  { %4442 = vst [vmem:[#allocation3 + $0x260] sm:$0xff] %v4330_v9  ;;  %v5521_v51 = vsel %vm2109_vm6, %v5519_v57, %v5520_v28  ;;  %v5880_v28 = vld [vmem:[#allocation3 + $0x88] sm:$0x3]  ;;  %v5943_v52 = vrot.slane %v5879_v15, 2 }
 0x450   :  { %5559 = vrot.lane.b32.xlu1 %v5521_v51, %s14100_s16  ;;  %v5108_v19 = vsel %vm2109_vm6, %v5106_v58, %v5107_v29  ;;  %v5415_v29 = vadd.f32 %v5353_v21, %v5271_v54  ;;  %v5944_v49 = vrot.slane %v5880_v28, 2 }
 0x452   :  { %5145 = vrot.lane.b32.xlu0 %v5108_v19, %s14101_s5  ;;  %v4859_v12 = vld [vmem:[#allocation3 + $0x240] sm:$0xfe] }
 0x453   :  { %v5449_v36 = vld [vmem:[#allocation3 + $0x248] sm:$0xfc]  ;;  %v4933_v34 = vrot.slane %v4859_v12, 1  ;;  %v5035_v8 = vld [vmem:[#allocation3 + $0x240] sm:$0xfc] }
 0x454   :  { %5655 = vrot.lane.b32.xlu1 %v4326_v33, %s14101_s5  ;;  %v15929_v63 = vpop.f32.mrb[132].mxu0  ;;  %v4411_v59 = vpop.f32.mrb[132].mxu1  ;;  %v4860_v26 = vld [vmem:[#allocation3 + $0x258] sm:$0x1]  ;;  %v5522_v27 = vrot.slane %v5449_v36, 2  ;;  %v5109_v9 = vrot.slane %v5035_v8, 2 }
 0x455   :  { %4444 = vst [vmem:[#allocation3 + $0x270] sm:$0xff] %v15929_v63  ;;  %4446 = vst.msk [vmem:[#allocation3 + $0x280] sm:$0xff] %vm748_vm7, %v4411_v59  ;;  %v4954_v45 = vpop.permute.xlu1 %4953  ;;  %v4336_v20 = vpop.f32.mrb[133].mxu0  ;;  %v4934_v47 = vrot.slane %v4860_v26, 1  ;;  %v5036_v39 = vld [vmem:[#allocation3 + $0x258] sm:$0x3] }
 0x456   :  { %v5450_v11 = vld [vmem:[#allocation3 + $0x260] sm:$0x3]  ;;  %4445 = vst [vmem:[#allocation3 + $0x278] sm:$0xff] %v4336_v20  ;;  %v13341_v5 = vpop.f32.mrb[133].mxu1  ;;  %5241 = vrot.lane.b32.xlu0 %v4324_v62, %s14102_s22  ;;  %v4338_v24 = vpop.f32.mrb[134].mxu0  ;;  %v5110_v32 = vrot.slane %v5036_v39, 2  ;;  %v5000_v10 = vadd.f32 %v4954_v45, %v15713_v30 }
 0x457   :  { %v5523_v55 = vrot.slane %v5450_v11, 2  ;;  %4447 = vst [vmem:[#allocation3 + $0x288] sm:$0xff] %v4338_v24  ;;  %v4414_v33 = vpop.f32.mrb[134].mxu1  ;;  %v5544_v22 = vpop.permute.xlu0 %5543  ;;  %v4935_v42 = vsel %vm1932_vm5, %v4933_v34, %v4934_v47  ;;  %v5720_v35 = vld [vmem:[#allocation3 + $0x260] sm:$0x1] }
 0x458   :  { %4449 = vst.msk [vmem:[#allocation3 + $0x298] sm:$0xff] %vm748_vm7, %v4414_v33  ;;  %v4340_v48 = vpop.f32.mrb[135].mxu0  ;;  %v13342_v57 = vpop.f32.mrb[135].mxu1  ;;  %4971 = vrot.lane.b32.xlu1 %v4935_v42, %s14100_s16  ;;  %v5719_v51 = vld [vmem:[#allocation3 + $0x248] sm:$0xfe]  ;;  %v5111_v58 = vsel %vm2109_vm6, %v5109_v9, %v5110_v32  ;;  %v5792_v44 = vrot.slane %v5720_v35, 1  ;;  %v5591_v1 = vadd.f32 %v5544_v22, %v5415_v29 }
 0x459   :  { %v5524_v62 = vsel %vm2109_vm6, %v5522_v27, %v5523_v55  ;;  %4448 = vst [vmem:[#allocation3 + $0x290] sm:$0xff] %v4340_v48  ;;  %v5130_v17 = vpop.permute.xlu1 %5129  ;;  %v13872_v19 = vld [vmem:[%s18149_s1 + $0x1b8] ss:$12 sps:$4 sm:$0xff]   ;;  %v5290_v36 = vld [vmem:[#allocation3 + $0x80] sm:$0x1]  ;;  %v5791_v50 = vrot.slane %v5719_v51, 1  ;;  %v5945_v48 = vsel %vm2109_vm6, %v5943_v52, %v5944_v49 }
 0x45a   :  { %5561 = vrot.lane.b32.xlu0 %v5524_v62, %s14100_s16  ;;  %v5289_v26 = vld [vmem:[#allocation3 + $0x68] sm:$0xfe]  ;;  %13388 = vmatpush3.bf16.msra.mxu1 %v13872_v19  ;;  %v13873_v30 = vld [vmem:[%s18149_s1 + $0x1d0] ss:$12 sps:$4 sm:$0xff]   ;;  %v5176_v34 = vadd.f32 %v5130_v17, %v5000_v10  ;;  %v5355_v33 = vrot.slane %v5290_v36, 1 }
 0x45b   :  { %v5640_v2 = vpop.permute.xlu0 %5639  ;;  %13389 = vmatprep.subr.bf16.mxu1 %v18158_v23  ;;  %v5793_v27 = vsel %vm1932_vm5, %v5791_v50, %v5792_v44  ;;  %v15966_v57 = vld [vmem:[%s18150_s2 + $0x1] ss:$0 sm:$0xff]  ;;  %v5354_v35 = vrot.slane %v5289_v26, 1  ;;  %v5882_v36 = vld [vmem:[#allocation3 + $0xb8] sm:$0x3] }
 0x45c   :  { %v15946_v12 = vpop.f32.mrb[136].mxu0  ;;  %v4419_v13 = vpop.f32.mrb[136].mxu1  ;;  %5147 = vrot.lane.b32.xlu1 %v5111_v58, %s14101_s5  ;;  %v4861_v61 = vld [vmem:[#allocation3 + $0x270] sm:$0xfe]  ;;  %v5687_v45 = vadd.f32 %v5640_v2, %v5591_v1  ;;  %v5881_v50 = vld [vmem:[#allocation3 + $0xa0] sm:$0xfc] }
 0x45d   :  { %4450 = vst [vmem:[#allocation3 + $0x2a0] sm:$0xff] %v15946_v12  ;;  %4452 = vst.msk [vmem:[#allocation3 + $0x2b0] sm:$0xff] %vm748_vm7, %v4419_v13  ;;  %v5226_v31 = vpop.permute.xlu1 %5225  ;;  %v15951_v59 = vpop.f32.mrb[137].mxu0  ;;  %v4936_v55 = vrot.slane %v4861_v61, 1  ;;  %v5451_v9 = vld [vmem:[#allocation3 + $0x278] sm:$0xfc]  ;;  %v5356_v51 = vsel %vm1932_vm5, %v5354_v35, %v5355_v33 }
 0x45e   :  { %4451 = vst [vmem:[#allocation3 + $0x2a8] sm:$0xff] %v15951_v59  ;;  %v13345_v47 = vpop.f32.mrb[137].mxu1  ;;  %5657 = vrot.lane.b32.xlu0 %v4336_v20, %s14101_s5  ;;  %v4348_v11 = vpop.f32.mrb[138].mxu0  ;;  %v4862_v39 = vld [vmem:[#allocation3 + $0x288] sm:$0x1]  ;;  %v5272_v18 = vadd.f32 %v5226_v31, %v5176_v34  ;;  %13390 = vmatpush3.bf16.msra.mxu1 %v13873_v30  ;;  %v5525_v13 = vrot.slane %v5451_v9, 2 }
 0x45f   :  { %v5038_v54 = vld [vmem:[#allocation3 + $0x288] sm:$0x3]  ;;  %v4422_v5 = vpop.f32.mrb[138].mxu1  ;;  %4453 = vst [vmem:[#allocation3 + $0x2b8] sm:$0xff] %v4348_v11  ;;  %v5816_v24 = vpop.permute.xlu0 %5815  ;;  %v4937_v8 = vrot.slane %v4862_v39, 1  ;;  %13391 = vmatprep.subr.bf16.mxu1 %v18158_v23  ;;  %v5947_v39 = vrot.slane %v5882_v36, 2 }
 0x460   :  { %4455 = vst.msk [vmem:[#allocation3 + $0x2c8] sm:$0xff] %vm748_vm7, %v4422_v5  ;;  %v5863_v22 = vadd.f32 %v5816_v24, %v5687_v45  ;;  %v4350_v42 = vpop.f32.mrb[139].mxu0  ;;  %v13346_v32 = vpop.f32.mrb[139].mxu1  ;;  %5831 = vrot.lane.b32.xlu1 %v5793_v27, %s14102_s22  ;;  %v5037_v20 = vld [vmem:[#allocation3 + $0x270] sm:$0xfc]  ;;  %v5113_v21 = vrot.slane %v5038_v54, 2  ;;  %v5416_v44 = vadd.f32 %v5356_v51, %v5272_v18 }
 0x461   :  { %v5452_v15 = vld [vmem:[#allocation3 + $0x290] sm:$0x3]  ;;  %4454 = vst [vmem:[#allocation3 + $0x2c0] sm:$0xff] %v4350_v42  ;;  %v4956_v62 = vpop.permute.xlu1 %4955  ;;  %v4938_v28 = vsel %vm1932_vm5, %v4936_v55, %v4937_v8  ;;  %v5112_v58 = vrot.slane %v5037_v20, 2  ;;  %v5721_v19 = vld [vmem:[#allocation3 + $0x278] sm:$0xfe] }
 0x462   :  { %v6007_v17 = vadd.f32 %v5945_v48, %v5863_v22  ;;  %4973 = vrot.lane.b32.xlu0 %v4938_v28, %s14100_s16  ;;  %v5722_v29 = vld [vmem:[#allocation3 + $0x290] sm:$0x1]  ;;  %v5526_v52 = vrot.slane %v5452_v15, 2  ;;  %v5794_v34 = vrot.slane %v5721_v19, 1  ;;  %v14045_v45 = vld [vmem:[#allocation3 + $0x60] sm:$0xff]  ;;  %v5946_v8 = vrot.slane %v5881_v50, 2 }
 0x463   :  { %v5546_v2 = vpop.permute.xlu0 %5545  ;;  %v5114_v1 = vsel %vm2109_vm6, %v5112_v58, %v5113_v21  ;;  %v5795_v61 = vrot.slane %v5722_v29, 1  ;;  %v5001_v47 = vadd.f32 %v14045_v45, %v4956_v62  ;;  %v5292_v54 = vld [vmem:[#allocation3 + $0xb0] sm:$0x1]  ;;  %v13875_v33 = vld [vmem:[%s18149_s1 + $0x200] ss:$12 sps:$4 sm:$0xff]  }
 0x464   :  { %v6031_v49 = vadd.f32 %v15966_v57, %v6007_v17  ;;  %5243 = vrot.lane.b32.xlu1 %v15929_v63, %s14102_s22  ;;  %v5527_v30 = vsel %vm2109_vm6, %v5525_v13, %v5526_v52  ;;  %v13874_v63 = vld [vmem:[%s18149_s1 + $0x1e8] ss:$12 sps:$4 sm:$0xff]   ;;  %v5592_v11 = vadd.f32 %v5546_v2, %v5416_v44  ;;  %v5291_v42 = vld [vmem:[#allocation3 + $0x98] sm:$0xfe]  ;;  %v4863_v32 = vld [vmem:[#allocation3 + $0x2a0] sm:$0xfe]  ;;  %v5948_v35 = vsel %vm2109_vm6, %v5946_v8, %v5947_v39 }
 0x465   :  { %v5132_v10 = vpop.permute.xlu1 %5131  ;;  %v5796_v55 = vsel %vm1932_vm5, %v5794_v34, %v5795_v61  ;;  %13392 = vmatpush3.bf16.msra.mxu1 %v13874_v63  ;;  %v5358_v48 = vrot.slane %v5292_v54, 1  ;;  %v5453_v17 = vld [vmem:[#allocation3 + $0x2a8] sm:$0xfc]  ;;  %v5357_v51 = vrot.slane %v5291_v42, 1  ;;  %v4939_v2 = vrot.slane %v4863_v32, 1 }
 0x466   :  { %v15976_v31 = vmax.f32 %v6031_v49, 0.0  ;;  %5149 = vrot.lane.b32.xlu0 %v5114_v1, %s14101_s5  ;;  %v4864_v5 = vld [vmem:[#allocation3 + $0x2b8] sm:$0x1]  ;;  %v5177_v18 = vadd.f32 %v5132_v10, %v5001_v47  ;;  %13393 = vmatprep.subr.bf16.mxu1 %v18158_v23  ;;  %v5723_v19 = vld [vmem:[#allocation3 + $0x2a8] sm:$0xfe]  ;;  %v5528_v13 = vrot.slane %v5453_v17, 2 }
 0x467   :  { %v5642_v26 = vpop.permute.xlu0 %5641  ;;  %v4940_v62 = vrot.slane %v4864_v5, 1  ;;  %v13876_v49 = vld [vmem:[%s18149_s1 + $0x218] ss:$12 sps:$4 sm:$0xff]   ;;  %v5797_v45 = vrot.slane %v5723_v19, 1 }
 0x468   :  { %5563 = vrot.lane.b32.xlu1 %v5527_v30, %s14100_s16  ;;  %v15986_v24 = vpack.c.bf16 %v15976_v31, %v15976_v31  ;;  %v5688_v22 = vadd.f32 %v5642_v26, %v5592_v11  ;;  %v5454_v20 = vld [vmem:[#allocation3 + $0x2c0] sm:$0x3]  ;;  %v13877_v11 = vld [vmem:[%s18149_s1 + $0x230] ss:$12 sps:$4 sm:$0xff]  }
 0x469   :  { %v5228_v27 = vpop.permute.xlu1 %5227  ;;  %v5724_v9 = vld [vmem:[#allocation3 + $0x2c0] sm:$0x1]  ;;  %v5529_v58 = vrot.slane %v5454_v20, 2  ;;  %13394 = vmatpush3.bf16.msra.mxu1 %v13875_v33  ;;  %v4941_v1 = vsel %vm1932_vm5, %v4939_v2, %v4940_v62  ;;  %v5039_v2 = vld [vmem:[#allocation3 + $0x2a0] sm:$0xfc] }
 0x46a   :  { %5833 = vrot.lane.b32.xlu0 %v5796_v55, %s14102_s22  ;;  %v5273_v28 = vadd.f32 %v5228_v27, %v5177_v18  ;;  %v6161_v52 = vshrl.u32 %v15986_v24, 16  ;;  %13395 = vmatprep.subr.bf16.mxu1 %v18158_v23  ;;  %v5798_v61 = vrot.slane %v5724_v9, 1  ;;  %v5884_v27 = vld [vmem:[#allocation3 + $0xe8] sm:$0x3]  ;;  %v4810_v55 = vld [vmem:[#allocation3 + $0x90] sm:$0xff]  ;;  %v6164_v42 = vshll.u32 %v15986_v24, 16 }
 0x46b   :  { %v5818_v15 = vpop.permute.xlu0 %5817  ;;  %v5530_v63 = vsel %vm2109_vm6, %v5528_v13, %v5529_v58  ;;  %v5294_v62 = vld [vmem:[#allocation3 + $0xe0] sm:$0x1] }
 0x46c   :  { %v5864_v21 = vadd.f32 %v5818_v15, %v5688_v22  ;;  %5659 = vrot.lane.b32.xlu1 %v15951_v59, %s14101_s5  ;;  %v5359_v59 = vsel %vm1932_vm5, %v5357_v51, %v5358_v48  ;;  %v6163_v47 = vrot.slane %v6161_v52, 7  ;;  %v5799_v18 = vsel %vm1932_vm5, %v5797_v45, %v5798_v61  ;;  %v5883_v22 = vld [vmem:[#allocation3 + $0xd0] sm:$0xfc]  ;;  %v5293_v51 = vld [vmem:[#allocation3 + $0xc8] sm:$0xfe] }
 0x46d   :  { %v4958_v29 = vpop.permute.xlu1 %4957  ;;  %v5417_v50 = vadd.f32 %v5359_v59, %v5273_v28  ;;  %13396 = vmatpush3.bf16.msra.mxu1 %v13876_v49  ;;  %v5040_v28 = vld [vmem:[#allocation3 + $0x2b8] sm:$0x3]  ;;  %v5949_v58 = vrot.slane %v5883_v22, 2  ;;  %v5361_v49 = vrot.slane %v5294_v62, 1  ;;  %v5360_v13 = vrot.slane %v5293_v51, 1 }
 0x46e   :  { %v6008_v44 = vadd.f32 %v5948_v35, %v5864_v21  ;;  %5245 = vrot.lane.b32.xlu0 %v15946_v12, %s14102_s22  ;;  %13397 = vmatprep.subr.bf16.mxu1 %v18158_v23  ;;  %v5002_v32 = vadd.f32 %v4958_v29, %v4810_v55  ;;  %v5950_v21 = vrot.slane %v5884_v27, 2  ;;  %v6166_v17 = vor.u32 %v6164_v42, %v6163_v47 }
 0x46f   :  { %v5548_v10 = vpop.permute.xlu0 %5547  ;;  %v5115_v61 = vrot.slane %v5039_v2, 2 }
 0x470   :  { %v6032_v36 = vadd.f32 %v15966_v57, %v6008_v44  ;;  %v16007_v26 = vpop.f32.mrb[140].mxu0  ;;  %v4738_v30 = vpop.f32.mrb[140].mxu1  ;;  %4975 = vrot.lane.b32.xlu1 %v4941_v1, %s14100_s16  ;;  %v5593_v20 = vadd.f32 %v5548_v10, %v5417_v50  ;;  %v5116_v44 = vrot.slane %v5040_v28, 2  ;;  %v5951_v10 = vsel %vm2109_vm6, %v5949_v58, %v5950_v21  ;;  %v4811_v21 = vld [vmem:[#allocation3 + $0xc0] sm:$0xff]  ;;  %v5296_v58 = vld [vmem:[#allocation3 + $0x110] sm:$0x1] }
 0x471   :  { %4777 = vst [vmem:[#allocation3 + $0x2d0] sm:$0xff] %v16007_v26  ;;  %4779 = vst.msk [vmem:[#allocation3 + $0x2e0] sm:$0xff] %vm748_vm7, %v4738_v30  ;;  %v5134_v12 = vpop.permute.xlu1 %5133  ;;  %v4657_v34 = vpop.f32.mrb[141].mxu0  ;;  %13398 = vmatpush3.bf16.msra.mxu1 %v13877_v11  ;;  %v16044_v11 = vld [vmem:[#allocation3 + $0x100] sm:$0xfc] }
 0x472   :  { %v16016_v39 = vmax.f32 %v6032_v36, 0.0  ;;  %4778 = vst [vmem:[#allocation3 + $0x2d8] sm:$0xff] %v4657_v34  ;;  %v13365_v54 = vpop.f32.mrb[141].mxu1  ;;  %5565 = vrot.lane.b32.xlu0 %v5530_v63, %s14100_s16  ;;  %v4659_v5 = vpop.f32.mrb[142].mxu0  ;;  %v5178_v24 = vadd.f32 %v5134_v12, %v5002_v32  ;;  %13419 = vmatprep.subr.bf16.mxu1 %v18158_v23  ;;  %v5362_v63 = vsel %vm1932_vm5, %v5360_v13, %v5361_v49 }
 0x473   :  { %4780 = vst [vmem:[#allocation3 + $0x2e8] sm:$0xff] %v4659_v5  ;;  %v4741_v8 = vpop.f32.mrb[142].mxu1  ;;  %v5644_v33 = vpop.permute.xlu0 %5643  ;;  %v5117_v47 = vsel %vm2109_vm6, %v5115_v61, %v5116_v44 }
 0x474   :  { %4782 = vst.msk [vmem:[#allocation3 + $0x2f8] sm:$0xff] %vm748_vm7, %v4741_v8  ;;  %v4661_v15 = vpop.f32.mrb[143].mxu0  ;;  %v13366_v48 = vpop.f32.mrb[143].mxu1  ;;  %5835 = vrot.lane.b32.xlu1 %v5799_v18, %s14102_s22  ;;  %v16026_v9 = vpack.c.bf16 %v16016_v39, %v16016_v39  ;;  %v5689_v29 = vadd.f32 %v5644_v33, %v5593_v20  ;;  %13400 = vmatmul.mubr.bf16.vlgmr.msra.gmra.mrb[160].mxu1 %v15846_v41  ;;  %v5886_v20 = vld [vmem:[#allocation3 + $0x118] sm:$0x3] }
 0x475   :  { %4781 = vst [vmem:[#allocation3 + $0x2f0] sm:$0xff] %v4661_v15  ;;  %v5230_v35 = vpop.permute.xlu1 %5229  ;;  %13403 = vmatprep.mubr.msk.bf16.mxu1 %vm14098_vm0, %v18158_v23  ;;  %v5953_v13 = vrot.slane %v5886_v20, 2 }
 0x476   :  { %5661 = vrot.lane.b32.xlu0 %v4657_v34, %s14101_s5  ;;  %v5274_v19 = vadd.f32 %v5230_v35, %v5178_v24  ;;  %v6168_v34 = vshrl.u32 %v16026_v9, 16  ;;  %v6171_v51 = vshll.u32 %v16026_v9, 16  ;;  %v16066_v9 = vld [vmem:[%s18149_s1 + $0x184] ss:$12 sps:$4 sm:$0xff]  }
 0x477   :  { %v5820_v52 = vpop.permute.xlu0 %5819  ;;  %6887 = vmatprep.subr.bf16.mxu0 %v16066_v9 }
 0x478   :  { %v5865_v59 = vadd.f32 %v5820_v52, %v5689_v29  ;;  %6272 = vrot.lane.b32.xlu1 %v6166_v17, %s14101_s5  ;;  %v5418_v5 = vadd.f32 %v5362_v63, %v5274_v19  ;;  %v6170_v28 = vrot.slane %v6168_v34, 7  ;;  %v5952_v29 = vrot.slane %v16044_v11, 2  ;;  %v5295_v34 = vld [vmem:[#allocation3 + $0xf8] sm:$0xfe]  ;;  %v4865_v63 = vld [vmem:[#allocation3 + $0x2d0] sm:$0xfe] }
 0x479   :  { %v4960_v1 = vpop.permute.xlu1 %4959  ;;  %v5725_v12 = vld [vmem:[#allocation3 + $0x2d8] sm:$0xfe]  ;;  %v5363_v20 = vrot.slane %v5295_v34, 1 }
 0x47a   :  { %v6009_v36 = vadd.f32 %v5951_v10, %v5865_v59  ;;  %v16035_v50 = vpop.f32.mrb[144].mxu0  ;;  %v4746_v30 = vpop.f32.mrb[144].mxu1  ;;  %v5800_v42 = vrot.slane %v5725_v12, 1  ;;  %v5455_v35 = vld [vmem:[#allocation3 + $0x2d8] sm:$0xfc]  ;;  %v5003_v49 = vadd.f32 %v4960_v1, %v4811_v21  ;;  %v6173_v12 = vor.u32 %v6171_v51, %v6170_v28 }
 0x47b   :  { %v5550_v45 = vpop.permute.xlu0 %5549  ;;  %4783 = vst [vmem:[#allocation3 + $0x300] sm:$0xff] %v16035_v50  ;;  %4785 = vst.msk [vmem:[#allocation3 + $0x310] sm:$0xff] %vm748_vm7, %v4746_v30  ;;  %v16041_v41 = vpop.f32.mrb[145].mxu0  ;;  %v4866_v19 = vld [vmem:[#allocation3 + $0x2e8] sm:$0x1]  ;;  %v5531_v61 = vrot.slane %v5455_v35, 2 }
 0x47c   :  { %v6033_v54 = vadd.f32 %v15966_v57, %v6009_v36  ;;  %4784 = vst [vmem:[#allocation3 + $0x308] sm:$0xff] %v16041_v41  ;;  %v13369_v27 = vpop.f32.mrb[145].mxu1  ;;  %v4669_v55 = vpop.f32.mrb[146].mxu0  ;;  %5151 = vrot.lane.b32.xlu1 %v5117_v47, %s14101_s5  ;;  %v5726_v8 = vld [vmem:[#allocation3 + $0x2f0] sm:$0x1]  ;;  %v5594_v44 = vadd.f32 %v5550_v45, %v5418_v5  ;;  %v4943_v5 = vrot.slane %v4866_v19, 1 }
 0x47d   :  { %v5456_v33 = vld [vmem:[#allocation3 + $0x2f0] sm:$0x3]  ;;  %v5136_v18 = vpop.permute.xlu1 %5135  ;;  %4786 = vst [vmem:[#allocation3 + $0x318] sm:$0xff] %v4669_v55  ;;  %v4749_v22 = vpop.f32.mrb[146].mxu1  ;;  %v5801_v32 = vrot.slane %v5726_v8, 1 }
 0x47e   :  { %v16049_v15 = vmax.f32 %v6033_v54, 0.0  ;;  %4788 = vst.msk [vmem:[#allocation3 + $0x328] sm:$0xff] %vm748_vm7, %v4749_v22  ;;  %v4671_v48 = vpop.f32.mrb[147].mxu0  ;;  %v13370_v62 = vpop.f32.mrb[147].mxu1  ;;  %v5532_v2 = vrot.slane %v5456_v33, 2  ;;  %v5179_v36 = vadd.f32 %v5136_v18, %v5003_v49  ;;  %v5364_v54 = vrot.slane %v5296_v58, 1 }
 0x47f   :  { %4787 = vst [vmem:[#allocation3 + $0x320] sm:$0xff] %v4671_v48  ;;  %v5646_v17 = vpop.permute.xlu0 %5645  ;;  %v5802_v24 = vsel %vm1932_vm5, %v5800_v42, %v5801_v32  ;;  %v13878_v59 = vld [vmem:[%s18149_s1 + $0x180] ss:$12 sps:$4 sm:$0xff]   ;;  %v13881_v1 = vld [vmem:[%s18149_s1 + $0x188] ss:$12 sps:$4 sm:$0xff]   ;;  %v5954_v42 = vsel %vm2109_vm6, %v5952_v29, %v5953_v13  ;;  %v4942_v48 = vrot.slane %v4865_v63, 1 }
 0x480   :  { %v6146_v52 = vpack.c.bf16 %v16049_v15, %v16049_v15  ;;  %5837 = vrot.lane.b32.xlu0 %v5802_v24, %s14102_s22  ;;  %5247 = vrot.lane.b32.xlu1 %v16007_v26, %s14102_s22  ;;  %v13884_v26 = vld [vmem:[%s18149_s1 + $0x19c] ss:$12 sps:$4 sm:$0xff]   ;;  %v5690_v30 = vadd.f32 %v5646_v17, %v5594_v44  ;;  %v5533_v11 = vsel %vm2109_vm6, %v5531_v61, %v5532_v2  ;;  %v13882_v55 = vld [vmem:[%s18149_s1 + $0x198] ss:$12 sps:$4 sm:$0xff]   ;;  %v5041_v21 = vld [vmem:[#allocation3 + $0x2d0] sm:$0xfc] }
 0x481   :  { %v5232_v10 = vpop.permute.xlu1 %5231  ;;  %v5042_v27 = vld [vmem:[#allocation3 + $0x2e8] sm:$0x3]  ;;  %6888 = vmatpush1.bf16.msra.mxu0 %v13878_v59  ;;  %13420 = vmatpush3.bf16.msra.mxu1 %v13881_v1  ;;  %v13885_v62 = vld [vmem:[%s18149_s1 + $0x1a0] ss:$12 sps:$4 sm:$0xff]   ;;  %v5365_v24 = vsel %vm1932_vm5, %v5363_v20, %v5364_v54  ;;  %v4944_v2 = vsel %vm1932_vm5, %v4942_v48, %v4943_v5  ;;  %v13886_v58 = vld [vmem:[%s18149_s1 + $0x1b0] ss:$12 sps:$4 sm:$0xff]  }
 0x482   :  { %v6175_v45 = vshrl.u32 %v6146_v52, 16  ;;  %v5275_v8 = vadd.f32 %v5232_v10, %v5179_v36  ;;  %v6178_v22 = vshll.u32 %v6146_v52, 16  ;;  %6889 = vmatprep.subr.bf16.mxu0 %v13884_v26  ;;  %13421 = vmatprep.subr.bf16.mxu1 %v18158_v23  ;;  %v5119_v17 = vrot.slane %v5042_v27, 2  ;;  %v13888_v52 = vld [vmem:[%s18149_s1 + $0x1b4] ss:$12 sps:$4 sm:$0xff]  }
 0x483   :  { %v5822_v47 = vpop.permute.xlu0 %5821  ;;  %v4812_v19 = vld [vmem:[#allocation3 + $0xf0] sm:$0xff]  ;;  %v5118_v10 = vrot.slane %v5041_v21, 2  ;;  %v5888_v1 = vld [vmem:[#allocation3 + $0x148] sm:$0x3]  ;;  %v13889_v34 = vld [vmem:[%s18149_s1 + $0x1b8] ss:$12 sps:$4 sm:$0xff]  }
 0x484   :  { %v5866_v33 = vadd.f32 %v5822_v47, %v5690_v30  ;;  %6274 = vrot.lane.b32.xlu0 %v6173_v12, %s14101_s5  ;;  %5567 = vrot.lane.b32.xlu1 %v5533_v11, %s14100_s16  ;;  %v6177_v18 = vrot.slane %v6175_v45, 7  ;;  %v5419_v44 = vadd.f32 %v5365_v24, %v5275_v8  ;;  %v5887_v13 = vld [vmem:[#allocation3 + $0x130] sm:$0xfc]  ;;  %v5727_v26 = vld [vmem:[#allocation3 + $0x308] sm:$0xfe] }
 0x485   :  { %v4962_v32 = vpop.permute.xlu1 %4961  ;;  %6890 = vmatpush1.bf16.msra.mxu0 %v13882_v55  ;;  %13422 = vmatpush3.bf16.msra.mxu1 %v13885_v62  ;;  %v5120_v12 = vsel %vm2109_vm6, %v5118_v10, %v5119_v17  ;;  %v13890_v63 = vld [vmem:[%s18149_s1 + $0x1c8] ss:$12 sps:$4 sm:$0xff]   ;;  %v13892_v45 = vld [vmem:[%s18149_s1 + $0x1cc] ss:$12 sps:$4 sm:$0xff]   ;;  %v5298_v27 = vld [vmem:[#allocation3 + $0x140] sm:$0x1] }
 0x486   :  { %v6010_v28 = vadd.f32 %v5954_v42, %v5866_v33  ;;  %v6180_v35 = vor.u32 %v6178_v22, %v6177_v18  ;;  %v5728_v29 = vld [vmem:[#allocation3 + $0x320] sm:$0x1]  ;;  %6891 = vmatprep.subr.bf16.mxu0 %v13888_v52  ;;  %13423 = vmatprep.subr.bf16.mxu1 %v18158_v23  ;;  %v5004_v11 = vadd.f32 %v4962_v32, %v4812_v19  ;;  %v5297_v5 = vld [vmem:[#allocation3 + $0x128] sm:$0xfe]  ;;  %v4868_v55 = vld [vmem:[#allocation3 + $0x318] sm:$0x1] }
 0x487   :  { %v5552_v51 = vpop.permute.xlu0 %5551  ;;  %v5804_v36 = vrot.slane %v5728_v29, 1  ;;  %v5956_v33 = vrot.slane %v5888_v1, 2  ;;  %v5803_v18 = vrot.slane %v5727_v26, 1  ;;  %v13893_v22 = vld [vmem:[%s18149_s1 + $0x1d0] ss:$12 sps:$4 sm:$0xff]   ;;  %v5955_v48 = vrot.slane %v5887_v13, 2 }
 0x488   :  { %v6034_v49 = vadd.f32 %v15966_v57, %v6010_v28  ;;  %4977 = vrot.lane.b32.xlu0 %v4944_v2, %s14100_s16  ;;  %6276 = vrot.lane.b32.xlu1 %v6180_v35, %s14101_s5  ;;  %v5595_v54 = vadd.f32 %v5552_v51, %v5419_v44  ;;  %v13896_v42 = vld [vmem:[%s18149_s1 + $0x1e4] ss:$12 sps:$4 sm:$0xff]   ;;  %v5366_v21 = vrot.slane %v5297_v5, 1  ;;  %v5367_v17 = vrot.slane %v5298_v27, 1  ;;  %v13894_v51 = vld [vmem:[%s18149_s1 + $0x1e0] ss:$12 sps:$4 sm:$0xff]  }
 0x489   :  { %v5138_v59 = vpop.permute.xlu1 %5137  ;;  %6892 = vmatpush1.bf16.msra.mxu0 %v13886_v58  ;;  %13424 = vmatpush3.bf16.msra.mxu1 %v13889_v34  ;;  %v4867_v62 = vld [vmem:[#allocation3 + $0x300] sm:$0xfe]  ;;  %v5805_v35 = vsel %vm1932_vm5, %v5803_v18, %v5804_v36  ;;  %v4946_v24 = vrot.slane %v4868_v55, 1  ;;  %v13900_v26 = vld [vmem:[%s18149_s1 + $0x1fc] ss:$12 sps:$4 sm:$0xff]  }
 0x48a   :  { %v16098_v61 = vmax.f32 %v6034_v49, 0.0  ;;  %6893 = vmatprep.subr.bf16.mxu0 %v13892_v45  ;;  %v5180_v32 = vadd.f32 %v5138_v59, %v5004_v11  ;;  %13425 = vmatprep.subr.bf16.mxu1 %v18158_v23  ;;  %v5458_v19 = vld [vmem:[#allocation3 + $0x320] sm:$0x3]  ;;  %v5957_v59 = vsel %vm2109_vm6, %v5955_v48, %v5956_v33  ;;  %v4945_v1 = vrot.slane %v4867_v62, 1  ;;  %v13898_v27 = vld [vmem:[%s18149_s1 + $0x1f8] ss:$12 sps:$4 sm:$0xff]  }
 0x48b   :  { %v5648_v30 = vpop.permute.xlu0 %5647  ;;  %v5535_v5 = vrot.slane %v5458_v19, 2  ;;  %v5890_v48 = vld [vmem:[#allocation3 + $0x178] sm:$0x3] }
 0x48c   :  { %v6147_v47 = vpack.c.bf16 %v16098_v61, %v16098_v61  ;;  %5153 = vrot.lane.b32.xlu0 %v5120_v12, %s14101_s5  ;;  %5663 = vrot.lane.b32.xlu1 %v16041_v41, %s14101_s5  ;;  %v5691_v20 = vadd.f32 %v5648_v30, %v5595_v54  ;;  %v4947_v54 = vsel %vm1932_vm5, %v4945_v1, %v4946_v24  ;;  %v5299_v19 = vld [vmem:[#allocation3 + $0x158] sm:$0xfe] }
 0x48d   :  { %v5234_v8 = vpop.permute.xlu1 %5233  ;;  %6894 = vmatpush1.bf16.msra.mxu0 %v13890_v63  ;;  %13426 = vmatpush3.bf16.msra.mxu1 %v13893_v22  ;;  %v5457_v63 = vld [vmem:[#allocation3 + $0x308] sm:$0xfc] }
 0x48e   :  { %v6182_v41 = vshrl.u32 %v6147_v47, 16  ;;  %v5276_v2 = vadd.f32 %v5234_v8, %v5180_v32  ;;  %v6185_v44 = vshll.u32 %v6147_v47, 16  ;;  %6895 = vmatprep.subr.bf16.mxu0 %v13896_v42  ;;  %13427 = vmatprep.subr.bf16.mxu1 %v18158_v23  ;;  %v5368_v47 = vsel %vm1932_vm5, %v5366_v21, %v5367_v17  ;;  %v13901_v32 = vld [vmem:[%s18149_s1 + $0x200] ss:$12 sps:$4 sm:$0xff]  }
 0x48f   :  { %v5824_v28 = vpop.permute.xlu0 %5823  ;;  %v5534_v42 = vrot.slane %v5457_v63, 2 }
 0x490   :  { %v5867_v29 = vadd.f32 %v5824_v28, %v5691_v20  ;;  %5249 = vrot.lane.b32.xlu0 %v16035_v50, %s14102_s22  ;;  %v16128_v58 = vpop.f32.mrb[148].mxu0  ;;  %v4754_v52 = vpop.f32.mrb[148].mxu1  ;;  %5839 = vrot.lane.b32.xlu1 %v5805_v35, %s14102_s22  ;;  %v6184_v49 = vrot.slane %v6182_v41, 7  ;;  %v13897_v50 = vld [vmem:[%s18149_s1 + $0x1e8] ss:$12 sps:$4 sm:$0xff]   ;;  %v5420_v8 = vadd.f32 %v5368_v47, %v5276_v2  ;;  %v4813_v41 = vld [vmem:[#allocation3 + $0x120] sm:$0xff] }
 0x491   :  { %4789 = vst [vmem:[#allocation3 + $0x330] sm:$0xff] %v16128_v58  ;;  %4791 = vst.msk [vmem:[#allocation3 + $0x340] sm:$0xff] %vm748_vm7, %v4754_v52  ;;  %v4964_v10 = vpop.permute.xlu1 %4963  ;;  %v16134_v13 = vpop.f32.mrb[149].mxu0  ;;  %6896 = vmatpush1.bf16.msra.mxu0 %v13894_v51  ;;  %13428 = vmatpush3.bf16.msra.mxu1 %v13897_v50  ;;  %v5536_v28 = vsel %vm2109_vm6, %v5534_v42, %v5535_v5  ;;  %v5889_v2 = vld [vmem:[#allocation3 + $0x160] sm:$0xfc] }
 0x492   :  { %v6011_v36 = vadd.f32 %v5957_v59, %v5867_v29  ;;  %4790 = vst [vmem:[#allocation3 + $0x338] sm:$0xff] %v16134_v13  ;;  %v13373_v30 = vpop.f32.mrb[149].mxu1  ;;  %v4679_v12 = vpop.f32.mrb[150].mxu0  ;;  %v6187_v34 = vor.u32 %v6185_v44, %v6184_v49  ;;  %6897 = vmatprep.subr.bf16.mxu0 %v13900_v26  ;;  %13429 = vmatprep.subr.bf16.mxu1 %v18158_v23  ;;  %v5300_v29 = vld [vmem:[#allocation3 + $0x170] sm:$0x1]  ;;  %v5959_v44 = vrot.slane %v5890_v48, 2 }
 0x493   :  { %4792 = vst [vmem:[#allocation3 + $0x348] sm:$0xff] %v4679_v12  ;;  %v4757_v45 = vpop.f32.mrb[150].mxu1  ;;  %v5554_v11 = vpop.permute.xlu0 %5553  ;;  %v5005_v21 = vadd.f32 %v4964_v10, %v4813_v41  ;;  %v5958_v12 = vrot.slane %v5889_v2, 2  ;;  %v5370_v63 = vrot.slane %v5300_v29, 1  ;;  %v4814_v29 = vld [vmem:[#allocation3 + $0x150] sm:$0xff] }
 0x494   :  { %v6035_v55 = vadd.f32 %v15966_v57, %v6011_v36  ;;  %4794 = vst.msk [vmem:[#allocation3 + $0x358] sm:$0xff] %vm748_vm7, %v4757_v45  ;;  %v4681_v33 = vpop.f32.mrb[151].mxu0  ;;  %v13374_v18 = vpop.f32.mrb[151].mxu1  ;;  %6278 = vrot.lane.b32.xlu0 %v6187_v34, %s14101_s5  ;;  %4979 = vrot.lane.b32.xlu1 %v4947_v54, %s14100_s16  ;;  %v5596_v17 = vadd.f32 %v5554_v11, %v5420_v8  ;;  %v5044_v45 = vld [vmem:[#allocation3 + $0x318] sm:$0x3] }
 0x495   :  { %4793 = vst [vmem:[#allocation3 + $0x350] sm:$0xff] %v4681_v33  ;;  %v5140_v22 = vpop.permute.xlu1 %5139  ;;  %6898 = vmatpush1.bf16.msra.mxu0 %v13898_v27  ;;  %13430 = vmatpush3.bf16.msra.mxu1 %v13901_v32  ;;  %v5960_v33 = vsel %vm2109_vm6, %v5958_v12, %v5959_v44  ;;  %v5302_v44 = vld [vmem:[#allocation3 + $0x1a0] sm:$0x1] }
 0x496   :  { %v16156_v20 = vmax.f32 %v6035_v55, 0.0  ;;  %v5181_v59 = vadd.f32 %v5140_v22, %v5005_v21  ;;  %13431 = vmatprep.subr.bf16.mxu1 %v18158_v23  ;;  %v5369_v22 = vrot.slane %v5299_v19, 1 }
 0x497   :  { %v5650_v62 = vpop.permute.xlu0 %5649 }
 0x498   :  { %v6148_v35 = vpack.c.bf16 %v16156_v20, %v16156_v20  ;;  %5569 = vrot.lane.b32.xlu0 %v5536_v28, %s14100_s16  ;;  %v16163_v24 = vpop.f32.mrb[152].mxu0  ;;  %v4762_v51 = vpop.f32.mrb[152].mxu1  ;;  %v5692_v1 = vadd.f32 %v5650_v62, %v5596_v17  ;;  %v5043_v62 = vld [vmem:[#allocation3 + $0x300] sm:$0xfc]  ;;  %v5371_v28 = vsel %vm1932_vm5, %v5369_v22, %v5370_v63  ;;  %v16202_v63 = vld [vmem:[%s18149_s1 + $0x228] ss:$12 sps:$4 sm:$0xff]  }
 0x499   :  { %4797 = vst.msk [vmem:[#allocation3 + $0x370] sm:$0xff] %vm748_vm7, %v4762_v51  ;;  %v5236_v52 = vpop.permute.xlu1 %5235  ;;  %v16166_v49 = vpop.f32.mrb[153].mxu0  ;;  %v5729_v26 = vld [vmem:[#allocation3 + $0x338] sm:$0xfe]  ;;  %v5122_v51 = vrot.slane %v5044_v45, 2 }
 0x49a   :  { %4796 = vst [vmem:[#allocation3 + $0x368] sm:$0xff] %v16166_v49  ;;  %v13377_v10 = vpop.f32.mrb[153].mxu1  ;;  %v4689_v50 = vpop.f32.mrb[154].mxu0  ;;  %v6189_v36 = vshrl.u32 %v6148_v35, 16  ;;  %v5277_v47 = vadd.f32 %v5236_v52, %v5181_v59  ;;  %v6192_v8 = vshll.u32 %v6148_v35, 16  ;;  %v5806_v42 = vrot.slane %v5729_v26, 1 }
 0x49b   :  { %v4765_v30 = vpop.f32.mrb[154].mxu1  ;;  %v5826_v34 = vpop.permute.xlu0 %5825  ;;  %v16184_v35 = vld [vmem:[%s18149_s1 + $0x214] ss:$12 sps:$4 sm:$0xff]   ;;  %v13905_v59 = vld [vmem:[%s18149_s1 + $0x218] ss:$12 sps:$4 sm:$0xff]   ;;  %v5121_v10 = vrot.slane %v5043_v62, 2 }
 0x49c   :  { %4800 = vst.msk [vmem:[#allocation3 + $0x388] sm:$0xff] %vm748_vm7, %v4765_v30  ;;  %v5868_v11 = vadd.f32 %v5826_v34, %v5692_v1  ;;  %v4691_v54 = vpop.f32.mrb[155].mxu0  ;;  %v13378_v5 = vpop.f32.mrb[155].mxu1  ;;  %5665 = vrot.lane.b32.xlu0 %v16134_v13, %s14101_s5  ;;  %v5730_v27 = vld [vmem:[#allocation3 + $0x350] sm:$0x1]  ;;  %v6191_v55 = vrot.slane %v6189_v36, 7  ;;  %v5421_v52 = vadd.f32 %v5371_v28, %v5277_v47  ;;  %6899 = vmatprep.subr.bf16.mxu0 %v16184_v35 }
 0x49d   :  { %4799 = vst [vmem:[#allocation3 + $0x380] sm:$0xff] %v4691_v54  ;;  %v4966_v18 = vpop.permute.xlu1 %4965  ;;  %v5807_v32 = vrot.slane %v5730_v27, 1  ;;  %v16179_v13 = vld [vmem:[%s18149_s1 + $0x210] ss:$12 sps:$4 sm:$0xff]   ;;  %v5892_v50 = vld [vmem:[#allocation3 + $0x1a8] sm:$0x3]  ;;  %13432 = vmatpush3.bf16.msra.mxu1 %v13905_v59 }
 0x49e   :  { %v6012_v48 = vadd.f32 %v5960_v33, %v5868_v11  ;;  %v6194_v41 = vor.u32 %v6192_v8, %v6191_v55  ;;  %v5301_v26 = vld [vmem:[#allocation3 + $0x188] sm:$0xfe]  ;;  %v5006_v12 = vadd.f32 %v4966_v18, %v4814_v29  ;;  %6900 = vmatpush1.bf16.msra.mxu0 %v16179_v13  ;;  %v5123_v11 = vsel %vm2109_vm6, %v5121_v10, %v5122_v51  ;;  %v13909_v27 = vld [vmem:[%s18149_s1 + $0x230] ss:$12 sps:$4 sm:$0xff]  }
 0x49f   :  { %v5556_v21 = vpop.permute.xlu0 %5555  ;;  %v5808_v17 = vsel %vm1932_vm5, %v5806_v42, %v5807_v32  ;;  %v16207_v45 = vld [vmem:[%s18149_s1 + $0x22c] ss:$12 sps:$4 sm:$0xff]   ;;  %v5373_v54 = vrot.slane %v5302_v44, 1  ;;  %13433 = vmatprep.subr.bf16.mxu1 %v18158_v23  ;;  %v5891_v18 = vld [vmem:[#allocation3 + $0x190] sm:$0xfc]  ;;  %v5962_v32 = vrot.slane %v5892_v50, 2 }
 0x4a0   :  { %v6036_v2 = vadd.f32 %v15966_v57, %v6012_v48  ;;  %5841 = vrot.lane.b32.xlu0 %v5808_v17, %s14102_s22  ;;  %6280 = vrot.lane.b32.xlu1 %v6194_v41, %s14101_s5  ;;  %v4695_v19 = vpop.f32.mrb[156].mxu0  ;;  %v5597_v8 = vadd.f32 %v5556_v21, %v5421_v52  ;;  %v5460_v22 = vld [vmem:[#allocation3 + $0x350] sm:$0x3]  ;;  %v5372_v48 = vrot.slane %v5301_v26, 1  ;;  %v5893_v41 = vld [vmem:[#allocation3 + $0x1c0] sm:$0xfc] }
 0x4a1   :  { %v5142_v1 = vpop.permute.xlu1 %5141  ;;  %v16192_v36 = vpop.f32.mrb[157].mxu0  ;;  %6901 = vmatprep.subr.bf16.mxu0 %v16207_v45  ;;  %v5459_v17 = vld [vmem:[#allocation3 + $0x338] sm:$0xfc]  ;;  %13434 = vmatpush3.bf16.msra.mxu1 %v13909_v27  ;;  %v5961_v21 = vrot.slane %v5891_v18, 2  ;;  %v5538_v44 = vrot.slane %v5460_v22, 2 }
 0x4a2   :  { %v16195_v30 = vmax.f32 %v6036_v2, 0.0  ;;  %4802 = vst [vmem:[#allocation3 + $0x398] sm:$0xff] %v16192_v36  ;;  %v4699_v34 = vpop.f32.mrb[158].mxu0  ;;  %v5182_v33 = vadd.f32 %v5142_v1, %v5006_v12  ;;  %v5894_v2 = vld [vmem:[#allocation3 + $0x1d8] sm:$0x3]  ;;  %6902 = vmatpush1.bf16.msra.mxu0 %v16202_v63  ;;  %v5374_v52 = vsel %vm1932_vm5, %v5372_v48, %v5373_v54  ;;  %13455 = vmatprep.subr.bf16.mxu1 %v18158_v23 }
 0x4a3   :  { %v5652_v47 = vpop.permute.xlu0 %5651  ;;  %v4701_v5 = vpop.f32.mrb[159].mxu0  ;;  %7238 = vmatprep.subr.bf16.mxu0 %v16066_v9  ;;  %v4870_v50 = vld [vmem:[#allocation3 + $0x348] sm:$0x1]  ;;  %v5963_v26 = vsel %vm2109_vm6, %v5961_v21, %v5962_v32  ;;  %v5537_v34 = vrot.slane %v5459_v17, 2  ;;  %v4869_v9 = vld [vmem:[#allocation3 + $0x330] sm:$0xfe] }
 0x4a4   :  { %18181 = vst [vmem:[#allocation7_spill] sm:$0xff] %v16195_v30  ;;  %v6149_v55 = vpack.c.bf16 %v16195_v30, %v16195_v30  ;;  %5155 = vrot.lane.b32.xlu1 %v5123_v11, %s14101_s5  ;;  %4805 = vst [vmem:[#allocation3 + $0x3b0] sm:$0xff] %v4701_v5  ;;  %v5693_v62 = vadd.f32 %v5652_v47, %v5597_v8  ;;  %v5964_v47 = vrot.slane %v5893_v41, 2  ;;  %v5965_v11 = vrot.slane %v5894_v2, 2  ;;  %v4770_v2 = vpop.f32.mrb[156].mxu1 }
 0x4a5   :  { %v5238_v42 = vpop.permute.xlu1 %5237  ;;  %v4949_v18 = vrot.slane %v4870_v50, 1  ;;  %v4948_v48 = vrot.slane %v4869_v9, 1  ;;  %4803 = vst.msk [vmem:[#allocation3 + $0x3a0] sm:$0xff] %vm748_vm7, %v4770_v2 }
 0x4a6   :  { %v5278_v28 = vadd.f32 %v5238_v42, %v5182_v33  ;;  %v6196_v51 = vshrl.u32 %v6149_v55, 16  ;;  %v6199_v10 = vshll.u32 %v6149_v55, 16  ;;  %v5539_v33 = vsel %vm2109_vm6, %v5537_v34, %v5538_v44  ;;  %v5046_v55 = vld [vmem:[#allocation3 + $0x348] sm:$0x3] }
 0x4a7   :  { %v5828_v29 = vpop.permute.xlu0 %5827  ;;  %v5966_v42 = vsel %vm2109_vm6, %v5964_v47, %v5965_v11  ;;  %v4950_v17 = vsel %vm1932_vm5, %v4948_v48, %v4949_v18 }
 0x4a8   :  { %v5869_v19 = vadd.f32 %v5828_v29, %v5693_v62  ;;  %5251 = vrot.lane.b32.xlu1 %v16128_v58, %s14102_s22  ;;  %v5422_v59 = vadd.f32 %v5374_v52, %v5278_v28  ;;  %v6198_v1 = vrot.slane %v6196_v51, 7  ;;  %v5045_v28 = vld [vmem:[#allocation3 + $0x330] sm:$0xfc]  ;;  %v5125_v51 = vrot.slane %v5046_v55, 2  ;;  %v13381_v52 = vpop.f32.mrb[157].mxu1 }
 0x4a9   :  { %v5558_v12 = vpop.permute.xlu1 %5557  ;;  %v5124_v44 = vrot.slane %v5045_v28, 2 }
 0x4aa   :  { %v6013_v54 = vadd.f32 %v5963_v26, %v5869_v19  ;;  %v5598_v5 = vadd.f32 %v5558_v12, %v5422_v59  ;;  %v6201_v27 = vor.u32 %v6199_v10, %v6198_v1  ;;  %v4773_v19 = vpop.f32.mrb[158].mxu1 }
 0x4ab   :  { %v5654_v8 = vpop.permute.xlu0 %5653  ;;  %4806 = vst.msk [vmem:[#allocation3 + $0x3b8] sm:$0xff] %vm748_vm7, %v4773_v19  ;;  %v13382_v10 = vpop.f32.mrb[159].mxu1  ;;  %v5126_v50 = vsel %vm2109_vm6, %v5124_v44, %v5125_v51  ;;  %v5734_v48 = vld [vmem:[#allocation3 + $0x3b0] sm:$0x1] }
 0x4ac   :  { %v6037_v58 = vadd.f32 %v15966_v57, %v6013_v54  ;;  %v5694_v22 = vadd.f32 %v5654_v8, %v5598_v5  ;;  %5571 = vrot.lane.b32.xlu1 %v5539_v33, %s14100_s16  ;;  %6282 = vrot.lane.b32.xlu0 %v6201_v27, %s14101_s5  ;;  %v5732_v5 = vld [vmem:[#allocation3 + $0x380] sm:$0x1]  ;;  %v5731_v8 = vld [vmem:[#allocation3 + $0x368] sm:$0xfe]  ;;  %v5813_v52 = vrot.slane %v5734_v48, 1 }
 0x4ad   :  { %v5830_v32 = vpop.permute.xlu1 %5829  ;;  %v5810_v33 = vrot.slane %v5732_v5, 1  ;;  %v4816_v5 = vld [vmem:[#allocation3 + $0x210] sm:$0xff] }
 0x4ae   :  { %v16230_v41 = vmax.f32 %v6037_v58, 0.0  ;;  %v5870_v62 = vadd.f32 %v5830_v32, %v5694_v22  ;;  %v5462_v22 = vld [vmem:[#allocation3 + $0x380] sm:$0x3]  ;;  %v5461_v32 = vld [vmem:[#allocation3 + $0x368] sm:$0xfc] }
 0x4af   :  { %v4968_v11 = vpop.permute.xlu0 %4967  ;;  %v5541_v28 = vrot.slane %v5462_v22, 2 }
 0x4b0   :  { %v6150_v21 = vpack.c.bf16 %v16230_v41, %v16230_v41  ;;  %v6014_v29 = vadd.f32 %v5966_v42, %v5870_v62  ;;  %4981 = vrot.lane.b32.xlu0 %v4950_v17, %s14100_s16  ;;  %v5809_v42 = vrot.slane %v5731_v8, 1  ;;  %v4815_v17 = vld [vmem:[#allocation3 + $0x1e0] sm:$0xff] }
 0x4b1   :  { %v5144_v55 = vpop.permute.xlu1 %5143  ;;  %v5007_v2 = vadd.f32 %v4968_v11, %v4815_v17 }
 0x4b2   :  { %v6038_v59 = vadd.f32 %v15966_v57, %v6014_v29  ;;  %v6203_v1 = vshrl.u32 %v6150_v21, 16  ;;  %v6206_v34 = vshll.u32 %v6150_v21, 16  ;;  %v5811_v62 = vsel %vm1932_vm5, %v5809_v42, %v5810_v33  ;;  %v5306_v33 = vld [vmem:[#allocation3 + $0x260] sm:$0x1] }
 0x4b3   :  { %v5240_v18 = vpop.permute.xlu0 %5239  ;;  %v5379_v48 = vrot.slane %v5306_v33, 1  ;;  %v5897_v33 = vld [vmem:[#allocation3 + $0x280] sm:$0xfc] }
 0x4b4   :  { %v16240_v26 = vmax.f32 %v6038_v59, 0.0  ;;  %5157 = vrot.lane.b32.xlu0 %v5126_v50, %s14101_s5  ;;  %v6205_v12 = vrot.slane %v6203_v1, 7  ;;  %v5183_v59 = vadd.f32 %v5144_v55, %v5007_v2  ;;  %v5304_v1 = vld [vmem:[#allocation3 + $0x230] sm:$0x1] }
 0x4b6   :  { %18182 = vst [vmem:[#allocation8_spill] sm:$0xff] %v16240_v26  ;;  %v6151_v47 = vpack.c.bf16 %v16240_v26, %v16240_v26  ;;  %v6208_v54 = vor.u32 %v6206_v34, %v6205_v12  ;;  %v5303_v12 = vld [vmem:[#allocation3 + $0x218] sm:$0xfe]  ;;  %v5376_v34 = vrot.slane %v5304_v1, 1  ;;  %v5279_v11 = vadd.f32 %v5240_v18, %v5183_v59 }
 0x4b8   :  { %5253 = vrot.lane.b32.xlu0 %v16163_v24, %s14102_s22  ;;  %6284 = vrot.lane.b32.xlu1 %v6208_v54, %s14101_s5  ;;  %v6210_v57 = vshrl.u32 %v6151_v47, 16  ;;  %v6213_v9 = vshll.u32 %v6151_v47, 16  ;;  %v5733_v24 = vld [vmem:[#allocation3 + $0x398] sm:$0xfe]  ;;  %v5375_v54 = vrot.slane %v5303_v12, 1 }
 0x4b9   :  { %v5812_v29 = vrot.slane %v5733_v24, 1  ;;  %v5895_v24 = vld [vmem:[#allocation3 + $0x250] sm:$0xfc] }
 0x4ba   :  { %v6212_v27 = vrot.slane %v6210_v57, 7 }
 0x4bb   :  { %v5814_v10 = vsel %vm1932_vm5, %v5812_v29, %v5813_v52 }
 0x4bc   :  { %5667 = vrot.lane.b32.xlu1 %v16166_v49, %s14101_s5  ;;  %v6215_v58 = vor.u32 %v6213_v9, %v6212_v27  ;;  %v5540_v49 = vrot.slane %v5461_v32, 2  ;;  %v5305_v32 = vld [vmem:[#allocation3 + $0x248] sm:$0xfe] }
 0x4bd   :  { %v5378_v2 = vrot.slane %v5305_v32, 1 }
 0x4be   :  { %6286 = vrot.lane.b32.xlu0 %v6215_v58, %s14101_s5  ;;  %v5542_v44 = vsel %vm2109_vm6, %v5540_v49, %v5541_v28  ;;  %v5896_v58 = vld [vmem:[#allocation3 + $0x268] sm:$0x3]  ;;  %v5967_v49 = vrot.slane %v5895_v24, 2 }
 0x4bf   :  { %v5968_v28 = vrot.slane %v5896_v58, 2 }
 0x4c0   :  { %5843 = vrot.lane.b32.xlu1 %v5811_v62, %s14102_s22  ;;  %v4970_v51 = vpop.permute.xlu0 %4969 }
 0x4c1   :  { %v5008_v9 = vadd.f32 %v4970_v51, %v4816_v5  ;;  %v5969_v51 = vsel %vm2109_vm6, %v5967_v49, %v5968_v28  ;;  %v5970_v28 = vrot.slane %v5897_v33, 2 }
 0x4c2   :  { %v5560_v21 = vpop.permute.xlu1 %5559  ;;  %5669 = vrot.lane.b32.xlu0 %v16192_v36, %s14101_s5  ;;  %v5377_v36 = vsel %vm1932_vm5, %v5375_v54, %v5376_v34  ;;  %v16265_v34 = vld [vmem:[%s18150_s2 + $0x1] ss:$0 sm:$0xff] }
 0x4c3   :  { %v5423_v8 = vadd.f32 %v5377_v36, %v5279_v11  ;;  %v5898_v11 = vld [vmem:[#allocation3 + $0x298] sm:$0x3] }
 0x4c4   :  { %5573 = vrot.lane.b32.xlu1 %v5542_v44, %s14100_s16  ;;  %v5146_v19 = vpop.permute.xlu0 %5145  ;;  %v5380_v44 = vsel %vm1932_vm5, %v5378_v2, %v5379_v48 }
 0x4c5   :  { %v5599_v55 = vadd.f32 %v5560_v21, %v5423_v8  ;;  %v5184_v42 = vadd.f32 %v5146_v19, %v5008_v9  ;;  %v4817_v21 = vld [vmem:[#allocation3 + $0x240] sm:$0xff]  ;;  %v5307_v8 = vld [vmem:[#allocation3 + $0x278] sm:$0xfe] }
 0x4c6   :  { %v5656_v50 = vpop.permute.xlu1 %5655  ;;  %v5381_v48 = vrot.slane %v5307_v8, 1 }
 0x4c7   :  { %v5695_v17 = vadd.f32 %v5656_v50, %v5599_v55 }
 0x4c8   :  { %5845 = vrot.lane.b32.xlu1 %v5814_v10, %s14102_s22  ;;  %v5242_v47 = vpop.permute.xlu0 %5241 }
 0x4c9   :  { %v5280_v18 = vadd.f32 %v5242_v47, %v5184_v42  ;;  %v5308_v47 = vld [vmem:[#allocation3 + $0x290] sm:$0x1]  ;;  %v5971_v42 = vrot.slane %v5898_v11, 2 }
 0x4ca   :  { %v4972_v57 = vpop.permute.xlu1 %4971  ;;  %v5382_v55 = vrot.slane %v5308_v47, 1  ;;  %v4818_v47 = vld [vmem:[#allocation3 + $0x270] sm:$0xff] }
 0x4cb   :  { %v5424_v1 = vadd.f32 %v5380_v44, %v5280_v18  ;;  %v5009_v12 = vadd.f32 %v4972_v57, %v4817_v21 }
 0x4cc   :  { %v5562_v27 = vpop.permute.xlu0 %5561 }
 0x4cd   :  { %v5600_v5 = vadd.f32 %v5562_v27, %v5424_v1  ;;  %v5383_v27 = vsel %vm1932_vm5, %v5381_v48, %v5382_v55  ;;  %v5310_v55 = vld [vmem:[#allocation3 + $0x2c0] sm:$0x1] }
 0x4ce   :  { %v5148_v22 = vpop.permute.xlu1 %5147 }
 0x4cf   :  { %v5185_v36 = vadd.f32 %v5148_v22, %v5009_v12  ;;  %v5972_v22 = vsel %vm2109_vm6, %v5970_v28, %v5971_v42  ;;  %v5900_v12 = vld [vmem:[#allocation3 + $0x2c8] sm:$0x3]  ;;  %v5899_v42 = vld [vmem:[#allocation3 + $0x2b0] sm:$0xfc] }
 0x4d0   :  { %v5658_v62 = vpop.permute.xlu0 %5657  ;;  %v5309_v28 = vld [vmem:[#allocation3 + $0x2a8] sm:$0xfe] }
 0x4d1   :  { %v5696_v57 = vadd.f32 %v5658_v62, %v5600_v5 }
 0x4d2   :  { %v5832_v29 = vpop.permute.xlu1 %5831 }
 0x4d3   :  { %v5871_v52 = vadd.f32 %v5832_v29, %v5695_v17 }
 0x4d4   :  { %v4974_v59 = vpop.permute.xlu0 %4973 }
 0x4d5   :  { %v6015_v10 = vadd.f32 %v5969_v51, %v5871_v52 }
 0x4d6   :  { %v5244_v19 = vpop.permute.xlu1 %5243 }
 0x4d7   :  { %v6039_v50 = vadd.f32 %v16265_v34, %v6015_v10  ;;  %v5281_v24 = vadd.f32 %v5244_v19, %v5185_v36  ;;  %v5010_v36 = vadd.f32 %v4974_v59, %v4818_v47 }
 0x4d8   :  { %v5150_v54 = vpop.permute.xlu0 %5149 }
 0x4d9   :  { %v16268_v9 = vmax.f32 %v6039_v50, 0.0  ;;  %v5425_v29 = vadd.f32 %v5383_v27, %v5281_v24 }
 0x4da   :  { %v5564_v58 = vpop.permute.xlu1 %5563  ;;  %v6570_v1 = vpop.f32.mrb[160].mxu0 }
 0x4db   :  { %v6152_v32 = vpack.c.bf16 %v16268_v9, %v16268_v9  ;;  %6692 = vst [vmem:[#allocation3] sm:$0xff] %v6570_v1  ;;  %v6572_v62 = vpop.f32.mrb[161].mxu0  ;;  %v5601_v8 = vadd.f32 %v5564_v58, %v5425_v29 }
 0x4dc   :  { %v5834_v17 = vpop.permute.xlu0 %5833  ;;  %v6574_v50 = vpop.f32.mrb[162].mxu0  ;;  %v6322_v62 = vld [vmem:[#allocation2 + $0x8] sm:$0x1f] }
 0x4dd   :  { %v5872_v18 = vadd.f32 %v5834_v17, %v5696_v57  ;;  %v6217_v2 = vshrl.u32 %v6152_v32, 16  ;;  %v6220_v51 = vshll.u32 %v6152_v32, 16  ;;  %6695 = vst [vmem:[#allocation3 + $0x18] sm:$0xff] %v6574_v50  ;;  %v6576_v5 = vpop.f32.mrb[163].mxu0  ;;  %v5974_v57 = vrot.slane %v5900_v12, 2 }
 0x4de   :  { %v5660_v49 = vpop.permute.xlu1 %5659  ;;  %v5186_v32 = vadd.f32 %v5150_v54, %v5010_v36  ;;  %v5385_v17 = vrot.slane %v5310_v55, 1  ;;  %v5902_v5 = vld [vmem:[#allocation3 + $0x2f8] sm:$0x3] }
 0x4df   :  { %v6016_v52 = vadd.f32 %v5972_v22, %v5872_v18  ;;  %v6219_v44 = vrot.slane %v6217_v2, 7  ;;  %v5697_v48 = vadd.f32 %v5660_v49, %v5601_v8  ;;  %v5973_v18 = vrot.slane %v5899_v42, 2 }
 0x4e0   :  { %v5246_v21 = vpop.permute.xlu0 %5245  ;;  %v5384_v22 = vrot.slane %v5309_v28, 1  ;;  %v4819_v28 = vld [vmem:[#allocation3 + $0x2a0] sm:$0xff] }
 0x4e1   :  { %v6040_v10 = vadd.f32 %v16265_v34, %v6016_v52  ;;  %v6222_v19 = vor.u32 %v6220_v51, %v6219_v44  ;;  %v5282_v27 = vadd.f32 %v5246_v21, %v5186_v32  ;;  %v5975_v52 = vsel %vm2109_vm6, %v5973_v18, %v5974_v57  ;;  %v5901_v57 = vld [vmem:[#allocation3 + $0x2e0] sm:$0xfc] }
 0x4e2   :  { %v4976_v11 = vpop.permute.xlu1 %4975  ;;  %v5386_v1 = vsel %vm1932_vm5, %v5384_v22, %v5385_v17  ;;  %v5977_v32 = vrot.slane %v5902_v5, 2  ;;  %v5976_v17 = vrot.slane %v5901_v57, 2  ;;  %v5312_v22 = vld [vmem:[#allocation3 + $0x2f0] sm:$0x1] }
 0x4e3   :  { %v16275_v33 = vmax.f32 %v6040_v10, 0.0  ;;  %6288 = vrot.lane.b32.xlu0 %v6222_v19, %s14101_s5  ;;  %v5426_v19 = vadd.f32 %v5386_v1, %v5282_v27  ;;  %v5011_v27 = vadd.f32 %v4976_v11, %v4819_v28  ;;  %v5311_v1 = vld [vmem:[#allocation3 + $0x2d8] sm:$0xfe]  ;;  %v6325_v11 = vld [vmem:[#allocation2 + $0x10] sm:$0x1f] }
 0x4e4   :  { %v5566_v29 = vpop.permute.xlu0 %5565 }
 0x4e5   :  { %18183 = vst [vmem:[#allocation9_spill] sm:$0xff] %v16275_v33  ;;  %v6153_v24 = vpack.c.bf16 %v16275_v33, %v16275_v33  ;;  %v5602_v55 = vadd.f32 %v5566_v29, %v5426_v19 }
 0x4e6   :  { %v5836_v2 = vpop.permute.xlu1 %5835 }
 0x4e7   :  { %v5873_v59 = vadd.f32 %v5836_v2, %v5697_v48  ;;  %v6224_v58 = vshrl.u32 %v6153_v24, 16  ;;  %v6227_v49 = vshll.u32 %v6153_v24, 16 }
 0x4e8   :  { %v5662_v36 = vpop.permute.xlu0 %5661 }
 0x4e9   :  { %v6017_v54 = vadd.f32 %v5975_v52, %v5873_v59  ;;  %v6226_v51 = vrot.slane %v6224_v58, 7  ;;  %v5698_v24 = vadd.f32 %v5662_v36, %v5602_v55 }
 0x4ea   :  { %v6273_v10 = vpop.permute.xlu1 %6272 }
 0x4eb   :  { %v6041_v21 = vadd.f32 %v16265_v34, %v6017_v54  ;;  %v6323_v12 = vsel %vm16282_vm11, %v6273_v10, %v6322_v62  ;;  %v6229_v50 = vor.u32 %v6227_v49, %v6226_v51  ;;  %v5978_v51 = vsel %vm2109_vm6, %v5976_v17, %v5977_v32  ;;  %v16296_v10 = vld [vmem:[#allocation2] sm:$0xff]  ;;  %v6328_v32 = vld [vmem:[#allocation2 + $0x18] sm:$0x1f] }
 0x4ec   :  { %6324 = vst [vmem:[#allocation2 + $0x8] sm:$0x1f] %v6323_v12 }
 0x4ed   :  { %v16290_v47 = vmax.f32 %v6041_v21, 0.0  ;;  %6290 = vrot.lane.b32.xlu1 %v6229_v50, %s14101_s5  ;;  %v5388_v21 = vrot.slane %v5312_v22, 1 }
 0x4ee   :  { %v5152_v8 = vpop.permute.xlu1 %5151 }
 0x4ef   :  { %18186 = vst [vmem:[#allocation10_spill] sm:$0xff] %v16290_v47  ;;  %v6154_v42 = vpack.c.bf16 %v16290_v47, %v16290_v47  ;;  %v5187_v29 = vadd.f32 %v5152_v8, %v5011_v27  ;;  %v5387_v8 = vrot.slane %v5311_v1, 1 }
 0x4f1   :  { %v6231_v48 = vshrl.u32 %v6154_v42, 16  ;;  %v6234_v54 = vshll.u32 %v6154_v42, 16  ;;  %v5389_v42 = vsel %vm1932_vm5, %v5387_v8, %v5388_v21  ;;  %v5314_v8 = vld [vmem:[#allocation3 + $0x320] sm:$0x1] }
 0x4f2   :  { %v5838_v18 = vpop.permute.xlu0 %5837  ;;  %v5248_v2 = vpop.permute.xlu1 %5247 }
 0x4f3   :  { %v5874_v59 = vadd.f32 %v5838_v18, %v5698_v24  ;;  %v6371_v58 = vld [vmem:[#allocation2 + $0x8] sm:$0xff]  ;;  %v6233_v52 = vrot.slane %v6231_v48, 7  ;;  %v5283_v5 = vadd.f32 %v5248_v2, %v5187_v29 }
 0x4f4   :  { %6579 = vmatmul.mubr.bf16.gmra.mrb[164].mxu0 %v6371_v58  ;;  %13404 = vmatmul.mubr.bf16.gmra.mrb[164].mxu1 %v6371_v58  ;;  %v5904_v2 = vld [vmem:[#allocation3 + $0x328] sm:$0x3] }
 0x4f5   :  { %v6018_v49 = vadd.f32 %v5978_v51, %v5874_v59  ;;  %v6236_v62 = vor.u32 %v6234_v54, %v6233_v52  ;;  %6588 = vmatprep.mubr.bf16.mxu0 %v16296_v10  ;;  %13407 = vmatprep.mubr.msk.bf16.mxu1 %vm14098_vm0, %v18158_v23  ;;  %v5427_v28 = vadd.f32 %v5389_v42, %v5283_v5  ;;  %v5903_v51 = vld [vmem:[#allocation3 + $0x310] sm:$0xfc]  ;;  %v5980_v29 = vrot.slane %v5904_v2, 2  ;;  %v6331_v42 = vld [vmem:[#allocation2 + $0x20] sm:$0x1f] }
 0x4f6   :  { %v6275_v19 = vpop.permute.xlu0 %6274  ;;  %v5568_v12 = vpop.permute.xlu1 %5567  ;;  %v5391_v2 = vrot.slane %v5314_v8, 1  ;;  %v6334_v8 = vld [vmem:[#allocation2 + $0x28] sm:$0x1f] }
 0x4f7   :  { %v6042_v50 = vadd.f32 %v16265_v34, %v6018_v49  ;;  %v6326_v36 = vsel %vm16282_vm11, %v6275_v19, %v6325_v11  ;;  %6292 = vrot.lane.b32.xlu0 %v6236_v62, %s14101_s5  ;;  %v5603_v58 = vadd.f32 %v5568_v12, %v5427_v28  ;;  %v5979_v11 = vrot.slane %v5903_v51, 2  ;;  %v4820_v12 = vld [vmem:[#allocation3 + $0x2d0] sm:$0xff]  ;;  %v5906_v51 = vld [vmem:[#allocation3 + $0x358] sm:$0x3] }
 0x4f8   :  { %6327 = vst [vmem:[#allocation2 + $0x10] sm:$0x1f] %v6326_v36 }
 0x4f9   :  { %v16305_v55 = vmax.f32 %v6042_v50, 0.0  ;;  %v5981_v50 = vsel %vm2109_vm6, %v5979_v11, %v5980_v29 }
 0x4fa   :  { %v4978_v57 = vpop.permute.xlu0 %4977  ;;  %v6277_v24 = vpop.permute.xlu1 %6276 }
 0x4fb   :  { %18187 = vst [vmem:[#allocation11_spill] sm:$0xff] %v16305_v55  ;;  %v6155_v48 = vpack.c.bf16 %v16305_v55, %v16305_v55  ;;  %v6329_v17 = vsel %vm16282_vm11, %v6277_v24, %v6328_v32  ;;  %v5012_v5 = vadd.f32 %v4978_v57, %v4820_v12 }
 0x4fc   :  { %6330 = vst [vmem:[#allocation2 + $0x18] sm:$0x1f] %v6329_v17 }
 0x4fd   :  { %v6238_v18 = vshrl.u32 %v6155_v48, 16  ;;  %v6241_v54 = vshll.u32 %v6155_v48, 16 }
 0x4fe   :  { %v5154_v27 = vpop.permute.xlu0 %5153  ;;  %v5664_v59 = vpop.permute.xlu1 %5663 }
 0x4ff   :  { %v6372_v22 = vld [vmem:[#allocation2 + $0x10] sm:$0xff]  ;;  %v6240_v52 = vrot.slane %v6238_v18, 7  ;;  %v5699_v49 = vadd.f32 %v5664_v59, %v5603_v58  ;;  %v5188_v24 = vadd.f32 %v5154_v27, %v5012_v5  ;;  %v5313_v18 = vld [vmem:[#allocation3 + $0x308] sm:$0xfe] }
 0x500   :  { %6589 = vmatmul.mubr.bf16.gmra.mrb[168].mxu0 %v6372_v22  ;;  %13408 = vmatmul.mubr.bf16.gmra.mrb[168].mxu1 %v6372_v22  ;;  %v5390_v57 = vrot.slane %v5313_v18, 1 }
 0x501   :  { %v6243_v1 = vor.u32 %v6241_v54, %v6240_v52  ;;  %6598 = vmatprep.mubr.bf16.mxu0 %v16296_v10  ;;  %13411 = vmatprep.mubr.msk.bf16.mxu1 %vm14098_vm0, %v18158_v23 }
 0x502   :  { %v5250_v62 = vpop.permute.xlu0 %5249  ;;  %v5840_v19 = vpop.permute.xlu1 %5839  ;;  %v5392_v52 = vsel %vm1932_vm5, %v5390_v57, %v5391_v2 }
 0x503   :  { %6294 = vrot.lane.b32.xlu1 %v6243_v1, %s14101_s5  ;;  %v5875_v21 = vadd.f32 %v5840_v19, %v5699_v49  ;;  %v6373_v17 = vld [vmem:[#allocation2 + $0x18] sm:$0xff]  ;;  %v5284_v59 = vadd.f32 %v5250_v62, %v5188_v24  ;;  %v5905_v19 = vld [vmem:[#allocation3 + $0x340] sm:$0xfc] }
 0x505   :  { %v6019_v36 = vadd.f32 %v5981_v50, %v5875_v21  ;;  %v5428_v54 = vadd.f32 %v5392_v52, %v5284_v59  ;;  %v5983_v50 = vrot.slane %v5906_v51, 2  ;;  %v6337_v51 = vld [vmem:[#allocation2 + $0x30] sm:$0x1f] }
 0x506   :  { %v6279_v32 = vpop.permute.xlu0 %6278  ;;  %v4980_v49 = vpop.permute.xlu1 %4979 }
 0x507   :  { %v6043_v48 = vadd.f32 %v16265_v34, %v6019_v36  ;;  %v6332_v28 = vsel %vm16282_vm11, %v6279_v32, %v6331_v42  ;;  %v5982_v32 = vrot.slane %v5905_v19, 2 }
 0x508   :  { %6333 = vst [vmem:[#allocation2 + $0x20] sm:$0x1f] %v6332_v28  ;;  %6599 = vmatmul.mubr.bf16.gmra.mrb[172].mxu0 %v6373_v17  ;;  %13412 = vmatmul.mubr.bf16.gmra.mrb[172].mxu1 %v6373_v17 }
 0x509   :  { %v16320_v58 = vmax.f32 %v6043_v48, 0.0  ;;  %6608 = vmatprep.mubr.bf16.mxu0 %v16296_v10  ;;  %13415 = vmatprep.mubr.msk.bf16.mxu1 %vm14098_vm0, %v18158_v23  ;;  %v5984_v17 = vsel %vm2109_vm6, %v5982_v32, %v5983_v50  ;;  %v13912_v32 = vld [vmem:[%s18149_s1 + $0x1b8] ss:$12 sps:$4 sm:$0xff]  }
 0x50a   :  { %v5570_v27 = vpop.permute.xlu0 %5569 }
 0x50b   :  { %18188 = vst [vmem:[#allocation12_spill] sm:$0xff] %v16320_v58  ;;  %v6156_v22 = vpack.c.bf16 %v16320_v58, %v16320_v58  ;;  %v5604_v62 = vadd.f32 %v5570_v27, %v5428_v54  ;;  %v13910_v27 = vld [vmem:[%s18149_s1 + $0x188] ss:$12 sps:$4 sm:$0xff]   ;;  %v16440_v58 = vld [vmem:[%s18149_s1 + $0x1f8] ss:$12 sps:$4 sm:$0xff]  }
 0x50d   :  { %v6245_v29 = vshrl.u32 %v6156_v22, 16  ;;  %v6248_v12 = vshll.u32 %v6156_v22, 16 }
 0x50e   :  { %v5666_v1 = vpop.permute.xlu0 %5665 }
 0x50f   :  { %v6374_v11 = vld [vmem:[#allocation2 + $0x20] sm:$0xff]  ;;  %v6247_v21 = vrot.slane %v6245_v29, 7  ;;  %v5700_v5 = vadd.f32 %v5666_v1, %v5604_v62 }
 0x510   :  { %6609 = vmatmul.mubr.bf16.gmra.mrb[176].mxu0 %v6374_v11  ;;  %13416 = vmatmul.mubr.bf16.gmra.mrb[176].mxu1 %v6374_v11  ;;  %v16349_v1 = vld [vmem:[%s18149_s1 + $0x180] ss:$12 sps:$4 sm:$0xff]  }
 0x511   :  { %v6250_v36 = vor.u32 %v6248_v12, %v6247_v21  ;;  %6919 = vmatprep.mubr.bf16.mxu0 %v16296_v10  ;;  %13435 = vmatprep.mubr.msk.bf16.mxu1 %vm14098_vm0, %v18158_v23  ;;  %v13911_v62 = vld [vmem:[%s18149_s1 + $0x1a0] ss:$12 sps:$4 sm:$0xff]   ;;  %v16360_v12 = vld [vmem:[%s18149_s1 + $0x19c] ss:$12 sps:$4 sm:$0xff]  }
 0x512   :  { %v6281_v42 = vpop.permute.xlu1 %6280  ;;  %v5842_v24 = vpop.permute.xlu0 %5841 }
 0x513   :  { %v6335_v48 = vsel %vm16282_vm11, %v6281_v42, %v6334_v8  ;;  %v5876_v28 = vadd.f32 %v5842_v24, %v5700_v5  ;;  %6296 = vrot.lane.b32.xlu0 %v6250_v36, %s14101_s5  ;;  %v4821_v36 = vld [vmem:[#allocation3 + $0x300] sm:$0xff] }
 0x514   :  { %6336 = vst [vmem:[#allocation2 + $0x28] sm:$0x1f] %v6335_v48  ;;  %v16367_v42 = vld [vmem:[%s18149_s1 + $0x198] ss:$12 sps:$4 sm:$0xff]   ;;  %v5013_v24 = vadd.f32 %v4980_v49, %v4821_v36  ;;  %v5316_v48 = vld [vmem:[#allocation3 + $0x350] sm:$0x1] }
 0x515   :  { %v6020_v18 = vadd.f32 %v5984_v17, %v5876_v28  ;;  %v16377_v28 = vld [vmem:[%s18149_s1 + $0x1b4] ss:$12 sps:$4 sm:$0xff]   ;;  %v16384_v49 = vld [vmem:[%s18149_s1 + $0x1b0] ss:$12 sps:$4 sm:$0xff]  }
 0x516   :  { %v5156_v57 = vpop.permute.xlu1 %5155 }
 0x517   :  { %v6044_v2 = vadd.f32 %v16265_v34, %v6020_v18  ;;  %v5189_v17 = vadd.f32 %v5156_v57, %v5013_v24  ;;  %v5315_v18 = vld [vmem:[#allocation3 + $0x338] sm:$0xfe]  ;;  %v4822_v24 = vld [vmem:[#allocation3 + $0x330] sm:$0xff] }
 0x518   :  { %v16393_v57 = vld [vmem:[%s18149_s1 + $0x1cc] ss:$12 sps:$4 sm:$0xff]  }
 0x519   :  { %v16336_v59 = vmax.f32 %v6044_v2, 0.0  ;;  %v5394_v2 = vrot.slane %v5316_v48, 1 }
 0x51a   :  { %v5252_v50 = vpop.permute.xlu1 %5251 }
 0x51b   :  { %18189 = vst [vmem:[#allocation13_spill] sm:$0xff] %v16336_v59  ;;  %v6157_v22 = vpack.c.bf16 %v16336_v59, %v16336_v59  ;;  %v6722_v52 = vld [vmem:[#allocation2 + $0x28] sm:$0xff] }
 0x51c   :  { %6920 = vmatmul.mubr.bf16.vlgmr.msra.gmra.mrb[180].mxu0 %v6722_v52  ;;  %13436 = vmatmul.mubr.bf16.vlgmr.msra.gmra.mrb[180].mxu1 %v6722_v52  ;;  %v13913_v52 = vld [vmem:[%s18149_s1 + $0x1d0] ss:$12 sps:$4 sm:$0xff]  }
 0x51d   :  { %v6252_v54 = vshrl.u32 %v6157_v22, 16  ;;  %6929 = vmatprep.mubr.bf16.mxu0 %v16296_v10  ;;  %13439 = vmatprep.mubr.msk.bf16.mxu1 %vm14098_vm0, %v18158_v23  ;;  %v6255_v21 = vshll.u32 %v6157_v22, 16 }
 0x51e   :  { %v6283_v29 = vpop.permute.xlu0 %6282  ;;  %7239 = vmatpush1.bf16.msra.mxu0 %v16349_v1  ;;  %13456 = vmatpush3.bf16.msra.mxu1 %v13910_v27  ;;  %v5572_v27 = vpop.permute.xlu1 %5571 }
 0x51f   :  { %v6338_v11 = vsel %vm16282_vm11, %v6283_v29, %v6337_v51  ;;  %v6254_v19 = vrot.slane %v6252_v54, 7  ;;  %7240 = vmatprep.subr.bf16.mxu0 %v16360_v12  ;;  %13457 = vmatprep.subr.bf16.mxu1 %v18158_v23  ;;  %v5285_v54 = vadd.f32 %v5252_v50, %v5189_v17  ;;  %v5393_v29 = vrot.slane %v5315_v18, 1  ;;  %v13914_v50 = vld [vmem:[%s18149_s1 + $0x1e8] ss:$12 sps:$4 sm:$0xff]  }
 0x520   :  { %6339 = vst [vmem:[#allocation2 + $0x30] sm:$0x1f] %v6338_v11  ;;  %v6340_v11 = vld [vmem:[#allocation2 + $0x38] sm:$0x1f]  ;;  %v5908_v18 = vld [vmem:[#allocation3 + $0x388] sm:$0x3] }
 0x521   :  { %v6257_v5 = vor.u32 %v6255_v21, %v6254_v19  ;;  %v16404_v21 = vld [vmem:[%s18149_s1 + $0x1c8] ss:$12 sps:$4 sm:$0xff]  }
 0x522   :  { %v4982_v8 = vpop.permute.xlu0 %4981  ;;  %7241 = vmatpush1.bf16.msra.mxu0 %v16367_v42  ;;  %13458 = vmatpush3.bf16.msra.mxu1 %v13911_v62  ;;  %v5395_v62 = vsel %vm1932_vm5, %v5393_v29, %v5394_v2  ;;  %v5318_v2 = vld [vmem:[#allocation3 + $0x380] sm:$0x1] }
 0x523   :  { %6298 = vrot.lane.b32.xlu1 %v6257_v5, %s14101_s5  ;;  %7242 = vmatprep.subr.bf16.mxu0 %v16377_v28  ;;  %v5429_v5 = vadd.f32 %v5395_v62, %v5285_v54  ;;  %v5014_v17 = vadd.f32 %v4982_v8, %v4822_v24  ;;  %v16422_v54 = vld [vmem:[%s18149_s1 + $0x1e0] ss:$12 sps:$4 sm:$0xff]   ;;  %v16431_v8 = vld [vmem:[%s18149_s1 + $0x1fc] ss:$12 sps:$4 sm:$0xff]   ;;  %v5397_v59 = vrot.slane %v5318_v2, 1 }
 0x524   :  { %13459 = vmatprep.subr.bf16.mxu1 %v18158_v23 }
 0x525   :  { %v5605_v29 = vadd.f32 %v5572_v27, %v5429_v5 }
 0x526   :  { %v5158_v22 = vpop.permute.xlu0 %5157  ;;  %7243 = vmatpush1.bf16.msra.mxu0 %v16384_v49  ;;  %13460 = vmatpush3.bf16.msra.mxu1 %v13912_v32  ;;  %v16415_v32 = vld [vmem:[%s18149_s1 + $0x1e4] ss:$12 sps:$4 sm:$0xff]  }
 0x527   :  { %v6723_v51 = vld [vmem:[#allocation2 + $0x30] sm:$0xff]  ;;  %7244 = vmatprep.subr.bf16.mxu0 %v16393_v57  ;;  %13461 = vmatprep.subr.bf16.mxu1 %v18158_v23  ;;  %v5190_v62 = vadd.f32 %v5158_v22, %v5014_v17 }
 0x528   :  { %6930 = vmatmul.mubr.bf16.gmra.mrb[184].mxu0 %v6723_v51  ;;  %13440 = vmatmul.mubr.bf16.gmra.mrb[184].mxu1 %v6723_v51  ;;  %v13915_v51 = vld [vmem:[%s18149_s1 + $0x200] ss:$12 sps:$4 sm:$0xff]  }
 0x529   :  { %6939 = vmatprep.mubr.bf16.mxu0 %v16296_v10  ;;  %13443 = vmatprep.mubr.msk.bf16.mxu1 %vm14098_vm0, %v18158_v23 }
 0x52a   :  { %v6285_v19 = vpop.permute.xlu1 %6284  ;;  %7245 = vmatpush1.bf16.msra.mxu0 %v16404_v21  ;;  %13462 = vmatpush3.bf16.msra.mxu1 %v13913_v52  ;;  %v5254_v48 = vpop.permute.xlu0 %5253 }
 0x52b   :  { %v6341_v36 = vsel %vm16282_vm11, %v6285_v19, %v6340_v11  ;;  %7246 = vmatprep.subr.bf16.mxu0 %v16415_v32  ;;  %13463 = vmatprep.subr.bf16.mxu1 %v18158_v23  ;;  %v5907_v11 = vld [vmem:[#allocation3 + $0x370] sm:$0xfc]  ;;  %v5317_v19 = vld [vmem:[#allocation3 + $0x368] sm:$0xfe]  ;;  %v5286_v55 = vadd.f32 %v5254_v48, %v5190_v62  ;;  %v13916_v48 = vld [vmem:[%s18149_s1 + $0x218] ss:$12 sps:$4 sm:$0xff]  }
 0x52c   :  { %6342 = vst [vmem:[#allocation2 + $0x38] sm:$0x1f] %v6341_v36  ;;  %v6343_v36 = vld [vmem:[#allocation2 + $0x40] sm:$0x1f]  ;;  %v5985_v22 = vrot.slane %v5907_v11, 2  ;;  %v5396_v17 = vrot.slane %v5317_v19, 1 }
 0x52e   :  { %v5668_v52 = vpop.permute.xlu1 %5667  ;;  %7247 = vmatpush1.bf16.msra.mxu0 %v16422_v54  ;;  %13464 = vmatpush3.bf16.msra.mxu1 %v13914_v50  ;;  %v5986_v50 = vrot.slane %v5908_v18, 2  ;;  %v5398_v11 = vsel %vm1932_vm5, %v5396_v17, %v5397_v59 }
 0x52f   :  { %7248 = vmatprep.subr.bf16.mxu0 %v16431_v8  ;;  %13465 = vmatprep.subr.bf16.mxu1 %v18158_v23  ;;  %v5701_v33 = vadd.f32 %v5668_v52, %v5605_v29  ;;  %v5909_v52 = vld [vmem:[#allocation3 + $0x3a0] sm:$0xfc]  ;;  %v5910_v29 = vld [vmem:[#allocation3 + $0x3b8] sm:$0x3] }
 0x530   :  { %v6287_v24 = vpop.permute.xlu0 %6286  ;;  %v5987_v62 = vsel %vm2109_vm6, %v5985_v22, %v5986_v50 }
 0x531   :  { %v6344_v27 = vsel %vm16282_vm11, %v6287_v24, %v6343_v36  ;;  %v5988_v24 = vrot.slane %v5909_v52, 2 }
 0x532   :  { %6345 = vst [vmem:[#allocation2 + $0x40] sm:$0x1f] %v6344_v27  ;;  %v5844_v5 = vpop.permute.xlu1 %5843  ;;  %7249 = vmatpush1.bf16.msra.mxu0 %v16440_v58  ;;  %13466 = vmatpush3.bf16.msra.mxu1 %v13915_v51  ;;  %v5430_v51 = vadd.f32 %v5398_v11, %v5286_v55  ;;  %v5989_v27 = vrot.slane %v5910_v29, 2  ;;  %v7808_v29 = vld [vmem:[#allocation3 + $0x18] sm:$0x1] }
 0x533   :  { %v5877_v18 = vadd.f32 %v5844_v5, %v5701_v33  ;;  %v6724_v2 = vld [vmem:[#allocation2 + $0x38] sm:$0xff]  ;;  %7250 = vmatprep.subr.bf16.mxu0 %v16184_v35  ;;  %13467 = vmatprep.subr.bf16.mxu1 %v18158_v23 }
 0x534   :  { %6940 = vmatmul.mubr.bf16.gmra.mrb[188].mxu0 %v6724_v2  ;;  %13444 = vmatmul.mubr.bf16.gmra.mrb[188].mxu1 %v6724_v2  ;;  %v5670_v36 = vpop.permute.xlu0 %5669  ;;  %v13917_v35 = vld [vmem:[%s18149_s1 + $0x230] ss:$12 sps:$4 sm:$0xff]   ;;  %v5990_v17 = vsel %vm2109_vm6, %v5988_v24, %v5989_v27 }
 0x535   :  { %v6021_v19 = vadd.f32 %v5987_v62, %v5877_v18  ;;  %6949 = vmatprep.mubr.bf16.mxu0 %v16296_v10  ;;  %13447 = vmatprep.mubr.msk.bf16.mxu1 %vm14098_vm0, %v18158_v23 }
 0x536   :  { %v5574_v33 = vpop.permute.xlu1 %5573  ;;  %7251 = vmatpush1.bf16.msra.mxu0 %v16179_v13  ;;  %13468 = vmatpush3.bf16.msra.mxu1 %v13916_v48 }
 0x537   :  { %v6045_v59 = vadd.f32 %v16265_v34, %v6021_v19  ;;  %v5606_v50 = vadd.f32 %v5574_v33, %v5430_v51  ;;  %7252 = vmatprep.subr.bf16.mxu0 %v16207_v45  ;;  %13469 = vmatprep.subr.bf16.mxu1 %v18158_v23  ;;  %v14059_v45 = vld [vmem:[%s18149_s1 + $0x184] ss:$12 sps:$4 sm:$0xff]   ;;  %v7872_v33 = vrot.slane %v7808_v29, 1  ;;  %v13919_v29 = vld [vmem:[%s18149_s1 + $0x1a0] ss:$12 sps:$4 sm:$0xff]  }
 0x539   :  { %v16460_v55 = vmax.f32 %v6045_v59, 0.0  ;;  %v5702_v22 = vadd.f32 %v5670_v36, %v5606_v50  ;;  %v6725_v5 = vld [vmem:[#allocation2 + $0x40] sm:$0xff]  ;;  %v7984_v50 = vld [vmem:[#allocation3 + $0x18] sm:$0x3] }
 0x53a   :  { %v5846_v18 = vpop.permute.xlu1 %5845  ;;  %7253 = vmatpush1.bf16.msra.mxu0 %v16202_v63  ;;  %13470 = vmatpush3.bf16.msra.mxu1 %v13917_v35  ;;  %v7807_v63 = vld [vmem:[#allocation3] sm:$0xfe] }
 0x53b   :  { %18190 = vst [vmem:[#allocation14_spill] sm:$0xff] %v16460_v55  ;;  %v6158_v13 = vpack.c.bf16 %v16460_v55, %v16460_v55  ;;  %v5878_v48 = vadd.f32 %v5846_v18, %v5702_v22  ;;  %7589 = vmatprep.subr.bf16.mxu0 %v14059_v45  ;;  %13491 = vmatprep.subr.bf16.mxu1 %v18158_v23  ;;  %v7871_v51 = vrot.slane %v7807_v63, 1  ;;  %v8048_v18 = vrot.slane %v7984_v50, 2  ;;  %v14063_v50 = vld [vmem:[%s18149_s1 + $0x228] ss:$12 sps:$4 sm:$0xff]  }
 0x53c   :  { %6950 = vmatmul.mubr.bf16.gmra.mrb[192].mxu0 %v6725_v5  ;;  %13448 = vmatmul.mubr.bf16.gmra.mrb[192].mxu1 %v6725_v5 }
 0x53d   :  { %v6022_v2 = vadd.f32 %v5990_v17, %v5878_v48  ;;  %v6259_v52 = vshrl.u32 %v6158_v13, 16  ;;  %6959 = vmatprep.mubr.bf16.mxu0 %v16296_v10  ;;  %13451 = vmatprep.mubr.msk.bf16.mxu1 %vm14098_vm0, %v18158_v23  ;;  %v6262_v19 = vshll.u32 %v6158_v13, 16  ;;  %v7873_v35 = vsel %vm1932_vm5, %v7871_v51, %v7872_v33  ;;  %v13918_v48 = vld [vmem:[%s18149_s1 + $0x188] ss:$12 sps:$4 sm:$0xff]  }
 0x53f   :  { %v6046_v62 = vadd.f32 %v16265_v34, %v6022_v2  ;;  %v6261_v11 = vrot.slane %v6259_v52, 7  ;;  %v7983_v34 = vld [vmem:[#allocation3] sm:$0xfc] }
 0x540   :  { %v8047_v17 = vrot.slane %v7983_v34, 2 }
 0x541   :  { %v16474_v36 = vmax.f32 %v6046_v62, 0.0  ;;  %v6264_v24 = vor.u32 %v6262_v19, %v6261_v11  ;;  %v13920_v11 = vld [vmem:[%s18149_s1 + $0x1b8] ss:$12 sps:$4 sm:$0xff]  }
 0x542   :  { %v8049_v2 = vsel %vm2109_vm6, %v8047_v17, %v8048_v18 }
 0x543   :  { %18191 = vst [vmem:[#allocation15_spill] sm:$0xff] %v16474_v36  ;;  %v6159_v27 = vpack.c.bf16 %v16474_v36, %v16474_v36  ;;  %6300 = vrot.lane.b32.xlu0 %v6264_v24, %s14101_s5  ;;  %v13925_v24 = vld [vmem:[%s18149_s1 + $0x230] ss:$12 sps:$4 sm:$0xff]  }
 0x544   :  { %6960 = vmatmul.mubr.bf16.gmra.mrb[196].mxu0 %v16296_v10  ;;  %13452 = vmatmul.mubr.bf16.gmra.mrb[196].mxu1 %v16296_v10 }
 0x545   :  { %v6266_v59 = vshrl.u32 %v6159_v27, 16  ;;  %7270 = vmatprep.mubr.bf16.mxu0 %v16296_v10  ;;  %13471 = vmatprep.mubr.msk.bf16.mxu1 %vm14098_vm0, %v18158_v23  ;;  %v6269_v5 = vshll.u32 %v6159_v27, 16 }
 0x547   :  { %v6268_v22 = vrot.slane %v6266_v59, 7  ;;  %7919 = vrot.lane.b32.xlu0 %v7873_v35, %s14100_s16  ;;  %v6653_v45 = vpop.f32.mrb[160].mxu1  ;;  %v6352_v35 = vld [vmem:[#allocation2 + $0x68] sm:$0x1f] }
 0x548   :  { %v13401_v52 = vpop.f32.mrb[161].mxu1 }
 0x549   :  { %v6271_v13 = vor.u32 %v6269_v5, %v6268_v22  ;;  %v6656_v63 = vpop.f32.mrb[162].mxu1  ;;  %v6355_v5 = vld [vmem:[#allocation2 + $0x70] sm:$0x1f] }
 0x54a   :  { %v13402_v62 = vpop.f32.mrb[163].mxu1  ;;  %v6361_v63 = vld [vmem:[#allocation2 + $0x80] sm:$0x1f] }
 0x54b   :  { %6302 = vrot.lane.b32.xlu1 %v6271_v13, %s14101_s5 }
 0x54c   :  { %7271 = vmatmul.mubr.bf16.vlgmr.msra.gmra.mrb[200].mxu0 %v16296_v10  ;;  %13472 = vmatmul.mubr.bf16.vlgmr.msra.gmra.mrb[200].mxu1 %v16296_v10 }
 0x54d   :  { %7280 = vmatprep.mubr.bf16.mxu0 %v16296_v10  ;;  %13475 = vmatprep.mubr.msk.bf16.mxu1 %vm14098_vm0, %v18158_v23 }
 0x54e   :  { %7590 = vmatpush1.bf16.msra.mxu0 %v16349_v1  ;;  %13492 = vmatpush3.bf16.msra.mxu1 %v13918_v48  ;;  %v6346_v1 = vld [vmem:[#allocation2 + $0x58] sm:$0x1f] }
 0x54f   :  { %8095 = vrot.lane.b32.xlu1 %v8049_v2, %s14101_s5  ;;  %7591 = vmatprep.subr.bf16.mxu0 %v16360_v12  ;;  %v13921_v12 = vld [vmem:[%s18149_s1 + $0x1d0] ss:$12 sps:$4 sm:$0xff]  }
 0x550   :  { %13493 = vmatprep.subr.bf16.mxu1 %v18158_v23  ;;  %v6358_v48 = vld [vmem:[#allocation2 + $0x78] sm:$0x1f] }
 0x552   :  { %7592 = vmatpush1.bf16.msra.mxu0 %v16367_v42  ;;  %13494 = vmatpush3.bf16.msra.mxu1 %v13919_v29  ;;  %v13922_v42 = vld [vmem:[%s18149_s1 + $0x1e8] ss:$12 sps:$4 sm:$0xff]  }
 0x553   :  { %7593 = vmatprep.subr.bf16.mxu0 %v16377_v28  ;;  %13495 = vmatprep.subr.bf16.mxu1 %v18158_v23 }
 0x555   :  { %v6289_v19 = vpop.permute.xlu0 %6288 }
 0x556   :  { %v6347_v51 = vsel %vm16282_vm11, %v6289_v19, %v6346_v1  ;;  %7594 = vmatpush1.bf16.msra.mxu0 %v16384_v49  ;;  %13496 = vmatpush3.bf16.msra.mxu1 %v13920_v11  ;;  %v13923_v49 = vld [vmem:[%s18149_s1 + $0x200] ss:$12 sps:$4 sm:$0xff]  }
 0x557   :  { %6348 = vst [vmem:[#allocation2 + $0x58] sm:$0x1f] %v6347_v51  ;;  %7595 = vmatprep.subr.bf16.mxu0 %v16393_v57  ;;  %13497 = vmatprep.subr.bf16.mxu1 %v18158_v23  ;;  %v6349_v57 = vld [vmem:[#allocation2 + $0x60] sm:$0x1f]  ;;  %v6364_v1 = vld [vmem:[#allocation2 + $0x88] sm:$0x1f] }
 0x55a   :  { %7596 = vmatpush1.bf16.msra.mxu0 %v16404_v21  ;;  %13498 = vmatpush3.bf16.msra.mxu1 %v13921_v12  ;;  %v6367_v12 = vld [vmem:[#allocation2 + $0x90] sm:$0x1f] }
 0x55b   :  { %7597 = vmatprep.subr.bf16.mxu0 %v16415_v32  ;;  %13499 = vmatprep.subr.bf16.mxu1 %v18158_v23  ;;  %v13924_v32 = vld [vmem:[%s18149_s1 + $0x218] ss:$12 sps:$4 sm:$0xff]  }
 0x55e   :  { %v7074_v28 = vld [vmem:[#allocation2 + $0x58] sm:$0xff]  ;;  %7598 = vmatpush1.bf16.msra.mxu0 %v16422_v54  ;;  %13500 = vmatpush3.bf16.msra.mxu1 %v13922_v42  ;;  %v14060_v54 = vld [vmem:[%s18149_s1 + $0x214] ss:$12 sps:$4 sm:$0xff]  }
 0x55f   :  { %v6291_v33 = vpop.permute.xlu1 %6290  ;;  %7281 = vmatmul.mubr.bf16.gmra.mrb[204].mxu0 %v7074_v28  ;;  %13476 = vmatmul.mubr.bf16.gmra.mrb[204].mxu1 %v7074_v28 }
 0x560   :  { %v6350_v21 = vsel %vm16282_vm11, %v6291_v33, %v6349_v57  ;;  %7290 = vmatprep.mubr.bf16.mxu0 %v16296_v10  ;;  %13479 = vmatprep.mubr.msk.bf16.mxu1 %vm14098_vm0, %v18158_v23 }
 0x561   :  { %6351 = vst [vmem:[#allocation2 + $0x60] sm:$0x1f] %v6350_v21  ;;  %7599 = vmatprep.subr.bf16.mxu0 %v16431_v8  ;;  %13501 = vmatprep.subr.bf16.mxu1 %v18158_v23  ;;  %v14061_v8 = vld [vmem:[%s18149_s1 + $0x210] ss:$12 sps:$4 sm:$0xff]  }
 0x562   :  { %7600 = vmatpush1.bf16.msra.mxu0 %v16440_v58  ;;  %13502 = vmatpush3.bf16.msra.mxu1 %v13923_v49  ;;  %v14062_v58 = vld [vmem:[%s18149_s1 + $0x22c] ss:$12 sps:$4 sm:$0xff]  }
 0x563   :  { %7601 = vmatprep.subr.bf16.mxu0 %v14060_v54  ;;  %13503 = vmatprep.subr.bf16.mxu1 %v18158_v23 }
 0x566   :  { %7602 = vmatpush1.bf16.msra.mxu0 %v14061_v8  ;;  %13504 = vmatpush3.bf16.msra.mxu1 %v13924_v32 }
 0x567   :  { %7603 = vmatprep.subr.bf16.mxu0 %v14062_v58  ;;  %13505 = vmatprep.subr.bf16.mxu1 %v18158_v23 }
 0x568   :  { %v7075_v27 = vld [vmem:[#allocation2 + $0x60] sm:$0xff] }
 0x569   :  { %7291 = vmatmul.mubr.bf16.gmra.mrb[208].mxu0 %v7075_v27  ;;  %13480 = vmatmul.mubr.bf16.gmra.mrb[208].mxu1 %v7075_v27  ;;  %v6293_v59 = vpop.permute.xlu0 %6292 }
 0x56a   :  { %v6353_v34 = vsel %vm16282_vm11, %v6293_v59, %v6352_v35  ;;  %7300 = vmatprep.mubr.bf16.mxu0 %v16296_v10  ;;  %13483 = vmatprep.mubr.msk.bf16.mxu1 %vm14098_vm0, %v18158_v23 }
 0x56b   :  { %6354 = vst [vmem:[#allocation2 + $0x68] sm:$0x1f] %v6353_v34  ;;  %7604 = vmatpush1.bf16.msra.mxu0 %v14063_v50  ;;  %13506 = vmatpush3.bf16.msra.mxu1 %v13925_v24 }
 0x56c   :  { %13527 = vmatprep.subr.bf16.mxu1 %v18158_v23 }
 0x572   :  { %v7076_v22 = vld [vmem:[#allocation2 + $0x68] sm:$0xff] }
 0x573   :  { %7301 = vmatmul.mubr.bf16.gmra.mrb[212].mxu0 %v7076_v22  ;;  %13484 = vmatmul.mubr.bf16.gmra.mrb[212].mxu1 %v7076_v22 }
 0x574   :  { %7310 = vmatprep.mubr.bf16.mxu0 %v16296_v10  ;;  %13487 = vmatprep.mubr.msk.bf16.mxu1 %vm14098_vm0, %v18158_v23 }
 0x575   :  { %v6295_v17 = vpop.permute.xlu1 %6294 }
 0x576   :  { %v6356_v18 = vsel %vm16282_vm11, %v6295_v17, %v6355_v5 }
 0x577   :  { %6357 = vst [vmem:[#allocation2 + $0x70] sm:$0x1f] %v6356_v18 }
 0x57e   :  { %v7077_v13 = vld [vmem:[#allocation2 + $0x70] sm:$0xff] }
 0x57f   :  { %7311 = vmatmul.mubr.bf16.gmra.mrb[216].mxu0 %v7077_v13  ;;  %13488 = vmatmul.mubr.bf16.gmra.mrb[216].mxu1 %v7077_v13 }
 0x580   :  { %7621 = vmatprep.mubr.bf16.mxu0 %v16296_v10  ;;  %13507 = vmatprep.mubr.msk.bf16.mxu1 %vm14098_vm0, %v18158_v23 }
 0x585   :  { %v6297_v45 = vpop.permute.xlu0 %6296 }
 0x586   :  { %v6359_v2 = vsel %vm16282_vm11, %v6297_v45, %v6358_v48 }
 0x587   :  { %6360 = vst [vmem:[#allocation2 + $0x78] sm:$0x1f] %v6359_v2 }
 0x58e   :  { %v7424_v52 = vld [vmem:[#allocation2 + $0x78] sm:$0xff] }
 0x58f   :  { %7622 = vmatmul.mubr.bf16.vlgmr.msra.gmra.mrb[220].mxu0 %v7424_v52  ;;  %13508 = vmatmul.mubr.bf16.vlgmr.msra.gmra.mrb[220].mxu1 %v7424_v52 }
 0x590   :  { %7631 = vmatprep.mubr.bf16.mxu0 %v16296_v10  ;;  %13511 = vmatprep.mubr.msk.bf16.mxu1 %vm14098_vm0, %v18158_v23 }
 0x595   :  { %v6299_v29 = vpop.permute.xlu1 %6298 }
 0x596   :  { %v6362_v62 = vsel %vm16282_vm11, %v6299_v29, %v6361_v63 }
 0x597   :  { %6363 = vst [vmem:[#allocation2 + $0x80] sm:$0x1f] %v6362_v62 }
 0x59e   :  { %v7425_v11 = vld [vmem:[#allocation2 + $0x80] sm:$0xff] }
 0x59f   :  { %7632 = vmatmul.mubr.bf16.gmra.mrb[224].mxu0 %v7425_v11  ;;  %13512 = vmatmul.mubr.bf16.gmra.mrb[224].mxu1 %v7425_v11 }
 0x5a0   :  { %7641 = vmatprep.mubr.bf16.mxu0 %v16296_v10  ;;  %13515 = vmatprep.mubr.msk.bf16.mxu1 %vm14098_vm0, %v18158_v23 }
 0x5b5   :  { %v6301_v19 = vpop.permute.xlu0 %6300 }
 0x5b6   :  { %v6365_v51 = vsel %vm16282_vm11, %v6301_v19, %v6364_v1 }
 0x5b7   :  { %6366 = vst [vmem:[#allocation2 + $0x88] sm:$0x1f] %v6365_v51 }
 0x5bd   :  { %v6303_v42 = vpop.permute.xlu1 %6302 }
 0x5be   :  { %v6368_v28 = vsel %vm16282_vm11, %v6303_v42, %v6367_v12  ;;  %v7426_v49 = vld [vmem:[#allocation2 + $0x88] sm:$0xff] }
 0x5bf   :  { %6369 = vst [vmem:[#allocation2 + $0x90] sm:$0x1f] %v6368_v28  ;;  %7642 = vmatmul.mubr.bf16.gmra.mrb[228].mxu0 %v7426_v49  ;;  %13516 = vmatmul.mubr.bf16.gmra.mrb[228].mxu1 %v7426_v49 }
 0x5c0   :  { %7651 = vmatprep.mubr.bf16.mxu0 %v16296_v10  ;;  %13519 = vmatprep.mubr.msk.bf16.mxu1 %vm14098_vm0, %v18158_v23 }
 0x5c6   :  { %v7427_v57 = vld [vmem:[#allocation2 + $0x90] sm:$0xff] }
 0x5c7   :  { %7652 = vmatmul.mubr.bf16.gmra.mrb[232].mxu0 %v7427_v57  ;;  %13520 = vmatmul.mubr.bf16.gmra.mrb[232].mxu1 %v7427_v57  ;;  %v6580_v33 = vpop.f32.mrb[164].mxu0  ;;  %v6661_v21 = vpop.f32.mrb[164].mxu1 }
 0x5c8   :  { %6698 = vst [vmem:[#allocation3 + $0x30] sm:$0xff] %v6580_v33  ;;  %v6582_v32 = vpop.f32.mrb[165].mxu0  ;;  %v13405_v54 = vpop.f32.mrb[165].mxu1  ;;  %8191 = vrot.lane.b32.xlu0 %v6580_v33, %s14102_s22  ;;  %7661 = vmatprep.mubr.bf16.mxu0 %v16296_v10 }
 0x5c9   :  { %6699 = vst [vmem:[#allocation3 + $0x38] sm:$0xff] %v6582_v32  ;;  %v6584_v44 = vpop.f32.mrb[166].mxu0  ;;  %v6664_v8 = vpop.f32.mrb[166].mxu1  ;;  %13523 = vmatprep.mubr.msk.bf16.mxu1 %vm14098_vm0, %v18158_v23 }
 0x5ca   :  { %6701 = vst [vmem:[#allocation3 + $0x48] sm:$0xff] %v6584_v44  ;;  %v6586_v58 = vpop.f32.mrb[167].mxu0  ;;  %v13406_v24 = vpop.f32.mrb[167].mxu1 }
 0x5cb   :  { %6702 = vst [vmem:[#allocation3 + $0x50] sm:$0xff] %v6586_v58 }
 0x5cf   :  { %v7809_v27 = vld [vmem:[#allocation3 + $0x30] sm:$0xfe]  ;;  %7662 = vmatmul.mubr.bf16.gmra.mrb[236].mxu0 %v16296_v10  ;;  %13524 = vmatmul.mubr.bf16.gmra.mrb[236].mxu1 %v16296_v10 }
 0x5d0   :  { %v8399_v35 = vld [vmem:[#allocation3 + $0x38] sm:$0xfc]  ;;  %9536 = vmatprep.mubr.bf16.mxu0 %v16296_v10  ;;  %13543 = vmatprep.mubr.msk.bf16.mxu1 %vm14098_vm0, %v18158_v23  ;;  %v7874_v50 = vrot.slane %v7809_v27, 1  ;;  %v7985_v45 = vld [vmem:[#allocation3 + $0x30] sm:$0xfc] }
 0x5d1   :  { %v7810_v59 = vld [vmem:[#allocation3 + $0x48] sm:$0x1]  ;;  %v8463_v13 = vrot.slane %v8399_v35, 2  ;;  %v8050_v51 = vrot.slane %v7985_v45, 2 }
 0x5d2   :  { %v7986_v34 = vld [vmem:[#allocation3 + $0x48] sm:$0x3]  ;;  %v7875_v22 = vrot.slane %v7810_v59, 1  ;;  %v8400_v5 = vld [vmem:[#allocation3 + $0x50] sm:$0x3] }
 0x5d3   :  { %v6590_v17 = vpop.f32.mrb[168].mxu0  ;;  %v6669_v18 = vpop.f32.mrb[168].mxu1  ;;  %v8464_v48 = vrot.slane %v8400_v5, 2  ;;  %v8051_v63 = vrot.slane %v7986_v34, 2 }
 0x5d4   :  { %6704 = vst [vmem:[#allocation3 + $0x60] sm:$0xff] %v6590_v17  ;;  %6706 = vst.msk [vmem:[#allocation3 + $0x70] sm:$0xff] %vm748_vm7, %v6669_v18  ;;  %v6592_v2 = vpop.f32.mrb[169].mxu0  ;;  %v13409_v52 = vpop.f32.mrb[169].mxu1  ;;  %v7876_v10 = vsel %vm1932_vm5, %v7874_v50, %v7875_v22 }
 0x5d5   :  { %6705 = vst [vmem:[#allocation3 + $0x68] sm:$0xff] %v6592_v2  ;;  %v6594_v29 = vpop.f32.mrb[170].mxu0  ;;  %v6672_v62 = vpop.f32.mrb[170].mxu1  ;;  %7921 = vrot.lane.b32.xlu1 %v7876_v10, %s14100_s16  ;;  %v8465_v11 = vsel %vm2109_vm6, %v8463_v13, %v8464_v48  ;;  %v8052_v12 = vsel %vm2109_vm6, %v8050_v51, %v8051_v63 }
 0x5d6   :  { %6707 = vst [vmem:[#allocation3 + $0x78] sm:$0xff] %v6594_v29  ;;  %6709 = vst.msk [vmem:[#allocation3 + $0x88] sm:$0xff] %vm748_vm7, %v6672_v62  ;;  %v6596_v1 = vpop.f32.mrb[171].mxu0  ;;  %v13410_v19 = vpop.f32.mrb[171].mxu1  ;;  %8511 = vrot.lane.b32.xlu0 %v8465_v11, %s14100_s16 }
 0x5d7   :  { %6708 = vst [vmem:[#allocation3 + $0x80] sm:$0xff] %v6596_v1 }
 0x5d9   :  { %8097 = vrot.lane.b32.xlu1 %v8052_v12, %s14101_s5 }
 0x5da   :  { %8607 = vrot.lane.b32.xlu0 %v6592_v2, %s14101_s5 }
 0x5db   :  { %v6600_v42 = vpop.f32.mrb[172].mxu0  ;;  %v6677_v28 = vpop.f32.mrb[172].mxu1  ;;  %v7811_v49 = vld [vmem:[#allocation3 + $0x60] sm:$0xfe] }
 0x5dc   :  { %6710 = vst [vmem:[#allocation3 + $0x90] sm:$0xff] %v6600_v42  ;;  %6712 = vst.msk [vmem:[#allocation3 + $0xa0] sm:$0xff] %vm748_vm7, %v6677_v28  ;;  %v6602_v57 = vpop.f32.mrb[173].mxu0  ;;  %v13413_v33 = vpop.f32.mrb[173].mxu1  ;;  %v8671_v21 = vld [vmem:[#allocation3 + $0x68] sm:$0xfe] }
 0x5dd   :  { %6711 = vst [vmem:[#allocation3 + $0x98] sm:$0xff] %v6602_v57  ;;  %v6680_v32 = vpop.f32.mrb[174].mxu1  ;;  %v6604_v54 = vpop.f32.mrb[174].mxu0  ;;  %8193 = vrot.lane.b32.xlu1 %v6590_v17, %s14102_s22  ;;  %v7812_v44 = vld [vmem:[#allocation3 + $0x78] sm:$0x1]  ;;  %v7877_v27 = vrot.slane %v7811_v49, 1 }
 0x5de   :  { %6715 = vst.msk [vmem:[#allocation3 + $0xb8] sm:$0xff] %vm748_vm7, %v6680_v32  ;;  %6713 = vst [vmem:[#allocation3 + $0xa8] sm:$0xff] %v6604_v54  ;;  %v6606_v8 = vpop.f32.mrb[175].mxu0  ;;  %v13414_v58 = vpop.f32.mrb[175].mxu1  ;;  %v8672_v24 = vld [vmem:[#allocation3 + $0x80] sm:$0x1] }
 0x5df   :  { %v7878_v35 = vrot.slane %v7812_v44, 1  ;;  %6714 = vst [vmem:[#allocation3 + $0xb0] sm:$0xff] %v6606_v8  ;;  %v8735_v59 = vrot.slane %v8671_v21, 1  ;;  %v8736_v34 = vrot.slane %v8672_v24, 1  ;;  %v8402_v50 = vld [vmem:[#allocation3 + $0x80] sm:$0x3] }
 0x5e0   :  { %v7987_v22 = vld [vmem:[#allocation3 + $0x60] sm:$0xfc]  ;;  %v8401_v18 = vld [vmem:[#allocation3 + $0x68] sm:$0xfc]  ;;  %v7988_v13 = vld [vmem:[#allocation3 + $0x78] sm:$0x3] }
 0x5e1   :  { %v7879_v5 = vsel %vm1932_vm5, %v7877_v27, %v7878_v35  ;;  %v8737_v17 = vsel %vm1932_vm5, %v8735_v59, %v8736_v34  ;;  %v8467_v48 = vrot.slane %v8402_v50, 2  ;;  %v8054_v45 = vrot.slane %v7988_v13, 2 }
 0x5e2   :  { %7923 = vrot.lane.b32.xlu1 %v7879_v5, %s14100_s16  ;;  %8783 = vrot.lane.b32.xlu0 %v8737_v17, %s14102_s22  ;;  %v8053_v2 = vrot.slane %v7987_v22, 2  ;;  %v8466_v63 = vrot.slane %v8401_v18, 2 }
 0x5e3   :  { %v16611_v52 = vpop.f32.mrb[176].mxu0  ;;  %v6685_v10 = vpop.f32.mrb[176].mxu1  ;;  %v7813_v21 = vld [vmem:[#allocation3 + $0x90] sm:$0xfe] }
 0x5e4   :  { %6716 = vst [vmem:[#allocation3 + $0xc0] sm:$0xff] %v16611_v52  ;;  %6718 = vst.msk [vmem:[#allocation3 + $0xd0] sm:$0xff] %vm748_vm7, %v6685_v10  ;;  %v6612_v29 = vpop.f32.mrb[177].mxu0  ;;  %v13417_v62 = vpop.f32.mrb[177].mxu1  ;;  %v8055_v11 = vsel %vm2109_vm6, %v8053_v2, %v8054_v45  ;;  %v8468_v51 = vsel %vm2109_vm6, %v8466_v63, %v8467_v48  ;;  %v8673_v32 = vld [vmem:[#allocation3 + $0x98] sm:$0xfe] }
 0x5e5   :  { %6717 = vst [vmem:[#allocation3 + $0xc8] sm:$0xff] %v6612_v29  ;;  %v6614_v1 = vpop.f32.mrb[178].mxu0  ;;  %v6688_v19 = vpop.f32.mrb[178].mxu1  ;;  %v7814_v12 = vld [vmem:[#allocation3 + $0xa8] sm:$0x1]  ;;  %v7880_v58 = vrot.slane %v7813_v21, 1 }
 0x5e6   :  { %8099 = vrot.lane.b32.xlu1 %v8055_v11, %s14101_s5  ;;  %6719 = vst [vmem:[#allocation3 + $0xd8] sm:$0xff] %v6614_v1  ;;  %6721 = vst.msk [vmem:[#allocation3 + $0xe8] sm:$0xff] %vm748_vm7, %v6688_v19  ;;  %8513 = vrot.lane.b32.xlu0 %v8468_v51, %s14100_s16  ;;  %v6616_v28 = vpop.f32.mrb[179].mxu0  ;;  %v13418_v49 = vpop.f32.mrb[179].mxu1  ;;  %v8674_v33 = vld [vmem:[#allocation3 + $0xb0] sm:$0x1] }
 0x5e7   :  { %6720 = vst [vmem:[#allocation3 + $0xe0] sm:$0xff] %v6616_v28  ;;  %v7881_v54 = vrot.slane %v7814_v12, 1  ;;  %v8739_v44 = vrot.slane %v8674_v33, 1  ;;  %v7990_v8 = vld [vmem:[#allocation3 + $0xa8] sm:$0x3]  ;;  %v8738_v27 = vrot.slane %v8673_v32, 1 }
 0x5e8   :  { %v8404_v24 = vld [vmem:[#allocation3 + $0xb0] sm:$0x3]  ;;  %v7989_v35 = vld [vmem:[#allocation3 + $0x90] sm:$0xfc]  ;;  %v8403_v34 = vld [vmem:[#allocation3 + $0x98] sm:$0xfc] }
 0x5e9   :  { %v7882_v59 = vsel %vm1932_vm5, %v7880_v58, %v7881_v54  ;;  %v8057_v50 = vrot.slane %v7990_v8, 2  ;;  %v8740_v22 = vsel %vm1932_vm5, %v8738_v27, %v8739_v44  ;;  %v8470_v5 = vrot.slane %v8404_v24, 2 }
 0x5ea   :  { %8195 = vrot.lane.b32.xlu1 %v6600_v42, %s14102_s22  ;;  %8609 = vrot.lane.b32.xlu0 %v6602_v57, %s14101_s5  ;;  %v8056_v42 = vrot.slane %v7989_v35, 2  ;;  %v8469_v57 = vrot.slane %v8403_v34, 2 }
 0x5eb   :  { %v7815_v51 = vld [vmem:[#allocation3 + $0xc0] sm:$0xfe] }
 0x5ec   :  { %v8058_v45 = vsel %vm2109_vm6, %v8056_v42, %v8057_v50  ;;  %v8471_v63 = vsel %vm2109_vm6, %v8469_v57, %v8470_v5  ;;  %v8675_v12 = vld [vmem:[#allocation3 + $0xc8] sm:$0xfe]  ;;  %v7883_v21 = vrot.slane %v7815_v51, 1  ;;  %v7991_v44 = vld [vmem:[#allocation3 + $0xc0] sm:$0xfc] }
 0x5ed   :  { %v7816_v62 = vld [vmem:[#allocation3 + $0xd8] sm:$0x1]  ;;  %v8741_v54 = vrot.slane %v8675_v12, 1  ;;  %v8405_v58 = vld [vmem:[#allocation3 + $0xc8] sm:$0xfc] }
 0x5ee   :  { %7925 = vrot.lane.b32.xlu1 %v7882_v59, %s14100_s16  ;;  %8785 = vrot.lane.b32.xlu0 %v8740_v22, %s14102_s22  ;;  %v8676_v19 = vld [vmem:[#allocation3 + $0xe0] sm:$0x1]  ;;  %v7884_v28 = vrot.slane %v7816_v62, 1  ;;  %v7992_v33 = vld [vmem:[#allocation3 + $0xd8] sm:$0x3] }
 0x5ef   :  { %v16626_v18 = vpop.f32.mrb[180].mxu0  ;;  %v7004_v13 = vpop.f32.mrb[180].mxu1  ;;  %v8742_v49 = vrot.slane %v8676_v19, 1  ;;  %v8406_v32 = vld [vmem:[#allocation3 + $0xe0] sm:$0x3]  ;;  %v8060_v24 = vrot.slane %v7992_v33, 2 }
 0x5f0   :  { %7043 = vst [vmem:[#allocation3 + $0xf0] sm:$0xff] %v16626_v18  ;;  %7045 = vst.msk [vmem:[#allocation3 + $0x100] sm:$0xff] %vm748_vm7, %v7004_v13  ;;  %v6923_v17 = vpop.f32.mrb[181].mxu0  ;;  %v13437_v48 = vpop.f32.mrb[181].mxu1  ;;  %v7885_v8 = vsel %vm1932_vm5, %v7883_v21, %v7884_v28  ;;  %v8473_v35 = vrot.slane %v8406_v32, 2 }
 0x5f1   :  { %7044 = vst [vmem:[#allocation3 + $0xf8] sm:$0xff] %v6923_v17  ;;  %v6925_v2 = vpop.f32.mrb[182].mxu0  ;;  %v7007_v10 = vpop.f32.mrb[182].mxu1  ;;  %v8743_v27 = vsel %vm1932_vm5, %v8741_v54, %v8742_v49 }
 0x5f2   :  { %8101 = vrot.lane.b32.xlu1 %v8058_v45, %s14101_s5  ;;  %7046 = vst [vmem:[#allocation3 + $0x108] sm:$0xff] %v6925_v2  ;;  %7048 = vst.msk [vmem:[#allocation3 + $0x118] sm:$0xff] %vm748_vm7, %v7007_v10  ;;  %8515 = vrot.lane.b32.xlu0 %v8471_v63, %s14100_s16  ;;  %v6927_v11 = vpop.f32.mrb[183].mxu0  ;;  %v13438_v1 = vpop.f32.mrb[183].mxu1 }
 0x5f3   :  { %7047 = vst [vmem:[#allocation3 + $0x110] sm:$0xff] %v6927_v11 }
 0x5f6   :  { %8197 = vrot.lane.b32.xlu1 %v16611_v52, %s14102_s22  ;;  %8611 = vrot.lane.b32.xlu0 %v6612_v29, %s14101_s5  ;;  %v8059_v52 = vrot.slane %v7991_v44, 2  ;;  %v8472_v29 = vrot.slane %v8405_v58, 2 }
 0x5f7   :  { %v7817_v63 = vld [vmem:[#allocation3 + $0xf0] sm:$0xfe] }
 0x5f8   :  { %v8061_v5 = vsel %vm2109_vm6, %v8059_v52, %v8060_v24  ;;  %v8474_v57 = vsel %vm2109_vm6, %v8472_v29, %v8473_v35  ;;  %v8677_v62 = vld [vmem:[#allocation3 + $0xf8] sm:$0xfe]  ;;  %v7886_v51 = vrot.slane %v7817_v63, 1  ;;  %v7993_v49 = vld [vmem:[#allocation3 + $0xf0] sm:$0xfc] }
 0x5f9   :  { %v7818_v48 = vld [vmem:[#allocation3 + $0x108] sm:$0x1]  ;;  %v8744_v28 = vrot.slane %v8677_v62, 1  ;;  %v8407_v21 = vld [vmem:[#allocation3 + $0xf8] sm:$0xfc] }
 0x5fa   :  { %7927 = vrot.lane.b32.xlu1 %v7885_v8, %s14100_s16  ;;  %8787 = vrot.lane.b32.xlu0 %v8743_v27, %s14102_s22  ;;  %v8678_v10 = vld [vmem:[#allocation3 + $0x110] sm:$0x1]  ;;  %v7887_v11 = vrot.slane %v7818_v48, 1  ;;  %v7994_v19 = vld [vmem:[#allocation3 + $0x108] sm:$0x3] }
 0x5fb   :  { %v16642_v59 = vpop.f32.mrb[184].mxu0  ;;  %v7012_v34 = vpop.f32.mrb[184].mxu1  ;;  %v8745_v1 = vrot.slane %v8678_v10, 1  ;;  %v8408_v12 = vld [vmem:[#allocation3 + $0x110] sm:$0x3]  ;;  %v8063_v32 = vrot.slane %v7994_v19, 2 }
 0x5fc   :  { %7049 = vst [vmem:[#allocation3 + $0x120] sm:$0xff] %v16642_v59  ;;  %7051 = vst.msk [vmem:[#allocation3 + $0x130] sm:$0xff] %vm748_vm7, %v7012_v34  ;;  %v6933_v50 = vpop.f32.mrb[185].mxu0  ;;  %v13441_v22 = vpop.f32.mrb[185].mxu1  ;;  %v7888_v33 = vsel %vm1932_vm5, %v7886_v51, %v7887_v11  ;;  %v8476_v44 = vrot.slane %v8408_v12, 2 }
 0x5fd   :  { %7050 = vst [vmem:[#allocation3 + $0x128] sm:$0xff] %v6933_v50  ;;  %v6935_v42 = vpop.f32.mrb[186].mxu0  ;;  %v7015_v13 = vpop.f32.mrb[186].mxu1  ;;  %v8746_v54 = vsel %vm1932_vm5, %v8744_v28, %v8745_v1 }
 0x5fe   :  { %8103 = vrot.lane.b32.xlu1 %v8061_v5, %s14101_s5  ;;  %7052 = vst [vmem:[#allocation3 + $0x138] sm:$0xff] %v6935_v42  ;;  %7054 = vst.msk [vmem:[#allocation3 + $0x148] sm:$0xff] %vm748_vm7, %v7015_v13  ;;  %8517 = vrot.lane.b32.xlu0 %v8474_v57, %s14100_s16  ;;  %v6937_v45 = vpop.f32.mrb[187].mxu0  ;;  %v13442_v2 = vpop.f32.mrb[187].mxu1 }
 0x5ff   :  { %7053 = vst [vmem:[#allocation3 + $0x140] sm:$0xff] %v6937_v45 }
 0x602   :  { %8199 = vrot.lane.b32.xlu1 %v16626_v18, %s14102_s22  ;;  %8613 = vrot.lane.b32.xlu0 %v6923_v17, %s14101_s5  ;;  %v8062_v18 = vrot.slane %v7993_v49, 2  ;;  %v8475_v17 = vrot.slane %v8407_v21, 2 }
 0x603   :  { %v7819_v57 = vld [vmem:[#allocation3 + $0x120] sm:$0xfe] }
 0x604   :  { %v8064_v35 = vsel %vm2109_vm6, %v8062_v18, %v8063_v32  ;;  %v8477_v29 = vsel %vm2109_vm6, %v8475_v17, %v8476_v44  ;;  %v8679_v48 = vld [vmem:[#allocation3 + $0x128] sm:$0xfe]  ;;  %v7889_v63 = vrot.slane %v7819_v57, 1  ;;  %v7995_v51 = vld [vmem:[#allocation3 + $0x120] sm:$0xfc] }
 0x605   :  { %v7820_v22 = vld [vmem:[#allocation3 + $0x138] sm:$0x1]  ;;  %v8747_v19 = vrot.slane %v8679_v48, 1 }
 0x606   :  { %7929 = vrot.lane.b32.xlu1 %v7888_v33, %s14100_s16  ;;  %8789 = vrot.lane.b32.xlu0 %v8746_v54, %s14102_s22  ;;  %v8680_v13 = vld [vmem:[#allocation3 + $0x140] sm:$0x1]  ;;  %v7890_v45 = vrot.slane %v7820_v22, 1  ;;  %v7996_v10 = vld [vmem:[#allocation3 + $0x138] sm:$0x3] }
 0x607   :  { %v16658_v8 = vpop.f32.mrb[188].mxu0  ;;  %v7020_v58 = vpop.f32.mrb[188].mxu1  ;;  %v8748_v2 = vrot.slane %v8680_v13, 1  ;;  %v8410_v62 = vld [vmem:[#allocation3 + $0x140] sm:$0x3] }
 0x608   :  { %7055 = vst [vmem:[#allocation3 + $0x150] sm:$0xff] %v16658_v8  ;;  %7057 = vst.msk [vmem:[#allocation3 + $0x160] sm:$0xff] %vm748_vm7, %v7020_v58  ;;  %v16662_v24 = vpop.f32.mrb[189].mxu0  ;;  %v13445_v27 = vpop.f32.mrb[189].mxu1  ;;  %v7891_v49 = vsel %vm1932_vm5, %v7889_v63, %v7890_v45  ;;  %v8409_v33 = vld [vmem:[#allocation3 + $0x128] sm:$0xfc] }
 0x609   :  { %7056 = vst [vmem:[#allocation3 + $0x158] sm:$0xff] %v16662_v24  ;;  %v6945_v52 = vpop.f32.mrb[190].mxu0  ;;  %v7023_v34 = vpop.f32.mrb[190].mxu1  ;;  %v8749_v32 = vsel %vm1932_vm5, %v8747_v19, %v8748_v2  ;;  %v8479_v54 = vrot.slane %v8410_v62, 2  ;;  %v8065_v58 = vrot.slane %v7995_v51, 2  ;;  %v8478_v17 = vrot.slane %v8409_v33, 2 }
 0x60a   :  { %8105 = vrot.lane.b32.xlu1 %v8064_v35, %s14101_s5  ;;  %7058 = vst [vmem:[#allocation3 + $0x168] sm:$0xff] %v6945_v52  ;;  %7060 = vst.msk [vmem:[#allocation3 + $0x178] sm:$0xff] %vm748_vm7, %v7023_v34  ;;  %8519 = vrot.lane.b32.xlu0 %v8477_v29, %s14100_s16  ;;  %v6947_v5 = vpop.f32.mrb[191].mxu0  ;;  %v13446_v42 = vpop.f32.mrb[191].mxu1 }
 0x60b   :  { %7059 = vst [vmem:[#allocation3 + $0x170] sm:$0xff] %v6947_v5  ;;  %v8480_v35 = vsel %vm2109_vm6, %v8478_v17, %v8479_v54 }
 0x60e   :  { %8201 = vrot.lane.b32.xlu1 %v16642_v59, %s14102_s22  ;;  %8615 = vrot.lane.b32.xlu0 %v6933_v50, %s14101_s5  ;;  %v8066_v59 = vrot.slane %v7996_v10, 2 }
 0x60f   :  { %v16673_v11 = vpop.f32.mrb[192].mxu0  ;;  %v7028_v1 = vpop.f32.mrb[192].mxu1  ;;  %v7821_v29 = vld [vmem:[#allocation3 + $0x150] sm:$0xfe] }
 0x610   :  { %7063 = vst.msk [vmem:[#allocation3 + $0x190] sm:$0xff] %vm748_vm7, %v7028_v1  ;;  %v16676_v12 = vpop.f32.mrb[193].mxu0  ;;  %v13449_v28 = vpop.f32.mrb[193].mxu1  ;;  %v8067_v27 = vsel %vm2109_vm6, %v8065_v58, %v8066_v59  ;;  %v8681_v42 = vld [vmem:[#allocation3 + $0x158] sm:$0xfe]  ;;  %v7892_v62 = vrot.slane %v7821_v29, 1 }
 0x611   :  { %7062 = vst [vmem:[#allocation3 + $0x188] sm:$0xff] %v16676_v12  ;;  %v6955_v21 = vpop.f32.mrb[194].mxu0  ;;  %v7031_v50 = vpop.f32.mrb[194].mxu1  ;;  %v7822_v52 = vld [vmem:[#allocation3 + $0x168] sm:$0x1]  ;;  %v8750_v28 = vrot.slane %v8681_v42, 1 }
 0x612   :  { %7931 = vrot.lane.b32.xlu1 %v7891_v49, %s14100_s16  ;;  %7066 = vst.msk [vmem:[#allocation3 + $0x1a8] sm:$0xff] %vm748_vm7, %v7031_v50  ;;  %8791 = vrot.lane.b32.xlu0 %v8749_v32, %s14102_s22  ;;  %v6957_v44 = vpop.f32.mrb[195].mxu0  ;;  %v13450_v18 = vpop.f32.mrb[195].mxu1  ;;  %v8682_v34 = vld [vmem:[#allocation3 + $0x170] sm:$0x1]  ;;  %v7893_v13 = vrot.slane %v7822_v52, 1 }
 0x613   :  { %7065 = vst [vmem:[#allocation3 + $0x1a0] sm:$0xff] %v6957_v44  ;;  %v8751_v45 = vrot.slane %v8682_v34, 1  ;;  %v7998_v10 = vld [vmem:[#allocation3 + $0x168] sm:$0x3]  ;;  %v8412_v1 = vld [vmem:[#allocation3 + $0x170] sm:$0x3] }
 0x614   :  { %v8411_v49 = vld [vmem:[#allocation3 + $0x158] sm:$0xfc]  ;;  %v7997_v33 = vld [vmem:[#allocation3 + $0x150] sm:$0xfc]  ;;  %v8069_v59 = vrot.slane %v7998_v10, 2  ;;  %v8482_v32 = vrot.slane %v8412_v1, 2 }
 0x615   :  { %v16701_v21 = vld [vmem:[%s18149_s1 + $0x240] ss:$12 sps:$4 sm:$0xff]   ;;  %v8752_v50 = vsel %vm1932_vm5, %v8750_v28, %v8751_v45  ;;  %v8068_v54 = vrot.slane %v7997_v33, 2  ;;  %v8481_v44 = vrot.slane %v8411_v49, 2  ;;  %v16724_v28 = vld [vmem:[%s18149_s1 + $0x258] ss:$12 sps:$4 sm:$0xff]  }
 0x616   :  { %8107 = vrot.lane.b32.xlu1 %v8067_v27, %s14101_s5  ;;  %8521 = vrot.lane.b32.xlu0 %v8480_v35, %s14100_s16  ;;  %v16729_v49 = vld [vmem:[%s18149_s1 + $0x25c] ss:$12 sps:$4 sm:$0xff]  }
 0x617   :  { %v6961_v22 = vpop.f32.mrb[196].mxu0  ;;  %v7036_v5 = vpop.f32.mrb[196].mxu1  ;;  %v8070_v17 = vsel %vm2109_vm6, %v8068_v54, %v8069_v59  ;;  %v8483_v52 = vsel %vm2109_vm6, %v8481_v44, %v8482_v32 }
 0x618   :  { %v16688_v57 = vpop.f32.mrb[197].mxu0  ;;  %7069 = vst.msk [vmem:[#allocation3 + $0x1c0] sm:$0xff] %vm748_vm7, %v7036_v5  ;;  %v13453_v48 = vpop.f32.mrb[197].mxu1  ;;  %v8413_v42 = vld [vmem:[#allocation3 + $0x188] sm:$0xfc] }
 0x619   :  { %7068 = vst [vmem:[#allocation3 + $0x1b8] sm:$0xff] %v16688_v57  ;;  %v6965_v2 = vpop.f32.mrb[198].mxu0  ;;  %v7039_v63 = vpop.f32.mrb[198].mxu1  ;;  %v8683_v10 = vld [vmem:[#allocation3 + $0x188] sm:$0xfe]  ;;  %v8484_v1 = vrot.slane %v8413_v42, 2 }
 0x61a   :  { %8203 = vrot.lane.b32.xlu1 %v16658_v8, %s14102_s22  ;;  %8617 = vrot.lane.b32.xlu0 %v16662_v24, %s14101_s5  ;;  %v6967_v19 = vpop.f32.mrb[199].mxu0  ;;  %7072 = vst.msk [vmem:[#allocation3 + $0x1d8] sm:$0xff] %vm748_vm7, %v7039_v63  ;;  %v13454_v51 = vpop.f32.mrb[199].mxu1  ;;  %v7894_v8 = vsel %vm1932_vm5, %v7892_v62, %v7893_v13  ;;  %v16706_v24 = vld [vmem:[%s18149_s1 + $0x244] ss:$12 sps:$4 sm:$0xff]   ;;  %v8753_v33 = vrot.slane %v8683_v10, 1 }
 0x61b   :  { %7071 = vst [vmem:[#allocation3 + $0x1d0] sm:$0xff] %v6967_v19  ;;  %9504 = vmatprep.subr.bf16.mxu0 %v16706_v24  ;;  %v8414_v29 = vld [vmem:[#allocation3 + $0x1a0] sm:$0x3] }
 0x61c   :  { %9505 = vmatpush1.bf16.msra.mxu0 %v16701_v21  ;;  %v8684_v5 = vld [vmem:[#allocation3 + $0x1a0] sm:$0x1]  ;;  %v8485_v63 = vrot.slane %v8414_v29, 2 }
 0x61d   :  { %v8754_v62 = vrot.slane %v8684_v5, 1  ;;  %9506 = vmatprep.subr.bf16.mxu0 %v16729_v49  ;;  %v16769_v5 = vld [vmem:[%s18149_s1 + $0x2a4] ss:$12 sps:$4 sm:$0xff]  }
 0x61e   :  { %7933 = vrot.lane.b32.xlu1 %v7894_v8, %s14100_s16  ;;  %8793 = vrot.lane.b32.xlu0 %v8752_v50, %s14102_s22 }
 0x61f   :  { %v7272_v18 = vpop.f32.mrb[200].mxu0  ;;  %v7355_v58 = vpop.f32.mrb[200].mxu1 }
 0x620   :  { %7394 = vst [vmem:[#allocation3 + $0x1e0] sm:$0xff] %v7272_v18  ;;  %v7274_v27 = vpop.f32.mrb[201].mxu0  ;;  %v13473_v35 = vpop.f32.mrb[201].mxu1  ;;  %v8685_v45 = vld [vmem:[#allocation3 + $0x1b8] sm:$0xfe]  ;;  %9507 = vmatpush1.bf16.msra.mxu0 %v16724_v28 }
 0x621   :  { %v7276_v34 = vpop.f32.mrb[202].mxu0  ;;  %v7358_v22 = vpop.f32.mrb[202].mxu1  ;;  %v8756_v19 = vrot.slane %v8685_v45, 1  ;;  %v16741_v27 = vld [vmem:[%s18149_s1 + $0x270] ss:$12 sps:$4 sm:$0xff]  }
 0x622   :  { %8109 = vrot.lane.b32.xlu1 %v8070_v17, %s14101_s5  ;;  %8523 = vrot.lane.b32.xlu0 %v8483_v52, %s14100_s16  ;;  %7397 = vst [vmem:[#allocation3 + $0x1f8] sm:$0xff] %v7276_v34  ;;  %v7278_v13 = vpop.f32.mrb[203].mxu0  ;;  %v13474_v48 = vpop.f32.mrb[203].mxu1  ;;  %v8686_v2 = vld [vmem:[#allocation3 + $0x1d0] sm:$0x1] }
 0x623   :  { %v8757_v51 = vrot.slane %v8686_v2, 1  ;;  %v16746_v35 = vld [vmem:[%s18149_s1 + $0x274] ss:$12 sps:$4 sm:$0xff]   ;;  %v16752_v52 = vld [vmem:[%s18149_s1 + $0x28c] ss:$12 sps:$4 sm:$0xff]  }
 0x624   :  { %9508 = vmatprep.subr.bf16.mxu0 %v16746_v35  ;;  %v16763_v22 = vld [vmem:[%s18149_s1 + $0x288] ss:$12 sps:$4 sm:$0xff]   ;;  %v16777_v45 = vld [vmem:[%s18149_s1 + $0x2a0] ss:$12 sps:$4 sm:$0xff]  }
 0x625   :  { %v8758_v54 = vsel %vm1932_vm5, %v8756_v19, %v8757_v51  ;;  %9509 = vmatpush1.bf16.msra.mxu0 %v16741_v27  ;;  %v16790_v19 = vld [vmem:[%s18149_s1 + $0x2b8] ss:$12 sps:$4 sm:$0xff]   ;;  %v16796_v51 = vld [vmem:[%s18149_s1 + $0x2d4] ss:$12 sps:$4 sm:$0xff]  }
 0x626   :  { %8205 = vrot.lane.b32.xlu1 %v16673_v11, %s14102_s22  ;;  %8619 = vrot.lane.b32.xlu0 %v16676_v12, %s14101_s5  ;;  %v8486_v11 = vsel %vm2109_vm6, %v8484_v1, %v8485_v63  ;;  %v8755_v12 = vsel %vm1932_vm5, %v8753_v33, %v8754_v62  ;;  %v16783_v63 = vld [vmem:[%s18149_s1 + $0x2bc] ss:$12 sps:$4 sm:$0xff]  }
 0x627   :  { %v7999_v8 = vld [vmem:[#allocation3 + $0x1e0] sm:$0xfc]  ;;  %9510 = vmatprep.subr.bf16.mxu0 %v16752_v52 }
 0x628   :  { %v7823_v59 = vld [vmem:[#allocation3 + $0x1e0] sm:$0xfe]  ;;  %v8071_v44 = vrot.slane %v7999_v8, 2 }
 0x629   :  { %v7824_v50 = vld [vmem:[#allocation3 + $0x1f8] sm:$0x1]  ;;  %v7895_v58 = vrot.slane %v7823_v59, 1  ;;  %9511 = vmatpush1.bf16.msra.mxu0 %v16763_v22 }
 0x62a   :  { %8525 = vrot.lane.b32.xlu1 %v8486_v11, %s14100_s16  ;;  %v8000_v32 = vld [vmem:[#allocation3 + $0x1f8] sm:$0x3]  ;;  %8795 = vrot.lane.b32.xlu0 %v8755_v12, %s14102_s22  ;;  %v7896_v17 = vrot.slane %v7824_v50, 1  ;;  %v16802_v11 = vld [vmem:[%s18149_s1 + $0x2d0] ss:$12 sps:$4 sm:$0xff]  }
 0x62b   :  { %v8072_v18 = vrot.slane %v8000_v32, 2  ;;  %9512 = vmatprep.subr.bf16.mxu0 %v16769_v5  ;;  %v16807_v59 = vld [vmem:[%s18149_s1 + $0x2ec] ss:$12 sps:$4 sm:$0xff]  }
 0x62c   :  { %v7897_v29 = vsel %vm1932_vm5, %v7895_v58, %v7896_v17 }
 0x62d   :  { %v8073_v34 = vsel %vm2109_vm6, %v8071_v44, %v8072_v18  ;;  %9513 = vmatpush1.bf16.msra.mxu0 %v16777_v45 }
 0x62e   :  { %8797 = vrot.lane.b32.xlu1 %v8758_v54, %s14102_s22  ;;  %8621 = vrot.lane.b32.xlu0 %v16688_v57, %s14101_s5 }
 0x62f   :  { %9514 = vmatprep.subr.bf16.mxu0 %v16783_v63 }
 0x631   :  { %9515 = vmatpush1.bf16.msra.mxu0 %v16790_v19 }
 0x632   :  { %8111 = vrot.lane.b32.xlu1 %v8073_v34, %s14101_s5  ;;  %7935 = vrot.lane.b32.xlu0 %v7897_v29, %s14100_s16  ;;  %v7282_v57 = vpop.f32.mrb[204].mxu0  ;;  %v7363_v42 = vpop.f32.mrb[204].mxu1 }
 0x633   :  { %7400 = vst [vmem:[#allocation3 + $0x210] sm:$0xff] %v7282_v57  ;;  %v7284_v13 = vpop.f32.mrb[205].mxu0  ;;  %v13477_v48 = vpop.f32.mrb[205].mxu1  ;;  %9516 = vmatprep.subr.bf16.mxu0 %v16796_v51 }
 0x634   :  { %7401 = vst [vmem:[#allocation3 + $0x218] sm:$0xff] %v7284_v13  ;;  %v7286_v2 = vpop.f32.mrb[206].mxu0  ;;  %v7366_v10 = vpop.f32.mrb[206].mxu1 }
 0x635   :  { %7403 = vst [vmem:[#allocation3 + $0x228] sm:$0xff] %v7286_v2  ;;  %v7288_v62 = vpop.f32.mrb[207].mxu0  ;;  %v13478_v1 = vpop.f32.mrb[207].mxu1  ;;  %9517 = vmatpush1.bf16.msra.mxu0 %v16802_v11 }
 0x636   :  { %7404 = vst [vmem:[#allocation3 + $0x230] sm:$0xff] %v7288_v62  ;;  %8207 = vrot.lane.b32.xlu0 %v7282_v57, %s14102_s22  ;;  %9518 = vmatprep.subr.bf16.mxu0 %v16807_v59 }
 0x63a   :  { %v7825_v33 = vld [vmem:[#allocation3 + $0x210] sm:$0xfe] }
 0x63b   :  { %v8415_v8 = vld [vmem:[#allocation3 + $0x218] sm:$0xfc]  ;;  %v8001_v54 = vld [vmem:[#allocation3 + $0x210] sm:$0xfc]  ;;  %v7898_v58 = vrot.slane %v7825_v33, 1 }
 0x63c   :  { %v7371_v12 = vpop.f32.mrb[208].mxu1  ;;  %v16809_v50 = vpop.f32.mrb[208].mxu0  ;;  %v7826_v32 = vld [vmem:[#allocation3 + $0x228] sm:$0x1]  ;;  %v8487_v42 = vrot.slane %v8415_v8, 2 }
 0x63d   :  { %7408 = vst.msk [vmem:[#allocation3 + $0x250] sm:$0xff] %vm748_vm7, %v7371_v12  ;;  %7406 = vst [vmem:[#allocation3 + $0x240] sm:$0xff] %v16809_v50  ;;  %v7294_v44 = vpop.f32.mrb[209].mxu0  ;;  %v13481_v18 = vpop.f32.mrb[209].mxu1  ;;  %v7899_v17 = vrot.slane %v7826_v32, 1 }
 0x63e   :  { %v8416_v34 = vld [vmem:[#allocation3 + $0x230] sm:$0x3]  ;;  %7407 = vst [vmem:[#allocation3 + $0x248] sm:$0xff] %v7294_v44  ;;  %v7296_v29 = vpop.f32.mrb[210].mxu0  ;;  %v7374_v57 = vpop.f32.mrb[210].mxu1  ;;  %v8074_v18 = vrot.slane %v8001_v54, 2 }
 0x63f   :  { %v8488_v13 = vrot.slane %v8416_v34, 2  ;;  %v8002_v48 = vld [vmem:[#allocation3 + $0x228] sm:$0x3]  ;;  %7409 = vst [vmem:[#allocation3 + $0x258] sm:$0xff] %v7296_v29  ;;  %7411 = vst.msk [vmem:[#allocation3 + $0x268] sm:$0xff] %vm748_vm7, %v7374_v57  ;;  %v7298_v2 = vpop.f32.mrb[211].mxu0  ;;  %v7900_v62 = vsel %vm1932_vm5, %v7898_v58, %v7899_v17  ;;  %v7920_v32 = vpop.permute.xlu0 %7919 }
 0x640   :  { %v13482_v10 = vpop.f32.mrb[211].mxu1  ;;  %v8075_v1 = vrot.slane %v8002_v48, 2  ;;  %v16820_v33 = vld [vmem:[%s18149_s1 + $0x2e8] ss:$12 sps:$4 sm:$0xff]   ;;  %7410 = vst [vmem:[#allocation3 + $0x260] sm:$0xff] %v7298_v2  ;;  %7937 = vrot.lane.b32.xlu0 %v7900_v62, %s14100_s16  ;;  %v8096_v17 = vpop.permute.xlu1 %8095 }
 0x641   :  { %v8489_v8 = vsel %vm2109_vm6, %v8487_v42, %v8488_v13  ;;  %v13950_v12 = vld [vmem:[%s18149_s1 + $0x248] ss:$12 sps:$4 sm:$0xff]   ;;  %v13951_v58 = vld [vmem:[%s18149_s1 + $0x260] ss:$12 sps:$4 sm:$0xff]   ;;  %9519 = vmatpush1.bf16.msra.mxu0 %v16820_v33  ;;  %v8256_v10 = vld [vmem:[#allocation3 + $0x50] sm:$0x1] }
 0x642   :  { %8527 = vrot.lane.b32.xlu1 %v8489_v8, %s14100_s16  ;;  %13528 = vmatpush3.bf16.msra.mxu1 %v13950_v12  ;;  %v8076_v34 = vsel %vm2109_vm6, %v8074_v18, %v8075_v1  ;;  %v14064_v42 = vld [vmem:[#allocation3] sm:$0xff]  ;;  %v8320_v47 = vrot.slane %v8256_v10, 1 }
 0x643   :  { %13529 = vmatprep.subr.bf16.mxu1 %v18158_v23  ;;  %9855 = vmatprep.subr.bf16.mxu0 %v16706_v24  ;;  %v8192_v57 = vpop.permute.xlu0 %8191  ;;  %v7967_v13 = vadd.f32 %v14064_v42, %v7920_v32  ;;  %v16840_v8 = vld [vmem:[#allocation2] sm:$0xff] }
 0x644   :  { %8113 = vrot.lane.b32.xlu0 %v8076_v34, %s14101_s5  ;;  %v7827_v29 = vld [vmem:[#allocation3 + $0x240] sm:$0xfe]  ;;  %9537 = vmatmul.mubr.bf16.vlgmr.msra.gmra.mrb[240].mxu0 %v16840_v8 }
 0x645   :  { %v7901_v54 = vrot.slane %v7827_v29, 1  ;;  %v8417_v1 = vld [vmem:[#allocation3 + $0x248] sm:$0xfc]  ;;  %9546 = vmatprep.mubr.bf16.mxu0 %v16840_v8  ;;  %v8003_v42 = vld [vmem:[#allocation3 + $0x240] sm:$0xfc]  ;;  %9856 = vmatpush1.bf16.msra.mxu0 %v16701_v21 }
 0x646   :  { %8623 = vrot.lane.b32.xlu1 %v7294_v44, %s14101_s5  ;;  %v16838_v48 = vpop.f32.mrb[212].mxu0  ;;  %v7379_v2 = vpop.f32.mrb[212].mxu1  ;;  %v7828_v62 = vld [vmem:[#allocation3 + $0x258] sm:$0x1]  ;;  %13530 = vmatpush3.bf16.msra.mxu1 %v13951_v58  ;;  %v8490_v36 = vrot.slane %v8417_v1, 2  ;;  %v8077_v1 = vrot.slane %v8003_v42, 2 }
 0x647   :  { %7412 = vst [vmem:[#allocation3 + $0x270] sm:$0xff] %v16838_v48  ;;  %7414 = vst.msk [vmem:[#allocation3 + $0x280] sm:$0xff] %vm748_vm7, %v7379_v2  ;;  %v16845_v24 = vpop.permute.xlu1 %7921  ;;  %v7304_v44 = vpop.f32.mrb[213].mxu0  ;;  %v7902_v12 = vrot.slane %v7828_v62, 1  ;;  %v8418_v32 = vld [vmem:[#allocation3 + $0x260] sm:$0x3]  ;;  %13531 = vmatprep.subr.bf16.mxu1 %v18158_v23  ;;  %9857 = vmatprep.subr.bf16.mxu0 %v16729_v49  ;;  %v8143_v23 = vadd.f32 %v8096_v17, %v7967_v13 }
 0x648   :  { %v8004_v18 = vld [vmem:[#allocation3 + $0x258] sm:$0x3]  ;;  %7413 = vst [vmem:[#allocation3 + $0x278] sm:$0xff] %v7304_v44  ;;  %v13485_v34 = vpop.f32.mrb[213].mxu1  ;;  %8209 = vrot.lane.b32.xlu0 %v16809_v50, %s14102_s22  ;;  %v7306_v58 = vpop.f32.mrb[214].mxu0  ;;  %v8491_v29 = vrot.slane %v8418_v32, 2 }
 0x649   :  { %7415 = vst [vmem:[#allocation3 + $0x288] sm:$0xff] %v7306_v58  ;;  %v7382_v2 = vpop.f32.mrb[214].mxu1  ;;  %v7903_v62 = vsel %vm1932_vm5, %v7901_v54, %v7902_v12  ;;  %v8078_v55 = vrot.slane %v8004_v18, 2  ;;  %v8255_v34 = vld [vmem:[#allocation3 + $0x38] sm:$0xfe]  ;;  %v7308_v50 = vpop.f32.mrb[215].mxu0  ;;  %v8239_v12 = vadd.f32 %v8192_v57, %v8143_v23  ;;  %9858 = vmatpush1.bf16.msra.mxu0 %v16724_v28 }
 0x64a   :  { %7417 = vst.msk [vmem:[#allocation3 + $0x298] sm:$0xff] %vm748_vm7, %v7382_v2  ;;  %7939 = vrot.lane.b32.xlu1 %v7903_v62, %s14100_s16  ;;  %v13486_v26 = vpop.f32.mrb[215].mxu1  ;;  %v8688_v32 = vld [vmem:[#allocation3 + $0x260] sm:$0x1]  ;;  %v8512_v30 = vpop.permute.xlu0 %8511  ;;  %7416 = vst [vmem:[#allocation3 + $0x290] sm:$0xff] %v7308_v50  ;;  %v8492_v54 = vsel %vm2109_vm6, %v8490_v36, %v8491_v29  ;;  %v8319_v17 = vrot.slane %v8255_v34, 1  ;;  %9859 = vmatprep.subr.bf16.mxu0 %v16746_v35 }
 0x64b   :  { %v16856_v21 = vpop.permute.xlu1 %8097  ;;  %v8687_v49 = vld [vmem:[#allocation3 + $0x248] sm:$0xfe]  ;;  %v8079_v13 = vsel %vm2109_vm6, %v8077_v1, %v8078_v55  ;;  %v8760_v18 = vrot.slane %v8688_v32, 1  ;;  %v13952_v26 = vld [vmem:[%s18149_s1 + $0x278] ss:$12 sps:$4 sm:$0xff]   ;;  %v18192_v2 = vmov 0.0  }
 0x64c   :  { %8529 = vrot.lane.b32.xlu0 %v8492_v54, %s14100_s16  ;;  %v8848_v36 = vld [vmem:[#allocation3 + $0x88] sm:$0x3]  ;;  %v8321_v23 = vsel %vm1932_vm5, %v8319_v17, %v8320_v47  ;;  %v8759_v58 = vrot.slane %v8687_v49, 1  ;;  %13532 = vmatpush3.bf16.msra.mxu1 %v13952_v26  ;;  %v13953_v55 = vld [vmem:[%s18149_s1 + $0x290] ss:$12 sps:$4 sm:$0xff]  }
 0x64d   :  { %v8383_v28 = vadd.f32 %v8321_v23, %v8239_v12  ;;  %v8847_v29 = vld [vmem:[#allocation3 + $0x70] sm:$0xfc]  ;;  %13533 = vmatprep.subr.bf16.mxu1 %v18192_v2  ;;  %v8912_v47 = vrot.slane %v8848_v36, 2  ;;  %9860 = vmatpush1.bf16.msra.mxu0 %v16741_v27 }
 0x64e   :  { %8115 = vrot.lane.b32.xlu1 %v8079_v13, %s14101_s5  ;;  %v7829_v10 = vld [vmem:[#allocation3 + $0x270] sm:$0xfe]  ;;  %v8608_v62 = vpop.permute.xlu0 %8607  ;;  %v8761_v34 = vsel %vm1932_vm5, %v8759_v58, %v8760_v18  ;;  %9861 = vmatprep.subr.bf16.mxu0 %v16752_v52  ;;  %v8911_v26 = vrot.slane %v8847_v29, 2 }
 0x64f   :  { %v16868_v57 = vpop.permute.xlu1 %8193  ;;  %v7904_v50 = vrot.slane %v7829_v10, 1  ;;  %v8559_v54 = vadd.f32 %v8512_v30, %v8383_v28  ;;  %v8005_v12 = vld [vmem:[#allocation3 + $0x270] sm:$0xfc] }
 0x650   :  { %8625 = vrot.lane.b32.xlu0 %v7304_v44, %s14101_s5  ;;  %v7830_v42 = vld [vmem:[#allocation3 + $0x288] sm:$0x1]  ;;  %v8258_v44 = vld [vmem:[#allocation3 + $0x80] sm:$0x1]  ;;  %13534 = vmatpush3.bf16.msra.mxu1 %v13953_v55  ;;  %v14066_v10 = vld [vmem:[#allocation3 + $0x30] sm:$0xff] }
 0x651   :  { %v8006_v35 = vld [vmem:[#allocation3 + $0x288] sm:$0x3]  ;;  %v7905_v32 = vrot.slane %v7830_v42, 1  ;;  %v8420_v17 = vld [vmem:[#allocation3 + $0x290] sm:$0x3]  ;;  %v7968_v23 = vadd.f32 %v14066_v10, %v16845_v24  ;;  %v8655_v52 = vadd.f32 %v8608_v62, %v8559_v54  ;;  %13535 = vmatprep.subr.bf16.mxu1 %v18192_v2  ;;  %v8080_v62 = vrot.slane %v8005_v12, 2  ;;  %9862 = vmatpush1.bf16.msra.mxu0 %v16763_v22 }
 0x652   :  { %v7387_v1 = vpop.f32.mrb[216].mxu1  ;;  %v16877_v49 = vpop.f32.mrb[216].mxu0  ;;  %8799 = vrot.lane.b32.xlu1 %v8761_v34, %s14102_s22  ;;  %v8081_v27 = vrot.slane %v8006_v35, 2  ;;  %v13954_v36 = vld [vmem:[%s18149_s1 + $0x2a8] ss:$12 sps:$4 sm:$0xff]   ;;  %v8494_v34 = vrot.slane %v8420_v17, 2  ;;  %9863 = vmatprep.subr.bf16.mxu0 %v16769_v5 }
 0x653   :  { %7420 = vst.msk [vmem:[#allocation3 + $0x2b0] sm:$0xff] %vm748_vm7, %v7387_v1  ;;  %7418 = vst [vmem:[#allocation3 + $0x2a0] sm:$0xff] %v16877_v49  ;;  %v16883_v13 = vpop.f32.mrb[217].mxu0  ;;  %v13489_v18 = vpop.f32.mrb[217].mxu1  ;;  %v7906_v30 = vsel %vm1932_vm5, %v7904_v50, %v7905_v32  ;;  %v8419_v42 = vld [vmem:[#allocation3 + $0x278] sm:$0xfc]  ;;  %v8144_v50 = vadd.f32 %v16856_v21, %v7968_v23  ;;  %v8913_v32 = vsel %vm2109_vm6, %v8911_v26, %v8912_v47 }
 0x654   :  { %7419 = vst [vmem:[#allocation3 + $0x2a8] sm:$0xff] %v16883_v13  ;;  %v7316_v58 = vpop.f32.mrb[218].mxu0  ;;  %v7390_v28 = vpop.f32.mrb[218].mxu1  ;;  %7941 = vrot.lane.b32.xlu0 %v7906_v30, %s14100_s16  ;;  %v8690_v29 = vld [vmem:[#allocation3 + $0x290] sm:$0x1]  ;;  %v8082_v12 = vsel %vm2109_vm6, %v8080_v62, %v8081_v27  ;;  %v8493_v17 = vrot.slane %v8419_v42, 2  ;;  %13536 = vmatpush3.bf16.msra.mxu1 %v13954_v36 }
 0x655   :  { %7421 = vst [vmem:[#allocation3 + $0x2b8] sm:$0xff] %v7316_v58  ;;  %7423 = vst.msk [vmem:[#allocation3 + $0x2c8] sm:$0xff] %vm748_vm7, %v7390_v28  ;;  %v16897_v55 = vld [vmem:[%s18150_s2 + $0x2] ss:$0 sm:$0xff]  ;;  %v8784_v24 = vpop.permute.xlu0 %8783  ;;  %v7924_v35 = vpop.permute.xlu1 %7923  ;;  %v8257_v30 = vld [vmem:[#allocation3 + $0x68] sm:$0xfe]  ;;  %v8240_v47 = vadd.f32 %v16868_v57, %v8144_v50  ;;  %13537 = vmatprep.subr.bf16.mxu1 %v18192_v2  ;;  %9864 = vmatpush1.bf16.msra.mxu0 %v16777_v45 }
 0x656   :  { %v8831_v54 = vadd.f32 %v8784_v24, %v8655_v52  ;;  %v7318_v1 = vpop.f32.mrb[219].mxu0  ;;  %v13490_v18 = vpop.f32.mrb[219].mxu1  ;;  %8211 = vrot.lane.b32.xlu1 %v16838_v48, %s14102_s22  ;;  %v8689_v10 = vld [vmem:[#allocation3 + $0x278] sm:$0xfe]  ;;  %v8323_v58 = vrot.slane %v8258_v44, 1  ;;  %v8763_v22 = vrot.slane %v8690_v29, 1  ;;  %v8495_v44 = vsel %vm2109_vm6, %v8493_v17, %v8494_v34  ;;  %9865 = vmatprep.subr.bf16.mxu0 %v16783_v63 }
 0x657   :  { %7422 = vst [vmem:[#allocation3 + $0x2c0] sm:$0xff] %v7318_v1  ;;  %v13955_v21 = vld [vmem:[%s18149_s1 + $0x2c0] ss:$12 sps:$4 sm:$0xff]   ;;  %v8322_v48 = vrot.slane %v8257_v30, 1  ;;  %v8762_v27 = vrot.slane %v8689_v10, 1 }
 0x658   :  { %v8975_v26 = vadd.f32 %v8913_v32, %v8831_v54  ;;  %8117 = vrot.lane.b32.xlu0 %v8082_v12, %s14101_s5  ;;  %v8850_v28 = vld [vmem:[#allocation3 + $0xb8] sm:$0x3]  ;;  %13538 = vmatpush3.bf16.msra.mxu1 %v13955_v21  ;;  %v8849_v50 = vld [vmem:[#allocation3 + $0xa0] sm:$0xfc] }
 0x659   :  { %v8514_v5 = vpop.permute.xlu0 %8513  ;;  %v8100_v23 = vpop.permute.xlu1 %8099  ;;  %v8324_v57 = vsel %vm1932_vm5, %v8322_v48, %v8323_v58  ;;  %v8764_v52 = vsel %vm1932_vm5, %v8762_v27, %v8763_v22  ;;  %v13956_v42 = vld [vmem:[%s18149_s1 + $0x2d8] ss:$12 sps:$4 sm:$0xff]   ;;  %13539 = vmatprep.subr.bf16.mxu1 %v18192_v2  ;;  %9866 = vmatpush1.bf16.msra.mxu0 %v16790_v19  ;;  %v8915_v58 = vrot.slane %v8850_v28, 2 }
 0x65a   :  { %v8999_v36 = vadd.f32 %v16897_v55, %v8975_v26  ;;  %8531 = vrot.lane.b32.xlu1 %v8495_v44, %s14100_s16  ;;  %v8384_v24 = vadd.f32 %v8324_v57, %v8240_v47  ;;  %v7831_v45 = vld [vmem:[#allocation3 + $0x2a0] sm:$0xfe]  ;;  %9867 = vmatprep.subr.bf16.mxu0 %v16796_v51  ;;  %v8260_v47 = vld [vmem:[#allocation3 + $0xb0] sm:$0x1] }
 0x65b   :  { %v8421_v18 = vld [vmem:[#allocation3 + $0x2a8] sm:$0xfc]  ;;  %v7907_v12 = vrot.slane %v7831_v45, 1  ;;  %v14067_v22 = vld [vmem:[#allocation3 + $0x60] sm:$0xff]  ;;  %v8326_v45 = vrot.slane %v8260_v47, 1 }
 0x65c   :  { %v16922_v29 = vmax.f32 %v8999_v36, 0.0  ;;  %8801 = vrot.lane.b32.xlu0 %v8764_v52, %s14102_s22  ;;  %v7832_v62 = vld [vmem:[#allocation3 + $0x2b8] sm:$0x1]  ;;  %v8560_v1 = vadd.f32 %v8514_v5, %v8384_v24  ;;  %13540 = vmatpush3.bf16.msra.mxu1 %v13956_v42  ;;  %v7969_v21 = vadd.f32 %v14067_v22, %v7924_v35  ;;  %v8691_v26 = vld [vmem:[#allocation3 + $0x2a8] sm:$0xfe]  ;;  %v8496_v27 = vrot.slane %v8421_v18, 2 }
 0x65d   :  { %v8610_v63 = vpop.permute.xlu0 %8609  ;;  %v8196_v34 = vpop.permute.xlu1 %8195  ;;  %v7908_v32 = vrot.slane %v7832_v62, 1  ;;  %13541 = vmatprep.subr.bf16.mxu1 %v18192_v2  ;;  %v13957_v35 = vld [vmem:[%s18149_s1 + $0x2f0] ss:$12 sps:$4 sm:$0xff]   ;;  %9868 = vmatpush1.bf16.msra.mxu0 %v16802_v11 }
 0x65e   :  { %v16929_v54 = vpack.c.bf16 %v16922_v29, %v16922_v29  ;;  %8627 = vrot.lane.b32.xlu1 %v16883_v13, %s14101_s5  ;;  %v8422_v30 = vld [vmem:[#allocation3 + $0x2c0] sm:$0x3]  ;;  %v8656_v19 = vadd.f32 %v8610_v63, %v8560_v1  ;;  %v8914_v13 = vrot.slane %v8849_v50, 2  ;;  %v8259_v42 = vld [vmem:[#allocation3 + $0x98] sm:$0xfe]  ;;  %9869 = vmatprep.subr.bf16.mxu0 %v16807_v59 }
 0x65f   :  { %v8692_v10 = vld [vmem:[#allocation3 + $0x2c0] sm:$0x1]  ;;  %v8497_v17 = vrot.slane %v8422_v30, 2  ;;  %v7909_v51 = vsel %vm1932_vm5, %v7907_v12, %v7908_v32  ;;  %v8325_v30 = vrot.slane %v8259_v42, 1 }
 0x660   :  { %8213 = vrot.lane.b32.xlu0 %v16877_v49, %s14102_s22  ;;  %v9129_v48 = vshrl.u32 %v16929_v54, 16  ;;  %v8766_v36 = vrot.slane %v8692_v10, 1  ;;  %v8145_v49 = vadd.f32 %v8100_v23, %v7969_v21  ;;  %v8916_v24 = vsel %vm2109_vm6, %v8914_v13, %v8915_v58  ;;  %13542 = vmatpush3.bf16.msra.mxu1 %v13957_v35  ;;  %v8852_v13 = vld [vmem:[#allocation3 + $0xe8] sm:$0x3]  ;;  %v8851_v35 = vld [vmem:[#allocation3 + $0xd0] sm:$0xfc] }
 0x661   :  { %v8786_v5 = vpop.permute.xlu0 %8785  ;;  %v16938_v44 = vpop.permute.xlu1 %7925  ;;  %v8498_v11 = vsel %vm2109_vm6, %v8496_v27, %v8497_v17  ;;  %v8765_v23 = vrot.slane %v8691_v26, 1  ;;  %13563 = vmatprep.subr.bf16.mxu1 %v18192_v2  ;;  %9870 = vmatpush1.bf16.msra.mxu0 %v16820_v33  ;;  %v9132_v21 = vshll.u32 %v16929_v54, 16  ;;  %v8327_v47 = vsel %vm1932_vm5, %v8325_v30, %v8326_v45  ;;  %v8262_v45 = vld [vmem:[#allocation3 + $0xe0] sm:$0x1] }
 0x662   :  { %v8832_v57 = vadd.f32 %v8786_v5, %v8656_v19  ;;  %7943 = vrot.lane.b32.xlu1 %v7909_v51, %s14100_s16  ;;  %v16946_v52 = vpop.f32.mrb[220].mxu0  ;;  %v7706_v28 = vpop.f32.mrb[220].mxu1  ;;  %v8241_v50 = vadd.f32 %v8196_v34, %v8145_v49  ;;  %v9131_v18 = vrot.slane %v9129_v48, 7  ;;  %v8008_v19 = vld [vmem:[#allocation3 + $0x2b8] sm:$0x3]  ;;  %v7778_v49 = vld [vmem:[#allocation3 + $0x90] sm:$0xff] }
 0x663   :  { %7745 = vst [vmem:[#allocation3 + $0x2d0] sm:$0xff] %v16946_v52  ;;  %7747 = vst.msk [vmem:[#allocation3 + $0x2e0] sm:$0xff] %vm748_vm7, %v7706_v28  ;;  %v7625_v62 = vpop.f32.mrb[221].mxu0  ;;  %v13509_v63 = vpop.f32.mrb[221].mxu1  ;;  %v8767_v12 = vsel %vm1932_vm5, %v8765_v23, %v8766_v36  ;;  %13544 = vmatmul.mubr.bf16.vlgmr.msra.gmra.mrb[240].mxu1 %v16840_v8  ;;  %v8007_v5 = vld [vmem:[#allocation3 + $0x2a0] sm:$0xfc]  ;;  %v7970_v42 = vadd.f32 %v16938_v44, %v7778_v49 }
 0x664   :  { %v8976_v32 = vadd.f32 %v8916_v24, %v8832_v57  ;;  %7746 = vst [vmem:[#allocation3 + $0x2d8] sm:$0xff] %v7625_v62  ;;  %8533 = vrot.lane.b32.xlu0 %v8498_v11, %s14100_s16  ;;  %v7627_v1 = vpop.f32.mrb[222].mxu0  ;;  %v7709_v59 = vpop.f32.mrb[222].mxu1  ;;  %13547 = vmatprep.mubr.msk.bf16.mxu1 %vm14098_vm0, %v18192_v2  ;;  %v8385_v33 = vadd.f32 %v8327_v47, %v8241_v50  ;;  %v8084_v54 = vrot.slane %v8008_v19, 2  ;;  %v8918_v57 = vrot.slane %v8852_v13, 2 }
 0x665   :  { %v8516_v10 = vpop.permute.xlu0 %8515  ;;  %v8102_v58 = vpop.permute.xlu1 %8101  ;;  %7748 = vst [vmem:[#allocation3 + $0x2e8] sm:$0xff] %v7627_v1  ;;  %7750 = vst.msk [vmem:[#allocation3 + $0x2f8] sm:$0xff] %vm748_vm7, %v7709_v59  ;;  %v9134_v48 = vor.u32 %v9132_v21, %v9131_v18  ;;  %v8083_v28 = vrot.slane %v8007_v5, 2  ;;  %v8917_v11 = vrot.slane %v8851_v35, 2  ;;  %v8261_v18 = vld [vmem:[#allocation3 + $0xc8] sm:$0xfe] }
 0x666   :  { %v9000_v34 = vadd.f32 %v16897_v55, %v8976_v32  ;;  %8803 = vrot.lane.b32.xlu1 %v8767_v12, %s14102_s22  ;;  %v7629_v17 = vpop.f32.mrb[223].mxu0  ;;  %v13510_v22 = vpop.f32.mrb[223].mxu1  ;;  %v8561_v36 = vadd.f32 %v8516_v10, %v8385_v33  ;;  %v8146_v1 = vadd.f32 %v8102_v58, %v7970_v42  ;;  %v8329_v44 = vrot.slane %v8262_v45, 1  ;;  %v13958_v49 = vld [vmem:[%s18149_s1 + $0x248] ss:$12 sps:$4 sm:$0xff]  }
 0x667   :  { %7749 = vst [vmem:[#allocation3 + $0x2f0] sm:$0xff] %v7629_v17  ;;  %v8085_v32 = vsel %vm2109_vm6, %v8083_v28, %v8084_v54  ;;  %v8919_v12 = vsel %vm2109_vm6, %v8917_v11, %v8918_v57  ;;  %v8328_v33 = vrot.slane %v8261_v18, 1  ;;  %v8854_v45 = vld [vmem:[#allocation3 + $0x118] sm:$0x3]  ;;  %13564 = vmatpush3.bf16.msra.mxu1 %v13958_v49 }
 0x668   :  { %v16965_v26 = vmax.f32 %v9000_v34, 0.0  ;;  %8629 = vrot.lane.b32.xlu0 %v7625_v62, %s14101_s5  ;;  %13565 = vmatprep.subr.bf16.mxu1 %v18192_v2 }
 0x669   :  { %v8612_v51 = vpop.permute.xlu0 %8611  ;;  %v8198_v27 = vpop.permute.xlu1 %8197  ;;  %v8330_v57 = vsel %vm1932_vm5, %v8328_v33, %v8329_v44 }
 0x66a   :  { %18193 = vst [vmem:[#allocation16_spill] sm:$0xff] %v16965_v26  ;;  %v9113_v8 = vpack.c.bf16 %v16965_v26, %v16965_v26  ;;  %9240 = vrot.lane.b32.xlu1 %v9134_v48, %s14100_s16  ;;  %v8657_v24 = vadd.f32 %v8612_v51, %v8561_v36  ;;  %v8242_v22 = vadd.f32 %v8198_v27, %v8146_v1 }
 0x66b   :  { %v8693_v63 = vld [vmem:[#allocation3 + $0x2d8] sm:$0xfe] }
 0x66c   :  { %v9136_v62 = vshrl.u32 %v9113_v8, 16  ;;  %v8768_v34 = vrot.slane %v8693_v63, 1  ;;  %v8423_v19 = vld [vmem:[#allocation3 + $0x2d8] sm:$0xfc]  ;;  %v7834_v51 = vld [vmem:[#allocation3 + $0x2e8] sm:$0x1] }
 0x66d   :  { %v8788_v23 = vpop.permute.xlu0 %8787  ;;  %v16972_v50 = vpop.permute.xlu1 %7927  ;;  %v9139_v27 = vshll.u32 %v9113_v8, 16  ;;  %v7911_v18 = vrot.slane %v7834_v51, 1 }
 0x66e   :  { %v8833_v59 = vadd.f32 %v8788_v23, %v8657_v24  ;;  %8119 = vrot.lane.b32.xlu1 %v8085_v32, %s14101_s5  ;;  %v8694_v30 = vld [vmem:[#allocation3 + $0x2f0] sm:$0x1]  ;;  %v9138_v47 = vrot.slane %v9136_v62, 7  ;;  %v8499_v24 = vrot.slane %v8423_v19, 2  ;;  %v8386_v62 = vadd.f32 %v8330_v57, %v8242_v22  ;;  %v7833_v23 = vld [vmem:[#allocation3 + $0x2d0] sm:$0xfe] }
 0x66f   :  { %v8424_v10 = vld [vmem:[#allocation3 + $0x2f0] sm:$0x3]  ;;  %v8769_v17 = vrot.slane %v8694_v30, 1  ;;  %v13959_v30 = vld [vmem:[%s18149_s1 + $0x260] ss:$12 sps:$4 sm:$0xff]   ;;  %v8921_v19 = vrot.slane %v8854_v45, 2 }
 0x670   :  { %v8977_v21 = vadd.f32 %v8919_v12, %v8833_v59  ;;  %v8500_v5 = vrot.slane %v8424_v10, 2  ;;  %v9141_v11 = vor.u32 %v9139_v27, %v9138_v47  ;;  %v8010_v22 = vld [vmem:[#allocation3 + $0x2e8] sm:$0x3]  ;;  %v7910_v47 = vrot.slane %v7833_v23, 1  ;;  %13566 = vmatpush3.bf16.msra.mxu1 %v13959_v30  ;;  %v8263_v45 = vld [vmem:[#allocation3 + $0xf8] sm:$0xfe] }
 0x671   :  { %v8518_v48 = vpop.permute.xlu0 %8517  ;;  %v8104_v13 = vpop.permute.xlu1 %8103  ;;  %v8770_v58 = vsel %vm1932_vm5, %v8768_v34, %v8769_v17  ;;  %v8853_v17 = vld [vmem:[#allocation3 + $0x100] sm:$0xfc]  ;;  %v8087_v57 = vrot.slane %v8010_v22, 2  ;;  %13567 = vmatprep.subr.bf16.mxu1 %v18192_v2  ;;  %v8331_v30 = vrot.slane %v8263_v45, 1 }
 0x672   :  { %v9001_v54 = vadd.f32 %v16897_v55, %v8977_v21  ;;  %v16979_v36 = vpop.f32.mrb[224].mxu0  ;;  %v7714_v35 = vpop.f32.mrb[224].mxu1  ;;  %8805 = vrot.lane.b32.xlu0 %v8770_v58, %s14102_s22  ;;  %8215 = vrot.lane.b32.xlu1 %v16946_v52, %s14102_s22  ;;  %v8501_v59 = vsel %vm2109_vm6, %v8499_v24, %v8500_v5  ;;  %v8562_v12 = vadd.f32 %v8518_v48, %v8386_v62  ;;  %v7779_v21 = vld [vmem:[#allocation3 + $0xc0] sm:$0xff]  ;;  %v8264_v5 = vld [vmem:[#allocation3 + $0x110] sm:$0x1]  ;;  %v8920_v48 = vrot.slane %v8853_v17, 2 }
 0x673   :  { %7751 = vst [vmem:[#allocation3 + $0x300] sm:$0xff] %v16979_v36  ;;  %7753 = vst.msk [vmem:[#allocation3 + $0x310] sm:$0xff] %vm748_vm7, %v7714_v35  ;;  %v13513_v28 = vpop.f32.mrb[225].mxu1  ;;  %v16990_v42 = vpop.f32.mrb[225].mxu0  ;;  %v7971_v33 = vadd.f32 %v16972_v50, %v7779_v21  ;;  %v7912_v49 = vsel %vm1932_vm5, %v7910_v47, %v7911_v18 }
 0x674   :  { %v16992_v63 = vmax.f32 %v9001_v54, 0.0  ;;  %7752 = vst [vmem:[#allocation3 + $0x308] sm:$0xff] %v16990_v42  ;;  %v7637_v52 = vpop.f32.mrb[226].mxu0  ;;  %v7717_v8 = vpop.f32.mrb[226].mxu1  ;;  %v8009_v54 = vld [vmem:[#allocation3 + $0x2d0] sm:$0xfc] }
 0x675   :  { %7754 = vst [vmem:[#allocation3 + $0x318] sm:$0xff] %v7637_v52  ;;  %7756 = vst.msk [vmem:[#allocation3 + $0x328] sm:$0xff] %vm748_vm7, %v7717_v8  ;;  %v8614_v32 = vpop.permute.xlu0 %8613  ;;  %v8200_v1 = vpop.permute.xlu1 %8199  ;;  %v8147_v28 = vadd.f32 %v8104_v13, %v7971_v33  ;;  %v8922_v52 = vsel %vm2109_vm6, %v8920_v48, %v8921_v19  ;;  %v8332_v8 = vrot.slane %v8264_v5, 1 }
 0x676   :  { %v9114_v10 = vpack.c.bf16 %v16992_v63, %v16992_v63  ;;  %v7639_v44 = vpop.f32.mrb[227].mxu0  ;;  %v13514_v34 = vpop.f32.mrb[227].mxu1  ;;  %8535 = vrot.lane.b32.xlu1 %v8501_v59, %s14100_s16  ;;  %9242 = vrot.lane.b32.xlu0 %v9141_v11, %s14100_s16  ;;  %v8658_v58 = vadd.f32 %v8614_v32, %v8562_v12  ;;  %v8086_v11 = vrot.slane %v8009_v54, 2  ;;  %v8855_v54 = vld [vmem:[#allocation3 + $0x130] sm:$0xfc] }
 0x677   :  { %7755 = vst [vmem:[#allocation3 + $0x320] sm:$0xff] %v7639_v44  ;;  %v8243_v23 = vadd.f32 %v8200_v1, %v8147_v28  ;;  %v8856_v1 = vld [vmem:[#allocation3 + $0x148] sm:$0x3]  ;;  %v13961_v28 = vld [vmem:[%s18149_s1 + $0x290] ss:$12 sps:$4 sm:$0xff]  }
 0x678   :  { %v9143_v51 = vshrl.u32 %v9114_v10, 16  ;;  %v9146_v50 = vshll.u32 %v9114_v10, 16  ;;  %v8088_v44 = vsel %vm2109_vm6, %v8086_v11, %v8087_v57  ;;  %v8333_v10 = vsel %vm1932_vm5, %v8331_v30, %v8332_v8  ;;  %v8265_v30 = vld [vmem:[#allocation3 + $0x128] sm:$0xfe] }
 0x679   :  { %v8790_v35 = vpop.permute.xlu0 %8789  ;;  %v7930_v27 = vpop.permute.xlu1 %7929  ;;  %v8387_v22 = vadd.f32 %v8333_v10, %v8243_v23 }
 0x67a   :  { %v8834_v24 = vadd.f32 %v8790_v35, %v8658_v58  ;;  %7945 = vrot.lane.b32.xlu0 %v7912_v49, %s14100_s16  ;;  %v9145_v62 = vrot.slane %v9143_v51, 7  ;;  %v13960_v58 = vld [vmem:[%s18149_s1 + $0x278] ss:$12 sps:$4 sm:$0xff]   ;;  %v7780_v35 = vld [vmem:[#allocation3 + $0xf0] sm:$0xff]  ;;  %v8924_v49 = vrot.slane %v8856_v1, 2 }
 0x67b   :  { %v8695_v21 = vld [vmem:[#allocation3 + $0x308] sm:$0xfe]  ;;  %13568 = vmatpush3.bf16.msra.mxu1 %v13960_v58 }
 0x67c   :  { %v8978_v32 = vadd.f32 %v8922_v52, %v8834_v24  ;;  %v9148_v59 = vor.u32 %v9146_v50, %v9145_v62  ;;  %v7836_v48 = vld [vmem:[#allocation3 + $0x318] sm:$0x1]  ;;  %v8771_v57 = vrot.slane %v8695_v21, 1  ;;  %v7972_v24 = vadd.f32 %v7930_v27, %v7780_v35  ;;  %v8266_v62 = vld [vmem:[#allocation3 + $0x140] sm:$0x1]  ;;  %13569 = vmatprep.subr.bf16.mxu1 %v18192_v2 }
 0x67d   :  { %v8520_v12 = vpop.permute.xlu0 %8519  ;;  %v8106_v18 = vpop.permute.xlu1 %8105  ;;  %v7835_v50 = vld [vmem:[#allocation3 + $0x300] sm:$0xfe]  ;;  %v7914_v23 = vrot.slane %v7836_v48, 1 }
 0x67e   :  { %v9002_v13 = vadd.f32 %v16897_v55, %v8978_v32  ;;  %9244 = vrot.lane.b32.xlu1 %v9148_v59, %s14100_s16  ;;  %8121 = vrot.lane.b32.xlu0 %v8088_v44, %s14101_s5  ;;  %v8696_v34 = vld [vmem:[#allocation3 + $0x320] sm:$0x1]  ;;  %v8563_v51 = vadd.f32 %v8520_v12, %v8387_v22  ;;  %v8148_v32 = vadd.f32 %v8106_v18, %v7972_v24  ;;  %v7913_v10 = vrot.slane %v7835_v50, 1  ;;  %v13962_v22 = vld [vmem:[%s18149_s1 + $0x2a8] ss:$12 sps:$4 sm:$0xff]  }
 0x67f   :  { %v8772_v33 = vrot.slane %v8696_v34, 1  ;;  %v8426_v27 = vld [vmem:[#allocation3 + $0x320] sm:$0x3]  ;;  %v8335_v34 = vrot.slane %v8266_v62, 1  ;;  %13570 = vmatpush3.bf16.msra.mxu1 %v13961_v28  ;;  %v8425_v18 = vld [vmem:[#allocation3 + $0x308] sm:$0xfc] }
 0x680   :  { %v17015_v17 = vmax.f32 %v9002_v13, 0.0  ;;  %13571 = vmatprep.subr.bf16.mxu1 %v18192_v2  ;;  %v8858_v24 = vld [vmem:[#allocation3 + $0x178] sm:$0x3] }
 0x681   :  { %v8616_v19 = vpop.permute.xlu0 %8615  ;;  %v8202_v47 = vpop.permute.xlu1 %8201  ;;  %v8773_v11 = vsel %vm1932_vm5, %v8771_v57, %v8772_v33  ;;  %v8334_v33 = vrot.slane %v8265_v30, 1 }
 0x682   :  { %18194 = vst [vmem:[#allocation17_spill] sm:$0xff] %v17015_v17  ;;  %v9115_v5 = vpack.c.bf16 %v17015_v17, %v17015_v17  ;;  %8631 = vrot.lane.b32.xlu1 %v16990_v42, %s14101_s5  ;;  %8217 = vrot.lane.b32.xlu0 %v16979_v36, %s14102_s22  ;;  %v8659_v45 = vadd.f32 %v8616_v19, %v8563_v51  ;;  %v8923_v42 = vrot.slane %v8855_v54, 2  ;;  %v8503_v54 = vrot.slane %v8426_v27, 2 }
 0x683   :  { %v8244_v1 = vadd.f32 %v8202_v47, %v8148_v32  ;;  %v8336_v35 = vsel %vm1932_vm5, %v8334_v33, %v8335_v34  ;;  %v8502_v47 = vrot.slane %v8425_v18, 2  ;;  %13572 = vmatpush3.bf16.msra.mxu1 %v13962_v22  ;;  %v13964_v32 = vld [vmem:[%s18149_s1 + $0x2d8] ss:$12 sps:$4 sm:$0xff]  }
 0x684   :  { %v9150_v52 = vshrl.u32 %v9115_v5, 16  ;;  %v9153_v44 = vshll.u32 %v9115_v5, 16  ;;  %v8925_v13 = vsel %vm2109_vm6, %v8923_v42, %v8924_v49  ;;  %v7915_v5 = vsel %vm1932_vm5, %v7913_v10, %v7914_v23  ;;  %v13963_v49 = vld [vmem:[%s18149_s1 + $0x2c0] ss:$12 sps:$4 sm:$0xff]   ;;  %13573 = vmatprep.subr.bf16.mxu1 %v18192_v2  ;;  %v8267_v10 = vld [vmem:[#allocation3 + $0x158] sm:$0xfe] }
 0x685   :  { %v8792_v8 = vpop.permute.xlu0 %8791  ;;  %v7932_v36 = vpop.permute.xlu1 %7931  ;;  %v8388_v28 = vadd.f32 %v8336_v35, %v8244_v1  ;;  %v8504_v50 = vsel %vm2109_vm6, %v8502_v47, %v8503_v54  ;;  %v8927_v23 = vrot.slane %v8858_v24, 2 }
 0x686   :  { %v8835_v59 = vadd.f32 %v8792_v8, %v8659_v45  ;;  %8807 = vrot.lane.b32.xlu1 %v8773_v11, %s14102_s22  ;;  %v9152_v12 = vrot.slane %v9150_v52, 7  ;;  %v8857_v8 = vld [vmem:[#allocation3 + $0x160] sm:$0xfc] }
 0x687   :  { %v7781_v11 = vld [vmem:[#allocation3 + $0x120] sm:$0xff]  ;;  %13574 = vmatpush3.bf16.msra.mxu1 %v13963_v49  ;;  %v8926_v27 = vrot.slane %v8857_v8, 2 }
 0x688   :  { %v8979_v21 = vadd.f32 %v8925_v13, %v8835_v59  ;;  %v9155_v19 = vor.u32 %v9153_v44, %v9152_v12  ;;  %v7973_v59 = vadd.f32 %v7932_v36, %v7781_v11  ;;  %v8268_v12 = vld [vmem:[#allocation3 + $0x170] sm:$0x1]  ;;  %13575 = vmatprep.subr.bf16.mxu1 %v18192_v2 }
 0x689   :  { %v8522_v58 = vpop.permute.xlu0 %8521  ;;  %v8108_v51 = vpop.permute.xlu1 %8107 }
 0x68a   :  { %v9003_v48 = vadd.f32 %v16897_v55, %v8979_v21  ;;  %7947 = vrot.lane.b32.xlu1 %v7915_v5, %s14100_s16  ;;  %9246 = vrot.lane.b32.xlu0 %v9155_v19, %s14100_s16  ;;  %v8564_v42 = vadd.f32 %v8522_v58, %v8388_v28  ;;  %v8149_v22 = vadd.f32 %v8108_v51, %v7973_v59  ;;  %v8012_v58 = vld [vmem:[#allocation3 + $0x318] sm:$0x3]  ;;  %v13965_v51 = vld [vmem:[%s18149_s1 + $0x2f0] ss:$12 sps:$4 sm:$0xff]  }
 0x68b   :  { %v8928_v5 = vsel %vm2109_vm6, %v8926_v27, %v8927_v23  ;;  %13576 = vmatpush3.bf16.msra.mxu1 %v13964_v32  ;;  %v8090_v23 = vrot.slane %v8012_v58, 2  ;;  %v8859_v58 = vld [vmem:[#allocation3 + $0x190] sm:$0xfc] }
 0x68c   :  { %v17045_v57 = vmax.f32 %v9003_v48, 0.0  ;;  %v8338_v48 = vrot.slane %v8268_v12, 1  ;;  %13577 = vmatprep.subr.bf16.mxu1 %v18192_v2  ;;  %v8860_v12 = vld [vmem:[#allocation3 + $0x1a8] sm:$0x3] }
 0x68d   :  { %v8618_v45 = vpop.permute.xlu0 %8617  ;;  %v8204_v62 = vpop.permute.xlu1 %8203 }
 0x68e   :  { %v9116_v52 = vpack.c.bf16 %v17045_v57, %v17045_v57  ;;  %8537 = vrot.lane.b32.xlu0 %v8504_v50, %s14100_s16  ;;  %v8660_v30 = vadd.f32 %v8618_v45, %v8564_v42  ;;  %v8245_v35 = vadd.f32 %v8204_v62, %v8149_v22  ;;  %v8011_v45 = vld [vmem:[#allocation3 + $0x300] sm:$0xfc]  ;;  %v8270_v50 = vld [vmem:[#allocation3 + $0x1a0] sm:$0x1]  ;;  %v8337_v42 = vrot.slane %v8267_v10, 1 }
 0x68f   :  { %v8341_v22 = vrot.slane %v8270_v50, 1  ;;  %13578 = vmatpush3.bf16.msra.mxu1 %v13965_v51 }
 0x690   :  { %v9157_v44 = vshrl.u32 %v9116_v52, 16  ;;  %v9160_v33 = vshll.u32 %v9116_v52, 16  ;;  %v7782_v52 = vld [vmem:[#allocation3 + $0x150] sm:$0xff]  ;;  %v8339_v27 = vsel %vm1932_vm5, %v8337_v42, %v8338_v48  ;;  %13599 = vmatprep.subr.bf16.mxu1 %v18192_v2 }
 0x691   :  { %v8794_v13 = vpop.permute.xlu0 %8793  ;;  %v7934_v34 = vpop.permute.xlu1 %7933  ;;  %v8389_v10 = vadd.f32 %v8339_v27, %v8245_v35 }
 0x692   :  { %v8836_v1 = vadd.f32 %v8794_v13, %v8660_v30  ;;  %v17056_v21 = vpop.f32.mrb[228].mxu0  ;;  %v7722_v19 = vpop.f32.mrb[228].mxu1  ;;  %v9159_v18 = vrot.slane %v9157_v44, 7  ;;  %v7974_v32 = vadd.f32 %v7934_v34, %v7782_v52  ;;  %v8269_v44 = vld [vmem:[#allocation3 + $0x188] sm:$0xfe]  ;;  %v8089_v13 = vrot.slane %v8011_v45, 2 }
 0x693   :  { %7757 = vst [vmem:[#allocation3 + $0x330] sm:$0xff] %v17056_v21  ;;  %7759 = vst.msk [vmem:[#allocation3 + $0x340] sm:$0xff] %vm748_vm7, %v7722_v19  ;;  %v7645_v36 = vpop.f32.mrb[229].mxu0  ;;  %v13517_v54 = vpop.f32.mrb[229].mxu1 }
 0x694   :  { %v8980_v47 = vadd.f32 %v8928_v5, %v8836_v1  ;;  %7758 = vst [vmem:[#allocation3 + $0x338] sm:$0xff] %v7645_v36  ;;  %v7647_v49 = vpop.f32.mrb[230].mxu0  ;;  %v7725_v28 = vpop.f32.mrb[230].mxu1  ;;  %v9162_v24 = vor.u32 %v9160_v33, %v9159_v18  ;;  %8633 = vrot.lane.b32.xlu0 %v7645_v36, %s14101_s5  ;;  %v8091_v33 = vsel %vm2109_vm6, %v8089_v13, %v8090_v23  ;;  %v8930_v5 = vrot.slane %v8860_v12, 2 }
 0x695   :  { %7760 = vst [vmem:[#allocation3 + $0x348] sm:$0xff] %v7647_v49  ;;  %7762 = vst.msk [vmem:[#allocation3 + $0x358] sm:$0xff] %vm748_vm7, %v7725_v28  ;;  %v8524_v8 = vpop.permute.xlu0 %8523  ;;  %v8110_v11 = vpop.permute.xlu1 %8109  ;;  %v8340_v36 = vrot.slane %v8269_v44, 1  ;;  %v8861_v49 = vld [vmem:[#allocation3 + $0x1c0] sm:$0xfc]  ;;  %v8929_v23 = vrot.slane %v8859_v58, 2 }
 0x696   :  { %v9004_v62 = vadd.f32 %v16897_v55, %v8980_v47  ;;  %v7649_v59 = vpop.f32.mrb[231].mxu0  ;;  %v13518_v30 = vpop.f32.mrb[231].mxu1  ;;  %9248 = vrot.lane.b32.xlu1 %v9162_v24, %s14100_s16  ;;  %v8150_v19 = vadd.f32 %v8110_v11, %v7974_v32  ;;  %v8565_v48 = vadd.f32 %v8524_v8, %v8389_v10  ;;  %v8862_v28 = vld [vmem:[#allocation3 + $0x1d8] sm:$0x3]  ;;  %v8932_v44 = vrot.slane %v8861_v49, 2 }
 0x697   :  { %7761 = vst [vmem:[#allocation3 + $0x350] sm:$0xff] %v7649_v59  ;;  %v8342_v50 = vsel %vm1932_vm5, %v8340_v36, %v8341_v22  ;;  %v8933_v27 = vrot.slane %v8862_v28, 2  ;;  %v8931_v13 = vsel %vm2109_vm6, %v8929_v23, %v8930_v5  ;;  %v17096_v23 = vld [vmem:[%s18149_s1 + $0x244] ss:$12 sps:$4 sm:$0xff]  }
 0x698   :  { %v17070_v1 = vmax.f32 %v9004_v62, 0.0  ;;  %10206 = vmatprep.subr.bf16.mxu0 %v17096_v23 }
 0x699   :  { %v8620_v18 = vpop.permute.xlu0 %8619  ;;  %v8206_v34 = vpop.permute.xlu1 %8205 }
 0x69a   :  { %18195 = vst [vmem:[#allocation18_spill] sm:$0xff] %v17070_v1  ;;  %v9117_v54 = vpack.c.bf16 %v17070_v1, %v17070_v1  ;;  %v8246_v47 = vadd.f32 %v8206_v34, %v8150_v19  ;;  %8123 = vrot.lane.b32.xlu1 %v8091_v33, %s14101_s5  ;;  %v17077_v51 = vpop.f32.mrb[232].mxu0  ;;  %v7730_v35 = vpop.f32.mrb[232].mxu1  ;;  %v8661_v42 = vadd.f32 %v8620_v18, %v8565_v48 }
 0x69b   :  { %7765 = vst.msk [vmem:[#allocation3 + $0x370] sm:$0xff] %vm748_vm7, %v7730_v35  ;;  %v17080_v24 = vpop.f32.mrb[233].mxu0  ;;  %v13521_v45 = vpop.f32.mrb[233].mxu1  ;;  %v8697_v52 = vld [vmem:[#allocation3 + $0x338] sm:$0xfe] }
 0x69c   :  { %7764 = vst [vmem:[#allocation3 + $0x368] sm:$0xff] %v17080_v24  ;;  %v7657_v8 = vpop.f32.mrb[234].mxu0  ;;  %v7733_v11 = vpop.f32.mrb[234].mxu1  ;;  %v8390_v62 = vadd.f32 %v8342_v50, %v8246_v47  ;;  %v8427_v32 = vld [vmem:[#allocation3 + $0x338] sm:$0xfc]  ;;  %v9164_v59 = vshrl.u32 %v9117_v54, 16 }
 0x69d   :  { %7768 = vst.msk [vmem:[#allocation3 + $0x388] sm:$0xff] %vm748_vm7, %v7733_v11  ;;  %v8796_v30 = vpop.permute.xlu0 %8795  ;;  %v8526_v12 = vpop.permute.xlu1 %8525  ;;  %v8774_v58 = vrot.slane %v8697_v52, 1  ;;  %v8505_v48 = vrot.slane %v8427_v32, 2  ;;  %v7838_v52 = vld [vmem:[#allocation3 + $0x348] sm:$0x1] }
 0x69e   :  { %v8837_v10 = vadd.f32 %v8796_v30, %v8661_v42  ;;  %v8566_v22 = vadd.f32 %v8526_v12, %v8390_v62  ;;  %v7659_v19 = vpop.f32.mrb[235].mxu0  ;;  %v13522_v18 = vpop.f32.mrb[235].mxu1  ;;  %8219 = vrot.lane.b32.xlu1 %v17056_v21, %s14102_s22  ;;  %v8698_v34 = vld [vmem:[#allocation3 + $0x350] sm:$0x1]  ;;  %v9166_v45 = vrot.slane %v9164_v59, 7  ;;  %v9167_v21 = vshll.u32 %v9117_v54, 16 }
 0x69f   :  { %v8428_v33 = vld [vmem:[#allocation3 + $0x350] sm:$0x3]  ;;  %7767 = vst [vmem:[#allocation3 + $0x380] sm:$0xff] %v7659_v19  ;;  %v8775_v36 = vrot.slane %v8698_v34, 1  ;;  %v8934_v62 = vsel %vm2109_vm6, %v8932_v44, %v8933_v27  ;;  %v7917_v54 = vrot.slane %v7838_v52, 1 }
 0x6a0   :  { %v8506_v47 = vrot.slane %v8428_v33, 2  ;;  %v8981_v35 = vadd.f32 %v8931_v13, %v8837_v10  ;;  %v9169_v12 = vor.u32 %v9167_v21, %v9166_v45  ;;  %v7837_v13 = vld [vmem:[#allocation3 + $0x330] sm:$0xfe]  ;;  %v8014_v44 = vld [vmem:[#allocation3 + $0x348] sm:$0x3] }
 0x6a1   :  { %v8622_v49 = vpop.permute.xlu0 %8621  ;;  %v8776_v28 = vsel %vm1932_vm5, %v8774_v58, %v8775_v36  ;;  %v8798_v50 = vpop.permute.xlu1 %8797  ;;  %v7916_v34 = vrot.slane %v7837_v13, 1 }
 0x6a2   :  { %v8507_v5 = vsel %vm2109_vm6, %v8505_v48, %v8506_v47  ;;  %v9005_v42 = vadd.f32 %v16897_v55, %v8981_v35  ;;  %v8662_v8 = vadd.f32 %v8622_v49, %v8566_v22  ;;  %8809 = vrot.lane.b32.xlu0 %v8776_v28, %s14102_s22  ;;  %v7663_v11 = vpop.f32.mrb[236].mxu0  ;;  %v7738_v18 = vpop.f32.mrb[236].mxu1  ;;  %v8013_v48 = vld [vmem:[#allocation3 + $0x330] sm:$0xfc]  ;;  %v8093_v49 = vrot.slane %v8014_v44, 2 }
 0x6a3   :  { %8539 = vrot.lane.b32.xlu1 %v8507_v5, %s14100_s16  ;;  %v17099_v32 = vpop.f32.mrb[237].mxu0  ;;  %7771 = vst.msk [vmem:[#allocation3 + $0x3a0] sm:$0xff] %vm748_vm7, %v7738_v18  ;;  %v13525_v33 = vpop.f32.mrb[237].mxu1  ;;  %v7918_v45 = vsel %vm1932_vm5, %v7916_v34, %v7917_v54  ;;  %v8699_v13 = vld [vmem:[#allocation3 + $0x368] sm:$0xfe] }
 0x6a4   :  { %v17101_v59 = vmax.f32 %v9005_v42, 0.0  ;;  %v8838_v30 = vadd.f32 %v8798_v50, %v8662_v8  ;;  %7770 = vst [vmem:[#allocation3 + $0x398] sm:$0xff] %v17099_v32  ;;  %v7667_v10 = vpop.f32.mrb[238].mxu0  ;;  %v7741_v35 = vpop.f32.mrb[238].mxu1  ;;  %v8092_v8 = vrot.slane %v8013_v48, 2  ;;  %v8777_v33 = vrot.slane %v8699_v13, 1 }
 0x6a5   :  { %v7669_v27 = vpop.f32.mrb[239].mxu0  ;;  %v7936_v36 = vpop.permute.xlu0 %7935  ;;  %7774 = vst.msk [vmem:[#allocation3 + $0x3b8] sm:$0xff] %vm748_vm7, %v7741_v35  ;;  %v8429_v48 = vld [vmem:[#allocation3 + $0x368] sm:$0xfc] }
 0x6a6   :  { %18196 = vst [vmem:[#allocation19_spill] sm:$0xff] %v17101_v59  ;;  %v9118_v22 = vpack.c.bf16 %v17101_v59, %v17101_v59  ;;  %v8982_v19 = vadd.f32 %v8934_v62, %v8838_v30  ;;  %9250 = vrot.lane.b32.xlu0 %v9169_v12, %s14100_s16  ;;  %7773 = vst [vmem:[#allocation3 + $0x3b0] sm:$0xff] %v7669_v27  ;;  %v13526_v28 = vpop.f32.mrb[239].mxu1  ;;  %v8094_v52 = vsel %vm2109_vm6, %v8092_v8, %v8093_v49  ;;  %v8700_v62 = vld [vmem:[#allocation3 + $0x380] sm:$0x1]  ;;  %v8112_v12 = vpop.permute.xlu1 %8111 }
 0x6a7   :  { %v8778_v54 = vrot.slane %v8700_v62, 1  ;;  %v8430_v27 = vld [vmem:[#allocation3 + $0x380] sm:$0x3] }
 0x6a8   :  { %v9006_v58 = vadd.f32 %v16897_v55, %v8982_v19  ;;  %v9171_v47 = vshrl.u32 %v9118_v22, 16  ;;  %v9174_v42 = vshll.u32 %v9118_v22, 16  ;;  %v7783_v19 = vld [vmem:[#allocation3 + $0x1e0] sm:$0xff]  ;;  %v8509_v49 = vrot.slane %v8430_v27, 2 }
 0x6a9   :  { %v8208_v11 = vpop.permute.xlu0 %8207  ;;  %v7975_v18 = vadd.f32 %v7936_v36, %v7783_v19  ;;  %v9311_v59 = vld [vmem:[#allocation2 + $0x40] sm:$0x1f] }
 0x6aa   :  { %v17112_v5 = vmax.f32 %v9006_v58, 0.0  ;;  %7949 = vrot.lane.b32.xlu0 %v7918_v45, %s14100_s16  ;;  %v9173_v50 = vrot.slane %v9171_v47, 7  ;;  %v8779_v45 = vsel %vm1932_vm5, %v8777_v33, %v8778_v54  ;;  %v7784_v54 = vld [vmem:[#allocation3 + $0x210] sm:$0xff]  ;;  %v8274_v33 = vld [vmem:[#allocation3 + $0x260] sm:$0x1] }
 0x6ab   :  { %v8701_v47 = vld [vmem:[#allocation3 + $0x398] sm:$0xfe]  ;;  %v8151_v28 = vadd.f32 %v8112_v12, %v7975_v18 }
 0x6ac   :  { %18197 = vst [vmem:[#allocation20_spill] sm:$0xff] %v17112_v5  ;;  %v9119_v55 = vpack.c.bf16 %v17112_v5, %v17112_v5  ;;  %v9176_v21 = vor.u32 %v9174_v42, %v9173_v50  ;;  %v8508_v42 = vrot.slane %v8429_v48, 2  ;;  %v8780_v8 = vrot.slane %v8701_v47, 1  ;;  %v8875_v5 = vld [vmem:[#allocation3 + $0x370] sm:$0xfc] }
 0x6ad   :  { %v8702_v35 = vld [vmem:[#allocation3 + $0x3b0] sm:$0x1]  ;;  %v8953_v17 = vrot.slane %v8875_v5, 2 }
 0x6ae   :  { %8125 = vrot.lane.b32.xlu0 %v8094_v52, %s14101_s5  ;;  %9252 = vrot.lane.b32.xlu1 %v9176_v21, %s14100_s16  ;;  %v9178_v30 = vshrl.u32 %v9119_v55, 16  ;;  %v9181_v44 = vshll.u32 %v9119_v55, 16  ;;  %v8781_v36 = vrot.slane %v8702_v35, 1  ;;  %v8271_v55 = vld [vmem:[#allocation3 + $0x218] sm:$0xfe]  ;;  %v8510_v21 = vsel %vm2109_vm6, %v8508_v42, %v8509_v49 }
 0x6b0   :  { %v9180_v10 = vrot.slane %v9178_v30, 7  ;;  %v8247_v30 = vadd.f32 %v8208_v11, %v8151_v28  ;;  %v8782_v13 = vsel %vm1932_vm5, %v8780_v8, %v8781_v36  ;;  %v8347_v11 = vrot.slane %v8274_v33, 1 }
 0x6b2   :  { %8221 = vrot.lane.b32.xlu0 %v17077_v51, %s14102_s22  ;;  %8635 = vrot.lane.b32.xlu1 %v17080_v24, %s14101_s5  ;;  %v7938_v22 = vpop.permute.xlu0 %7937  ;;  %v9183_v58 = vor.u32 %v9181_v44, %v9180_v10  ;;  %v8272_v24 = vld [vmem:[#allocation3 + $0x230] sm:$0x1]  ;;  %v8343_v10 = vrot.slane %v8271_v55, 1 }
 0x6b3   :  { %v8344_v52 = vrot.slane %v8272_v24, 1  ;;  %v7976_v27 = vadd.f32 %v7938_v22, %v7784_v54 }
 0x6b4   :  { %v8528_v34 = vpop.permute.xlu1 %8527 }
 0x6b5   :  { %v8345_v19 = vsel %vm1932_vm5, %v8343_v10, %v8344_v52 }
 0x6b6   :  { %8811 = vrot.lane.b32.xlu1 %v8779_v45, %s14102_s22  ;;  %9254 = vrot.lane.b32.xlu0 %v9183_v58, %s14100_s16  ;;  %v8114_v51 = vpop.permute.xlu0 %8113  ;;  %v8391_v18 = vadd.f32 %v8345_v19, %v8247_v30  ;;  %v8864_v58 = vld [vmem:[#allocation3 + $0x268] sm:$0x3]  ;;  %v8863_v45 = vld [vmem:[#allocation3 + $0x250] sm:$0xfc]  ;;  %v17139_v19 = vld [vmem:[%s18150_s2 + $0x2] ss:$0 sm:$0xff] }
 0x6b7   :  { %v8152_v35 = vadd.f32 %v8114_v51, %v7976_v27  ;;  %v8936_v28 = vrot.slane %v8864_v58, 2  ;;  %v8935_v36 = vrot.slane %v8863_v45, 2  ;;  %v8866_v27 = vld [vmem:[#allocation3 + $0x298] sm:$0x3] }
 0x6b8   :  { %v8624_v50 = vpop.permute.xlu1 %8623  ;;  %v8567_v47 = vadd.f32 %v8528_v34, %v8391_v18  ;;  %v7785_v34 = vld [vmem:[#allocation3 + $0x240] sm:$0xff] }
 0x6b9   :  { %v8937_v22 = vsel %vm2109_vm6, %v8935_v36, %v8936_v28  ;;  %v8939_v28 = vrot.slane %v8866_v27, 2  ;;  %v7786_v27 = vld [vmem:[#allocation3 + $0x270] sm:$0xff] }
 0x6ba   :  { %8541 = vrot.lane.b32.xlu1 %v8510_v21, %s14100_s16  ;;  %8637 = vrot.lane.b32.xlu0 %v17099_v32, %s14101_s5  ;;  %v8210_v62 = vpop.permute.xlu0 %8209  ;;  %v8273_v32 = vld [vmem:[#allocation3 + $0x248] sm:$0xfe]  ;;  %v8663_v24 = vadd.f32 %v8624_v50, %v8567_v47 }
 0x6bb   :  { %v8248_v42 = vadd.f32 %v8210_v62, %v8152_v35  ;;  %v8346_v8 = vrot.slane %v8273_v32, 1  ;;  %v8276_v62 = vld [vmem:[#allocation3 + $0x290] sm:$0x1]  ;;  %v8275_v35 = vld [vmem:[#allocation3 + $0x278] sm:$0xfe] }
 0x6bc   :  { %v7940_v12 = vpop.permute.xlu1 %7939  ;;  %v8865_v32 = vld [vmem:[#allocation3 + $0x280] sm:$0xfc] }
 0x6bd   :  { %v8348_v52 = vsel %vm1932_vm5, %v8346_v8, %v8347_v11  ;;  %v7977_v54 = vadd.f32 %v7940_v12, %v7785_v34  ;;  %v8350_v11 = vrot.slane %v8276_v62, 1  ;;  %v8349_v8 = vrot.slane %v8275_v35, 1  ;;  %v8868_v62 = vld [vmem:[#allocation3 + $0x2c8] sm:$0x3] }
 0x6be   :  { %8813 = vrot.lane.b32.xlu1 %v8782_v13, %s14102_s22  ;;  %v8530_v44 = vpop.permute.xlu0 %8529  ;;  %v8392_v13 = vadd.f32 %v8348_v52, %v8248_v42  ;;  %v8938_v36 = vrot.slane %v8865_v32, 2 }
 0x6c0   :  { %v8116_v48 = vpop.permute.xlu1 %8115  ;;  %v8568_v33 = vadd.f32 %v8530_v44, %v8392_v13  ;;  %v8351_v44 = vsel %vm1932_vm5, %v8349_v8, %v8350_v11  ;;  %v8278_v11 = vld [vmem:[#allocation3 + $0x2c0] sm:$0x1] }
 0x6c1   :  { %v8153_v58 = vadd.f32 %v8116_v48, %v7977_v54  ;;  %v8940_v48 = vsel %vm2109_vm6, %v8938_v36, %v8939_v28  ;;  %v8867_v28 = vld [vmem:[#allocation3 + $0x2b0] sm:$0xfc]  ;;  %v8277_v36 = vld [vmem:[#allocation3 + $0x2a8] sm:$0xfe] }
 0x6c2   :  { %v8626_v49 = vpop.permute.xlu0 %8625 }
 0x6c3   :  { %v8664_v12 = vadd.f32 %v8626_v49, %v8568_v33 }
 0x6c4   :  { %v8800_v55 = vpop.permute.xlu1 %8799 }
 0x6c5   :  { %v8839_v21 = vadd.f32 %v8800_v55, %v8663_v24 }
 0x6c6   :  { %v7942_v30 = vpop.permute.xlu0 %7941 }
 0x6c7   :  { %v8983_v10 = vadd.f32 %v8937_v22, %v8839_v21 }
 0x6c8   :  { %v8212_v51 = vpop.permute.xlu1 %8211 }
 0x6c9   :  { %v9007_v50 = vadd.f32 %v17139_v19, %v8983_v10  ;;  %v8249_v42 = vadd.f32 %v8212_v51, %v8153_v58  ;;  %v7978_v58 = vadd.f32 %v7942_v30, %v7786_v27 }
 0x6ca   :  { %v8118_v18 = vpop.permute.xlu0 %8117 }
 0x6cb   :  { %v17142_v47 = vmax.f32 %v9007_v50, 0.0  ;;  %v8393_v13 = vadd.f32 %v8351_v44, %v8249_v42  ;;  %v8154_v42 = vadd.f32 %v8118_v18, %v7978_v58 }
 0x6cc   :  { %v8532_v45 = vpop.permute.xlu1 %8531 }
 0x6cd   :  { %18198 = vst [vmem:[#allocation21_spill] sm:$0xff] %v17142_v47  ;;  %v9120_v24 = vpack.c.bf16 %v17142_v47, %v17142_v47  ;;  %v8569_v35 = vadd.f32 %v8532_v45, %v8393_v13 }
 0x6ce   :  { %v8802_v55 = vpop.permute.xlu0 %8801 }
 0x6cf   :  { %v8840_v21 = vadd.f32 %v8802_v55, %v8664_v12  ;;  %v9185_v52 = vshrl.u32 %v9120_v24, 16  ;;  %v9188_v54 = vshll.u32 %v9120_v24, 16  ;;  %v8942_v12 = vrot.slane %v8868_v62, 2 }
 0x6d0   :  { %v8628_v22 = vpop.permute.xlu1 %8627  ;;  %v8353_v55 = vrot.slane %v8278_v11, 1 }
 0x6d1   :  { %v8984_v10 = vadd.f32 %v8940_v48, %v8840_v21  ;;  %v9187_v34 = vrot.slane %v9185_v52, 7  ;;  %v8665_v8 = vadd.f32 %v8628_v22, %v8569_v35  ;;  %v8941_v21 = vrot.slane %v8867_v28, 2  ;;  %v8870_v28 = vld [vmem:[#allocation3 + $0x2f8] sm:$0x3] }
 0x6d2   :  { %v8214_v51 = vpop.permute.xlu0 %8213  ;;  %v8352_v48 = vrot.slane %v8277_v36, 1  ;;  %v8869_v36 = vld [vmem:[#allocation3 + $0x2e0] sm:$0xfc] }
 0x6d3   :  { %v9008_v49 = vadd.f32 %v17139_v19, %v8984_v10  ;;  %v9190_v50 = vor.u32 %v9188_v54, %v9187_v34  ;;  %v8250_v44 = vadd.f32 %v8214_v51, %v8154_v42  ;;  %v8943_v10 = vsel %vm2109_vm6, %v8941_v21, %v8942_v12 }
 0x6d4   :  { %v17149_v33 = vpop.permute.xlu1 %7943 }
 0x6d5   :  { %v17151_v32 = vmax.f32 %v9008_v49, 0.0  ;;  %9256 = vrot.lane.b32.xlu0 %v9190_v50, %s14100_s16  ;;  %v8354_v49 = vsel %vm1932_vm5, %v8352_v48, %v8353_v55  ;;  %v9290_v50 = vld [vmem:[#allocation2 + $0x8] sm:$0x1f]  ;;  %v8945_v55 = vrot.slane %v8870_v28, 2  ;;  %v8280_v28 = vld [vmem:[#allocation3 + $0x2f0] sm:$0x1] }
 0x6d6   :  { %v8534_v13 = vpop.permute.xlu0 %8533  ;;  %v8394_v27 = vadd.f32 %v8354_v49, %v8250_v44  ;;  %v8944_v44 = vrot.slane %v8869_v36, 2  ;;  %v8279_v36 = vld [vmem:[#allocation3 + $0x2d8] sm:$0xfe] }
 0x6d7   :  { %18199 = vst [vmem:[#allocation22_spill] sm:$0xff] %v17151_v32  ;;  %v9121_v24 = vpack.c.bf16 %v17151_v32, %v17151_v32 }
 0x6d8   :  { %v8804_v52 = vpop.permute.xlu1 %8803 }
 0x6d9   :  { %v8841_v30 = vadd.f32 %v8804_v52, %v8665_v8  ;;  %v9192_v45 = vshrl.u32 %v9121_v24, 16  ;;  %v9195_v22 = vshll.u32 %v9121_v24, 16  ;;  %v8570_v24 = vadd.f32 %v8534_v13, %v8394_v27  ;;  %v9293_v27 = vld [vmem:[#allocation2 + $0x10] sm:$0x1f] }
 0x6da   :  { %v8630_v12 = vpop.permute.xlu0 %8629 }
 0x6db   :  { %v8985_v18 = vadd.f32 %v8943_v10, %v8841_v30  ;;  %v9194_v54 = vrot.slane %v9192_v45, 7  ;;  %v8666_v21 = vadd.f32 %v8630_v12, %v8570_v24 }
 0x6dc   :  { %v9241_v62 = vpop.permute.xlu1 %9240 }
 0x6dd   :  { %v9009_v51 = vadd.f32 %v17139_v19, %v8985_v18  ;;  %v9291_v58 = vsel %vm17158_vm13, %v9241_v62, %v9290_v50  ;;  %v9197_v35 = vor.u32 %v9195_v22, %v9194_v54  ;;  %v8946_v22 = vsel %vm2109_vm6, %v8944_v44, %v8945_v55  ;;  %v17172_v50 = vld [vmem:[#allocation2] sm:$0xff] }
 0x6de   :  { %9292 = vst [vmem:[#allocation2 + $0x8] sm:$0x1f] %v9291_v58  ;;  %v7787_v62 = vld [vmem:[#allocation3 + $0x2a0] sm:$0xff]  ;;  %v8356_v55 = vrot.slane %v8280_v28, 1  ;;  %v8871_v28 = vld [vmem:[#allocation3 + $0x310] sm:$0xfc] }
 0x6df   :  { %v17166_v11 = vmax.f32 %v9009_v51, 0.0  ;;  %9258 = vrot.lane.b32.xlu1 %v9197_v35, %s14100_s16  ;;  %v7979_v58 = vadd.f32 %v17149_v33, %v7787_v62 }
 0x6e0   :  { %v8120_v42 = vpop.permute.xlu1 %8119 }
 0x6e1   :  { %18202 = vst [vmem:[#allocation23_spill] sm:$0xff] %v17166_v11  ;;  %v9122_v8 = vpack.c.bf16 %v17166_v11, %v17166_v11  ;;  %v8155_v24 = vadd.f32 %v8120_v42, %v7979_v58  ;;  %v8285_v11 = vld [vmem:[#allocation3 + $0x368] sm:$0xfe] }
 0x6e2   :  { %v8364_v26 = vrot.slane %v8285_v11, 1 }
 0x6e3   :  { %v9199_v52 = vshrl.u32 %v9122_v8, 16  ;;  %v9202_v18 = vshll.u32 %v9122_v8, 16 }
 0x6e4   :  { %v8806_v30 = vpop.permute.xlu0 %8805  ;;  %v8216_v54 = vpop.permute.xlu1 %8215 }
 0x6e5   :  { %v8842_v45 = vadd.f32 %v8806_v30, %v8666_v21  ;;  %v9339_v48 = vld [vmem:[#allocation2 + $0x8] sm:$0xff]  ;;  %v9201_v10 = vrot.slane %v9199_v52, 7  ;;  %v8251_v44 = vadd.f32 %v8216_v54, %v8155_v24  ;;  %v8355_v30 = vrot.slane %v8279_v36, 1 }
 0x6e6   :  { %9547 = vmatmul.mubr.bf16.gmra.mrb[244].mxu0 %v9339_v48  ;;  %13548 = vmatmul.mubr.bf16.gmra.mrb[244].mxu1 %v9339_v48 }
 0x6e7   :  { %v8986_v49 = vadd.f32 %v8946_v22, %v8842_v45  ;;  %v9204_v13 = vor.u32 %v9202_v18, %v9201_v10  ;;  %9556 = vmatprep.mubr.bf16.mxu0 %v17172_v50  ;;  %13551 = vmatprep.mubr.msk.bf16.mxu1 %vm14098_vm0, %v18192_v2  ;;  %v8357_v48 = vsel %vm1932_vm5, %v8355_v30, %v8356_v55  ;;  %v9296_v10 = vld [vmem:[#allocation2 + $0x18] sm:$0x1f]  ;;  %v8947_v55 = vrot.slane %v8871_v28, 2 }
 0x6e8   :  { %v9243_v51 = vpop.permute.xlu0 %9242  ;;  %v8536_v21 = vpop.permute.xlu1 %8535  ;;  %v8395_v22 = vadd.f32 %v8357_v48, %v8251_v44 }
 0x6e9   :  { %v9010_v35 = vadd.f32 %v17139_v19, %v8986_v49  ;;  %v9294_v12 = vsel %vm17158_vm13, %v9243_v51, %v9293_v27  ;;  %9260 = vrot.lane.b32.xlu0 %v9204_v13, %s14100_s16  ;;  %v8872_v51 = vld [vmem:[#allocation3 + $0x328] sm:$0x3] }
 0x6ea   :  { %9295 = vst [vmem:[#allocation2 + $0x10] sm:$0x1f] %v9294_v12  ;;  %v8948_v12 = vrot.slane %v8872_v51, 2 }
 0x6eb   :  { %v17182_v8 = vmax.f32 %v9010_v35, 0.0  ;;  %v8571_v35 = vadd.f32 %v8536_v21, %v8395_v22  ;;  %v9299_v21 = vld [vmem:[#allocation2 + $0x20] sm:$0x1f] }
 0x6ec   :  { %v7946_v52 = vpop.permute.xlu0 %7945 }
 0x6ed   :  { %18203 = vst [vmem:[#allocation24_spill] sm:$0xff] %v17182_v8  ;;  %v9123_v33 = vpack.c.bf16 %v17182_v8, %v17182_v8 }
 0x6ef   :  { %v9206_v45 = vshrl.u32 %v9123_v33, 16  ;;  %v9209_v62 = vshll.u32 %v9123_v33, 16 }
 0x6f0   :  { %v9245_v18 = vpop.permute.xlu1 %9244  ;;  %v8122_v27 = vpop.permute.xlu0 %8121 }
 0x6f1   :  { %v9297_v42 = vsel %vm17158_vm13, %v9245_v18, %v9296_v10  ;;  %v9340_v49 = vld [vmem:[#allocation2 + $0x10] sm:$0xff]  ;;  %v9208_v13 = vrot.slane %v9206_v45, 7  ;;  %v8949_v45 = vsel %vm2109_vm6, %v8947_v55, %v8948_v12  ;;  %v8282_v12 = vld [vmem:[#allocation3 + $0x320] sm:$0x1]  ;;  %v9302_v55 = vld [vmem:[#allocation2 + $0x28] sm:$0x1f] }
 0x6f2   :  { %9298 = vst [vmem:[#allocation2 + $0x18] sm:$0x1f] %v9297_v42  ;;  %9557 = vmatmul.mubr.bf16.gmra.mrb[248].mxu0 %v9340_v49  ;;  %13552 = vmatmul.mubr.bf16.gmra.mrb[248].mxu1 %v9340_v49 }
 0x6f3   :  { %v9211_v54 = vor.u32 %v9209_v62, %v9208_v13  ;;  %9566 = vmatprep.mubr.bf16.mxu0 %v17172_v50  ;;  %13555 = vmatprep.mubr.msk.bf16.mxu1 %vm14098_vm0, %v18192_v2 }
 0x6f4   :  { %v8632_v58 = vpop.permute.xlu1 %8631  ;;  %v8218_v36 = vpop.permute.xlu0 %8217 }
 0x6f5   :  { %9262 = vrot.lane.b32.xlu1 %v9211_v54, %s14100_s16  ;;  %v8667_v24 = vadd.f32 %v8632_v58, %v8571_v35  ;;  %v7788_v35 = vld [vmem:[#allocation3 + $0x2d0] sm:$0xff] }
 0x6f6   :  { %v7980_v28 = vadd.f32 %v7946_v52, %v7788_v35 }
 0x6f8   :  { %v8808_v44 = vpop.permute.xlu1 %8807 }
 0x6f9   :  { %v8843_v33 = vadd.f32 %v8808_v44, %v8667_v24  ;;  %v9341_v30 = vld [vmem:[#allocation2 + $0x18] sm:$0xff] }
 0x6fa   :  { %9567 = vmatmul.mubr.bf16.gmra.mrb[252].mxu0 %v9341_v30  ;;  %13556 = vmatmul.mubr.bf16.gmra.mrb[252].mxu1 %v9341_v30  ;;  %v8281_v30 = vld [vmem:[#allocation3 + $0x308] sm:$0xfe] }
 0x6fb   :  { %v8987_v48 = vadd.f32 %v8949_v45, %v8843_v33  ;;  %9576 = vmatprep.mubr.bf16.mxu0 %v17172_v50  ;;  %13559 = vmatprep.mubr.msk.bf16.mxu1 %vm14098_vm0, %v18192_v2  ;;  %v8156_v33 = vadd.f32 %v8122_v27, %v7980_v28  ;;  %v8358_v52 = vrot.slane %v8281_v30, 1  ;;  %v17214_v27 = vld [vmem:[%s18149_s1 + $0x240] ss:$12 sps:$4 sm:$0xff]   ;;  %v17222_v28 = vld [vmem:[%s18149_s1 + $0x25c] ss:$12 sps:$4 sm:$0xff]  }
 0x6fc   :  { %v9247_v10 = vpop.permute.xlu0 %9246  ;;  %v7948_v62 = vpop.permute.xlu1 %7947  ;;  %v13979_v30 = vld [vmem:[%s18149_s1 + $0x260] ss:$12 sps:$4 sm:$0xff]  }
 0x6fd   :  { %v9011_v18 = vadd.f32 %v17139_v19, %v8987_v48  ;;  %v9300_v22 = vsel %vm17158_vm13, %v9247_v10, %v9299_v21  ;;  %v8359_v48 = vrot.slane %v8282_v12, 1  ;;  %v8252_v21 = vadd.f32 %v8218_v36, %v8156_v33  ;;  %v8873_v36 = vld [vmem:[#allocation3 + $0x340] sm:$0xfc] }
 0x6fe   :  { %9301 = vst [vmem:[#allocation2 + $0x20] sm:$0x1f] %v9300_v22  ;;  %v17231_v33 = vld [vmem:[%s18149_s1 + $0x258] ss:$12 sps:$4 sm:$0xff]  }
 0x6ff   :  { %v17200_v42 = vmax.f32 %v9011_v18, 0.0  ;;  %v8360_v18 = vsel %vm1932_vm5, %v8358_v52, %v8359_v48  ;;  %v17240_v48 = vld [vmem:[%s18149_s1 + $0x274] ss:$12 sps:$4 sm:$0xff]  }
 0x700   :  { %v8538_v10 = vpop.permute.xlu0 %8537  ;;  %v8396_v22 = vadd.f32 %v8360_v18, %v8252_v21  ;;  %v9305_v18 = vld [vmem:[#allocation2 + $0x30] sm:$0x1f] }
 0x701   :  { %18204 = vst [vmem:[#allocation25_spill] sm:$0xff] %v17200_v42  ;;  %v9124_v49 = vpack.c.bf16 %v17200_v42, %v17200_v42  ;;  %v17299_v42 = vld [vmem:[%s18149_s1 + $0x2bc] ss:$12 sps:$4 sm:$0xff]  }
 0x703   :  { %v9213_v13 = vshrl.u32 %v9124_v49, 16  ;;  %v9216_v58 = vshll.u32 %v9124_v49, 16  ;;  %v8874_v49 = vld [vmem:[#allocation3 + $0x358] sm:$0x3] }
 0x704   :  { %v8951_v12 = vrot.slane %v8874_v49, 2 }
 0x705   :  { %v9342_v54 = vld [vmem:[#allocation2 + $0x20] sm:$0xff]  ;;  %v9215_v51 = vrot.slane %v9213_v13, 7 }
 0x706   :  { %9577 = vmatmul.mubr.bf16.gmra.mrb[0].mxu0 %v9342_v54  ;;  %13560 = vmatmul.mubr.bf16.gmra.mrb[0].mxu1 %v9342_v54  ;;  %v8634_v54 = vpop.permute.xlu0 %8633 }
 0x707   :  { %v9218_v24 = vor.u32 %v9216_v58, %v9215_v51  ;;  %9887 = vmatprep.mubr.bf16.mxu0 %v17172_v50  ;;  %13579 = vmatprep.mubr.msk.bf16.mxu1 %vm14098_vm0, %v18192_v2  ;;  %v13975_v51 = vld [vmem:[%s18149_s1 + $0x248] ss:$12 sps:$4 sm:$0xff]   ;;  %v8572_v58 = vadd.f32 %v8538_v10, %v8396_v22  ;;  %v7789_v22 = vld [vmem:[#allocation3 + $0x300] sm:$0xff] }
 0x708   :  { %v9249_v44 = vpop.permute.xlu1 %9248 }
 0x709   :  { %v9303_v45 = vsel %vm17158_vm13, %v9249_v44, %v9302_v55  ;;  %9264 = vrot.lane.b32.xlu0 %v9218_v24, %s14100_s16  ;;  %v8668_v24 = vadd.f32 %v8634_v54, %v8572_v58  ;;  %v8950_v55 = vrot.slane %v8873_v36, 2  ;;  %v17248_v54 = vld [vmem:[%s18149_s1 + $0x270] ss:$12 sps:$4 sm:$0xff]   ;;  %v7981_v58 = vadd.f32 %v7948_v62, %v7789_v22 }
 0x70a   :  { %9304 = vst [vmem:[#allocation2 + $0x28] sm:$0x1f] %v9303_v45 }
 0x70b   :  { %v8952_v52 = vsel %vm2109_vm6, %v8950_v55, %v8951_v12 }
 0x70c   :  { %v8124_v13 = vpop.permute.xlu1 %8123 }
 0x70d   :  { %v8157_v62 = vadd.f32 %v8124_v13, %v7981_v58 }
 0x710   :  { %v8220_v21 = vpop.permute.xlu1 %8219 }
 0x711   :  { %v9690_v35 = vld [vmem:[#allocation2 + $0x28] sm:$0xff]  ;;  %v8253_v13 = vadd.f32 %v8220_v21, %v8157_v62 }
 0x712   :  { %9888 = vmatmul.mubr.bf16.vlgmr.msra.gmra.mrb[4].mxu0 %v9690_v35  ;;  %13580 = vmatmul.mubr.bf16.vlgmr.msra.gmra.mrb[4].mxu1 %v9690_v35  ;;  %v8284_v35 = vld [vmem:[#allocation3 + $0x350] sm:$0x1]  ;;  %v17288_v21 = vld [vmem:[%s18149_s1 + $0x2a0] ss:$12 sps:$4 sm:$0xff]   ;;  %v13991_v62 = vld [vmem:[%s18149_s1 + $0x2a8] ss:$12 sps:$4 sm:$0xff]  }
 0x713   :  { %9897 = vmatprep.mubr.bf16.mxu0 %v17172_v50  ;;  %13583 = vmatprep.mubr.msk.bf16.mxu1 %vm14098_vm0, %v18192_v2 }
 0x714   :  { %v8810_v44 = vpop.permute.xlu0 %8809  ;;  %10207 = vmatpush1.bf16.msra.mxu0 %v17214_v27  ;;  %13600 = vmatpush3.bf16.msra.mxu1 %v13975_v51  ;;  %v13983_v51 = vld [vmem:[%s18149_s1 + $0x278] ss:$12 sps:$4 sm:$0xff]  }
 0x715   :  { %v8844_v45 = vadd.f32 %v8810_v44, %v8668_v24  ;;  %10208 = vmatprep.subr.bf16.mxu0 %v17222_v28  ;;  %13601 = vmatprep.subr.bf16.mxu1 %v18192_v2  ;;  %v17260_v24 = vld [vmem:[%s18149_s1 + $0x28c] ss:$12 sps:$4 sm:$0xff]  }
 0x717   :  { %v8988_v10 = vadd.f32 %v8952_v52, %v8844_v45  ;;  %v9538_v55 = vpop.f32.mrb[240].mxu0 }
 0x718   :  { %v9251_v49 = vpop.permute.xlu0 %9250  ;;  %10209 = vmatpush1.bf16.msra.mxu0 %v17231_v33  ;;  %13602 = vmatpush3.bf16.msra.mxu1 %v13979_v30  ;;  %9660 = vst [vmem:[#allocation3] sm:$0xff] %v9538_v55  ;;  %v9540_v44 = vpop.f32.mrb[241].mxu0  ;;  %v8283_v30 = vld [vmem:[#allocation3 + $0x338] sm:$0xfe] }
 0x719   :  { %v9012_v36 = vadd.f32 %v17139_v19, %v8988_v10  ;;  %v9306_v12 = vsel %vm17158_vm13, %v9251_v49, %v9305_v18  ;;  %10210 = vmatprep.subr.bf16.mxu0 %v17240_v48  ;;  %13603 = vmatprep.subr.bf16.mxu1 %v18192_v2  ;;  %v9542_v52 = vpop.f32.mrb[242].mxu0  ;;  %v8362_v10 = vrot.slane %v8284_v35, 1  ;;  %v8540_v18 = vpop.permute.xlu1 %8539  ;;  %v17269_v49 = vld [vmem:[%s18149_s1 + $0x288] ss:$12 sps:$4 sm:$0xff]   ;;  %v17280_v35 = vld [vmem:[%s18149_s1 + $0x2a4] ss:$12 sps:$4 sm:$0xff]  }
 0x71a   :  { %9307 = vst [vmem:[#allocation2 + $0x30] sm:$0x1f] %v9306_v12  ;;  %v13987_v12 = vld [vmem:[%s18149_s1 + $0x290] ss:$12 sps:$4 sm:$0xff]   ;;  %9663 = vst [vmem:[#allocation3 + $0x18] sm:$0xff] %v9542_v52 }
 0x71b   :  { %v17263_v45 = vmax.f32 %v9012_v36, 0.0  ;;  %v8361_v36 = vrot.slane %v8283_v30, 1  ;;  %v9308_v44 = vld [vmem:[#allocation2 + $0x38] sm:$0x1f] }
 0x71c   :  { %v7950_v22 = vpop.permute.xlu0 %7949  ;;  %10211 = vmatpush1.bf16.msra.mxu0 %v17248_v54  ;;  %13604 = vmatpush3.bf16.msra.mxu1 %v13983_v51 }
 0x71d   :  { %18205 = vst [vmem:[#allocation26_spill] sm:$0xff] %v17263_v45  ;;  %v9125_v58 = vpack.c.bf16 %v17263_v45, %v17263_v45  ;;  %10212 = vmatprep.subr.bf16.mxu0 %v17260_v24  ;;  %13605 = vmatprep.subr.bf16.mxu1 %v18192_v2  ;;  %v8363_v55 = vsel %vm1932_vm5, %v8361_v36, %v8362_v10 }
 0x71e   :  { %v8397_v45 = vadd.f32 %v8363_v55, %v8253_v13 }
 0x71f   :  { %v9220_v51 = vshrl.u32 %v9125_v58, 16  ;;  %v9223_v32 = vshll.u32 %v9125_v58, 16  ;;  %v8286_v58 = vld [vmem:[#allocation3 + $0x380] sm:$0x1] }
 0x720   :  { %v9253_v8 = vpop.permute.xlu1 %9252  ;;  %v8126_v52 = vpop.permute.xlu0 %8125  ;;  %10213 = vmatpush1.bf16.msra.mxu0 %v17269_v49  ;;  %13606 = vmatpush3.bf16.msra.mxu1 %v13987_v12  ;;  %v7790_v12 = vld [vmem:[#allocation3 + $0x330] sm:$0xff]  ;;  %v8365_v1 = vrot.slane %v8286_v58, 1  ;;  %v8878_v58 = vld [vmem:[#allocation3 + $0x3b8] sm:$0x3] }
 0x721   :  { %v9309_v30 = vsel %vm17158_vm13, %v9253_v8, %v9308_v44  ;;  %v9691_v10 = vld [vmem:[#allocation2 + $0x30] sm:$0xff]  ;;  %v9222_v36 = vrot.slane %v9220_v51, 7  ;;  %10214 = vmatprep.subr.bf16.mxu0 %v17280_v35  ;;  %13607 = vmatprep.subr.bf16.mxu1 %v18192_v2  ;;  %v7982_v13 = vadd.f32 %v7950_v22, %v7790_v12  ;;  %v8876_v8 = vld [vmem:[#allocation3 + $0x388] sm:$0x3]  ;;  %v8573_v22 = vadd.f32 %v8540_v18, %v8397_v45 }
 0x722   :  { %9310 = vst [vmem:[#allocation2 + $0x38] sm:$0x1f] %v9309_v30  ;;  %9898 = vmatmul.mubr.bf16.gmra.mrb[8].mxu0 %v9691_v10  ;;  %13584 = vmatmul.mubr.bf16.gmra.mrb[8].mxu1 %v9691_v10  ;;  %v17309_v30 = vld [vmem:[%s18149_s1 + $0x2b8] ss:$12 sps:$4 sm:$0xff]   ;;  %v8954_v12 = vrot.slane %v8876_v8, 2 }
 0x723   :  { %v9225_v55 = vor.u32 %v9223_v32, %v9222_v36  ;;  %9907 = vmatprep.mubr.bf16.mxu0 %v17172_v50  ;;  %13587 = vmatprep.mubr.msk.bf16.mxu1 %vm14098_vm0, %v18192_v2  ;;  %v13995_v32 = vld [vmem:[%s18149_s1 + $0x2c0] ss:$12 sps:$4 sm:$0xff]   ;;  %v8158_v10 = vadd.f32 %v8126_v52, %v7982_v13  ;;  %v17326_v13 = vld [vmem:[%s18149_s1 + $0x2d0] ss:$12 sps:$4 sm:$0xff]  }
 0x724   :  { %v8636_v51 = vpop.permute.xlu1 %8635  ;;  %v8222_v44 = vpop.permute.xlu0 %8221  ;;  %10215 = vmatpush1.bf16.msra.mxu0 %v17288_v21  ;;  %13608 = vmatpush3.bf16.msra.mxu1 %v13991_v62  ;;  %v17319_v36 = vld [vmem:[%s18149_s1 + $0x2d4] ss:$12 sps:$4 sm:$0xff]  }
 0x725   :  { %9266 = vrot.lane.b32.xlu1 %v9225_v55, %s14100_s16  ;;  %10216 = vmatprep.subr.bf16.mxu0 %v17299_v42  ;;  %v8669_v62 = vadd.f32 %v8636_v51, %v8573_v22  ;;  %v8254_v47 = vadd.f32 %v8222_v44, %v8158_v10  ;;  %v8877_v52 = vld [vmem:[#allocation3 + $0x3a0] sm:$0xfc]  ;;  %v17337_v51 = vld [vmem:[%s18149_s1 + $0x2ec] ss:$12 sps:$4 sm:$0xff]   ;;  %v8955_v44 = vsel %vm2109_vm6, %v8953_v17, %v8954_v12  ;;  %v17349_v17 = vld [vmem:[%s18149_s1 + $0x2e8] ss:$12 sps:$4 sm:$0xff]  }
 0x726   :  { %13609 = vmatprep.subr.bf16.mxu1 %v18192_v2  ;;  %v13996_v55 = vld [vmem:[%s18149_s1 + $0x2d8] ss:$12 sps:$4 sm:$0xff]  }
 0x728   :  { %v8812_v45 = vpop.permute.xlu1 %8811  ;;  %v9255_v18 = vpop.permute.xlu0 %9254  ;;  %10217 = vmatpush1.bf16.msra.mxu0 %v17309_v30  ;;  %13610 = vmatpush3.bf16.msra.mxu1 %v13995_v32  ;;  %v8366_v32 = vsel %vm1932_vm5, %v8364_v26, %v8365_v1  ;;  %v13997_v26 = vld [vmem:[%s18149_s1 + $0x2f0] ss:$12 sps:$4 sm:$0xff]  }
 0x729   :  { %v8845_v8 = vadd.f32 %v8812_v45, %v8669_v62  ;;  %v9312_v5 = vsel %vm17158_vm13, %v9255_v18, %v9311_v59  ;;  %v9692_v11 = vld [vmem:[#allocation2 + $0x38] sm:$0xff]  ;;  %10218 = vmatprep.subr.bf16.mxu0 %v17319_v36  ;;  %13611 = vmatprep.subr.bf16.mxu1 %v18192_v2  ;;  %v8398_v59 = vadd.f32 %v8366_v32, %v8254_v47  ;;  %v8956_v62 = vrot.slane %v8877_v52, 2 }
 0x72a   :  { %9313 = vst [vmem:[#allocation2 + $0x40] sm:$0x1f] %v9312_v5  ;;  %9908 = vmatmul.mubr.bf16.gmra.mrb[12].mxu0 %v9692_v11  ;;  %13588 = vmatmul.mubr.bf16.gmra.mrb[12].mxu1 %v9692_v11  ;;  %v8957_v45 = vrot.slane %v8878_v58, 2 }
 0x72b   :  { %v8989_v22 = vadd.f32 %v8955_v44, %v8845_v8  ;;  %9917 = vmatprep.mubr.bf16.mxu0 %v17172_v50  ;;  %13591 = vmatprep.mubr.msk.bf16.mxu1 %vm14098_vm0, %v18192_v2 }
 0x72c   :  { %v8542_v10 = vpop.permute.xlu1 %8541  ;;  %10219 = vmatpush1.bf16.msra.mxu0 %v17326_v13  ;;  %13612 = vmatpush3.bf16.msra.mxu1 %v13996_v55  ;;  %v8638_v12 = vpop.permute.xlu0 %8637  ;;  %v8958_v8 = vsel %vm2109_vm6, %v8956_v62, %v8957_v45 }
 0x72d   :  { %v9013_v1 = vadd.f32 %v17139_v19, %v8989_v22  ;;  %v8574_v47 = vadd.f32 %v8542_v10, %v8398_v59  ;;  %10220 = vmatprep.subr.bf16.mxu0 %v17337_v51  ;;  %13613 = vmatprep.subr.bf16.mxu1 %v18192_v2 }
 0x72f   :  { %v17357_v18 = vmax.f32 %v9013_v1, 0.0  ;;  %v8670_v52 = vadd.f32 %v8638_v12, %v8574_v47 }
 0x730   :  { %v8814_v5 = vpop.permute.xlu1 %8813  ;;  %10221 = vmatpush1.bf16.msra.mxu0 %v17349_v17  ;;  %13614 = vmatpush3.bf16.msra.mxu1 %v13997_v26  ;;  %v9544_v26 = vpop.f32.mrb[243].mxu0 }
 0x731   :  { %v9126_v55 = vpack.c.bf16 %v17357_v18, %v17357_v18  ;;  %v8846_v11 = vadd.f32 %v8814_v5, %v8670_v52  ;;  %v9693_v58 = vld [vmem:[#allocation2 + $0x40] sm:$0xff]  ;;  %10557 = vmatprep.subr.bf16.mxu0 %v17096_v23  ;;  %13635 = vmatprep.subr.bf16.mxu1 %v18192_v2 }
 0x732   :  { %9918 = vmatmul.mubr.bf16.gmra.mrb[16].mxu0 %v9693_v58  ;;  %13592 = vmatmul.mubr.bf16.gmra.mrb[16].mxu1 %v9693_v58 }
 0x733   :  { %v8990_v44 = vadd.f32 %v8958_v8, %v8846_v11  ;;  %v9227_v32 = vshrl.u32 %v9126_v55, 16  ;;  %9927 = vmatprep.mubr.bf16.mxu0 %v17172_v50  ;;  %13595 = vmatprep.mubr.msk.bf16.mxu1 %vm14098_vm0, %v18192_v2  ;;  %v9230_v10 = vshll.u32 %v9126_v55, 16  ;;  %v13998_v11 = vld [vmem:[%s18149_s1 + $0x248] ss:$12 sps:$4 sm:$0xff]  }
 0x735   :  { %v9014_v22 = vadd.f32 %v17139_v19, %v8990_v44  ;;  %v9229_v59 = vrot.slane %v9227_v32, 7  ;;  %v14000_v44 = vld [vmem:[%s18149_s1 + $0x278] ss:$12 sps:$4 sm:$0xff]  }
 0x736   :  { %v9621_v1 = vpop.f32.mrb[240].mxu1  ;;  %v10775_v32 = vld [vmem:[#allocation3] sm:$0xfe] }
 0x737   :  { %v17369_v62 = vmax.f32 %v9014_v22, 0.0  ;;  %v9232_v45 = vor.u32 %v9230_v10, %v9229_v59  ;;  %v13545_v47 = vpop.f32.mrb[241].mxu1  ;;  %v10776_v22 = vld [vmem:[#allocation3 + $0x18] sm:$0x1]  ;;  %v18222_v59 = vld [vmem:[#allocation25_spill] sm:$0xff] }
 0x738   :  { %v9624_v12 = vpop.f32.mrb[242].mxu1  ;;  %v18223_v10 = vld [vmem:[#allocation22_spill] sm:$0xff]  ;;  %v10840_v26 = vrot.slane %v10776_v22, 1  ;;  %v10951_v47 = vld [vmem:[#allocation3] sm:$0xfc] }
 0x739   :  { %v9127_v23 = vpack.c.bf16 %v17369_v62, %v17369_v62  ;;  %9268 = vrot.lane.b32.xlu0 %v9232_v45, %s14100_s16  ;;  %v13546_v52 = vpop.f32.mrb[243].mxu1  ;;  %v10839_v45 = vrot.slane %v10775_v32, 1 }
 0x73a   :  { %9928 = vmatmul.mubr.bf16.gmra.mrb[20].mxu0 %v17172_v50  ;;  %13596 = vmatmul.mubr.bf16.gmra.mrb[20].mxu1 %v17172_v50  ;;  %v18224_v52 = vld [vmem:[#allocation24_spill] sm:$0xff] }
 0x73b   :  { %10238 = vmatprep.mubr.bf16.mxu0 %v17172_v50  ;;  %v9234_v19 = vshrl.u32 %v9127_v23, 16  ;;  %13615 = vmatprep.mubr.msk.bf16.mxu1 %vm14098_vm0, %v18192_v2  ;;  %v9237_v5 = vshll.u32 %v9127_v23, 16  ;;  %v9329_v23 = vld [vmem:[#allocation2 + $0x80] sm:$0x1f] }
 0x73d   :  { %3111 = vrot.lane.b32.xlu0 %v15078_v25, %s14103_s15  ;;  %v9236_v8 = vrot.slane %v9234_v19, 7  ;;  %v13999_v25 = vld [vmem:[%s18149_s1 + $0x260] ss:$12 sps:$4 sm:$0xff]   ;;  %v10952_v19 = vld [vmem:[#allocation3 + $0x18] sm:$0x3] }
 0x73f   :  { %v9239_v55 = vor.u32 %v9237_v5, %v9236_v8  ;;  %v10841_v8 = vsel %vm1932_vm5, %v10839_v45, %v10840_v26  ;;  %v11015_v5 = vrot.slane %v10951_v47, 2 }
 0x741   :  { %3115 = vrot.lane.b32.xlu0 %v15148_v43, %s14103_s15  ;;  %9270 = vrot.lane.b32.xlu1 %v9239_v55, %s14100_s16  ;;  %v9314_v43 = vld [vmem:[#allocation2 + $0x58] sm:$0x1f]  ;;  %v11016_v55 = vrot.slane %v10952_v19, 2 }
 0x742   :  { %10239 = vmatmul.mubr.bf16.vlgmr.msra.gmra.mrb[24].mxu0 %v17172_v50  ;;  %13616 = vmatmul.mubr.bf16.vlgmr.msra.gmra.mrb[24].mxu1 %v17172_v50 }
 0x743   :  { %10248 = vmatprep.mubr.bf16.mxu0 %v17172_v50  ;;  %13619 = vmatprep.mubr.msk.bf16.mxu1 %vm14098_vm0, %v18192_v2 }
 0x744   :  { %10558 = vmatpush1.bf16.msra.mxu0 %v17214_v27  ;;  %13636 = vmatpush3.bf16.msra.mxu1 %v13998_v11  ;;  %v18225_v11 = vld [vmem:[#allocation26_spill] sm:$0xff] }
 0x745   :  { %3119 = vrot.lane.b32.xlu0 %v15237_v40, %s14103_s15  ;;  %3113 = vrot.lane.b32.xlu1 %v15108_v3, %s14103_s15  ;;  %v14001_v3 = vld [vmem:[%s18149_s1 + $0x290] ss:$12 sps:$4 sm:$0xff]   ;;  %v9317_v40 = vld [vmem:[#allocation2 + $0x60] sm:$0x1f] }
 0x746   :  { %10559 = vmatprep.subr.bf16.mxu0 %v17222_v28  ;;  %13637 = vmatprep.subr.bf16.mxu1 %v18192_v2 }
 0x747   :  { %v9257_v58 = vpop.permute.xlu0 %9256 }
 0x748   :  { %v9315_v27 = vsel %vm17158_vm13, %v9257_v58, %v9314_v43  ;;  %10560 = vmatpush1.bf16.msra.mxu0 %v17231_v33  ;;  %13638 = vmatpush3.bf16.msra.mxu1 %v13999_v25  ;;  %v18208_v33 = vld [vmem:[#allocation8_spill] sm:$0xff]  ;;  %v11017_v25 = vsel %vm2109_vm6, %v11015_v5, %v11016_v55 }
 0x749   :  { %3123 = vrot.lane.b32.xlu0 %v15360_v6, %s14103_s15  ;;  %3117 = vrot.lane.b32.xlu1 %v15177_v53, %s14103_s15  ;;  %9316 = vst [vmem:[#allocation2 + $0x58] sm:$0x1f] %v9315_v27 }
 0x74a   :  { %10561 = vmatprep.subr.bf16.mxu0 %v17240_v48  ;;  %13639 = vmatprep.subr.bf16.mxu1 %v18192_v2  ;;  %v18212_v48 = vld [vmem:[#allocation11_spill] sm:$0xff] }
 0x74c   :  { %10562 = vmatpush1.bf16.msra.mxu0 %v17248_v54  ;;  %13640 = vmatpush3.bf16.msra.mxu1 %v14000_v44  ;;  %v9326_v54 = vld [vmem:[#allocation2 + $0x78] sm:$0x1f] }
 0x74d   :  { %3127 = vrot.lane.b32.xlu0 %v15408_v4, %s14103_s15  ;;  %3121 = vrot.lane.b32.xlu1 %v15294_v38, %s14103_s15  ;;  %v14002_v4 = vld [vmem:[%s18149_s1 + $0x2a8] ss:$12 sps:$4 sm:$0xff]  }
 0x74e   :  { %10563 = vmatprep.subr.bf16.mxu0 %v17260_v24  ;;  %13641 = vmatprep.subr.bf16.mxu1 %v18192_v2 }
 0x750   :  { %v10042_v53 = vld [vmem:[#allocation2 + $0x58] sm:$0xff]  ;;  %10564 = vmatpush1.bf16.msra.mxu0 %v17269_v49  ;;  %13642 = vmatpush3.bf16.msra.mxu1 %v14001_v3  ;;  %v9335_v3 = vld [vmem:[#allocation2 + $0x90] sm:$0x1f] }
 0x751   :  { %3131 = vrot.lane.b32.xlu0 %v15430_v46, %s14103_s15  ;;  %3125 = vrot.lane.b32.xlu1 %v15377_v37, %s14103_s15  ;;  %v9259_v6 = vpop.permute.xlu1 %9258  ;;  %v14003_v37 = vld [vmem:[%s18149_s1 + $0x2c0] ss:$12 sps:$4 sm:$0xff]  }
 0x752   :  { %10249 = vmatmul.mubr.bf16.gmra.mrb[28].mxu0 %v10042_v53  ;;  %13620 = vmatmul.mubr.bf16.gmra.mrb[28].mxu1 %v10042_v53  ;;  %v9318_v38 = vsel %vm17158_vm13, %v9259_v6, %v9317_v40 }
 0x753   :  { %9319 = vst [vmem:[#allocation2 + $0x60] sm:$0x1f] %v9318_v38  ;;  %10258 = vmatprep.mubr.bf16.mxu0 %v17172_v50  ;;  %13623 = vmatprep.mubr.msk.bf16.mxu1 %vm14098_vm0, %v18192_v2 }
 0x754   :  { %10565 = vmatprep.subr.bf16.mxu0 %v17280_v35  ;;  %13643 = vmatprep.subr.bf16.mxu1 %v18192_v2  ;;  %v18213_v35 = vld [vmem:[#allocation13_spill] sm:$0xff] }
 0x755   :  { %3135 = vrot.lane.b32.xlu0 %v15464_v56, %s14103_s15  ;;  %3129 = vrot.lane.b32.xlu1 %v15415_v16, %s14103_s15  ;;  %v9320_v16 = vld [vmem:[#allocation2 + $0x68] sm:$0x1f] }
 0x756   :  { %10566 = vmatpush1.bf16.msra.mxu0 %v17288_v21  ;;  %13644 = vmatpush3.bf16.msra.mxu1 %v14002_v4  ;;  %v18214_v21 = vld [vmem:[#allocation15_spill] sm:$0xff] }
 0x757   :  { %10567 = vmatprep.subr.bf16.mxu0 %v17299_v42  ;;  %13645 = vmatprep.subr.bf16.mxu1 %v18192_v2  ;;  %v14004_v42 = vld [vmem:[%s18149_s1 + $0x2d8] ss:$12 sps:$4 sm:$0xff]  }
 0x759   :  { %3139 = vrot.lane.b32.xlu0 %v15553_v60, %s14103_s15  ;;  %3133 = vrot.lane.b32.xlu1 %v15439_v7, %s14103_s15  ;;  %v14005_v7 = vld [vmem:[%s18149_s1 + $0x2f0] ss:$12 sps:$4 sm:$0xff]   ;;  %s14105_s1 = smov 68  }
 0x75a   :  { %v10043_v46 = vld [vmem:[#allocation2 + $0x60] sm:$0xff]  ;;  %10568 = vmatpush1.bf16.msra.mxu0 %v17309_v30  ;;  %13646 = vmatpush3.bf16.msra.mxu1 %v14003_v37  ;;  %v9323_v60 = vld [vmem:[#allocation2 + $0x70] sm:$0x1f] }
 0x75b   :  { %v9261_v56 = vpop.permute.xlu0 %9260  ;;  %10259 = vmatmul.mubr.bf16.gmra.mrb[32].mxu0 %v10043_v46  ;;  %13624 = vmatmul.mubr.bf16.gmra.mrb[32].mxu1 %v10043_v46 }
 0x75c   :  { %v9321_v28 = vsel %vm17158_vm13, %v9261_v56, %v9320_v16  ;;  %10268 = vmatprep.mubr.bf16.mxu0 %v17172_v50  ;;  %13627 = vmatprep.mubr.msk.bf16.mxu1 %vm14098_vm0, %v18192_v2 }
 0x75d   :  { %6079 = vrot.lane.b32.xlu0 %v15976_v31, %s14104_s25  ;;  %3137 = vrot.lane.b32.xlu1 %v15480_v14, %s14103_s15  ;;  %9322 = vst [vmem:[#allocation2 + $0x68] sm:$0x1f] %v9321_v28 }
 0x75e   :  { %10569 = vmatprep.subr.bf16.mxu0 %v17319_v36  ;;  %13647 = vmatprep.subr.bf16.mxu1 %v18192_v2  ;;  %v18215_v36 = vld [vmem:[#allocation16_spill] sm:$0xff] }
 0x75f   :  { %10570 = vmatpush1.bf16.msra.mxu0 %v17326_v13  ;;  %13648 = vmatpush3.bf16.msra.mxu1 %v14004_v42  ;;  %v18218_v13 = vld [vmem:[#allocation21_spill] sm:$0xff] }
 0x760   :  { %10571 = vmatprep.subr.bf16.mxu0 %v17337_v51  ;;  %13649 = vmatprep.subr.bf16.mxu1 %v18192_v2  ;;  %v18220_v51 = vld [vmem:[#allocation23_spill] sm:$0xff] }
 0x761   :  { %6083 = vrot.lane.b32.xlu0 %v16049_v15, %s14104_s25  ;;  %3141 = vrot.lane.b32.xlu1 %v15574_v0, %s14103_s15 }
 0x763   :  { %10572 = vmatpush1.bf16.msra.mxu0 %v17349_v17  ;;  %13650 = vmatpush3.bf16.msra.mxu1 %v14005_v7  ;;  %v18221_v17 = vld [vmem:[#allocation20_spill] sm:$0xff] }
 0x764   :  { %v10044_v14 = vld [vmem:[#allocation2 + $0x68] sm:$0xff] }
 0x765   :  { %6087 = vrot.lane.b32.xlu0 %v16156_v20, %s14104_s25  ;;  %6081 = vrot.lane.b32.xlu1 %v16016_v39, %s14104_s25  ;;  %v18206_v39 = vld [vmem:[#allocation7_spill] sm:$0xff]  ;;  %v18207_v20 = vld [vmem:[#allocation10_spill] sm:$0xff] }
 0x766   :  { %10269 = vmatmul.mubr.bf16.gmra.mrb[36].mxu0 %v10044_v14  ;;  %13628 = vmatmul.mubr.bf16.gmra.mrb[36].mxu1 %v10044_v14 }
 0x767   :  { %v9263_v31 = vpop.permute.xlu1 %9262  ;;  %10278 = vmatprep.mubr.bf16.mxu0 %v17172_v50  ;;  %13631 = vmatprep.mubr.msk.bf16.mxu1 %vm14098_vm0, %v18192_v2 }
 0x768   :  { %v9324_v0 = vsel %vm17158_vm13, %v9263_v31, %v9323_v60 }
 0x769   :  { %6091 = vrot.lane.b32.xlu0 %v16230_v41, %s14104_s25  ;;  %9325 = vst [vmem:[#allocation2 + $0x70] sm:$0x1f] %v9324_v0  ;;  %6085 = vrot.lane.b32.xlu1 %v16098_v61, %s14104_s25  ;;  %v18209_v61 = vld [vmem:[#allocation12_spill] sm:$0xff]  ;;  %v18210_v41 = vld [vmem:[#allocation9_spill] sm:$0xff] }
 0x76d   :  { %6095 = vrot.lane.b32.xlu0 %v16268_v9, %s14104_s25  ;;  %6089 = vrot.lane.b32.xlu1 %v18206_v39, %s14104_s25  ;;  %v18211_v9 = vld [vmem:[#allocation14_spill] sm:$0xff] }
 0x770   :  { %v10045_v15 = vld [vmem:[#allocation2 + $0x70] sm:$0xff] }
 0x771   :  { %6099 = vrot.lane.b32.xlu0 %v18207_v20, %s14104_s25  ;;  %6093 = vrot.lane.b32.xlu1 %v18208_v33, %s14104_s25 }
 0x772   :  { %10279 = vmatmul.mubr.bf16.gmra.mrb[40].mxu0 %v10045_v15  ;;  %13632 = vmatmul.mubr.bf16.gmra.mrb[40].mxu1 %v10045_v15 }
 0x773   :  { %10589 = vmatprep.mubr.bf16.mxu0 %v17172_v50  ;;  %13651 = vmatprep.mubr.msk.bf16.mxu1 %vm14098_vm0, %v18192_v2 }
 0x775   :  { %6103 = vrot.lane.b32.xlu0 %v18209_v61, %s14104_s25  ;;  %6097 = vrot.lane.b32.xlu1 %v18210_v41, %s14104_s25 }
 0x779   :  { %6107 = vrot.lane.b32.xlu0 %v18211_v9, %s14104_s25  ;;  %6101 = vrot.lane.b32.xlu1 %v18212_v48, %s14104_s25 }
 0x77b   :  { %v9265_v24 = vpop.permute.xlu0 %9264 }
 0x77c   :  { %v9327_v49 = vsel %vm17158_vm13, %v9265_v24, %v9326_v54 }
 0x77d   :  { %9328 = vst [vmem:[#allocation2 + $0x78] sm:$0x1f] %v9327_v49  ;;  %9047 = vrot.lane.b32.xlu0 %v16922_v29, %s14105_s1  ;;  %6105 = vrot.lane.b32.xlu1 %v18213_v35, %s14104_s25  ;;  %v18216_v29 = vld [vmem:[#allocation19_spill] sm:$0xff] }
 0x781   :  { %9051 = vrot.lane.b32.xlu0 %v16992_v63, %s14105_s1  ;;  %6109 = vrot.lane.b32.xlu1 %v18214_v21, %s14104_s25  ;;  %v18217_v63 = vld [vmem:[#allocation17_spill] sm:$0xff] }
 0x784   :  { %v10392_v30 = vld [vmem:[#allocation2 + $0x78] sm:$0xff] }
 0x785   :  { %9055 = vrot.lane.b32.xlu0 %v17045_v57, %s14105_s1  ;;  %9049 = vrot.lane.b32.xlu1 %v18215_v36, %s14105_s1  ;;  %v18219_v57 = vld [vmem:[#allocation18_spill] sm:$0xff] }
 0x786   :  { %10590 = vmatmul.mubr.bf16.vlgmr.msra.gmra.mrb[44].mxu0 %v10392_v30  ;;  %13652 = vmatmul.mubr.bf16.vlgmr.msra.gmra.mrb[44].mxu1 %v10392_v30 }
 0x787   :  { %10599 = vmatprep.mubr.bf16.mxu0 %v17172_v50  ;;  %13655 = vmatprep.mubr.msk.bf16.mxu1 %vm14098_vm0, %v18192_v2 }
 0x789   :  { %9059 = vrot.lane.b32.xlu0 %v18216_v29, %s14105_s1  ;;  %9053 = vrot.lane.b32.xlu1 %v18217_v63, %s14105_s1 }
 0x78d   :  { %9063 = vrot.lane.b32.xlu0 %v18218_v13, %s14105_s1  ;;  %9057 = vrot.lane.b32.xlu1 %v18219_v57, %s14105_s1 }
 0x791   :  { %9067 = vrot.lane.b32.xlu0 %v18220_v51, %s14105_s1  ;;  %9061 = vrot.lane.b32.xlu1 %v18221_v17, %s14105_s1 }
 0x795   :  { %9071 = vrot.lane.b32.xlu0 %v18222_v59, %s14105_s1  ;;  %9065 = vrot.lane.b32.xlu1 %v18223_v10, %s14105_s1 }
 0x797   :  { %v9267_v1 = vpop.permute.xlu1 %9266 }
 0x798   :  { %v9330_v12 = vsel %vm17158_vm13, %v9267_v1, %v9329_v23 }
 0x799   :  { %9331 = vst [vmem:[#allocation2 + $0x80] sm:$0x1f] %v9330_v12  ;;  %9075 = vrot.lane.b32.xlu0 %v17357_v18, %s14105_s1  ;;  %9069 = vrot.lane.b32.xlu1 %v18224_v52, %s14105_s1  ;;  %v9332_v18 = vld [vmem:[#allocation2 + $0x88] sm:$0x1f] }
 0x79d   :  { %10887 = vrot.lane.b32.xlu0 %v10841_v8, %s14100_s16  ;;  %9073 = vrot.lane.b32.xlu1 %v18225_v11, %s14105_s1 }
 0x7a0   :  { %v10393_v43 = vld [vmem:[#allocation2 + $0x80] sm:$0xff] }
 0x7a1   :  { %11063 = vrot.lane.b32.xlu0 %v11017_v25, %s14101_s5  ;;  %9077 = vrot.lane.b32.xlu1 %v17369_v62, %s14105_s1 }
 0x7a2   :  { %10600 = vmatmul.mubr.bf16.gmra.mrb[48].mxu0 %v10393_v43  ;;  %13656 = vmatmul.mubr.bf16.gmra.mrb[48].mxu1 %v10393_v43 }
 0x7a3   :  { %10609 = vmatprep.mubr.bf16.mxu0 %v17172_v50  ;;  %13659 = vmatprep.mubr.msk.bf16.mxu1 %vm14098_vm0, %v18192_v2 }
 0x7ab   :  { %v9269_v58 = vpop.permute.xlu0 %9268 }
 0x7ac   :  { %v9333_v27 = vsel %vm17158_vm13, %v9269_v58, %v9332_v18 }
 0x7ad   :  { %9334 = vst [vmem:[#allocation2 + $0x88] sm:$0x1f] %v9333_v27 }
 0x7af   :  { %v3112_v44 = vpop.permute.xlu0 %3111 }
 0x7b0   :  { %3160 = vst.msk [vmem:[#allocation4] sm:$0xff] %vm3159_vm14, %v3112_v44 }
 0x7b3   :  { %v9271_v53 = vpop.permute.xlu1 %9270  ;;  %v3116_v62 = vpop.permute.xlu0 %3115 }
 0x7b4   :  { %v9336_v40 = vsel %vm17158_vm13, %v9271_v53, %v9335_v3  ;;  %3162 = vst.msk [vmem:[#allocation4 + $0x20] sm:$0xff] %vm3159_vm14, %v3116_v62  ;;  %v10394_v6 = vld [vmem:[#allocation2 + $0x88] sm:$0xff] }
 0x7b5   :  { %9337 = vst [vmem:[#allocation2 + $0x90] sm:$0x1f] %v9336_v40  ;;  %10610 = vmatmul.mubr.bf16.gmra.mrb[52].mxu0 %v10394_v6  ;;  %13660 = vmatmul.mubr.bf16.gmra.mrb[52].mxu1 %v10394_v6 }
 0x7b6   :  { %10619 = vmatprep.mubr.bf16.mxu0 %v17172_v50  ;;  %13663 = vmatprep.mubr.msk.bf16.mxu1 %vm14098_vm0, %v18192_v2 }
 0x7b7   :  { %v3114_v38 = vpop.permute.xlu1 %3113  ;;  %v3120_v4 = vpop.permute.xlu0 %3119 }
 0x7b8   :  { %3161 = vst.msk [vmem:[#allocation4 + $0x10] sm:$0xff] %vm3159_vm14, %v3114_v38  ;;  %3164 = vst.msk [vmem:[#allocation4 + $0x40] sm:$0xff] %vm3159_vm14, %v3120_v4 }
 0x7b9   :  { %v9548_v37 = vpop.f32.mrb[244].mxu0  ;;  %v9629_v34 = vpop.f32.mrb[244].mxu1 }
 0x7ba   :  { %9666 = vst [vmem:[#allocation3 + $0x30] sm:$0xff] %v9548_v37  ;;  %v9550_v46 = vpop.f32.mrb[245].mxu0  ;;  %v13549_v16 = vpop.f32.mrb[245].mxu1  ;;  %11159 = vrot.lane.b32.xlu0 %v9548_v37, %s14102_s22 }
 0x7bb   :  { %v3118_v56 = vpop.permute.xlu1 %3117  ;;  %v3124_v42 = vpop.permute.xlu0 %3123  ;;  %9667 = vst [vmem:[#allocation3 + $0x38] sm:$0xff] %v9550_v46 }
 0x7bc   :  { %3163 = vst.msk [vmem:[#allocation4 + $0x30] sm:$0xff] %vm3159_vm14, %v3118_v56  ;;  %3166 = vst.msk [vmem:[#allocation4 + $0x60] sm:$0xff] %vm3159_vm14, %v3124_v42  ;;  %v9552_v28 = vpop.f32.mrb[246].mxu0  ;;  %v9632_v7 = vpop.f32.mrb[246].mxu1  ;;  %v10395_v14 = vld [vmem:[#allocation2 + $0x90] sm:$0xff] }
 0x7bd   :  { %9669 = vst [vmem:[#allocation3 + $0x48] sm:$0xff] %v9552_v28  ;;  %10620 = vmatmul.mubr.bf16.gmra.mrb[56].mxu0 %v10395_v14  ;;  %13664 = vmatmul.mubr.bf16.gmra.mrb[56].mxu1 %v10395_v14  ;;  %v9554_v60 = vpop.f32.mrb[247].mxu0  ;;  %v13550_v31 = vpop.f32.mrb[247].mxu1 }
 0x7be   :  { %9670 = vst [vmem:[#allocation3 + $0x50] sm:$0xff] %v9554_v60  ;;  %10629 = vmatprep.mubr.bf16.mxu0 %v17172_v50  ;;  %13667 = vmatprep.mubr.msk.bf16.mxu1 %vm14098_vm0, %v18192_v2  ;;  %vm9095_vm0 = vcmask 818720  }
 0x7bf   :  { %v3122_v0 = vpop.permute.xlu1 %3121  ;;  %v3128_v39 = vpop.permute.xlu0 %3127 }
 0x7c0   :  { %3165 = vst.msk [vmem:[#allocation4 + $0x50] sm:$0xff] %vm3159_vm14, %v3122_v0  ;;  %3168 = vst.msk [vmem:[#allocation4 + $0x80] sm:$0xff] %vm3159_vm14, %v3128_v39 }
 0x7c1   :  { %v10777_v15 = vld [vmem:[#allocation3 + $0x30] sm:$0xfe] }
 0x7c2   :  { %v11367_v61 = vld [vmem:[#allocation3 + $0x38] sm:$0xfc]  ;;  %v10842_v24 = vrot.slane %v10777_v15, 1  ;;  %v10953_v29 = vld [vmem:[#allocation3 + $0x30] sm:$0xfc] }
 0x7c3   :  { %v3126_v20 = vpop.permute.xlu1 %3125  ;;  %v3132_v33 = vpop.permute.xlu0 %3131  ;;  %v11431_v30 = vrot.slane %v11367_v61, 2  ;;  %v11018_v10 = vrot.slane %v10953_v29, 2 }
 0x7c4   :  { %3167 = vst.msk [vmem:[#allocation4 + $0x70] sm:$0xff] %vm3159_vm14, %v3126_v20  ;;  %3170 = vst.msk [vmem:[#allocation4 + $0xa0] sm:$0xff] %vm3159_vm14, %v3132_v33  ;;  %v10778_v41 = vld [vmem:[#allocation3 + $0x48] sm:$0x1] }
 0x7c5   :  { %v10954_v9 = vld [vmem:[#allocation3 + $0x48] sm:$0x3]  ;;  %v9558_v48 = vpop.f32.mrb[248].mxu0  ;;  %v9637_v54 = vpop.f32.mrb[248].mxu1  ;;  %v10843_v2 = vrot.slane %v10778_v41, 1  ;;  %10630 = vmatmul.mubr.bf16.gmra.mrb[60].mxu0 %v17172_v50  ;;  %13668 = vmatmul.mubr.bf16.gmra.mrb[60].mxu1 %v17172_v50 }
 0x7c6   :  { %v11368_v49 = vld [vmem:[#allocation3 + $0x50] sm:$0x3]  ;;  %9672 = vst [vmem:[#allocation3 + $0x60] sm:$0xff] %v9558_v48  ;;  %9674 = vst.msk [vmem:[#allocation3 + $0x70] sm:$0xff] %vm748_vm7, %v9637_v54  ;;  %v9560_v35 = vpop.f32.mrb[249].mxu0  ;;  %v13553_v21 = vpop.f32.mrb[249].mxu1 }
 0x7c7   :  { %v11432_v36 = vrot.slane %v11368_v49, 2  ;;  %v3130_v63 = vpop.permute.xlu1 %3129  ;;  %v3136_v13 = vpop.permute.xlu0 %3135  ;;  %9673 = vst [vmem:[#allocation3 + $0x68] sm:$0xff] %v9560_v35  ;;  %v10844_v57 = vsel %vm1932_vm5, %v10842_v24, %v10843_v2  ;;  %v11019_v51 = vrot.slane %v10954_v9, 2 }
 0x7c8   :  { %3169 = vst.msk [vmem:[#allocation4 + $0x90] sm:$0xff] %vm3159_vm14, %v3130_v63  ;;  %3172 = vst.msk [vmem:[#allocation4 + $0xc0] sm:$0xff] %vm3159_vm14, %v3136_v13  ;;  %v9562_v17 = vpop.f32.mrb[250].mxu0  ;;  %v9640_v50 = vpop.f32.mrb[250].mxu1  ;;  %10889 = vrot.lane.b32.xlu1 %v10844_v57, %s14100_s16 }
 0x7c9   :  { %v11433_v32 = vsel %vm2109_vm6, %v11431_v30, %v11432_v36  ;;  %9675 = vst [vmem:[#allocation3 + $0x78] sm:$0xff] %v9562_v17  ;;  %9677 = vst.msk [vmem:[#allocation3 + $0x88] sm:$0xff] %vm748_vm7, %v9640_v50  ;;  %v9564_v22 = vpop.f32.mrb[251].mxu0  ;;  %v13554_v59 = vpop.f32.mrb[251].mxu1  ;;  %v11020_v23 = vsel %vm2109_vm6, %v11018_v10, %v11019_v51 }
 0x7ca   :  { %11479 = vrot.lane.b32.xlu0 %v11433_v32, %s14100_s16  ;;  %9676 = vst [vmem:[#allocation3 + $0x80] sm:$0xff] %v9564_v22 }
 0x7cb   :  { %v3134_v45 = vpop.permute.xlu1 %3133  ;;  %v3140_v26 = vpop.permute.xlu0 %3139 }
 0x7cc   :  { %3171 = vst.msk [vmem:[#allocation4 + $0xb0] sm:$0xff] %vm3159_vm14, %v3134_v45  ;;  %3174 = vst.msk [vmem:[#allocation4 + $0xe0] sm:$0xff] %vm3159_vm14, %v3140_v26  ;;  %11065 = vrot.lane.b32.xlu1 %v11020_v23, %s14101_s5 }
 0x7cd   :  { %v17596_v1 = vpop.f32.mrb[252].mxu0  ;;  %v9645_v47 = vpop.f32.mrb[252].mxu1  ;;  %v10779_v52 = vld [vmem:[#allocation3 + $0x60] sm:$0xfe] }
 0x7ce   :  { %11575 = vrot.lane.b32.xlu0 %v9560_v35, %s14101_s5  ;;  %9678 = vst [vmem:[#allocation3 + $0x90] sm:$0xff] %v17596_v1  ;;  %9680 = vst.msk [vmem:[#allocation3 + $0xa0] sm:$0xff] %vm748_vm7, %v9645_v47  ;;  %v9570_v19 = vpop.f32.mrb[253].mxu0  ;;  %v13557_v12 = vpop.f32.mrb[253].mxu1  ;;  %v11369_v55 = vld [vmem:[#allocation3 + $0x68] sm:$0xfc] }
 0x7cf   :  { %v3138_v8 = vpop.permute.xlu1 %3137  ;;  %v6080_v5 = vpop.permute.xlu0 %6079  ;;  %9679 = vst [vmem:[#allocation3 + $0x98] sm:$0xff] %v9570_v19  ;;  %v10845_v44 = vrot.slane %v10779_v52, 1  ;;  %v11434_v62 = vrot.slane %v11369_v55, 2  ;;  %v10955_v6 = vld [vmem:[#allocation3 + $0x60] sm:$0xfc] }
 0x7d0   :  { %3173 = vst.msk [vmem:[#allocation4 + $0xd0] sm:$0xff] %vm3159_vm14, %v3138_v8  ;;  %v9648_v11 = vpop.f32.mrb[254].mxu1  ;;  %v9572_v25 = vpop.f32.mrb[254].mxu0  ;;  %11161 = vrot.lane.b32.xlu1 %v9558_v48, %s14102_s22  ;;  %v10780_v43 = vld [vmem:[#allocation3 + $0x78] sm:$0x1]  ;;  %v11021_v56 = vrot.slane %v10955_v6, 2 }
 0x7d1   :  { %6128 = vst.msk [vmem:[#allocation4] sm:$0xff] %vm6127_vm15, %v6080_v5  ;;  %v10956_v18 = vld [vmem:[#allocation3 + $0x78] sm:$0x3]  ;;  %9681 = vst [vmem:[#allocation3 + $0xa8] sm:$0xff] %v9572_v25  ;;  %v9574_v58 = vpop.f32.mrb[255].mxu0  ;;  %v13558_v27 = vpop.f32.mrb[255].mxu1 }
 0x7d2   :  { %9683 = vst.msk [vmem:[#allocation3 + $0xb8] sm:$0xff] %vm748_vm7, %v9648_v11  ;;  %v10846_v3 = vrot.slane %v10780_v43, 1  ;;  %v11370_v53 = vld [vmem:[#allocation3 + $0x80] sm:$0x3]  ;;  %9682 = vst [vmem:[#allocation3 + $0xb0] sm:$0xff] %v9574_v58  ;;  %v11022_v34 = vrot.slane %v10956_v18, 2 }
 0x7d3   :  { %v11435_v40 = vrot.slane %v11370_v53, 2  ;;  %v3142_v38 = vpop.permute.xlu1 %3141  ;;  %v6084_v4 = vpop.permute.xlu0 %6083  ;;  %v11640_v16 = vld [vmem:[#allocation3 + $0x80] sm:$0x1]  ;;  %v11639_v42 = vld [vmem:[#allocation3 + $0x68] sm:$0xfe] }
 0x7d4   :  { %v10847_v37 = vsel %vm1932_vm5, %v10845_v44, %v10846_v3  ;;  %3175 = vst.msk [vmem:[#allocation4 + $0xf0] sm:$0xff] %vm3159_vm14, %v3142_v38  ;;  %v11023_v60 = vsel %vm2109_vm6, %v11021_v56, %v11022_v34  ;;  %v11704_v31 = vrot.slane %v11640_v16, 1  ;;  %v11703_v0 = vrot.slane %v11639_v42, 1 }
 0x7d5   :  { %6130 = vst.msk [vmem:[#allocation4 + $0x20] sm:$0xff] %vm6127_vm15, %v6084_v4  ;;  %10891 = vrot.lane.b32.xlu0 %v10847_v37, %s14100_s16  ;;  %v11436_v46 = vsel %vm2109_vm6, %v11434_v62, %v11435_v40  ;;  %v10781_v28 = vld [vmem:[#allocation3 + $0x90] sm:$0xfe] }
 0x7d6   :  { %11481 = vrot.lane.b32.xlu1 %v11436_v46, %s14100_s16  ;;  %v10848_v33 = vrot.slane %v10781_v28, 1  ;;  %v11705_v2 = vsel %vm1932_vm5, %v11703_v0, %v11704_v31  ;;  %v10957_v35 = vld [vmem:[#allocation3 + $0x90] sm:$0xfc]  ;;  %v11371_v17 = vld [vmem:[#allocation3 + $0x98] sm:$0xfc] }
 0x7d7   :  { %v6082_v7 = vpop.permute.xlu1 %6081  ;;  %v6088_v14 = vpop.permute.xlu0 %6087  ;;  %v11024_v51 = vrot.slane %v10957_v35, 2  ;;  %v11641_v32 = vld [vmem:[#allocation3 + $0x98] sm:$0xfe]  ;;  %v11437_v26 = vrot.slane %v11371_v17, 2 }
 0x7d8   :  { %6129 = vst.msk [vmem:[#allocation4 + $0x10] sm:$0xff] %vm6127_vm15, %v6082_v7  ;;  %6132 = vst.msk [vmem:[#allocation4 + $0x40] sm:$0xff] %vm6127_vm15, %v6088_v14  ;;  %v10782_v39 = vld [vmem:[#allocation3 + $0xa8] sm:$0x1]  ;;  %v11706_v23 = vrot.slane %v11641_v32, 1 }
 0x7d9   :  { %11067 = vrot.lane.b32.xlu0 %v11023_v60, %s14101_s5  ;;  %v17615_v15 = vpop.f32.mrb[0].mxu0  ;;  %v9653_v20 = vpop.f32.mrb[0].mxu1  ;;  %v10849_v61 = vrot.slane %v10782_v39, 1  ;;  %v10958_v41 = vld [vmem:[#allocation3 + $0xa8] sm:$0x3] }
 0x7da   :  { %11577 = vrot.lane.b32.xlu1 %v9570_v19, %s14101_s5  ;;  %9684 = vst [vmem:[#allocation3 + $0xc0] sm:$0xff] %v17615_v15  ;;  %9686 = vst.msk [vmem:[#allocation3 + $0xd0] sm:$0xff] %vm748_vm7, %v9653_v20  ;;  %v9580_v9 = vpop.f32.mrb[1].mxu0  ;;  %v13561_v48 = vpop.f32.mrb[1].mxu1  ;;  %v11025_v36 = vrot.slane %v10958_v41, 2 }
 0x7db   :  { %9685 = vst [vmem:[#allocation3 + $0xc8] sm:$0xff] %v9580_v9  ;;  %v9582_v54 = vpop.f32.mrb[2].mxu0  ;;  %v9656_v24 = vpop.f32.mrb[2].mxu1  ;;  %v10850_v49 = vsel %vm1932_vm5, %v10848_v33, %v10849_v61  ;;  %v11372_v29 = vld [vmem:[#allocation3 + $0xb0] sm:$0x3] }
 0x7dc   :  { %9687 = vst [vmem:[#allocation3 + $0xd8] sm:$0xff] %v9582_v54  ;;  %9689 = vst.msk [vmem:[#allocation3 + $0xe8] sm:$0xff] %vm748_vm7, %v9656_v24  ;;  %v6086_v21 = vpop.permute.xlu1 %6085  ;;  %v6092_v30 = vpop.permute.xlu0 %6091  ;;  %v11642_v57 = vld [vmem:[#allocation3 + $0xb0] sm:$0x1]  ;;  %v11438_v50 = vrot.slane %v11372_v29, 2  ;;  %v11026_v10 = vsel %vm2109_vm6, %v11024_v51, %v11025_v36 }
 0x7dd   :  { %11751 = vrot.lane.b32.xlu0 %v11705_v2, %s14102_s22  ;;  %6131 = vst.msk [vmem:[#allocation4 + $0x30] sm:$0xff] %vm6127_vm15, %v6086_v21  ;;  %6134 = vst.msk [vmem:[#allocation4 + $0x60] sm:$0xff] %vm6127_vm15, %v6092_v30  ;;  %v9584_v63 = vpop.f32.mrb[3].mxu0  ;;  %v13562_v13 = vpop.f32.mrb[3].mxu1  ;;  %v11707_v45 = vrot.slane %v11642_v57, 1 }
 0x7de   :  { %10893 = vrot.lane.b32.xlu1 %v10850_v49, %s14100_s16  ;;  %9688 = vst [vmem:[#allocation3 + $0xe0] sm:$0xff] %v9584_v63  ;;  %v11439_v47 = vsel %vm2109_vm6, %v11437_v26, %v11438_v50 }
 0x7df   :  { %v11708_v52 = vsel %vm1932_vm5, %v11706_v23, %v11707_v45 }
 0x7e0   :  { %v6090_v22 = vpop.permute.xlu1 %6089  ;;  %v6096_v59 = vpop.permute.xlu0 %6095 }
 0x7e1   :  { %11163 = vrot.lane.b32.xlu0 %v17596_v1, %s14102_s22  ;;  %6133 = vst.msk [vmem:[#allocation4 + $0x50] sm:$0xff] %vm6127_vm15, %v6090_v22  ;;  %6136 = vst.msk [vmem:[#allocation4 + $0x80] sm:$0xff] %vm6127_vm15, %v6096_v59  ;;  %v10783_v43 = vld [vmem:[#allocation3 + $0xc0] sm:$0xfe] }
 0x7e2   :  { %11069 = vrot.lane.b32.xlu1 %v11026_v10, %s14101_s5  ;;  %v11373_v44 = vld [vmem:[#allocation3 + $0xc8] sm:$0xfc]  ;;  %v10851_v4 = vrot.slane %v10783_v43, 1  ;;  %v10959_v34 = vld [vmem:[#allocation3 + $0xc0] sm:$0xfc] }
 0x7e3   :  { %v10784_v1 = vld [vmem:[#allocation3 + $0xd8] sm:$0x1]  ;;  %v11440_v37 = vrot.slane %v11373_v44, 2  ;;  %v11027_v14 = vrot.slane %v10959_v34, 2  ;;  %v11643_v60 = vld [vmem:[#allocation3 + $0xc8] sm:$0xfe] }
 0x7e4   :  { %v6094_v19 = vpop.permute.xlu1 %6093  ;;  %v6100_v12 = vpop.permute.xlu0 %6099  ;;  %v10852_v27 = vrot.slane %v10784_v1, 1  ;;  %v10960_v40 = vld [vmem:[#allocation3 + $0xd8] sm:$0x3]  ;;  %v11709_v41 = vrot.slane %v11643_v60, 1 }
 0x7e5   :  { %11483 = vrot.lane.b32.xlu0 %v11439_v47, %s14100_s16  ;;  %6135 = vst.msk [vmem:[#allocation4 + $0x70] sm:$0xff] %vm6127_vm15, %v6094_v19  ;;  %6138 = vst.msk [vmem:[#allocation4 + $0xa0] sm:$0xff] %vm6127_vm15, %v6100_v12  ;;  %v17638_v8 = vpop.f32.mrb[4].mxu0  ;;  %v9972_v5 = vpop.f32.mrb[4].mxu1  ;;  %v11374_v55 = vld [vmem:[#allocation3 + $0xe0] sm:$0x3] }
 0x7e6   :  { %11753 = vrot.lane.b32.xlu1 %v11708_v52, %s14102_s22  ;;  %10011 = vst [vmem:[#allocation3 + $0xf0] sm:$0xff] %v17638_v8  ;;  %10013 = vst.msk [vmem:[#allocation3 + $0x100] sm:$0xff] %vm748_vm7, %v9972_v5  ;;  %v9891_v11 = vpop.f32.mrb[5].mxu0  ;;  %v13581_v25 = vpop.f32.mrb[5].mxu1  ;;  %v11441_v62 = vrot.slane %v11374_v55, 2  ;;  %v10853_v46 = vsel %vm1932_vm5, %v10851_v4, %v10852_v27  ;;  %v11028_v16 = vrot.slane %v10960_v40, 2 }
 0x7e7   :  { %10012 = vst [vmem:[#allocation3 + $0xf8] sm:$0xff] %v9891_v11  ;;  %v9893_v18 = vpop.f32.mrb[6].mxu0  ;;  %v9975_v58 = vpop.f32.mrb[6].mxu1  ;;  %v11644_v7 = vld [vmem:[#allocation3 + $0xe0] sm:$0x1] }
 0x7e8   :  { %10014 = vst [vmem:[#allocation3 + $0x108] sm:$0xff] %v9893_v18  ;;  %10016 = vst.msk [vmem:[#allocation3 + $0x118] sm:$0xff] %vm748_vm7, %v9975_v58  ;;  %v6098_v3 = vpop.permute.xlu1 %6097  ;;  %v6104_v53 = vpop.permute.xlu0 %6103  ;;  %v11442_v28 = vsel %vm2109_vm6, %v11440_v37, %v11441_v62  ;;  %v11029_v31 = vsel %vm2109_vm6, %v11027_v14, %v11028_v16  ;;  %v11710_v0 = vrot.slane %v11644_v7, 1 }
 0x7e9   :  { %11579 = vrot.lane.b32.xlu0 %v9580_v9, %s14101_s5  ;;  %6137 = vst.msk [vmem:[#allocation4 + $0x90] sm:$0xff] %vm6127_vm15, %v6098_v3  ;;  %6140 = vst.msk [vmem:[#allocation4 + $0xc0] sm:$0xff] %vm6127_vm15, %v6104_v53  ;;  %v9895_v6 = vpop.f32.mrb[7].mxu0  ;;  %v13582_v38 = vpop.f32.mrb[7].mxu1 }
 0x7ea   :  { %11165 = vrot.lane.b32.xlu1 %v17615_v15, %s14102_s22  ;;  %10015 = vst [vmem:[#allocation3 + $0x110] sm:$0xff] %v9895_v6  ;;  %v11711_v54 = vsel %vm1932_vm5, %v11709_v41, %v11710_v0 }
 0x7ec   :  { %v6102_v56 = vpop.permute.xlu1 %6101  ;;  %v6108_v42 = vpop.permute.xlu0 %6107 }
 0x7ed   :  { %10895 = vrot.lane.b32.xlu0 %v10853_v46, %s14100_s16  ;;  %6139 = vst.msk [vmem:[#allocation4 + $0xb0] sm:$0xff] %vm6127_vm15, %v6102_v56  ;;  %6142 = vst.msk [vmem:[#allocation4 + $0xe0] sm:$0xff] %vm6127_vm15, %v6108_v42  ;;  %v10785_v39 = vld [vmem:[#allocation3 + $0xf0] sm:$0xfe] }
 0x7ee   :  { %11485 = vrot.lane.b32.xlu1 %v11442_v28, %s14100_s16  ;;  %v10854_v48 = vrot.slane %v10785_v39, 1  ;;  %v10961_v24 = vld [vmem:[#allocation3 + $0xf0] sm:$0xfc]  ;;  %v11375_v17 = vld [vmem:[#allocation3 + $0xf8] sm:$0xfc] }
 0x7ef   :  { %v10786_v15 = vld [vmem:[#allocation3 + $0x108] sm:$0x1]  ;;  %v11030_v51 = vrot.slane %v10961_v24, 2  ;;  %v11645_v59 = vld [vmem:[#allocation3 + $0xf8] sm:$0xfe]  ;;  %v11443_v12 = vrot.slane %v11375_v17, 2 }
 0x7f0   :  { %v6106_v20 = vpop.permute.xlu1 %6105  ;;  %v9048_v33 = vpop.permute.xlu0 %9047  ;;  %v10855_v61 = vrot.slane %v10786_v15, 1  ;;  %v10962_v9 = vld [vmem:[#allocation3 + $0x108] sm:$0x3]  ;;  %v11712_v52 = vrot.slane %v11645_v59, 1 }
 0x7f1   :  { %11071 = vrot.lane.b32.xlu0 %v11029_v31, %s14101_s5  ;;  %6141 = vst.msk [vmem:[#allocation4 + $0xd0] sm:$0xff] %vm6127_vm15, %v6106_v20  ;;  %v11031_v21 = vrot.slane %v10962_v9, 2  ;;  %v11376_v30 = vld [vmem:[#allocation3 + $0x110] sm:$0x3] }
 0x7f2   :  { %9096 = vst.msk [vmem:[#allocation4] sm:$0xff] %vm9095_vm0, %v9048_v33  ;;  %11581 = vrot.lane.b32.xlu1 %v9891_v11, %s14101_s5  ;;  %v10856_v35 = vsel %vm1932_vm5, %v10854_v48, %v10855_v61  ;;  %v11646_v63 = vld [vmem:[#allocation3 + $0x110] sm:$0x1]  ;;  %v11444_v22 = vrot.slane %v11376_v30, 2 }
 0x7f3   :  { %v11032_v26 = vsel %vm2109_vm6, %v11030_v51, %v11031_v21  ;;  %v11713_v23 = vrot.slane %v11646_v63, 1 }
 0x7f4   :  { %v6110_v2 = vpop.permute.xlu1 %6109  ;;  %v9052_v49 = vpop.permute.xlu0 %9051  ;;  %v11445_v1 = vsel %vm2109_vm6, %v11443_v12, %v11444_v22 }
 0x7f5   :  { %11755 = vrot.lane.b32.xlu0 %v11711_v54, %s14102_s22  ;;  %6143 = vst.msk [vmem:[#allocation4 + $0xf0] sm:$0xff] %vm6127_vm15, %v6110_v2  ;;  %v9899_v36 = vpop.f32.mrb[8].mxu0  ;;  %v9980_v29 = vpop.f32.mrb[8].mxu1 }
 0x7f6   :  { %9098 = vst.msk [vmem:[#allocation4 + $0x20] sm:$0xff] %vm9095_vm0, %v9052_v49  ;;  %10897 = vrot.lane.b32.xlu1 %v10856_v35, %s14100_s16  ;;  %10017 = vst [vmem:[#allocation3 + $0x120] sm:$0xff] %v9899_v36  ;;  %v9901_v13 = vpop.f32.mrb[9].mxu0  ;;  %v13585_v57 = vpop.f32.mrb[9].mxu1 }
 0x7f7   :  { %10019 = vst.msk [vmem:[#allocation3 + $0x130] sm:$0xff] %vm748_vm7, %v9980_v29  ;;  %10018 = vst [vmem:[#allocation3 + $0x128] sm:$0xff] %v9901_v13  ;;  %v9903_v50 = vpop.f32.mrb[10].mxu0  ;;  %v9983_v32 = vpop.f32.mrb[10].mxu1 }
 0x7f8   :  { %10020 = vst [vmem:[#allocation3 + $0x138] sm:$0xff] %v9903_v50  ;;  %10022 = vst.msk [vmem:[#allocation3 + $0x148] sm:$0xff] %vm748_vm7, %v9983_v32  ;;  %v9050_v10 = vpop.permute.xlu1 %9049  ;;  %v9056_v45 = vpop.permute.xlu0 %9055 }
 0x7f9   :  { %11167 = vrot.lane.b32.xlu0 %v17638_v8, %s14102_s22  ;;  %9097 = vst.msk [vmem:[#allocation4 + $0x10] sm:$0xff] %vm9095_vm0, %v9050_v10  ;;  %9100 = vst.msk [vmem:[#allocation4 + $0x40] sm:$0xff] %vm9095_vm0, %v9056_v45  ;;  %v9905_v47 = vpop.f32.mrb[11].mxu0  ;;  %v13586_v19 = vpop.f32.mrb[11].mxu1  ;;  %v11714_v8 = vsel %vm1932_vm5, %v11712_v52, %v11713_v23 }
 0x7fa   :  { %11073 = vrot.lane.b32.xlu1 %v11032_v26, %s14101_s5  ;;  %10021 = vst [vmem:[#allocation3 + $0x140] sm:$0xff] %v9905_v47 }
 0x7fc   :  { %v9054_v5 = vpop.permute.xlu1 %9053  ;;  %v9060_v55 = vpop.permute.xlu0 %9059 }
 0x7fd   :  { %11487 = vrot.lane.b32.xlu0 %v11445_v1, %s14100_s16  ;;  %9099 = vst.msk [vmem:[#allocation4 + $0x30] sm:$0xff] %vm9095_vm0, %v9054_v5  ;;  %9102 = vst.msk [vmem:[#allocation4 + $0x60] sm:$0xff] %vm9095_vm0, %v9060_v55  ;;  %v17679_v11 = vpop.f32.mrb[12].mxu0  ;;  %v9988_v25 = vpop.f32.mrb[12].mxu1  ;;  %v10787_v58 = vld [vmem:[#allocation3 + $0x120] sm:$0xfe] }
 0x7fe   :  { %11757 = vrot.lane.b32.xlu1 %v11714_v8, %s14102_s22  ;;  %10023 = vst [vmem:[#allocation3 + $0x150] sm:$0xff] %v17679_v11  ;;  %10025 = vst.msk [vmem:[#allocation3 + $0x160] sm:$0xff] %vm748_vm7, %v9988_v25  ;;  %v9911_v43 = vpop.f32.mrb[13].mxu0  ;;  %v13589_v18 = vpop.f32.mrb[13].mxu1  ;;  %v11377_v53 = vld [vmem:[#allocation3 + $0x128] sm:$0xfc] }
 0x7ff   :  { %10024 = vst [vmem:[#allocation3 + $0x158] sm:$0xff] %v9911_v43  ;;  %v9913_v27 = vpop.f32.mrb[14].mxu0  ;;  %v9991_v44 = vpop.f32.mrb[14].mxu1  ;;  %v10788_v3 = vld [vmem:[#allocation3 + $0x138] sm:$0x1]  ;;  %v10857_v34 = vrot.slane %v10787_v58, 1 }
 0x800   :  { %10026 = vst [vmem:[#allocation3 + $0x168] sm:$0xff] %v9913_v27  ;;  %10028 = vst.msk [vmem:[#allocation3 + $0x178] sm:$0xff] %vm748_vm7, %v9991_v44  ;;  %v9058_v62 = vpop.permute.xlu1 %9057  ;;  %v9064_v40 = vpop.permute.xlu0 %9063  ;;  %v10858_v6 = vrot.slane %v10788_v3, 1  ;;  %v10964_v38 = vld [vmem:[#allocation3 + $0x138] sm:$0x3]  ;;  %v11446_v16 = vrot.slane %v11377_v53, 2 }
 0x801   :  { %11583 = vrot.lane.b32.xlu0 %v9901_v13, %s14101_s5  ;;  %9101 = vst.msk [vmem:[#allocation4 + $0x50] sm:$0xff] %vm9095_vm0, %v9058_v62  ;;  %9104 = vst.msk [vmem:[#allocation4 + $0x80] sm:$0xff] %vm9095_vm0, %v9064_v40  ;;  %v9915_v4 = vpop.f32.mrb[15].mxu0  ;;  %v13590_v37 = vpop.f32.mrb[15].mxu1  ;;  %v11378_v46 = vld [vmem:[#allocation3 + $0x140] sm:$0x3] }
 0x802   :  { %11169 = vrot.lane.b32.xlu1 %v9899_v36, %s14102_s22  ;;  %10027 = vst [vmem:[#allocation3 + $0x170] sm:$0xff] %v9915_v4  ;;  %v11447_v56 = vrot.slane %v11378_v46, 2  ;;  %v10963_v42 = vld [vmem:[#allocation3 + $0x120] sm:$0xfc]  ;;  %v10859_v28 = vsel %vm1932_vm5, %v10857_v34, %v10858_v6  ;;  %v11034_v7 = vrot.slane %v10964_v38, 2 }
 0x803   :  { %v11648_v14 = vld [vmem:[#allocation3 + $0x140] sm:$0x1]  ;;  %v11033_v20 = vrot.slane %v10963_v42, 2  ;;  %v11647_v41 = vld [vmem:[#allocation3 + $0x128] sm:$0xfe] }
 0x804   :  { %v9062_v60 = vpop.permute.xlu1 %9061  ;;  %v9068_v31 = vpop.permute.xlu0 %9067  ;;  %v11448_v0 = vsel %vm2109_vm6, %v11446_v16, %v11447_v56  ;;  %v11716_v9 = vrot.slane %v11648_v14, 1  ;;  %v11715_v63 = vrot.slane %v11647_v41, 1 }
 0x805   :  { %10899 = vrot.lane.b32.xlu0 %v10859_v28, %s14100_s16  ;;  %9103 = vst.msk [vmem:[#allocation4 + $0x70] sm:$0xff] %vm9095_vm0, %v9062_v60  ;;  %9106 = vst.msk [vmem:[#allocation4 + $0xa0] sm:$0xff] %vm9095_vm0, %v9068_v31  ;;  %v17694_v39 = vpop.f32.mrb[16].mxu0  ;;  %v9996_v15 = vpop.f32.mrb[16].mxu1  ;;  %v11035_v24 = vsel %vm2109_vm6, %v11033_v20, %v11034_v7  ;;  %v10789_v2 = vld [vmem:[#allocation3 + $0x150] sm:$0xfe] }
 0x806   :  { %11489 = vrot.lane.b32.xlu1 %v11448_v0, %s14100_s16  ;;  %10031 = vst.msk [vmem:[#allocation3 + $0x190] sm:$0xff] %vm748_vm7, %v9996_v15  ;;  %v17698_v33 = vpop.f32.mrb[17].mxu0  ;;  %v13593_v61 = vpop.f32.mrb[17].mxu1  ;;  %v10860_v57 = vrot.slane %v10789_v2, 1  ;;  %v11717_v51 = vsel %vm1932_vm5, %v11715_v63, %v11716_v9  ;;  %v10965_v17 = vld [vmem:[#allocation3 + $0x150] sm:$0xfc] }
 0x807   :  { %10030 = vst [vmem:[#allocation3 + $0x188] sm:$0xff] %v17698_v33  ;;  %v9923_v48 = vpop.f32.mrb[18].mxu0  ;;  %v9999_v54 = vpop.f32.mrb[18].mxu1  ;;  %v10790_v49 = vld [vmem:[#allocation3 + $0x168] sm:$0x1]  ;;  %v11036_v19 = vrot.slane %v10965_v17, 2 }
 0x808   :  { %10034 = vst.msk [vmem:[#allocation3 + $0x1a8] sm:$0xff] %vm748_vm7, %v9999_v54  ;;  %v9066_v35 = vpop.permute.xlu1 %9065  ;;  %v9072_v21 = vpop.permute.xlu0 %9071  ;;  %v10861_v30 = vrot.slane %v10790_v49, 1  ;;  %v10966_v13 = vld [vmem:[#allocation3 + $0x168] sm:$0x3]  ;;  %v11379_v12 = vld [vmem:[#allocation3 + $0x158] sm:$0xfc] }
 0x809   :  { %11075 = vrot.lane.b32.xlu0 %v11035_v24, %s14101_s5  ;;  %9105 = vst.msk [vmem:[#allocation4 + $0x90] sm:$0xff] %vm9095_vm0, %v9066_v35  ;;  %9108 = vst.msk [vmem:[#allocation4 + $0xc0] sm:$0xff] %vm9095_vm0, %v9072_v21  ;;  %v9925_v36 = vpop.f32.mrb[19].mxu0  ;;  %v13594_v29 = vpop.f32.mrb[19].mxu1  ;;  %v11037_v59 = vrot.slane %v10966_v13, 2  ;;  %v11449_v27 = vrot.slane %v11379_v12, 2 }
 0x80a   :  { %11585 = vrot.lane.b32.xlu1 %v9911_v43, %s14101_s5  ;;  %10033 = vst [vmem:[#allocation3 + $0x1a0] sm:$0xff] %v9925_v36  ;;  %v10862_v22 = vsel %vm1932_vm5, %v10860_v57, %v10861_v30  ;;  %v11380_v10 = vld [vmem:[#allocation3 + $0x170] sm:$0x3]  ;;  %v11649_v55 = vld [vmem:[#allocation3 + $0x158] sm:$0xfe] }
 0x80b   :  { %v11650_v26 = vld [vmem:[#allocation3 + $0x170] sm:$0x1]  ;;  %v11450_v5 = vrot.slane %v11380_v10, 2  ;;  %v11038_v43 = vsel %vm2109_vm6, %v11036_v19, %v11037_v59  ;;  %v11718_v3 = vrot.slane %v11649_v55, 1 }
 0x80c   :  { %v9070_v50 = vpop.permute.xlu1 %9069  ;;  %v9076_v32 = vpop.permute.xlu0 %9075  ;;  %v11719_v18 = vrot.slane %v11650_v26, 1 }
 0x80d   :  { %11759 = vrot.lane.b32.xlu0 %v11717_v51, %s14102_s22  ;;  %9107 = vst.msk [vmem:[#allocation4 + $0xb0] sm:$0xff] %vm9095_vm0, %v9070_v50  ;;  %9110 = vst.msk [vmem:[#allocation4 + $0xe0] sm:$0xff] %vm9095_vm0, %v9076_v32  ;;  %v9929_v45 = vpop.f32.mrb[20].mxu0  ;;  %v10004_v23 = vpop.f32.mrb[20].mxu1  ;;  %v11451_v53 = vsel %vm2109_vm6, %v11449_v27, %v11450_v5 }
 0x80e   :  { %10901 = vrot.lane.b32.xlu1 %v10862_v22, %s14100_s16  ;;  %v17713_v47 = vpop.f32.mrb[21].mxu0  ;;  %10037 = vst.msk [vmem:[#allocation3 + $0x1c0] sm:$0xff] %vm748_vm7, %v10004_v23  ;;  %v13597_v52 = vpop.f32.mrb[21].mxu1  ;;  %v11651_v34 = vld [vmem:[#allocation3 + $0x188] sm:$0xfe] }
 0x80f   :  { %10036 = vst [vmem:[#allocation3 + $0x1b8] sm:$0xff] %v17713_v47  ;;  %v9933_v1 = vpop.f32.mrb[22].mxu0  ;;  %v10007_v8 = vpop.f32.mrb[22].mxu1  ;;  %v11381_v42 = vld [vmem:[#allocation3 + $0x188] sm:$0xfc]  ;;  %v11721_v31 = vrot.slane %v11651_v34, 1 }
 0x810   :  { %v9074_v25 = vpop.permute.xlu1 %9073  ;;  %10040 = vst.msk [vmem:[#allocation3 + $0x1d8] sm:$0xff] %vm748_vm7, %v10007_v8  ;;  %v9935_v58 = vpop.f32.mrb[23].mxu0  ;;  %v11452_v0 = vrot.slane %v11381_v42, 2 }
 0x811   :  { %11171 = vrot.lane.b32.xlu0 %v17679_v11, %s14102_s22  ;;  %9109 = vst.msk [vmem:[#allocation4 + $0xd0] sm:$0xff] %vm9095_vm0, %v9074_v25  ;;  %v13598_v44 = vpop.f32.mrb[23].mxu1  ;;  %10039 = vst [vmem:[#allocation3 + $0x1d0] sm:$0xff] %v9935_v58  ;;  %v11720_v11 = vsel %vm1932_vm5, %v11718_v3, %v11719_v18  ;;  %v11652_v40 = vld [vmem:[#allocation3 + $0x1a0] sm:$0x1]  ;;  %v17745_v59 = vpop.permute.xlu0 %10887 }
 0x812   :  { %11077 = vrot.lane.b32.xlu1 %v11038_v43, %s14101_s5  ;;  %v11382_v38 = vld [vmem:[#allocation3 + $0x1a0] sm:$0x3]  ;;  %v11722_v56 = vrot.slane %v11652_v40, 1 }
 0x813   :  { %v11453_v7 = vrot.slane %v11382_v38, 2 }
 0x814   :  { %v9078_v62 = vpop.permute.xlu1 %9077  ;;  %v11723_v15 = vsel %vm1932_vm5, %v11721_v31, %v11722_v56 }
 0x815   :  { %11491 = vrot.lane.b32.xlu0 %v11451_v53, %s14100_s16  ;;  %9111 = vst.msk [vmem:[#allocation4 + $0xf0] sm:$0xff] %vm9095_vm0, %v9078_v62  ;;  %v10240_v6 = vpop.f32.mrb[24].mxu0  ;;  %v10323_v4 = vpop.f32.mrb[24].mxu1  ;;  %v11454_v41 = vsel %vm2109_vm6, %v11452_v0, %v11453_v7 }
 0x816   :  { %11761 = vrot.lane.b32.xlu1 %v11720_v11, %s14102_s22  ;;  %10362 = vst [vmem:[#allocation3 + $0x1e0] sm:$0xff] %v10240_v6  ;;  %v10242_v37 = vpop.f32.mrb[25].mxu0  ;;  %v13617_v46 = vpop.f32.mrb[25].mxu1  ;;  %v11653_v20 = vld [vmem:[#allocation3 + $0x1b8] sm:$0xfe] }
 0x817   :  { %v10244_v16 = vpop.f32.mrb[26].mxu0  ;;  %v10326_v28 = vpop.f32.mrb[26].mxu1  ;;  %v11724_v54 = vrot.slane %v11653_v20, 1 }
 0x818   :  { %10365 = vst [vmem:[#allocation3 + $0x1f8] sm:$0xff] %v10244_v16  ;;  %v10246_v14 = vpop.f32.mrb[27].mxu0  ;;  %v13618_v60 = vpop.f32.mrb[27].mxu1  ;;  %v11654_v61 = vld [vmem:[#allocation3 + $0x1d0] sm:$0x1] }
 0x819   :  { %11587 = vrot.lane.b32.xlu0 %v17698_v33, %s14101_s5  ;;  %v11725_v24 = vrot.slane %v11654_v61, 1  ;;  %v11064_v11 = vpop.permute.xlu0 %11063 }
 0x81a   :  { %11173 = vrot.lane.b32.xlu1 %v17694_v39, %s14102_s22 }
 0x81b   :  { %v11726_v36 = vsel %vm1932_vm5, %v11724_v54, %v11725_v24 }
 0x81d   :  { %11763 = vrot.lane.b32.xlu0 %v11723_v15, %s14102_s22  ;;  %v10791_v9 = vld [vmem:[#allocation3 + $0x1e0] sm:$0xfe] }
 0x81e   :  { %11493 = vrot.lane.b32.xlu1 %v11454_v41, %s14100_s16  ;;  %v10967_v33 = vld [vmem:[#allocation3 + $0x1e0] sm:$0xfc]  ;;  %v10863_v48 = vrot.slane %v10791_v9, 1 }
 0x81f   :  { %v10792_v2 = vld [vmem:[#allocation3 + $0x1f8] sm:$0x1]  ;;  %v11039_v35 = vrot.slane %v10967_v33, 2 }
 0x820   :  { %v10968_v49 = vld [vmem:[#allocation3 + $0x1f8] sm:$0x3]  ;;  %v10864_v39 = vrot.slane %v10792_v2, 1 }
 0x821   :  { %v11040_v21 = vrot.slane %v10968_v49, 2 }
 0x822   :  { %11589 = vrot.lane.b32.xlu1 %v17713_v47, %s14101_s5  ;;  %v10865_v30 = vsel %vm1932_vm5, %v10863_v48, %v10864_v39 }
 0x823   :  { %10903 = vrot.lane.b32.xlu0 %v10865_v30, %s14100_s16  ;;  %v11041_v29 = vsel %vm2109_vm6, %v11039_v35, %v11040_v21 }
 0x825   :  { %v10250_v63 = vpop.f32.mrb[28].mxu0  ;;  %v10331_v13 = vpop.f32.mrb[28].mxu1 }
 0x826   :  { %11765 = vrot.lane.b32.xlu1 %v11726_v36, %s14102_s22  ;;  %10368 = vst [vmem:[#allocation3 + $0x210] sm:$0xff] %v10250_v63  ;;  %v10252_v57 = vpop.f32.mrb[29].mxu0  ;;  %v13621_v51 = vpop.f32.mrb[29].mxu1 }
 0x827   :  { %10369 = vst [vmem:[#allocation3 + $0x218] sm:$0xff] %v10252_v57  ;;  %11079 = vrot.lane.b32.xlu0 %v11041_v29, %s14101_s5  ;;  %v10254_v17 = vpop.f32.mrb[30].mxu0  ;;  %v10334_v50 = vpop.f32.mrb[30].mxu1  ;;  %v11224_v29 = vld [vmem:[#allocation3 + $0x50] sm:$0x1]  ;;  %v14070_v57 = vld [vmem:[#allocation3] sm:$0xff] }
 0x828   :  { %10371 = vst [vmem:[#allocation3 + $0x228] sm:$0xff] %v10254_v17  ;;  %v10256_v32 = vpop.f32.mrb[31].mxu0  ;;  %v13622_v22 = vpop.f32.mrb[31].mxu1  ;;  %v10935_v51 = vadd.f32 %v14070_v57, %v17745_v59 }
 0x829   :  { %10372 = vst [vmem:[#allocation3 + $0x230] sm:$0xff] %v10256_v32 }
 0x82b   :  { %11175 = vrot.lane.b32.xlu0 %v10250_v63, %s14102_s22 }
 0x82c   :  { %v11160_v37 = vpop.permute.xlu0 %11159 }
 0x82d   :  { %v10793_v10 = vld [vmem:[#allocation3 + $0x210] sm:$0xfe] }
 0x82e   :  { %v10260_v45 = vpop.f32.mrb[32].mxu0  ;;  %v10339_v26 = vpop.f32.mrb[32].mxu1  ;;  %v11383_v23 = vld [vmem:[#allocation3 + $0x218] sm:$0xfc]  ;;  %v10969_v52 = vld [vmem:[#allocation3 + $0x210] sm:$0xfc] }
 0x82f   :  { %10374 = vst [vmem:[#allocation3 + $0x240] sm:$0xff] %v10260_v45  ;;  %10376 = vst.msk [vmem:[#allocation3 + $0x250] sm:$0xff] %vm748_vm7, %v10339_v26  ;;  %v10262_v47 = vpop.f32.mrb[33].mxu0  ;;  %v13625_v19 = vpop.f32.mrb[33].mxu1  ;;  %v10794_v12 = vld [vmem:[#allocation3 + $0x228] sm:$0x1] }
 0x830   :  { %10375 = vst [vmem:[#allocation3 + $0x248] sm:$0xff] %v10262_v47  ;;  %v10264_v1 = vpop.f32.mrb[34].mxu0  ;;  %v10342_v5 = vpop.f32.mrb[34].mxu1  ;;  %v10866_v55 = vrot.slane %v10793_v10, 1  ;;  %v10867_v8 = vrot.slane %v10794_v12, 1  ;;  %v11455_v58 = vrot.slane %v11383_v23, 2 }
 0x831   :  { %v11384_v25 = vld [vmem:[#allocation3 + $0x230] sm:$0x3]  ;;  %10377 = vst [vmem:[#allocation3 + $0x258] sm:$0xff] %v10264_v1  ;;  %10379 = vst.msk [vmem:[#allocation3 + $0x268] sm:$0xff] %vm748_vm7, %v10342_v5  ;;  %v13626_v43 = vpop.f32.mrb[35].mxu1  ;;  %v10266_v18 = vpop.f32.mrb[35].mxu0 }
 0x832   :  { %v11456_v27 = vrot.slane %v11384_v25, 2  ;;  %v10970_v44 = vld [vmem:[#allocation3 + $0x228] sm:$0x3]  ;;  %v10868_v3 = vsel %vm1932_vm5, %v10866_v55, %v10867_v8  ;;  %10378 = vst [vmem:[#allocation3 + $0x260] sm:$0xff] %v10266_v18  ;;  %v11042_v40 = vrot.slane %v10969_v52, 2  ;;  %v11288_v23 = vrot.slane %v11224_v29, 1 }
 0x833   :  { %v11043_v53 = vrot.slane %v10970_v44, 2  ;;  %10905 = vrot.lane.b32.xlu1 %v10868_v3, %s14100_s16  ;;  %v11223_v26 = vld [vmem:[#allocation3 + $0x38] sm:$0xfe] }
 0x834   :  { %v11457_v62 = vsel %vm2109_vm6, %v11455_v58, %v11456_v27  ;;  %v11287_v58 = vrot.slane %v11223_v26, 1 }
 0x835   :  { %11495 = vrot.lane.b32.xlu0 %v11457_v62, %s14100_s16  ;;  %v11044_v6 = vsel %vm2109_vm6, %v11042_v40, %v11043_v53 }
 0x836   :  { %v10795_v38 = vld [vmem:[#allocation3 + $0x240] sm:$0xfe] }
 0x837   :  { %11081 = vrot.lane.b32.xlu1 %v11044_v6, %s14101_s5  ;;  %v11385_v4 = vld [vmem:[#allocation3 + $0x248] sm:$0xfc]  ;;  %v10869_v42 = vrot.slane %v10795_v38, 1  ;;  %v10971_v15 = vld [vmem:[#allocation3 + $0x240] sm:$0xfc]  ;;  %v11289_v6 = vsel %vm1932_vm5, %v11287_v58, %v11288_v23 }
 0x838   :  { %v10796_v34 = vld [vmem:[#allocation3 + $0x258] sm:$0x1]  ;;  %v11458_v31 = vrot.slane %v11385_v4, 2  ;;  %v11045_v39 = vrot.slane %v10971_v15, 2  ;;  %v11655_v21 = vld [vmem:[#allocation3 + $0x248] sm:$0xfe] }
 0x839   :  { %11591 = vrot.lane.b32.xlu0 %v10262_v47, %s14101_s5  ;;  %v10972_v46 = vld [vmem:[#allocation3 + $0x258] sm:$0x3]  ;;  %v17756_v16 = vpop.f32.mrb[36].mxu0  ;;  %v10347_v56 = vpop.f32.mrb[36].mxu1  ;;  %v10870_v28 = vrot.slane %v10796_v34, 1  ;;  %v11727_v63 = vrot.slane %v11655_v21, 1 }
 0x83a   :  { %v11386_v7 = vld [vmem:[#allocation3 + $0x260] sm:$0x3]  ;;  %10380 = vst [vmem:[#allocation3 + $0x270] sm:$0xff] %v17756_v16  ;;  %10382 = vst.msk [vmem:[#allocation3 + $0x280] sm:$0xff] %vm748_vm7, %v10347_v56  ;;  %v17760_v14 = vpop.permute.xlu1 %10889  ;;  %v10272_v60 = vpop.f32.mrb[37].mxu0  ;;  %v11046_v9 = vrot.slane %v10972_v46, 2 }
 0x83b   :  { %v11459_v0 = vrot.slane %v11386_v7, 2  ;;  %10381 = vst [vmem:[#allocation3 + $0x278] sm:$0xff] %v10272_v60  ;;  %v13629_v20 = vpop.f32.mrb[37].mxu1  ;;  %11177 = vrot.lane.b32.xlu1 %v10260_v45, %s14102_s22  ;;  %v10274_v61 = vpop.f32.mrb[38].mxu0  ;;  %v10871_v41 = vsel %vm1932_vm5, %v10869_v42, %v10870_v28  ;;  %v11656_v24 = vld [vmem:[#allocation3 + $0x260] sm:$0x1]  ;;  %v11111_v45 = vadd.f32 %v11064_v11, %v10935_v51 }
 0x83c   :  { %10383 = vst [vmem:[#allocation3 + $0x288] sm:$0xff] %v10274_v61  ;;  %v10350_v33 = vpop.f32.mrb[38].mxu1  ;;  %v17764_v48 = vpop.permute.xlu0 %11479  ;;  %v11047_v30 = vsel %vm2109_vm6, %v11045_v39, %v11046_v9  ;;  %v11728_v36 = vrot.slane %v11656_v24, 1  ;;  %v11230_v23 = vld [vmem:[#allocation3 + $0xe0] sm:$0x1] }
 0x83d   :  { %10907 = vrot.lane.b32.xlu0 %v10871_v41, %s14100_s16  ;;  %v11460_v54 = vsel %vm2109_vm6, %v11458_v31, %v11459_v0  ;;  %10385 = vst.msk [vmem:[#allocation3 + $0x298] sm:$0xff] %vm748_vm7, %v10350_v33  ;;  %v10276_v2 = vpop.f32.mrb[39].mxu0  ;;  %v13630_v49 = vpop.f32.mrb[39].mxu1  ;;  %v11207_v5 = vadd.f32 %v11160_v37, %v11111_v45 }
 0x83e   :  { %10384 = vst [vmem:[#allocation3 + $0x290] sm:$0xff] %v10276_v2  ;;  %v17769_v35 = vpop.permute.xlu1 %11065  ;;  %v11729_v32 = vsel %vm1932_vm5, %v11727_v63, %v11728_v36 }
 0x83f   :  { %11497 = vrot.lane.b32.xlu1 %v11460_v54, %s14100_s16  ;;  %v11351_v46 = vadd.f32 %v11289_v6, %v11207_v5 }
 0x840   :  { %v11576_v50 = vpop.permute.xlu0 %11575 }
 0x841   :  { %11083 = vrot.lane.b32.xlu0 %v11047_v30, %s14101_s5  ;;  %v10797_v13 = vld [vmem:[#allocation3 + $0x270] sm:$0xfe] }
 0x842   :  { %v17775_v17 = vpop.permute.xlu1 %11161  ;;  %v10872_v47 = vrot.slane %v10797_v13, 1  ;;  %v10973_v1 = vld [vmem:[#allocation3 + $0x270] sm:$0xfc]  ;;  %v11387_v18 = vld [vmem:[#allocation3 + $0x278] sm:$0xfc] }
 0x843   :  { %11593 = vrot.lane.b32.xlu1 %v10272_v60, %s14101_s5  ;;  %v10798_v22 = vld [vmem:[#allocation3 + $0x288] sm:$0x1]  ;;  %v11048_v40 = vrot.slane %v10973_v1, 2  ;;  %v11461_v37 = vrot.slane %v11387_v18, 2  ;;  %v11657_v34 = vld [vmem:[#allocation3 + $0x278] sm:$0xfe]  ;;  %v11527_v60 = vadd.f32 %v17764_v48, %v11351_v46 }
 0x844   :  { %v10974_v10 = vld [vmem:[#allocation3 + $0x288] sm:$0x3]  ;;  %v10873_v19 = vrot.slane %v10798_v22, 1  ;;  %v11730_v31 = vrot.slane %v11657_v34, 1  ;;  %v11297_v18 = vrot.slane %v11230_v23, 1 }
 0x845   :  { %11767 = vrot.lane.b32.xlu0 %v11729_v32, %s14102_s22  ;;  %v10280_v12 = vpop.f32.mrb[40].mxu0  ;;  %v10355_v52 = vpop.f32.mrb[40].mxu1  ;;  %v11388_v59 = vld [vmem:[#allocation3 + $0x290] sm:$0x3]  ;;  %v11049_v43 = vrot.slane %v10974_v10, 2  ;;  %v11623_v0 = vadd.f32 %v11576_v50, %v11527_v60 }
 0x846   :  { %10386 = vst [vmem:[#allocation3 + $0x2a0] sm:$0xff] %v10280_v12  ;;  %10388 = vst.msk [vmem:[#allocation3 + $0x2b0] sm:$0xff] %vm748_vm7, %v10355_v52  ;;  %v10282_v55 = vpop.f32.mrb[41].mxu0  ;;  %v13633_v8 = vpop.f32.mrb[41].mxu1  ;;  %v10874_v25 = vsel %vm1932_vm5, %v10872_v47, %v10873_v19  ;;  %v11462_v3 = vrot.slane %v11388_v59, 2  ;;  %v10746_v47 = vld [vmem:[#allocation3 + $0x90] sm:$0xff] }
 0x847   :  { %10387 = vst [vmem:[#allocation3 + $0x2a8] sm:$0xff] %v10282_v55  ;;  %v17782_v27 = vpop.permute.xlu0 %10891  ;;  %10909 = vrot.lane.b32.xlu1 %v10874_v25, %s14100_s16  ;;  %v11658_v53 = vld [vmem:[#allocation3 + $0x290] sm:$0x1]  ;;  %v10358_v62 = vpop.f32.mrb[42].mxu1  ;;  %v11050_v56 = vsel %vm2109_vm6, %v11048_v40, %v11049_v43 }
 0x848   :  { %v17784_v44 = vpop.permute.xlu1 %11481  ;;  %v10284_v11 = vpop.f32.mrb[42].mxu0  ;;  %10391 = vst.msk [vmem:[#allocation3 + $0x2c8] sm:$0xff] %vm748_vm7, %v10358_v62  ;;  %v11731_v42 = vrot.slane %v11658_v53, 1 }
 0x849   :  { %11179 = vrot.lane.b32.xlu0 %v17756_v16, %s14102_s22  ;;  %10389 = vst [vmem:[#allocation3 + $0x2b8] sm:$0xff] %v10284_v11  ;;  %v10286_v38 = vpop.f32.mrb[43].mxu0  ;;  %v13634_v4 = vpop.f32.mrb[43].mxu1  ;;  %v11463_v16 = vsel %vm2109_vm6, %v11461_v37, %v11462_v3 }
 0x84a   :  { %10390 = vst [vmem:[#allocation3 + $0x2c0] sm:$0xff] %v10286_v38  ;;  %v11732_v15 = vsel %vm1932_vm5, %v11730_v31, %v11731_v42 }
 0x84b   :  { %v17792_v28 = vpop.permute.xlu0 %11067  ;;  %11085 = vrot.lane.b32.xlu1 %v11050_v56, %s14101_s5 }
 0x84c   :  { %v17794_v7 = vpop.permute.xlu1 %11577 }
 0x84d   :  { %11499 = vrot.lane.b32.xlu0 %v11463_v16, %s14100_s16  ;;  %v10799_v20 = vld [vmem:[#allocation3 + $0x2a0] sm:$0xfe] }
 0x84e   :  { %v10875_v24 = vrot.slane %v10799_v20, 1  ;;  %v11389_v48 = vld [vmem:[#allocation3 + $0x2a8] sm:$0xfc]  ;;  %v10975_v21 = vld [vmem:[#allocation3 + $0x2a0] sm:$0xfc] }
 0x84f   :  { %v11752_v61 = vpop.permute.xlu0 %11751  ;;  %11769 = vrot.lane.b32.xlu1 %v11732_v15, %s14102_s22  ;;  %v11464_v13 = vrot.slane %v11389_v48, 2  ;;  %v11051_v51 = vrot.slane %v10975_v21, 2  ;;  %v11659_v32 = vld [vmem:[#allocation3 + $0x2a8] sm:$0xfe] }
 0x850   :  { %v10894_v41 = vpop.permute.xlu1 %10893  ;;  %v17802_v9 = vadd.f32 %v11752_v61, %v11623_v0  ;;  %v10800_v33 = vld [vmem:[#allocation3 + $0x2b8] sm:$0x1]  ;;  %v11733_v52 = vrot.slane %v11659_v32, 1 }
 0x851   :  { %11595 = vrot.lane.b32.xlu0 %v10282_v55, %s14101_s5  ;;  %v10976_v54 = vld [vmem:[#allocation3 + $0x2b8] sm:$0x3]  ;;  %v10876_v2 = vrot.slane %v10800_v33, 1  ;;  %v11390_v49 = vld [vmem:[#allocation3 + $0x2c0] sm:$0x3]  ;;  %v10938_v1 = vadd.f32 %v10894_v41, %v10746_v47 }
 0x852   :  { %v11465_v39 = vrot.slane %v11390_v49, 2  ;;  %v11052_v63 = vrot.slane %v10976_v54, 2  ;;  %v11660_v57 = vld [vmem:[#allocation3 + $0x2c0] sm:$0x1]  ;;  %v11229_v55 = vld [vmem:[#allocation3 + $0xc8] sm:$0xfe] }
 0x853   :  { %v17805_v30 = vpop.permute.xlu0 %11163  ;;  %11181 = vrot.lane.b32.xlu1 %v10280_v12, %s14102_s22  ;;  %v10877_v29 = vsel %vm1932_vm5, %v10875_v24, %v10876_v2  ;;  %v11734_v26 = vrot.slane %v11660_v57, 1  ;;  %v11296_v40 = vrot.slane %v11229_v55, 1 }
 0x854   :  { %v11070_v36 = vpop.permute.xlu1 %11069  ;;  %v11466_v50 = vsel %vm2109_vm6, %v11464_v13, %v11465_v39  ;;  %v11053_v45 = vsel %vm2109_vm6, %v11051_v51, %v11052_v63 }
 0x855   :  { %10911 = vrot.lane.b32.xlu0 %v10877_v29, %s14100_s16  ;;  %v11735_v43 = vsel %vm1932_vm5, %v11733_v52, %v11734_v26  ;;  %v11114_v58 = vadd.f32 %v11070_v36, %v10938_v1  ;;  %v11298_v38 = vsel %vm1932_vm5, %v11296_v40, %v11297_v18 }
 0x857   :  { %v17811_v22 = vpop.permute.xlu0 %11483  ;;  %11501 = vrot.lane.b32.xlu1 %v11466_v50, %s14100_s16 }
 0x858   :  { %v17813_v10 = vpop.permute.xlu1 %11753 }
 0x859   :  { %11087 = vrot.lane.b32.xlu0 %v11053_v45, %s14101_s5  ;;  %v17818_v19 = vpop.f32.mrb[44].mxu0  ;;  %v10674_v12 = vpop.f32.mrb[44].mxu1 }
 0x85a   :  { %18226 = vst [vmem:[#allocation7_spill] sm:$0xff] %v17818_v19  ;;  %10713 = vst [vmem:[#allocation3 + $0x2d0] sm:$0xff] %v17818_v19  ;;  %v10593_v59 = vpop.f32.mrb[45].mxu0  ;;  %v13653_v5 = vpop.f32.mrb[45].mxu1 }
 0x85b   :  { %10715 = vst.msk [vmem:[#allocation3 + $0x2e0] sm:$0xff] %vm748_vm7, %v10674_v12  ;;  %10714 = vst [vmem:[#allocation3 + $0x2d8] sm:$0xff] %v10593_v59  ;;  %v10595_v8 = vpop.f32.mrb[46].mxu0  ;;  %v10677_v25 = vpop.f32.mrb[46].mxu1  ;;  %11597 = vrot.lane.b32.xlu1 %v10593_v59, %s14101_s5 }
 0x85c   :  { %10716 = vst [vmem:[#allocation3 + $0x2e8] sm:$0xff] %v10595_v8  ;;  %10718 = vst.msk [vmem:[#allocation3 + $0x2f8] sm:$0xff] %vm748_vm7, %v10677_v25  ;;  %v10597_v3 = vpop.f32.mrb[47].mxu0  ;;  %v13654_v53 = vpop.f32.mrb[47].mxu1 }
 0x85d   :  { %11771 = vrot.lane.b32.xlu0 %v11735_v43, %s14102_s22  ;;  %10717 = vst [vmem:[#allocation3 + $0x2f0] sm:$0xff] %v10597_v3  ;;  %v17826_v62 = vpop.permute.xlu0 %11579  ;;  %v11166_v11 = vpop.permute.xlu1 %11165 }
 0x85e   :  { %v11210_v6 = vadd.f32 %v11166_v11, %v11114_v58 }
 0x860   :  { %v11354_v4 = vadd.f32 %v11298_v38, %v11210_v6 }
 0x861   :  { %11183 = vrot.lane.b32.xlu0 %v17818_v19, %s14102_s22  ;;  %v17831_v37 = vpop.permute.xlu0 %10895  ;;  %v11486_v34 = vpop.permute.xlu1 %11485  ;;  %v10801_v46 = vld [vmem:[#allocation3 + $0x2d0] sm:$0xfe] }
 0x862   :  { %v17833_v56 = vadd.f32 %v11486_v34, %v11354_v4  ;;  %v11391_v42 = vld [vmem:[#allocation3 + $0x2d8] sm:$0xfc]  ;;  %v10878_v31 = vrot.slane %v10801_v46, 1  ;;  %v10977_v54 = vld [vmem:[#allocation3 + $0x2d0] sm:$0xfc] }
 0x863   :  { %v10802_v16 = vld [vmem:[#allocation3 + $0x2e8] sm:$0x1]  ;;  %v11467_v41 = vrot.slane %v11391_v42, 2  ;;  %v11054_v39 = vrot.slane %v10977_v54, 2  ;;  %v11661_v29 = vld [vmem:[#allocation3 + $0x2d8] sm:$0xfe] }
 0x864   :  { %v10978_v60 = vld [vmem:[#allocation3 + $0x2e8] sm:$0x3]  ;;  %v10879_v0 = vrot.slane %v10802_v16, 1  ;;  %v11392_v15 = vld [vmem:[#allocation3 + $0x2f0] sm:$0x3]  ;;  %v11736_v57 = vrot.slane %v11661_v29, 1 }
 0x865   :  { %v17835_v20 = vpop.permute.xlu0 %11071  ;;  %v17837_v61 = vpop.permute.xlu1 %11581  ;;  %v11468_v33 = vrot.slane %v11392_v15, 2  ;;  %v11055_v2 = vrot.slane %v10978_v60, 2  ;;  %v11662_v49 = vld [vmem:[#allocation3 + $0x2f0] sm:$0x1]  ;;  %v10745_v29 = vld [vmem:[#allocation3 + $0x60] sm:$0xff] }
 0x866   :  { %v10880_v24 = vsel %vm1932_vm5, %v10878_v31, %v10879_v0  ;;  %v11737_v13 = vrot.slane %v11662_v49, 1 }
 0x867   :  { %10913 = vrot.lane.b32.xlu1 %v10880_v24, %s14100_s16  ;;  %v11469_v48 = vsel %vm2109_vm6, %v11467_v41, %v11468_v33  ;;  %v11056_v63 = vsel %vm2109_vm6, %v11054_v39, %v11055_v2 }
 0x868   :  { %11503 = vrot.lane.b32.xlu0 %v11469_v48, %s14100_s16  ;;  %v11738_v32 = vsel %vm1932_vm5, %v11736_v57, %v11737_v13  ;;  %v10937_v57 = vadd.f32 %v17782_v27, %v10745_v29 }
 0x869   :  { %v17843_v21 = vpop.permute.xlu0 %11755  ;;  %v17845_v36 = vpop.permute.xlu1 %10897 }
 0x86a   :  { %v11113_v27 = vadd.f32 %v17792_v28, %v10937_v57  ;;  %v10747_v28 = vld [vmem:[#allocation3 + $0xc0] sm:$0xff]  ;;  %v10744_v57 = vld [vmem:[#allocation3 + $0x30] sm:$0xff] }
 0x86b   :  { %11089 = vrot.lane.b32.xlu1 %v11056_v63, %s14101_s5 }
 0x86d   :  { %v17849_v51 = vpop.permute.xlu0 %11167  ;;  %v17851_v50 = vpop.permute.xlu1 %11073 }
 0x86f   :  { %11773 = vrot.lane.b32.xlu1 %v11738_v32, %s14102_s22  ;;  %v11228_v32 = vld [vmem:[#allocation3 + $0xb0] sm:$0x1] }
 0x871   :  { %v17855_v45 = vpop.permute.xlu0 %11487  ;;  %v17857_v26 = vpop.permute.xlu1 %11757 }
 0x875   :  { %v17859_v23 = vpop.permute.xlu0 %11583  ;;  %v17861_v47 = vpop.permute.xlu1 %11169 }
 0x876   :  { %v17863_v12 = vpop.f32.mrb[48].mxu0  ;;  %v10682_v52 = vpop.f32.mrb[48].mxu1 }
 0x877   :  { %18227 = vst [vmem:[#allocation10_spill] sm:$0xff] %v17863_v12  ;;  %10719 = vst [vmem:[#allocation3 + $0x300] sm:$0xff] %v17863_v12  ;;  %v10603_v1 = vpop.f32.mrb[49].mxu0  ;;  %v13657_v59 = vpop.f32.mrb[49].mxu1  ;;  %11185 = vrot.lane.b32.xlu1 %v17863_v12, %s14102_s22  ;;  %v11819_v12 = vld [vmem:[#allocation3 + $0xd0] sm:$0xfc] }
 0x878   :  { %10721 = vst.msk [vmem:[#allocation3 + $0x310] sm:$0xff] %vm748_vm7, %v10682_v52  ;;  %10720 = vst [vmem:[#allocation3 + $0x308] sm:$0xff] %v10603_v1  ;;  %v10605_v5 = vpop.f32.mrb[50].mxu0  ;;  %v10685_v55 = vpop.f32.mrb[50].mxu1  ;;  %11599 = vrot.lane.b32.xlu0 %v10603_v1, %s14101_s5 }
 0x879   :  { %10722 = vst [vmem:[#allocation3 + $0x318] sm:$0xff] %v10605_v5  ;;  %10724 = vst.msk [vmem:[#allocation3 + $0x328] sm:$0xff] %vm748_vm7, %v10685_v55  ;;  %v10607_v8 = vpop.f32.mrb[51].mxu0  ;;  %v13658_v25 = vpop.f32.mrb[51].mxu1  ;;  %v17898_v5 = vld [vmem:[#allocation3 + $0x68] sm:$0xfe] }
 0x87a   :  { %10723 = vst [vmem:[#allocation3 + $0x320] sm:$0xff] %v10607_v8  ;;  %v17871_v43 = vpop.permute.xlu0 %10899  ;;  %v17873_v18 = vpop.permute.xlu1 %11489  ;;  %v17905_v25 = vld [vmem:[#allocation3 + $0x80] sm:$0x1] }
 0x87e   :  { %v17875_v58 = vpop.permute.xlu0 %11075  ;;  %v17877_v3 = vpop.permute.xlu1 %11585  ;;  %v10803_v53 = vld [vmem:[#allocation3 + $0x300] sm:$0xfe] }
 0x87f   :  { %v11393_v11 = vld [vmem:[#allocation3 + $0x308] sm:$0xfc]  ;;  %v10881_v38 = vrot.slane %v10803_v53, 1  ;;  %v10979_v31 = vld [vmem:[#allocation3 + $0x300] sm:$0xfc] }
 0x880   :  { %v10804_v40 = vld [vmem:[#allocation3 + $0x318] sm:$0x1]  ;;  %v11470_v16 = vrot.slane %v11393_v11, 2  ;;  %v11057_v54 = vrot.slane %v10979_v31, 2  ;;  %v11663_v48 = vld [vmem:[#allocation3 + $0x308] sm:$0xfe]  ;;  %v11209_v31 = vadd.f32 %v17805_v30, %v11113_v27 }
 0x881   :  { %v10980_v6 = vld [vmem:[#allocation3 + $0x318] sm:$0x3]  ;;  %v10882_v4 = vrot.slane %v10804_v40, 1  ;;  %v11394_v34 = vld [vmem:[#allocation3 + $0x320] sm:$0x3]  ;;  %v11739_v59 = vrot.slane %v11663_v48, 1 }
 0x882   :  { %v17879_v46 = vpop.permute.xlu0 %11759  ;;  %v17881_v42 = vpop.permute.xlu1 %10901  ;;  %v11471_v60 = vrot.slane %v11394_v34, 2  ;;  %v11058_v15 = vrot.slane %v10980_v6, 2  ;;  %v11664_v33 = vld [vmem:[#allocation3 + $0x320] sm:$0x1]  ;;  %v11227_v53 = vld [vmem:[#allocation3 + $0x98] sm:$0xfe] }
 0x883   :  { %v10883_v0 = vsel %vm1932_vm5, %v10881_v38, %v10882_v4  ;;  %v11740_v39 = vrot.slane %v11664_v33, 1  ;;  %v17909_v38 = vld [vmem:[#allocation3 + $0x70] sm:$0xfc]  ;;  %v11294_v4 = vrot.slane %v11228_v32, 1  ;;  %v10939_v33 = vadd.f32 %v17831_v37, %v10747_v28  ;;  %v17926_v30 = vld [vmem:[#allocation3 + $0x170] sm:$0x1] }
 0x884   :  { %10915 = vrot.lane.b32.xlu0 %v10883_v0, %s14100_s16  ;;  %v11472_v41 = vsel %vm2109_vm6, %v11470_v16, %v11471_v60  ;;  %v11059_v49 = vsel %vm2109_vm6, %v11057_v54, %v11058_v15  ;;  %v17913_v60 = vld [vmem:[#allocation3 + $0x88] sm:$0x3]  ;;  %v11232_v0 = vld [vmem:[#allocation3 + $0x110] sm:$0x1]  ;;  %v11879_v29 = vrot.slane %v17909_v38, 2 }
 0x885   :  { %11505 = vrot.lane.b32.xlu1 %v11472_v41, %s14100_s16  ;;  %v11741_v6 = vsel %vm1932_vm5, %v11739_v59, %v11740_v39  ;;  %v11293_v41 = vrot.slane %v11227_v53, 1  ;;  %v17918_v54 = vld [vmem:[#allocation3 + $0xe8] sm:$0x3]  ;;  %v11291_v39 = vrot.slane %v17905_v25, 1  ;;  %v11880_v32 = vrot.slane %v17913_v60, 2 }
 0x886   :  { %v17887_v24 = vpop.permute.xlu0 %11171  ;;  %v17889_v2 = vpop.permute.xlu1 %11077  ;;  %v11115_v37 = vadd.f32 %v17835_v20, %v10939_v33  ;;  %v11306_v60 = vrot.slane %v17926_v30, 1 }
 0x888   :  { %11091 = vrot.lane.b32.xlu0 %v11059_v49, %s14101_s5  ;;  %v17893_v63 = vpop.f32.mrb[52].mxu0  ;;  %v10690_v13 = vpop.f32.mrb[52].mxu1 }
 0x889   :  { %18228 = vst [vmem:[#allocation8_spill] sm:$0xff] %v17893_v63  ;;  %10725 = vst [vmem:[#allocation3 + $0x330] sm:$0xff] %v17893_v63  ;;  %v10613_v52 = vpop.f32.mrb[53].mxu0  ;;  %v13661_v1 = vpop.f32.mrb[53].mxu1 }
 0x88a   :  { %10727 = vst.msk [vmem:[#allocation3 + $0x340] sm:$0xff] %vm748_vm7, %v10690_v13  ;;  %v17900_v55 = vpop.permute.xlu0 %11491  ;;  %v17902_v8 = vpop.permute.xlu1 %11761  ;;  %10726 = vst [vmem:[#allocation3 + $0x338] sm:$0xff] %v10613_v52  ;;  %11601 = vrot.lane.b32.xlu1 %v10613_v52, %s14101_s5  ;;  %v11231_v13 = vld [vmem:[#allocation3 + $0xf8] sm:$0xfe]  ;;  %v11295_v52 = vsel %vm1932_vm5, %v11293_v41, %v11294_v4  ;;  %v11300_v1 = vrot.slane %v11232_v0, 1  ;;  %v11211_v4 = vadd.f32 %v17849_v51, %v11115_v37 }
 0x88b   :  { %v10615_v11 = vpop.f32.mrb[54].mxu0  ;;  %v10693_v40 = vpop.f32.mrb[54].mxu1  ;;  %v11353_v25 = vadd.f32 %v11295_v52, %v11209_v31  ;;  %v11299_v20 = vrot.slane %v11231_v13, 1  ;;  %v10936_v41 = vadd.f32 %v17760_v14, %v10744_v57 }
 0x88c   :  { %10728 = vst [vmem:[#allocation3 + $0x348] sm:$0xff] %v10615_v11  ;;  %10730 = vst.msk [vmem:[#allocation3 + $0x358] sm:$0xff] %vm748_vm7, %v10693_v40  ;;  %11775 = vrot.lane.b32.xlu0 %v11741_v6, %s14102_s22  ;;  %v10617_v34 = vpop.f32.mrb[55].mxu0  ;;  %v13662_v16 = vpop.f32.mrb[55].mxu1  ;;  %v10749_v11 = vld [vmem:[#allocation3 + $0x120] sm:$0xff] }
 0x88d   :  { %10729 = vst [vmem:[#allocation3 + $0x350] sm:$0xff] %v10617_v34  ;;  %v10941_v34 = vadd.f32 %v17871_v43, %v10749_v11  ;;  %v11235_v16 = vld [vmem:[#allocation3 + $0x158] sm:$0xfe]  ;;  %v11301_v51 = vsel %vm1932_vm5, %v11299_v20, %v11300_v1  ;;  %v11112_v15 = vadd.f32 %v17769_v35, %v10936_v41 }
 0x88e   :  { %v17920_v48 = vpop.permute.xlu0 %11587  ;;  %v17922_v49 = vpop.permute.xlu1 %11173  ;;  %v11355_v19 = vadd.f32 %v11301_v51, %v11211_v4  ;;  %v11305_v35 = vrot.slane %v11235_v16, 1 }
 0x88f   :  { %v11117_v43 = vadd.f32 %v17875_v58, %v10941_v34 }
 0x890   :  { %v17931_v59 = vpop.f32.mrb[56].mxu0  ;;  %v10698_v27 = vpop.f32.mrb[56].mxu1  ;;  %11187 = vrot.lane.b32.xlu0 %v17893_v63, %s14102_s22  ;;  %v10805_v38 = vld [vmem:[#allocation3 + $0x330] sm:$0xfe]  ;;  %v11529_v63 = vadd.f32 %v17811_v22, %v11353_v25  ;;  %v11307_v16 = vsel %vm1932_vm5, %v11305_v35, %v11306_v60  ;;  %v11828_v35 = vld [vmem:[#allocation3 + $0x1a8] sm:$0x3] }
 0x891   :  { %10733 = vst.msk [vmem:[#allocation3 + $0x370] sm:$0xff] %vm748_vm7, %v10698_v27  ;;  %v17937_v40 = vpop.f32.mrb[57].mxu0  ;;  %v13665_v6 = vpop.f32.mrb[57].mxu1  ;;  %v11395_v0 = vld [vmem:[#allocation3 + $0x338] sm:$0xfc]  ;;  %v10884_v37 = vrot.slane %v10805_v38, 1  ;;  %v11213_v1 = vadd.f32 %v17887_v24, %v11117_v43  ;;  %v11208_v38 = vadd.f32 %v17775_v17, %v11112_v15  ;;  %v11881_v24 = vsel %vm2109_vm6, %v11879_v29, %v11880_v32 }
 0x892   :  { %v17942_v28 = vpop.permute.xlu0 %11763  ;;  %v17944_v31 = vpop.permute.xlu1 %11493  ;;  %10732 = vst [vmem:[#allocation3 + $0x368] sm:$0xff] %v17937_v40  ;;  %v11473_v14 = vrot.slane %v11395_v0, 2  ;;  %v11823_v0 = vld [vmem:[#allocation3 + $0x130] sm:$0xfc]  ;;  %v11943_v17 = vadd.f32 %v11881_v24, %v17802_v9  ;;  %v11824_v15 = vld [vmem:[#allocation3 + $0x148] sm:$0x3]  ;;  %v11531_v32 = vadd.f32 %v17855_v45, %v11355_v19 }
 0x893   :  { %v10701_v33 = vpop.f32.mrb[58].mxu1  ;;  %v10625_v52 = vpop.f32.mrb[58].mxu0  ;;  %v10806_v27 = vld [vmem:[#allocation3 + $0x348] sm:$0x1]  ;;  %v10748_v29 = vld [vmem:[#allocation3 + $0xf0] sm:$0xff]  ;;  %v11357_v51 = vadd.f32 %v11307_v16, %v11213_v1 }
 0x894   :  { %v10982_v6 = vld [vmem:[#allocation3 + $0x348] sm:$0x3]  ;;  %10736 = vst.msk [vmem:[#allocation3 + $0x388] sm:$0xff] %vm748_vm7, %v10701_v33  ;;  %v10627_v13 = vpop.f32.mrb[59].mxu0  ;;  %v13666_v30 = vpop.f32.mrb[59].mxu1  ;;  %v10885_v11 = vrot.slane %v10806_v27, 1  ;;  %v11625_v33 = vadd.f32 %v17826_v62, %v11529_v63 }
 0x895   :  { %v11396_v53 = vld [vmem:[#allocation3 + $0x350] sm:$0x3]  ;;  %10735 = vst [vmem:[#allocation3 + $0x380] sm:$0xff] %v10627_v13  ;;  %v10981_v52 = vld [vmem:[#allocation3 + $0x330] sm:$0xfc]  ;;  %v11061_v34 = vrot.slane %v10982_v6, 2 }
 0x896   :  { %v11474_v57 = vrot.slane %v11396_v53, 2  ;;  %v17954_v58 = vpop.permute.xlu0 %10903  ;;  %v10886_v20 = vsel %vm1932_vm5, %v10884_v37, %v10885_v11  ;;  %v11666_v25 = vld [vmem:[#allocation3 + $0x350] sm:$0x1]  ;;  %v18229_v53 = vrot.slane %v17898_v5, 1  ;;  %v11060_v41 = vrot.slane %v10981_v52, 2  ;;  %v17977_v43 = vpop.permute.xlu1 %11589 }
 0x897   :  { %10917 = vrot.lane.b32.xlu1 %v10886_v20, %s14100_s16  ;;  %v11885_v62 = vrot.slane %v11819_v12, 2  ;;  %v11801_v63 = vadd.f32 %v17843_v21, %v11625_v33  ;;  %v11665_v5 = vld [vmem:[#allocation3 + $0x338] sm:$0xfe]  ;;  %v11743_v21 = vrot.slane %v11666_v25, 1  ;;  %v18230_v13 = vrot.slane %v17918_v54, 2 }
 0x898   :  { %v11475_v22 = vsel %vm2109_vm6, %v11473_v14, %v11474_v57  ;;  %v11292_v4 = vsel %vm1932_vm5, %v18229_v53, %v11291_v39  ;;  %v10631_v27 = vpop.f32.mrb[60].mxu0  ;;  %v17974_v39 = vld [vmem:[%s18150_s2 + $0x3] ss:$0 sm:$0xff]  ;;  %v11062_v9 = vsel %vm2109_vm6, %v11060_v41, %v11061_v34  ;;  %v17984_v37 = vld [vmem:[#allocation3 + $0x128] sm:$0xfe]  ;;  %v10706_v45 = vpop.f32.mrb[60].mxu1  ;;  %v11627_v14 = vadd.f32 %v17859_v23, %v11531_v32 }
 0x899   :  { %11507 = vrot.lane.b32.xlu0 %v11475_v22, %s14100_s16  ;;  %v17969_v6 = vpop.f32.mrb[61].mxu0  ;;  %v11667_v12 = vld [vmem:[#allocation3 + $0x368] sm:$0xfe]  ;;  %v11352_v60 = vadd.f32 %v11292_v4, %v11208_v38  ;;  %v11887_v30 = vsel %vm2109_vm6, %v11885_v62, %v18230_v13  ;;  %v17986_v11 = vld [vmem:[#allocation3 + $0x140] sm:$0x1]  ;;  %v11891_v57 = vrot.slane %v11823_v0, 2  ;;  %v11967_v38 = vadd.f32 %v17974_v39, %v11943_v17 }
 0x89a   :  { %10738 = vst [vmem:[#allocation3 + $0x398] sm:$0xff] %v17969_v6  ;;  %v10635_v19 = vpop.f32.mrb[62].mxu0  ;;  %v11892_v52 = vrot.slane %v11824_v15, 2  ;;  %v17990_v1 = vpop.permute.xlu0 %11079  ;;  %v11742_v54 = vrot.slane %v11665_v5, 1  ;;  %10739 = vst.msk [vmem:[#allocation3 + $0x3a0] sm:$0xff] %vm748_vm7, %v10706_v45  ;;  %v10940_v33 = vadd.f32 %v17845_v36, %v10748_v29  ;;  %v11745_v22 = vrot.slane %v11667_v12, 1 }
 0x89b   :  { %11093 = vrot.lane.b32.xlu1 %v11062_v9, %s14101_s5  ;;  %v10637_v20 = vpop.f32.mrb[63].mxu0  ;;  %v13669_v25 = vpop.f32.mrb[61].mxu1  ;;  %v11817_v53 = vld [vmem:[#allocation3 + $0xa0] sm:$0xfc]  ;;  %v11945_v4 = vadd.f32 %v11887_v30, %v11801_v63  ;;  %v11803_v24 = vadd.f32 %v17879_v46, %v11627_v14  ;;  %v11528_v27 = vadd.f32 %v17784_v44, %v11352_v60  ;;  %v11818_v62 = vld [vmem:[#allocation3 + $0xb8] sm:$0x3] }
 0x89c   :  { %v11668_v34 = vld [vmem:[#allocation3 + $0x380] sm:$0x1]  ;;  %10741 = vst [vmem:[#allocation3 + $0x3b0] sm:$0xff] %v10637_v20  ;;  %v11744_v0 = vsel %vm1932_vm5, %v11742_v54, %v11743_v21  ;;  %v10709_v41 = vpop.f32.mrb[62].mxu1  ;;  %v11116_v17 = vadd.f32 %v17851_v50, %v10940_v33  ;;  %v11302_v36 = vrot.slane %v17984_v37, 1  ;;  %v11893_v63 = vsel %vm2109_vm6, %v11891_v57, %v11892_v52  ;;  %v10750_v5 = vld [vmem:[#allocation3 + $0x150] sm:$0xff]  ;;  %v18013_v60 = vpop.permute.xlu1 %11765 }
 0x89d   :  { %11603 = vrot.lane.b32.xlu0 %v17937_v40, %s14101_s5  ;;  %v11746_v23 = vrot.slane %v11668_v34, 1  ;;  %v11533_v40 = vadd.f32 %v17900_v55, %v11357_v51  ;;  %v11398_v16 = vld [vmem:[#allocation3 + $0x380] sm:$0x3]  ;;  %10742 = vst.msk [vmem:[#allocation3 + $0x3b8] sm:$0xff] %vm748_vm7, %v10709_v41  ;;  %v13670_v46 = vpop.f32.mrb[63].mxu1  ;;  %v11303_v55 = vrot.slane %v17986_v11, 1  ;;  %v11624_v50 = vadd.f32 %v17794_v7, %v11528_v27 }
 0x89e   :  { %v11827_v29 = vld [vmem:[#allocation3 + $0x190] sm:$0xfc]  ;;  %v11898_v32 = vrot.slane %v11828_v35, 2  ;;  %v11983_v51 = vmax.f32 %v11967_v38, 0.0  ;;  %v11212_v9 = vadd.f32 %v17861_v47, %v11116_v17  ;;  %v10942_v21 = vadd.f32 %v17881_v42, %v10750_v5  ;;  %v11238_v12 = vld [vmem:[#allocation3 + $0x1a0] sm:$0x1]  ;;  %v18017_v19 = vpop.permute.xlu0 %11175 }
 0x89f   :  { %11777 = vrot.lane.b32.xlu1 %v11744_v0, %s14102_s22  ;;  %v11747_v15 = vsel %vm1932_vm5, %v11745_v22, %v11746_v23  ;;  %v11629_v44 = vadd.f32 %v17920_v48, %v11533_v40  ;;  %v11397_v13 = vld [vmem:[#allocation3 + $0x368] sm:$0xfc]  ;;  %v11969_v30 = vadd.f32 %v17974_v39, %v11945_v4  ;;  %v11947_v37 = vadd.f32 %v11893_v63, %v11803_v24  ;;  %v11822_v52 = vld [vmem:[#allocation3 + $0x118] sm:$0x3]  ;;  %s14106_s2 = smov 100  }
 0x8a0   :  { %v11237_v11 = vld [vmem:[#allocation3 + $0x188] sm:$0xfe]  ;;  %v11477_v45 = vrot.slane %v11398_v16, 2  ;;  %v11882_v14 = vrot.slane %v11817_v53, 2  ;;  %v11883_v7 = vrot.slane %v11818_v62, 2  ;;  %v11118_v57 = vadd.f32 %v17889_v2, %v10942_v21 }
 0x8a1   :  { %11779 = vrot.lane.b32.xlu0 %v11747_v15, %s14102_s22  ;;  %v11805_v48 = vadd.f32 %v17942_v28, %v11629_v44  ;;  %v11897_v47 = vrot.slane %v11827_v29, 2  ;;  %v11800_v42 = vadd.f32 %v17813_v10, %v11624_v50  ;;  %v11304_v54 = vsel %vm1932_vm5, %v11302_v36, %v11303_v55  ;;  %v11821_v34 = vld [vmem:[#allocation3 + $0x100] sm:$0xfc]  ;;  %v11826_v46 = vld [vmem:[#allocation3 + $0x178] sm:$0x3] }
 0x8a2   :  { %v11309_v20 = vrot.slane %v11238_v12, 1  ;;  %v11476_v28 = vrot.slane %v11397_v13, 2  ;;  %v11356_v38 = vadd.f32 %v11304_v54, %v11212_v9  ;;  %v11214_v33 = vadd.f32 %v17922_v49, %v11118_v57  ;;  %v11669_v49 = vld [vmem:[#allocation3 + $0x398] sm:$0xfe]  ;;  %v11825_v62 = vld [vmem:[#allocation3 + $0x160] sm:$0xfc] }
 0x8a3   :  { %11189 = vrot.lane.b32.xlu1 %v17931_v59, %s14102_s22  ;;  %v11899_v2 = vsel %vm2109_vm6, %v11897_v47, %v11898_v32  ;;  %v11308_v35 = vrot.slane %v11237_v11, 1  ;;  %v11985_v59 = vmax.f32 %v11969_v30, 0.0  ;;  %v11971_v10 = vadd.f32 %v17974_v39, %v11947_v37  ;;  %v11670_v0 = vld [vmem:[#allocation3 + $0x3b0] sm:$0x1]  ;;  %v10751_v36 = vld [vmem:[#allocation3 + $0x1e0] sm:$0xff] }
 0x8a4   :  { %v11949_v23 = vadd.f32 %v11899_v2, %v11805_v48  ;;  %v11478_v25 = vsel %vm2109_vm6, %v11476_v28, %v11477_v45  ;;  %v11884_v4 = vsel %vm2109_vm6, %v11882_v14, %v11883_v7  ;;  %v11626_v24 = vadd.f32 %v17837_v61, %v17833_v56  ;;  %v11829_v61 = vld [vmem:[#allocation3 + $0x1c0] sm:$0xfc]  ;;  %v11240_v63 = vld [vmem:[#allocation3 + $0x230] sm:$0x1]  ;;  %v11830_v12 = vld [vmem:[#allocation3 + $0x1d8] sm:$0x3] }
 0x8a5   :  { %12015 = vrot.lane.b32.xlu0 %v11983_v51, %s14106_s2  ;;  %v18027_v22 = vpop.permute.xlu1 %10905  ;;  %v11889_v40 = vrot.slane %v11822_v52, 2  ;;  %v11944_v41 = vadd.f32 %v11884_v4, %v11800_v42  ;;  %v11888_v27 = vrot.slane %v11821_v34, 2  ;;  %v11310_v17 = vsel %vm1932_vm5, %v11308_v35, %v11309_v20  ;;  %v11239_v13 = vld [vmem:[#allocation3 + $0x218] sm:$0xfe]  ;;  %v10752_v34 = vld [vmem:[#allocation3 + $0x210] sm:$0xff] }
 0x8a6   :  { %v11802_v15 = vadd.f32 %v17857_v26, %v11626_v24  ;;  %v11532_v16 = vadd.f32 %v17873_v18, %v11356_v38  ;;  %v11358_v55 = vadd.f32 %v11310_v17, %v11214_v33  ;;  %v10943_v56 = vadd.f32 %v17954_v58, %v10751_v36  ;;  %v11242_v2 = vld [vmem:[#allocation3 + $0x260] sm:$0x1]  ;;  %v11832_v35 = vld [vmem:[#allocation3 + $0x268] sm:$0x3] }
 0x8a7   :  { %v18031_v53 = vpop.permute.xlu0 %11495  ;;  %11509 = vrot.lane.b32.xlu1 %v11478_v25, %s14100_s16  ;;  %v11987_v44 = vmax.f32 %v11971_v10, 0.0  ;;  %v11973_v29 = vadd.f32 %v17974_v39, %v11949_v23  ;;  %v11748_v50 = vrot.slane %v11669_v49, 1  ;;  %v11749_v51 = vrot.slane %v11670_v0, 1  ;;  %v11831_v25 = vld [vmem:[#allocation3 + $0x250] sm:$0xfc]  ;;  %s14107_s16 = smov [#allocation4]  }
 0x8a8   :  { %v11890_v9 = vsel %vm2109_vm6, %v11888_v27, %v11889_v40  ;;  %v11628_v21 = vadd.f32 %v17877_v3, %v11532_v16  ;;  %v11894_v26 = vrot.slane %v11825_v62, 2  ;;  %v11119_v18 = vadd.f32 %v17990_v1, %v10943_v56  ;;  %v11241_v24 = vld [vmem:[#allocation3 + $0x248] sm:$0xfe] }
 0x8a9   :  { %12019 = vrot.lane.b32.xlu0 %v11985_v59, %s14106_s2  ;;  %v11082_v5 = vpop.permute.xlu1 %11081  ;;  %v11968_v58 = vadd.f32 %v17974_v39, %v11944_v41  ;;  %v11895_v30 = vrot.slane %v11826_v46, 2  ;;  %v11900_v37 = vrot.slane %v11829_v61, 2  ;;  %v11312_v48 = vrot.slane %v11240_v63, 1 }
 0x8aa   :  { %v11946_v11 = vadd.f32 %v11890_v9, %v11802_v15  ;;  %v11804_v45 = vadd.f32 %v17902_v8, %v11628_v21  ;;  %v11534_v3 = vadd.f32 %v17944_v31, %v11358_v55  ;;  %v11215_v14 = vadd.f32 %v18017_v19, %v11119_v18  ;;  %v10753_v21 = vld [vmem:[#allocation3 + $0x240] sm:$0xff] }
 0x8ab   :  { %v11592_v32 = vpop.permute.xlu0 %11591  ;;  %11605 = vrot.lane.b32.xlu1 %v17969_v6, %s14101_s5  ;;  %v11989_v1 = vmax.f32 %v11973_v29, 0.0  ;;  %v11901_v57 = vrot.slane %v11830_v12, 2  ;;  %v11311_v47 = vrot.slane %v11239_v13, 1  ;;  %v11750_v6 = vsel %vm1932_vm5, %v11748_v50, %v11749_v51  ;;  %v11833_v18 = vld [vmem:[#allocation3 + $0x280] sm:$0xfc]  ;;  %s12101_s5 = sshll.u32 %s14107_s16, 4  ;;  %s12102_s5 = int_to_ptr.vmem [resolvable:$true] %s12101_s5 }
 0x8ac   :  { %v11630_v52 = vadd.f32 %v17977_v43, %v11534_v3  ;;  %v11984_v54 = vmax.f32 %v11968_v58, 0.0  ;;  %v11896_v20 = vsel %vm2109_vm6, %v11894_v26, %v11895_v30  ;;  %v11970_v31 = vadd.f32 %v17974_v39, %v11946_v11  ;;  %v11244_v58 = vld [vmem:[#allocation3 + $0x290] sm:$0x1]  ;;  %v11243_v11 = vld [vmem:[#allocation3 + $0x278] sm:$0xfe]  ;;  %p14076_p1 = scmp.lt.s32.totalorder %s12102_s5, %s12102_s5 }
 0x8ad   :  { %12023 = vrot.lane.b32.xlu0 %v11987_v44, %s14106_s2  ;;  %v11178_v7 = vpop.permute.xlu1 %11177  ;;  %v11313_v8 = vsel %vm1932_vm5, %v11311_v47, %v11312_v48  ;;  %v11948_v19 = vadd.f32 %v11896_v20, %v11804_v45  ;;  %v11902_v43 = vsel %vm2109_vm6, %v11900_v37, %v11901_v57  ;;  %v10944_v59 = vadd.f32 %v18027_v22, %v10752_v34 }
 0x8ae   :  { %v11806_v28 = vadd.f32 %v18013_v60, %v11630_v52  ;;  %v11359_v38 = vadd.f32 %v11313_v8, %v11215_v14  ;;  %v11315_v40 = vrot.slane %v11242_v2, 1  ;;  %v11904_v49 = vrot.slane %v11832_v35, 2 }
 0x8af   :  { %v10908_v42 = vpop.permute.xlu0 %10907  ;;  %11781 = vrot.lane.b32.xlu1 %v11750_v6, %s14102_s22  ;;  %v11120_v4 = vadd.f32 %v11082_v5, %v10944_v59  ;;  %v11986_v60 = vmax.f32 %v11970_v31, 0.0  ;;  %v11972_v0 = vadd.f32 %v17974_v39, %v11948_v19  ;;  %v11903_v36 = vrot.slane %v11831_v25, 2  ;;  %s14071_s22 = scalar_lea.vmem %s12102_s5, 4096 }
 0x8b0   :  { %v11535_v23 = vadd.f32 %v18031_v53, %v11359_v38  ;;  %v11950_v41 = vadd.f32 %v11902_v43, %v11806_v28  ;;  %v11314_v22 = vrot.slane %v11241_v24, 1  ;;  %v10945_v13 = vadd.f32 %v10908_v42, %v10753_v21  ;;  %v11836_v28 = vld [vmem:[#allocation3 + $0x2c8] sm:$0x3]  ;;  %p14072_p0 = scmp.ne.s32.totalorder %s12102_s5, %s14071_s22  ;;  %p14077_p2 = scmp.lt.s32.totalorder %s14071_s22, %s14071_s22 }
 0x8b1   :  { %12027 = vrot.lane.b32.xlu0 %v11989_v1, %s14106_s2  ;;  %v11498_v33 = vpop.permute.xlu1 %11497  ;;  %v11216_v17 = vadd.f32 %v11178_v7, %v11120_v4  ;;  %v11905_v16 = vsel %vm2109_vm6, %v11903_v36, %v11904_v49  ;;  %v11988_v46 = vmax.f32 %v11972_v0, 0.0  ;;  %v11906_v45 = vrot.slane %v11833_v18, 2  ;;  %v10754_v4 = vld [vmem:[#allocation3 + $0x270] sm:$0xff]  ;;  %v11246_v49 = vld [vmem:[#allocation3 + $0x2c0] sm:$0x1] }
 0x8b2   :  { %v11631_v27 = vadd.f32 %v11592_v32, %v11535_v23  ;;  %v11974_v55 = vadd.f32 %v17974_v39, %v11950_v41  ;;  %v11316_v56 = vsel %vm1932_vm5, %v11314_v22, %v11315_v40  ;;  %v11834_v32 = vld [vmem:[#allocation3 + $0x298] sm:$0x3]  ;;  %v11318_v14 = vrot.slane %v11244_v58, 1  ;;  %v11245_v41 = vld [vmem:[#allocation3 + $0x2a8] sm:$0xfe]  ;;  %p14078_p3 = por %p14077_p2, %p14076_p1 }
 0x8b3   :  { %v11084_v10 = vpop.permute.xlu0 %11083  ;;  %12017 = vrot.lane.b32.xlu1 %v11984_v54, %s14106_s2  ;;  %v11360_v5 = vadd.f32 %v11316_v56, %v11216_v17  ;;  %v11907_v30 = vrot.slane %v11834_v32, 2  ;;  %v11317_v6 = vrot.slane %v11243_v11, 1  ;;  %v11910_v2 = vrot.slane %v11836_v28, 2  ;;  %v11248_v58 = vld [vmem:[#allocation3 + $0x2f0] sm:$0x1] }
 0x8b4   :  { %v11990_v50 = vmax.f32 %v11974_v55, 0.0  ;;  %v11121_v48 = vadd.f32 %v11084_v10, %v10945_v13  ;;  %p14079_p4 = pnand %p14078_p3, %p14072_p0 }
 0x8b5   :  { %v11594_v62 = vpop.permute.xlu1 %11593  ;;  %v11536_v26 = vadd.f32 %v11498_v33, %v11360_v5  ;;  %v11908_v47 = vsel %vm2109_vm6, %v11906_v45, %v11907_v30  ;;  %v11319_v42 = vsel %vm1932_vm5, %v11317_v6, %v11318_v14  ;;  %v11835_v33 = vld [vmem:[#allocation3 + $0x2b0] sm:$0xfc] }
 0x8b6   :  { %v11909_v43 = vrot.slane %v11835_v33, 2 }
 0x8b7   :  { %v11768_v15 = vpop.permute.xlu0 %11767  ;;  %12021 = vrot.lane.b32.xlu1 %v11986_v60, %s14106_s2  ;;  %v11632_v37 = vadd.f32 %v11594_v62, %v11536_v26 }
 0x8b8   :  { %v11807_v53 = vadd.f32 %v11768_v15, %v11631_v27  ;;  %v11911_v25 = vsel %vm2109_vm6, %v11909_v43, %v11910_v2  ;;  %v11321_v27 = vrot.slane %v11246_v49, 1  ;;  %v11320_v15 = vrot.slane %v11245_v41, 1  ;;  %v18231_v2 = vld [vmem:[#allocation7_spill] sm:$0xff]  ;;  %v11251_v41 = vld [vmem:[#allocation3 + $0x338] sm:$0xfe] }
 0x8b9   :  { %v10910_v63 = vpop.permute.xlu1 %10909  ;;  %v11250_v43 = vld [vmem:[#allocation3 + $0x320] sm:$0x1] }
 0x8ba   :  { %v11951_v61 = vadd.f32 %v11905_v16, %v11807_v53  ;;  %v10946_v40 = vadd.f32 %v10910_v63, %v10754_v4  ;;  %v11322_v22 = vsel %vm1932_vm5, %v11320_v15, %v11321_v27  ;;  %v11252_v4 = vld [vmem:[#allocation3 + $0x350] sm:$0x1] }
 0x8bb   :  { %v11180_v44 = vpop.permute.xlu0 %11179  ;;  %12025 = vrot.lane.b32.xlu1 %v11988_v46, %s14106_s2  ;;  %v11838_v46 = vld [vmem:[#allocation3 + $0x2f8] sm:$0x3] }
 0x8bc   :  { %v11975_v29 = vadd.f32 %v17974_v39, %v11951_v61  ;;  %v11217_v57 = vadd.f32 %v11180_v44, %v11121_v48  ;;  %v11837_v61 = vld [vmem:[#allocation3 + $0x2e0] sm:$0xfc]  ;;  %v11913_v63 = vrot.slane %v11838_v46, 2  ;;  %v11324_v48 = vrot.slane %v11248_v58, 1  ;;  %v18233_v58 = vld [vmem:[#allocation8_spill] sm:$0xff] }
 0x8bd   :  { %v11086_v9 = vpop.permute.xlu1 %11085  ;;  %v11912_v44 = vrot.slane %v11837_v61, 2 }
 0x8be   :  { %v11991_v51 = vmax.f32 %v11975_v29, 0.0  ;;  %v11361_v8 = vadd.f32 %v11319_v42, %v11217_v57  ;;  %v11122_v0 = vadd.f32 %v11086_v9, %v10946_v40  ;;  %v11840_v57 = vld [vmem:[#allocation3 + $0x328] sm:$0x3] }
 0x8bf   :  { %v11500_v12 = vpop.permute.xlu0 %11499  ;;  %12029 = vrot.lane.b32.xlu1 %v11990_v50, %s14106_s2  ;;  %v11914_v50 = vsel %vm2109_vm6, %v11912_v44, %v11913_v63  ;;  %v11916_v42 = vrot.slane %v11840_v57, 2  ;;  %v11249_v40 = vld [vmem:[#allocation3 + $0x308] sm:$0xfe] }
 0x8c0   :  { %12031 = vrot.lane.b32.xlu0 %v11991_v51, %s14106_s2  ;;  %v11537_v38 = vadd.f32 %v11500_v12, %v11361_v8  ;;  %v10755_v12 = vld [vmem:[#allocation3 + $0x2a0] sm:$0xff] }
 0x8c1   :  { %v11770_v3 = vpop.permute.xlu1 %11769 }
 0x8c2   :  { %v11808_v7 = vadd.f32 %v11770_v3, %v11632_v37  ;;  %v11247_v37 = vld [vmem:[#allocation3 + $0x2d8] sm:$0xfe] }
 0x8c3   :  { %v11596_v1 = vpop.permute.xlu0 %11595  ;;  %v11323_v3 = vrot.slane %v11247_v37, 1 }
 0x8c4   :  { %v11952_v52 = vadd.f32 %v11908_v47, %v11808_v7  ;;  %v11633_v35 = vadd.f32 %v11596_v1, %v11537_v38 }
 0x8c5   :  { %v11182_v19 = vpop.permute.xlu1 %11181  ;;  %v11325_v14 = vsel %vm1932_vm5, %v11323_v3, %v11324_v48 }
 0x8c6   :  { %v11976_v54 = vadd.f32 %v17974_v39, %v11952_v52  ;;  %v11218_v36 = vadd.f32 %v11182_v19, %v11122_v0  ;;  %v11839_v52 = vld [vmem:[#allocation3 + $0x310] sm:$0xfc] }
 0x8c7   :  { %v10912_v20 = vpop.permute.xlu0 %10911 }
 0x8c8   :  { %v11992_v31 = vmax.f32 %v11976_v54, 0.0  ;;  %v11362_v16 = vadd.f32 %v11322_v22, %v11218_v36  ;;  %v10947_v13 = vadd.f32 %v10912_v20, %v10755_v12  ;;  %v11329_v22 = vrot.slane %v11251_v41, 1 }
 0x8c9   :  { %v11502_v10 = vpop.permute.xlu1 %11501 }
 0x8ca   :  { %12033 = vrot.lane.b32.xlu1 %v11992_v31, %s14106_s2  ;;  %v11538_v56 = vadd.f32 %v11502_v10, %v11362_v16  ;;  %v11915_v31 = vrot.slane %v11839_v52, 2 }
 0x8cb   :  { %v11088_v34 = vpop.permute.xlu0 %11087 }
 0x8cc   :  { %v11123_v30 = vadd.f32 %v11088_v34, %v10947_v13  ;;  %v11917_v28 = vsel %vm2109_vm6, %v11915_v31, %v11916_v42 }
 0x8cd   :  { %v11598_v17 = vpop.permute.xlu1 %11597 }
 0x8ce   :  { %v11634_v5 = vadd.f32 %v11598_v17, %v11538_v56  ;;  %v11326_v17 = vrot.slane %v11249_v40, 1 }
 0x8cf   :  { %v11772_v59 = vpop.permute.xlu0 %11771 }
 0x8d0   :  { %v11809_v23 = vadd.f32 %v11772_v59, %v11633_v35  ;;  %v18232_v59 = vld [vmem:[#allocation10_spill] sm:$0xff] }
 0x8d2   :  { %v11953_v24 = vadd.f32 %v11911_v25, %v11809_v23 }
 0x8d3   :  { %v11184_v21 = vpop.permute.xlu0 %11183 }
 0x8d4   :  { %v11977_v60 = vadd.f32 %v17974_v39, %v11953_v24  ;;  %v11219_v45 = vadd.f32 %v11184_v21, %v11123_v30 }
 0x8d6   :  { %v11993_v62 = vmax.f32 %v11977_v60, 0.0  ;;  %v11363_v1 = vadd.f32 %v11325_v14, %v11219_v45  ;;  %v11327_v60 = vrot.slane %v11250_v43, 1  ;;  %v11254_v45 = vld [vmem:[#allocation3 + $0x380] sm:$0x1]  ;;  %v11845_v43 = vld [vmem:[#allocation3 + $0x3a0] sm:$0xfc] }
 0x8d7   :  { %v11333_v42 = vrot.slane %v11254_v45, 1 }
 0x8d8   :  { %12035 = vrot.lane.b32.xlu0 %v11993_v62, %s14106_s2  ;;  %v11330_v62 = vrot.slane %v11252_v4, 1  ;;  %v11328_v16 = vsel %vm1932_vm5, %v11326_v17, %v11327_v60  ;;  %v11924_v4 = vrot.slane %v11845_v43, 2 }
 0x8d9   :  { %v10914_v53 = vpop.permute.xlu1 %10913 }
 0x8da   :  { %v11504_v18 = vpop.permute.xlu0 %11503  ;;  %v10948_v35 = vadd.f32 %v10914_v53, %v18231_v2  ;;  %v11331_v56 = vsel %vm1932_vm5, %v11329_v22, %v11330_v62 }
 0x8db   :  { %v11539_v6 = vadd.f32 %v11504_v18, %v11363_v1 }
 0x8dd   :  { %v11090_v55 = vpop.permute.xlu1 %11089 }
 0x8de   :  { %v11124_v24 = vadd.f32 %v11090_v55, %v10948_v35  ;;  %v11842_v55 = vld [vmem:[#allocation3 + $0x358] sm:$0x3] }
 0x8e1   :  { %v11774_v29 = vpop.permute.xlu1 %11773 }
 0x8e2   :  { %v11810_v32 = vadd.f32 %v11774_v29, %v11634_v5  ;;  %v11844_v5 = vld [vmem:[#allocation3 + $0x388] sm:$0x3] }
 0x8e4   :  { %v11954_v51 = vadd.f32 %v11914_v50, %v11810_v32  ;;  %v11841_v32 = vld [vmem:[#allocation3 + $0x340] sm:$0xfc] }
 0x8e5   :  { %v11918_v18 = vrot.slane %v11841_v32, 2 }
 0x8e6   :  { %v11978_v9 = vadd.f32 %v17974_v39, %v11954_v51  ;;  %v11919_v51 = vrot.slane %v11842_v55, 2 }
 0x8e8   :  { %v11994_v26 = vmax.f32 %v11978_v9, 0.0  ;;  %v11843_v9 = vld [vmem:[#allocation3 + $0x370] sm:$0xfc]  ;;  %v11920_v3 = vsel %vm2109_vm6, %v11918_v18, %v11919_v51 }
 0x8e9   :  { %v11186_v54 = vpop.permute.xlu1 %11185  ;;  %v11921_v48 = vrot.slane %v11843_v9, 2 }
 0x8ea   :  { %12037 = vrot.lane.b32.xlu1 %v11994_v26, %s14106_s2  ;;  %v11600_v11 = vpop.permute.xlu0 %11599  ;;  %v11220_v27 = vadd.f32 %v11186_v54, %v11124_v24  ;;  %v11922_v26 = vrot.slane %v11844_v5, 2 }
 0x8eb   :  { %v11635_v8 = vadd.f32 %v11600_v11, %v11539_v6 }
 0x8ec   :  { %v11364_v46 = vadd.f32 %v11328_v16, %v11220_v27  ;;  %v11923_v57 = vsel %vm2109_vm6, %v11921_v48, %v11922_v26 }
 0x8f6   :  { %v10916_v7 = vpop.permute.xlu0 %10915 }
 0x8f7   :  { %v11506_v34 = vpop.permute.xlu1 %11505  ;;  %v10949_v10 = vadd.f32 %v10916_v7, %v18232_v59  ;;  %v11846_v59 = vld [vmem:[#allocation3 + $0x3b8] sm:$0x3] }
 0x8f8   :  { %v11540_v44 = vadd.f32 %v11506_v34, %v11364_v46  ;;  %v11925_v24 = vrot.slane %v11846_v59, 2 }
 0x8fa   :  { %v11092_v47 = vpop.permute.xlu0 %11091  ;;  %v11926_v41 = vsel %vm2109_vm6, %v11924_v4, %v11925_v24 }
 0x8fb   :  { %v11125_v0 = vadd.f32 %v11092_v47, %v10949_v10  ;;  %v11253_v47 = vld [vmem:[#allocation3 + $0x368] sm:$0xfe] }
 0x8fc   :  { %v11602_v25 = vpop.permute.xlu1 %11601 }
 0x8fd   :  { %v11636_v21 = vadd.f32 %v11602_v25, %v11540_v44 }
 0x8fe   :  { %v11776_v20 = vpop.permute.xlu0 %11775 }
 0x8ff   :  { %v11811_v19 = vadd.f32 %v11776_v20, %v11635_v8 }
 0x901   :  { %v11955_v38 = vadd.f32 %v11917_v28, %v11811_v19  ;;  %v11332_v19 = vrot.slane %v11253_v47, 1 }
 0x902   :  { %v11188_v49 = vpop.permute.xlu0 %11187 }
 0x903   :  { %v11979_v33 = vadd.f32 %v17974_v39, %v11955_v38  ;;  %v11221_v36 = vadd.f32 %v11188_v49, %v11125_v0 }
 0x905   :  { %v11995_v23 = vmax.f32 %v11979_v33, 0.0  ;;  %v11365_v61 = vadd.f32 %v11331_v56, %v11221_v36  ;;  %v11334_v33 = vsel %vm1932_vm5, %v11332_v19, %v11333_v42 }
 0x907   :  { %12039 = vrot.lane.b32.xlu0 %v11995_v23, %s14106_s2 }
 0x909   :  { %v10918_v15 = vpop.permute.xlu1 %10917 }
 0x90a   :  { %v10950_v30 = vadd.f32 %v10918_v15, %v18233_v58 }
 0x90b   :  { %v11508_v53 = vpop.permute.xlu0 %11507 }
 0x90c   :  { %v11541_v50 = vadd.f32 %v11508_v53, %v11365_v61 }
 0x90d   :  { %v11094_v63 = vpop.permute.xlu1 %11093 }
 0x90e   :  { %v11126_v7 = vadd.f32 %v11094_v63, %v10950_v30 }
 0x90f   :  { %v11604_v29 = vpop.permute.xlu0 %11603 }
 0x910   :  { %v11637_v12 = vadd.f32 %v11604_v29, %v11541_v50 }
 0x911   :  { %v11778_v13 = vpop.permute.xlu1 %11777 }
 0x912   :  { %v11812_v37 = vadd.f32 %v11778_v13, %v11636_v21 }
 0x913   :  { %v11780_v11 = vpop.permute.xlu0 %11779 }
 0x914   :  { %v11813_v14 = vadd.f32 %v11780_v11, %v11637_v12  ;;  %v11956_v1 = vadd.f32 %v11920_v3, %v11812_v37 }
 0x915   :  { %v11190_v52 = vpop.permute.xlu1 %11189 }
 0x916   :  { %v11957_v6 = vadd.f32 %v11923_v57, %v11813_v14  ;;  %v11980_v54 = vadd.f32 %v17974_v39, %v11956_v1  ;;  %v11222_v8 = vadd.f32 %v11190_v52, %v11126_v7 }
 0x917   :  { %v12016_v31 = vpop.permute.xlu0 %12015 }
 0x918   :  { %v11981_v20 = vadd.f32 %v17974_v39, %v11957_v6  ;;  %12064 = vst.msk [vmem:[#allocation4] sm:$0xff] %vm12063_vm2, %v12016_v31  ;;  %v11996_v28 = vmax.f32 %v11980_v54, 0.0  ;;  %v11366_v2 = vadd.f32 %v11334_v33, %v11222_v8 }
 0x919   :  { %12065 = vst.msk [vmem:[#allocation4 + $0x8] sm:$0xff] %vm212_vm1, %v12016_v31  ;;  %v11510_v38 = vpop.permute.xlu1 %11509 }
 0x91a   :  { %v11997_v34 = vmax.f32 %v11981_v20, 0.0  ;;  %12041 = vrot.lane.b32.xlu1 %v11996_v28, %s14106_s2  ;;  %v11542_v23 = vadd.f32 %v11510_v38, %v11366_v2 }
 0x91b   :  { %v12020_v35 = vpop.permute.xlu0 %12019 }
 0x91c   :  { %12068 = vst.msk [vmem:[#allocation4 + $0x20] sm:$0xff] %vm12063_vm2, %v12020_v35  ;;  %12043 = vrot.lane.b32.xlu0 %v11997_v34, %s14106_s2 }
 0x91d   :  { %12069 = vst.msk [vmem:[#allocation4 + $0x28] sm:$0xff] %vm212_vm1, %v12020_v35  ;;  %v11606_v10 = vpop.permute.xlu1 %11605 }
 0x91e   :  { %v11638_v40 = vadd.f32 %v11606_v10, %v11542_v23 }
 0x91f   :  { %v12024_v25 = vpop.permute.xlu0 %12023 }
 0x920   :  { %12072 = vst.msk [vmem:[#allocation4 + $0x40] sm:$0xff] %vm12063_vm2, %v12024_v25 }
 0x921   :  { %12073 = vst.msk [vmem:[#allocation4 + $0x48] sm:$0xff] %vm212_vm1, %v12024_v25  ;;  %v11782_v49 = vpop.permute.xlu1 %11781 }
 0x922   :  { %v11814_v60 = vadd.f32 %v11782_v49, %v11638_v40 }
 0x923   :  { %v12028_v0 = vpop.permute.xlu0 %12027 }
 0x924   :  { %12076 = vst.msk [vmem:[#allocation4 + $0x60] sm:$0xff] %vm12063_vm2, %v12028_v0  ;;  %v11958_v27 = vadd.f32 %v11926_v41, %v11814_v60 }
 0x925   :  { %12077 = vst.msk [vmem:[#allocation4 + $0x68] sm:$0xff] %vm212_vm1, %v12028_v0  ;;  %v12018_v62 = vpop.permute.xlu1 %12017 }
 0x926   :  { %v11982_v17 = vadd.f32 %v17974_v39, %v11958_v27  ;;  %12066 = vst.msk [vmem:[#allocation4 + $0x10] sm:$0xff] %vm12063_vm2, %v12018_v62 }
 0x927   :  { %12067 = vst.msk [vmem:[#allocation4 + $0x18] sm:$0xff] %vm212_vm1, %v12018_v62 }
 0x928   :  { %v11998_v36 = vmax.f32 %v11982_v17, 0.0 }
 0x929   :  { %v12022_v15 = vpop.permute.xlu1 %12021 }
 0x92a   :  { %12070 = vst.msk [vmem:[#allocation4 + $0x30] sm:$0xff] %vm12063_vm2, %v12022_v15  ;;  %12045 = vrot.lane.b32.xlu1 %v11998_v36, %s14106_s2 }
 0x92b   :  { %12071 = vst.msk [vmem:[#allocation4 + $0x38] sm:$0xff] %vm212_vm1, %v12022_v15 }
 0x92d   :  { %v12026_v22 = vpop.permute.xlu1 %12025 }
 0x92e   :  { %12074 = vst.msk [vmem:[#allocation4 + $0x50] sm:$0xff] %vm12063_vm2, %v12026_v22 }
 0x92f   :  { %12075 = vst.msk [vmem:[#allocation4 + $0x58] sm:$0xff] %vm212_vm1, %v12026_v22 }
 0x931   :  { %v12030_v53 = vpop.permute.xlu1 %12029 }
 0x932   :  { %v12032_v16 = vpop.permute.xlu0 %12031  ;;  %12078 = vst.msk [vmem:[#allocation4 + $0x70] sm:$0xff] %vm12063_vm2, %v12030_v53 }
 0x933   :  { %12079 = vst.msk [vmem:[#allocation4 + $0x78] sm:$0xff] %vm212_vm1, %v12030_v53  ;;  %12081 = vst.msk [vmem:[#allocation4 + $0x88] sm:$0xff] %vm212_vm1, %v12032_v16 }
 0x934   :  { %12080 = vst.msk [vmem:[#allocation4 + $0x80] sm:$0xff] %vm12063_vm2, %v12032_v16 }
 0x93c   :  { %v12034_v39 = vpop.permute.xlu1 %12033 }
 0x93d   :  { %12082 = vst.msk [vmem:[#allocation4 + $0x90] sm:$0xff] %vm12063_vm2, %v12034_v39 }
 0x93e   :  { %12083 = vst.msk [vmem:[#allocation4 + $0x98] sm:$0xff] %vm212_vm1, %v12034_v39 }
 0x94a   :  { %v12036_v46 = vpop.permute.xlu0 %12035 }
 0x94b   :  { %12084 = vst.msk [vmem:[#allocation4 + $0xa0] sm:$0xff] %vm12063_vm2, %v12036_v46 }
 0x94c   :  { %12085 = vst.msk [vmem:[#allocation4 + $0xa8] sm:$0xff] %vm212_vm1, %v12036_v46 }
 0x95c   :  { %v12038_v56 = vpop.permute.xlu1 %12037 }
 0x95d   :  { %12086 = vst.msk [vmem:[#allocation4 + $0xb0] sm:$0xff] %vm12063_vm2, %v12038_v56 }
 0x95e   :  { %12087 = vst.msk [vmem:[#allocation4 + $0xb8] sm:$0xff] %vm212_vm1, %v12038_v56 }
 0x979   :  { %v12040_v55 = vpop.permute.xlu0 %12039 }
 0x97a   :  { %12088 = vst.msk [vmem:[#allocation4 + $0xc0] sm:$0xff] %vm12063_vm2, %v12040_v55 }
 0x97b   :  { %12089 = vst.msk [vmem:[#allocation4 + $0xc8] sm:$0xff] %vm212_vm1, %v12040_v55 }
 0x98c   :  { %v12042_v61 = vpop.permute.xlu1 %12041 }
 0x98d   :  { %12090 = vst.msk [vmem:[#allocation4 + $0xd0] sm:$0xff] %vm12063_vm2, %v12042_v61 }
 0x98e   :  { %12091 = vst.msk [vmem:[#allocation4 + $0xd8] sm:$0xff] %vm212_vm1, %v12042_v61  ;;  %v12044_v63 = vpop.permute.xlu0 %12043 }
 0x98f   :  { %12092 = vst.msk [vmem:[#allocation4 + $0xe0] sm:$0xff] %vm12063_vm2, %v12044_v63 }
 0x990   :  { %12093 = vst.msk [vmem:[#allocation4 + $0xe8] sm:$0xff] %vm212_vm1, %v12044_v63 }
 0x99c   :  { %v12046_v5 = vpop.permute.xlu1 %12045 }
 0x99d   :  { %12094 = vst.msk [vmem:[#allocation4 + $0xf0] sm:$0xff] %vm12063_vm2, %v12046_v5 }
 0x99e   :  { %12095 = vst.msk [vmem:[#allocation4 + $0xf8] sm:$0xff] %vm212_vm1, %v12046_v5 }
 0x99f   :  { %14082 = shalt.err (!%p14079_p4)
}
 0x9a0   :  { %s14083_s12 = scalar_lea.hbm %s18151_s3, 4096 }
 0x9a1   :  { %p14084_p5 = scmp.ne.s32.totalorder %s18151_s3, %s14083_s12  ;;  %p14087_p6 = scmp.lt.u32.totalorder %s14083_s12, %s18151_s3 }
 0x9a3   :  { %p14089_p7 = pnand %p14087_p6, %p14084_p5 }
 0x9a5   :  { %14092 = shalt.err (!%p14089_p7)
}
 0x9a6   :  { %s14108_s18 = smov 256   ;;  %s14109_s19 = smov 16  }
 0x9a7   :  { %12107 = dma.vmem_to_hbm [thread:$0]  %s12102_s5, 4096, %s18151_s3, [#allocation5], %s14108_s18, %s14108_s18, %s14109_s19  }
 0x9a8   :  { %14093 = dma.done.wait [#allocation5], 4096  }
 0x9a9   :  { %14094 = vsyncadd [#allocation5], 4294963200 }
 0x9aa   :  { %12111 = vsyncpa [#allocation5], 1 }

</bundles_post_ra>
